<compile_context>
chip_gen: v7x
topology: tpu7x:2x2x1
jax: 0.10.0
libtpu: 0.0.40
codegen_flags: <defaults>
</compile_context>

<pallas_src>
import jax
import jax.numpy as jnp
from jax.experimental import pallas as pl
from jax.experimental.pallas import tpu as pltpu

NUM_BLOCKS = 18
FEATS = 64


def _round_up(x, m):
    return (x + m - 1) // m * m


def _make_kernel(H, W, Wp):
    """Build the fused Asym_Net kernel for a fixed (H, W, padded-W) shape."""
    Hp = H + 2              # height incl. 1-row zero halo top/bottom
    M = H * Wp              # flattened (row, padded-col) matmul M dimension
    K = 3 * FEATS           # packed contraction depth (3 taps x 64 channels)

    def kernel(x_ref, w_in_ref, w1_ref, w2_ref, w_out_ref, o_ref, act_ref):
        # x_ref:     (1, Hp, Wp, 1)  zero-padded single-channel input
        # w_in_ref:  (3, 3, 64)      input conv taps
        # w1_ref:    (18, 192, 64)   bf16, packed 3x1 taps (dh-major, cin-minor)
        # w2_ref:    (18, 192, 64)   bf16, packed 1x3 taps (dw-major, cin-minor)
        # w_out_ref: (3, 192, 1)     f32, packed output conv taps per dh
        # o_ref:     (1, H, W, 1)
        # act_ref:   (Hp, Wp, 64)    resident activation with zero halo

        # ---- zero the halo once; interior is overwritten below ---------------
        act_ref[...] = jnp.zeros_like(act_ref)

        # ---- input conv 1->64, 3x3, pad 1, ReLU (tiny; VPU broadcast-mult) ----
        xv = x_ref[...]                                   # (1, Hp, Wp, 1)
        acc = jnp.zeros((H, W, FEATS), jnp.float32)
        for dh in range(3):
            for dw in range(3):
                acc = acc + xv[0, dh:dh + H, dw:dw + W, :] * w_in_ref[dh, dw]
        act_ref[1:H + 1, 1:W + 1, :] = jnp.maximum(acc, 0.0)

        # ---- 18 fused asym blocks: conv(3x1) -> conv(1x3) -> ReLU -------------
        def block_body(i, carry):
            w1 = w1_ref[i]                                # (192, 64) bf16
            w2 = w2_ref[i]                                # (192, 64) bf16

            # conv1 (3x1 over height), taps packed into one K=192 contraction.
            lhs1 = jnp.concatenate(
                [act_ref[dh:dh + H, :, :].reshape(M, FEATS) for dh in range(3)],
                axis=-1)                                  # (M, 192) f32
            t = jnp.dot(lhs1.astype(jnp.bfloat16), w1,
                        preferred_element_type=jnp.float32)
            t = t.reshape(H, Wp, FEATS)
            # Halo columns of act are zero, so t columns {0} and [W+1, Wp) are
            # exactly zero: they serve as conv2's width zero-padding.

            # conv2 (1x3 over width): column-shifted copies (zero fill), K=192.
            zc = jnp.zeros((H, 1, FEATS), jnp.float32)
            t_l = jnp.concatenate([zc, t[:, :Wp - 1, :]], axis=1)   # col j -> t[:, j-1]
            t_r = jnp.concatenate([t[:, 1:, :], zc], axis=1)        # col j -> t[:, j+1]
            lhs2 = jnp.concatenate([t_l, t, t_r], axis=-1)          # (H, Wp, 192)
            u = jnp.dot(lhs2.reshape(M, K).astype(jnp.bfloat16), w2,
                        preferred_element_type=jnp.float32)
            u = u.reshape(H, Wp, FEATS)

            # Store only real columns; halo stays zero for the next block.
            act_ref[1:H + 1, 1:W + 1, :] = jnp.maximum(u[:, 1:W + 1, :], 0.0)
            return carry

        jax.lax.fori_loop(0, NUM_BLOCKS, block_body, 0)

        # ---- output conv 64->1, 3x3, pad 1, + residual (MXU, 3 x K=192) -------
        a = act_ref[...]                                  # (Hp, Wp, 64)
        zc = jnp.zeros((Hp, 1, FEATS), jnp.float32)
        a_l = jnp.concatenate([zc, a[:, :Wp - 1, :]], axis=1)
        a_r = jnp.concatenate([a[:, 1:, :], zc], axis=1)
        lhsw = jnp.concatenate([a_l, a, a_r], axis=-1)    # (Hp, Wp, 192)
        out = jnp.zeros((M, 1), jnp.float32)
        for dh in range(3):
            out = out + jnp.dot(lhsw[dh:dh + H].reshape(M, K), w_out_ref[dh],
                                preferred_element_type=jnp.float32)
        out = out.reshape(H, Wp, 1)[:, 1:W + 1, :]        # (H, W, 1)
        res = xv[0, 1:H + 1, 1:W + 1, :]                  # residual = input
        o_ref[...] = (out + res).reshape(1, H, W, 1)

    return kernel


# --------------------------------------------------------------------------
# parameter init (matches PyTorch: normal(0, sqrt(2 / (kh*kw*out_channels))))
# --------------------------------------------------------------------------
def init_params(key):
    k1, k2, k3, k4 = jax.random.split(key, 4)
    std_in = (2.0 / (3 * 3 * FEATS)) ** 0.5
    std_c1 = (2.0 / (3 * 1 * FEATS)) ** 0.5
    std_c2 = (2.0 / (1 * 3 * FEATS)) ** 0.5
    std_out = (2.0 / (3 * 3 * 1)) ** 0.5
    return dict(
        # (dh, dw, cout)
        w_in=jax.random.normal(k1, (3, 3, FEATS), jnp.float32) * std_in,
        # (block, dh, cin, cout)
        w1=jax.random.normal(k2, (NUM_BLOCKS, 3, FEATS, FEATS), jnp.float32) * std_c1,
        # (block, dw, cin, cout)
        w2=jax.random.normal(k3, (NUM_BLOCKS, 3, FEATS, FEATS), jnp.float32) * std_c2,
        # (dh, dw, cin)
        w_out=jax.random.normal(k4, (3, 3, FEATS), jnp.float32) * std_out,
    )


# --------------------------------------------------------------------------
# full forward (NCHW in / NCHW out, like the PyTorch module)
# --------------------------------------------------------------------------
@jax.jit
def asym_net_forward(x_nchw, params):
    x = jnp.transpose(x_nchw, (0, 2, 3, 1)).astype(jnp.float32)   # NHWC
    N, H, W, _ = x.shape
    Hp = H + 2
    Wp = _round_up(W + 2, 8)          # padded width: halo + sublane alignment

    # pad once (1 top/bottom row, 1 left col, >=1 right cols of zeros)
    xpad = jnp.pad(x, ((0, 0), (1, 1), (1, Wp - (W + 1)), (0, 0)))

    # pack weights for the in-kernel K=192 contractions
    w_in = params["w_in"]                                                  # (3,3,64)
    w1p = params["w1"].reshape(NUM_BLOCKS, 3 * FEATS, FEATS).astype(jnp.bfloat16)
    w2p = params["w2"].reshape(NUM_BLOCKS, 3 * FEATS, FEATS).astype(jnp.bfloat16)
    w_outp = params["w_out"].reshape(3, 3 * FEATS, 1).astype(jnp.float32)  # (3,192,1)

    flops = N * (
        2 * 9 * H * W * FEATS                               # input conv
        + NUM_BLOCKS * 2 * 2 * H * Wp * (3 * FEATS) * FEATS  # 18 blocks, 2 matmuls each
        + 2 * 3 * H * Wp * (3 * FEATS))                      # output conv
    bytes_accessed = int(xpad.size * 4 + N * H * W * 4
                         + w1p.size * 2 + w2p.size * 2
                         + w_in.size * 4 + w_outp.size * 4)

    kernel = _make_kernel(H, W, Wp)

    out = pl.pallas_call(
        kernel,
        out_shape=jax.ShapeDtypeStruct((N, H, W, 1), jnp.float32),
        grid_spec=pltpu.PrefetchScalarGridSpec(
            num_scalar_prefetch=0,
            grid=(N,),
            in_specs=[
                pl.BlockSpec((1, Hp, Wp, 1), lambda n: (n, 0, 0, 0)),
                pl.BlockSpec((3, 3, FEATS), lambda n: (0, 0, 0)),
                pl.BlockSpec((NUM_BLOCKS, 3 * FEATS, FEATS), lambda n: (0, 0, 0)),
                pl.BlockSpec((NUM_BLOCKS, 3 * FEATS, FEATS), lambda n: (0, 0, 0)),
                pl.BlockSpec((3, 3 * FEATS, 1), lambda n: (0, 0, 0)),
            ],
            out_specs=pl.BlockSpec((1, H, W, 1), lambda n: (n, 0, 0, 0)),
            scratch_shapes=[pltpu.VMEM((Hp, Wp, FEATS), jnp.float32)],
        ),
        compiler_params=pltpu.CompilerParams(
            dimension_semantics=("parallel",),
            vmem_limit_bytes=48 * 1024 * 1024,
        ),
        cost_estimate=pl.CostEstimate(
            flops=flops, transcendentals=0, bytes_accessed=bytes_accessed),
    )(xpad, w_in, w1p, w2p, w_outp)

    return jnp.transpose(out, (0, 3, 1, 2))                 # back to NCHW


if __name__ == "__main__":
    key = jax.random.PRNGKey(0)
    pkey, xkey = jax.random.split(key)
    params = init_params(pkey)

    # VDSR-style input: single-channel images, NCHW
    x = jax.random.normal(xkey, (2, 1, 16, 16), jnp.float32)

    y = asym_net_forward(x, params)
    y = jax.block_until_ready(y)

    assert y.shape == x.shape, y.shape
    assert bool(jnp.all(jnp.isfinite(y)))
    print("KERNEL_OK")
</pallas_src>

<mosaic_0001>
module attributes {stable_mosaic.version = 11 : i64} {
  func.func @kernel(%arg0: i32, %arg1: memref<1x18x24x1xf32, #tpu.memory_space<vmem>>, %arg2: memref<3x3x64xf32, #tpu.memory_space<vmem>>, %arg3: memref<18x192x64xbf16, #tpu.memory_space<vmem>>, %arg4: memref<18x192x64xbf16, #tpu.memory_space<vmem>>, %arg5: memref<3x192x1xf32, #tpu.memory_space<vmem>>, %arg6: memref<1x16x16x1xf32, #tpu.memory_space<vmem>>, %arg7: memref<18x24x64xf32, #tpu.memory_space<vmem>>) attributes {dimension_semantics = [#tpu.dimension_semantics<parallel>], iteration_bounds = array<i64: 2>, scalar_prefetch = 0 : i64, scratch_operands = 1 : i64, tpu.core_type = #tpu.core_type<tc>, window_params = [{transform_indices = @transform_0, window_bounds = array<i64: 1, 18, 24, 1>}, {pipeline_mode = #tpu.pipeline_mode<synchronous>, transform_indices = @transform_1, window_bounds = array<i64: 3, 3, 64>}, {pipeline_mode = #tpu.pipeline_mode<synchronous>, transform_indices = @transform_2, window_bounds = array<i64: 18, 192, 64>}, {pipeline_mode = #tpu.pipeline_mode<synchronous>, transform_indices = @transform_3, window_bounds = array<i64: 18, 192, 64>}, {pipeline_mode = #tpu.pipeline_mode<synchronous>, transform_indices = @transform_4, window_bounds = array<i64: 3, 192, 1>}, {transform_indices = @transform_5, window_bounds = array<i64: 1, 16, 16, 1>}]} {
    %cst = arith.constant 0.000000e+00 : f32
    %0 = vector.broadcast %cst : f32 to vector<18x24x64xf32>
    %c0 = arith.constant 0 : index
    %c0_0 = arith.constant 0 : index
    %c0_1 = arith.constant 0 : index
    %1 = vector.load %arg7[%c0, %c0_0, %c0_1] : memref<18x24x64xf32, #tpu.memory_space<vmem>>, vector<18x24x64xf32>
    tpu.vector_store %arg7[%c0, %c0_0, %c0_1], %0 {strides = array<i32>} : memref<18x24x64xf32, #tpu.memory_space<vmem>>, vector<18x24x64xf32>,
    %c0_2 = arith.constant 0 : index
    %c0_3 = arith.constant 0 : index
    %c0_4 = arith.constant 0 : index
    %c0_5 = arith.constant 0 : index
    %2 = vector.load %arg1[%c0_2, %c0_3, %c0_4, %c0_5] : memref<1x18x24x1xf32, #tpu.memory_space<vmem>>, vector<1x18x24x1xf32>
    %cst_6 = arith.constant 0.000000e+00 : f32
    %3 = vector.broadcast %cst_6 : f32 to vector<16x16x64xf32>
    %4 = vector.extract_strided_slice %2 {offsets = [0, 0, 0, 0], sizes = [1, 16, 16, 1], strides = [1, 1, 1, 1]} : vector<1x18x24x1xf32> to vector<1x16x16x1xf32>
    %5 = vector.shape_cast %4 : vector<1x16x16x1xf32> to vector<16x16x1xf32>
    %c0_7 = arith.constant 0 : index
    %c0_8 = arith.constant 0 : index
    %c0_9 = arith.constant 0 : index
    %6 = vector.load %arg2[%c0_7, %c0_8, %c0_9] : memref<3x3x64xf32, #tpu.memory_space<vmem>>, vector<1x1x64xf32>
    %7 = vector.shape_cast %6 : vector<1x1x64xf32> to vector<64xf32>
    %8 = vector.shape_cast %7 : vector<64xf32> to vector<1x1x64xf32>
    %9 = vector.broadcast %5 : vector<16x16x1xf32> to vector<16x16x64xf32>
    %10 = vector.broadcast %8 : vector<1x1x64xf32> to vector<16x16x64xf32>
    %11 = arith.mulf %9, %10 : vector<16x16x64xf32>
    %12 = arith.addf %3, %11 : vector<16x16x64xf32>
    %13 = vector.extract_strided_slice %2 {offsets = [0, 0, 1, 0], sizes = [1, 16, 16, 1], strides = [1, 1, 1, 1]} : vector<1x18x24x1xf32> to vector<1x16x16x1xf32>
    %14 = vector.shape_cast %13 : vector<1x16x16x1xf32> to vector<16x16x1xf32>
    %c0_10 = arith.constant 0 : index
    %c1 = arith.constant 1 : index
    %c0_11 = arith.constant 0 : index
    %15 = vector.load %arg2[%c0_10, %c1, %c0_11] : memref<3x3x64xf32, #tpu.memory_space<vmem>>, vector<1x1x64xf32>
    %16 = vector.shape_cast %15 : vector<1x1x64xf32> to vector<64xf32>
    %17 = vector.shape_cast %16 : vector<64xf32> to vector<1x1x64xf32>
    %18 = vector.broadcast %14 : vector<16x16x1xf32> to vector<16x16x64xf32>
    %19 = vector.broadcast %17 : vector<1x1x64xf32> to vector<16x16x64xf32>
    %20 = arith.mulf %18, %19 : vector<16x16x64xf32>
    %21 = arith.addf %12, %20 : vector<16x16x64xf32>
    %22 = vector.extract_strided_slice %2 {offsets = [0, 0, 2, 0], sizes = [1, 16, 16, 1], strides = [1, 1, 1, 1]} : vector<1x18x24x1xf32> to vector<1x16x16x1xf32>
    %23 = vector.shape_cast %22 : vector<1x16x16x1xf32> to vector<16x16x1xf32>
    %c0_12 = arith.constant 0 : index
    %c2 = arith.constant 2 : index
    %c0_13 = arith.constant 0 : index
    %24 = vector.load %arg2[%c0_12, %c2, %c0_13] : memref<3x3x64xf32, #tpu.memory_space<vmem>>, vector<1x1x64xf32>
    %25 = vector.shape_cast %24 : vector<1x1x64xf32> to vector<64xf32>
    %26 = vector.shape_cast %25 : vector<64xf32> to vector<1x1x64xf32>
    %27 = vector.broadcast %23 : vector<16x16x1xf32> to vector<16x16x64xf32>
    %28 = vector.broadcast %26 : vector<1x1x64xf32> to vector<16x16x64xf32>
    %29 = arith.mulf %27, %28 : vector<16x16x64xf32>
    %30 = arith.addf %21, %29 : vector<16x16x64xf32>
    %31 = vector.extract_strided_slice %2 {offsets = [0, 1, 0, 0], sizes = [1, 16, 16, 1], strides = [1, 1, 1, 1]} : vector<1x18x24x1xf32> to vector<1x16x16x1xf32>
    %32 = vector.shape_cast %31 : vector<1x16x16x1xf32> to vector<16x16x1xf32>
    %c1_14 = arith.constant 1 : index
    %c0_15 = arith.constant 0 : index
    %c0_16 = arith.constant 0 : index
    %33 = vector.load %arg2[%c1_14, %c0_15, %c0_16] : memref<3x3x64xf32, #tpu.memory_space<vmem>>, vector<1x1x64xf32>
    %34 = vector.shape_cast %33 : vector<1x1x64xf32> to vector<64xf32>
    %35 = vector.shape_cast %34 : vector<64xf32> to vector<1x1x64xf32>
    %36 = vector.broadcast %32 : vector<16x16x1xf32> to vector<16x16x64xf32>
    %37 = vector.broadcast %35 : vector<1x1x64xf32> to vector<16x16x64xf32>
    %38 = arith.mulf %36, %37 : vector<16x16x64xf32>
    %39 = arith.addf %30, %38 : vector<16x16x64xf32>
    %40 = vector.extract_strided_slice %2 {offsets = [0, 1, 1, 0], sizes = [1, 16, 16, 1], strides = [1, 1, 1, 1]} : vector<1x18x24x1xf32> to vector<1x16x16x1xf32>
    %41 = vector.shape_cast %40 : vector<1x16x16x1xf32> to vector<16x16x1xf32>
    %c1_17 = arith.constant 1 : index
    %c1_18 = arith.constant 1 : index
    %c0_19 = arith.constant 0 : index
    %42 = vector.load %arg2[%c1_17, %c1_18, %c0_19] : memref<3x3x64xf32, #tpu.memory_space<vmem>>, vector<1x1x64xf32>
    %43 = vector.shape_cast %42 : vector<1x1x64xf32> to vector<64xf32>
    %44 = vector.shape_cast %43 : vector<64xf32> to vector<1x1x64xf32>
    %45 = vector.broadcast %41 : vector<16x16x1xf32> to vector<16x16x64xf32>
    %46 = vector.broadcast %44 : vector<1x1x64xf32> to vector<16x16x64xf32>
    %47 = arith.mulf %45, %46 : vector<16x16x64xf32>
    %48 = arith.addf %39, %47 : vector<16x16x64xf32>
    %49 = vector.extract_strided_slice %2 {offsets = [0, 1, 2, 0], sizes = [1, 16, 16, 1], strides = [1, 1, 1, 1]} : vector<1x18x24x1xf32> to vector<1x16x16x1xf32>
    %50 = vector.shape_cast %49 : vector<1x16x16x1xf32> to vector<16x16x1xf32>
    %c1_20 = arith.constant 1 : index
    %c2_21 = arith.constant 2 : index
    %c0_22 = arith.constant 0 : index
    %51 = vector.load %arg2[%c1_20, %c2_21, %c0_22] : memref<3x3x64xf32, #tpu.memory_space<vmem>>, vector<1x1x64xf32>
    %52 = vector.shape_cast %51 : vector<1x1x64xf32> to vector<64xf32>
    %53 = vector.shape_cast %52 : vector<64xf32> to vector<1x1x64xf32>
    %54 = vector.broadcast %50 : vector<16x16x1xf32> to vector<16x16x64xf32>
    %55 = vector.broadcast %53 : vector<1x1x64xf32> to vector<16x16x64xf32>
    %56 = arith.mulf %54, %55 : vector<16x16x64xf32>
    %57 = arith.addf %48, %56 : vector<16x16x64xf32>
    %58 = vector.extract_strided_slice %2 {offsets = [0, 2, 0, 0], sizes = [1, 16, 16, 1], strides = [1, 1, 1, 1]} : vector<1x18x24x1xf32> to vector<1x16x16x1xf32>
    %59 = vector.shape_cast %58 : vector<1x16x16x1xf32> to vector<16x16x1xf32>
    %c2_23 = arith.constant 2 : index
    %c0_24 = arith.constant 0 : index
    %c0_25 = arith.constant 0 : index
    %60 = vector.load %arg2[%c2_23, %c0_24, %c0_25] : memref<3x3x64xf32, #tpu.memory_space<vmem>>, vector<1x1x64xf32>
    %61 = vector.shape_cast %60 : vector<1x1x64xf32> to vector<64xf32>
    %62 = vector.shape_cast %61 : vector<64xf32> to vector<1x1x64xf32>
    %63 = vector.broadcast %59 : vector<16x16x1xf32> to vector<16x16x64xf32>
    %64 = vector.broadcast %62 : vector<1x1x64xf32> to vector<16x16x64xf32>
    %65 = arith.mulf %63, %64 : vector<16x16x64xf32>
    %66 = arith.addf %57, %65 : vector<16x16x64xf32>
    %67 = vector.extract_strided_slice %2 {offsets = [0, 2, 1, 0], sizes = [1, 16, 16, 1], strides = [1, 1, 1, 1]} : vector<1x18x24x1xf32> to vector<1x16x16x1xf32>
    %68 = vector.shape_cast %67 : vector<1x16x16x1xf32> to vector<16x16x1xf32>
    %c2_26 = arith.constant 2 : index
    %c1_27 = arith.constant 1 : index
    %c0_28 = arith.constant 0 : index
    %69 = vector.load %arg2[%c2_26, %c1_27, %c0_28] : memref<3x3x64xf32, #tpu.memory_space<vmem>>, vector<1x1x64xf32>
    %70 = vector.shape_cast %69 : vector<1x1x64xf32> to vector<64xf32>
    %71 = vector.shape_cast %70 : vector<64xf32> to vector<1x1x64xf32>
    %72 = vector.broadcast %68 : vector<16x16x1xf32> to vector<16x16x64xf32>
    %73 = vector.broadcast %71 : vector<1x1x64xf32> to vector<16x16x64xf32>
    %74 = arith.mulf %72, %73 : vector<16x16x64xf32>
    %75 = arith.addf %66, %74 : vector<16x16x64xf32>
    %76 = vector.extract_strided_slice %2 {offsets = [0, 2, 2, 0], sizes = [1, 16, 16, 1], strides = [1, 1, 1, 1]} : vector<1x18x24x1xf32> to vector<1x16x16x1xf32>
    %77 = vector.shape_cast %76 : vector<1x16x16x1xf32> to vector<16x16x1xf32>
    %c2_29 = arith.constant 2 : index
    %c2_30 = arith.constant 2 : index
    %c0_31 = arith.constant 0 : index
    %78 = vector.load %arg2[%c2_29, %c2_30, %c0_31] : memref<3x3x64xf32, #tpu.memory_space<vmem>>, vector<1x1x64xf32>
    %79 = vector.shape_cast %78 : vector<1x1x64xf32> to vector<64xf32>
    %80 = vector.shape_cast %79 : vector<64xf32> to vector<1x1x64xf32>
    %81 = vector.broadcast %77 : vector<16x16x1xf32> to vector<16x16x64xf32>
    %82 = vector.broadcast %80 : vector<1x1x64xf32> to vector<16x16x64xf32>
    %83 = arith.mulf %81, %82 : vector<16x16x64xf32>
    %84 = arith.addf %75, %83 : vector<16x16x64xf32>
    %cst_32 = arith.constant 0.000000e+00 : f32
    %85 = vector.broadcast %cst_32 : f32 to vector<16x16x64xf32>
    %86 = arith.maximumf %84, %85 : vector<16x16x64xf32>
    %c1_33 = arith.constant 1 : index
    %c1_34 = arith.constant 1 : index
    %c0_35 = arith.constant 0 : index
    %87 = vector.load %arg7[%c1_33, %c1_34, %c0_35] : memref<18x24x64xf32, #tpu.memory_space<vmem>>, vector<16x16x64xf32>
    tpu.vector_store %arg7[%c1_33, %c1_34, %c0_35], %86 {strides = array<i32>} : memref<18x24x64xf32, #tpu.memory_space<vmem>>, vector<16x16x64xf32>,
    %c0_i32 = arith.constant 0 : i32
    %c18_i32 = arith.constant 18 : i32
    %88 = arith.addi %c0_i32, %c18_i32 : i32
    %c1_i32 = arith.constant 1 : i32
    scf.for %arg8 = %c0_i32 to %88 step %c1_i32  : i32 {
      %122 = arith.index_cast %arg8 : i32 to index
      %c0_58 = arith.constant 0 : index
      %c0_59 = arith.constant 0 : index
      %123 = vector.load %arg3[%122, %c0_58, %c0_59] : memref<18x192x64xbf16, #tpu.memory_space<vmem>>, vector<1x192x64xbf16>
      %124 = vector.shape_cast %123 : vector<1x192x64xbf16> to vector<192x64xbf16>
      %125 = arith.index_cast %arg8 : i32 to index
      %c0_60 = arith.constant 0 : index
      %c0_61 = arith.constant 0 : index
      %126 = vector.load %arg4[%125, %c0_60, %c0_61] : memref<18x192x64xbf16, #tpu.memory_space<vmem>>, vector<1x192x64xbf16>
      %127 = vector.shape_cast %126 : vector<1x192x64xbf16> to vector<192x64xbf16>
      %c0_62 = arith.constant 0 : index
      %c0_63 = arith.constant 0 : index
      %c0_64 = arith.constant 0 : index
      %128 = vector.load %arg7[%c0_62, %c0_63, %c0_64] : memref<18x24x64xf32, #tpu.memory_space<vmem>>, vector<16x24x64xf32>
      %129 = vector.shape_cast %128 : vector<16x24x64xf32> to vector<384x64xf32>
      %c1_65 = arith.constant 1 : index
      %c0_66 = arith.constant 0 : index
      %c0_67 = arith.constant 0 : index
      %130 = vector.load %arg7[%c1_65, %c0_66, %c0_67] : memref<18x24x64xf32, #tpu.memory_space<vmem>>, vector<16x24x64xf32>
      %131 = vector.shape_cast %130 : vector<16x24x64xf32> to vector<384x64xf32>
      %c2_68 = arith.constant 2 : index
      %c0_69 = arith.constant 0 : index
      %c0_70 = arith.constant 0 : index
      %132 = vector.load %arg7[%c2_68, %c0_69, %c0_70] : memref<18x24x64xf32, #tpu.memory_space<vmem>>, vector<16x24x64xf32>
      %133 = vector.shape_cast %132 : vector<16x24x64xf32> to vector<384x64xf32>
      %134 = tpu.concatenate %129, %131, %133 in 1 : vector<384x64xf32>, vector<384x64xf32>, vector<384x64xf32> -> vector<384x192xf32>
      %135 = arith.truncf %134 : vector<384x192xf32> to vector<384x192xbf16>
      %cst_71 = arith.constant dense<0.000000e+00> : vector<384x64xf32>
      %136 = tpu.matmul %135, %124, %cst_71 {dimension_numbers = #tpu.dot_dimension_numbers<[1], [0], [0], [1], [0, 0, 1, 1], [], []>} : vector<384x192xbf16>, vector<192x64xbf16>, vector<384x64xf32> -> vector<384x64xf32>
      %137 = vector.shape_cast %136 : vector<384x64xf32> to vector<16x24x64xf32>
      %cst_72 = arith.constant 0.000000e+00 : f32
      %138 = vector.broadcast %cst_72 : f32 to vector<16x1x64xf32>
      %139 = vector.extract_strided_slice %137 {offsets = [0, 0, 0], sizes = [16, 23, 64], strides = [1, 1, 1]} : vector<16x24x64xf32> to vector<16x23x64xf32>
      %140 = tpu.concatenate %138, %139 in 1 : vector<16x1x64xf32>, vector<16x23x64xf32> -> vector<16x24x64xf32>
      %141 = vector.extract_strided_slice %137 {offsets = [0, 1, 0], sizes = [16, 23, 64], strides = [1, 1, 1]} : vector<16x24x64xf32> to vector<16x23x64xf32>
      %142 = tpu.concatenate %141, %138 in 1 : vector<16x23x64xf32>, vector<16x1x64xf32> -> vector<16x24x64xf32>
      %143 = tpu.concatenate %140, %137, %142 in 2 : vector<16x24x64xf32>, vector<16x24x64xf32>, vector<16x24x64xf32> -> vector<16x24x192xf32>
      %144 = vector.shape_cast %143 : vector<16x24x192xf32> to vector<384x192xf32>
      %145 = arith.truncf %144 : vector<384x192xf32> to vector<384x192xbf16>
      %cst_73 = arith.constant dense<0.000000e+00> : vector<384x64xf32>
      %146 = tpu.matmul %145, %127, %cst_73 {dimension_numbers = #tpu.dot_dimension_numbers<[1], [0], [0], [1], [0, 0, 1, 1], [], []>} : vector<384x192xbf16>, vector<192x64xbf16>, vector<384x64xf32> -> vector<384x64xf32>
      %147 = vector.shape_cast %146 : vector<384x64xf32> to vector<16x24x64xf32>
      %148 = vector.extract_strided_slice %147 {offsets = [0, 1, 0], sizes = [16, 16, 64], strides = [1, 1, 1]} : vector<16x24x64xf32> to vector<16x16x64xf32>
      %cst_74 = arith.constant 0.000000e+00 : f32
      %149 = vector.broadcast %cst_74 : f32 to vector<16x16x64xf32>
      %150 = arith.maximumf %148, %149 : vector<16x16x64xf32>
      %c1_75 = arith.constant 1 : index
      %c1_76 = arith.constant 1 : index
      %c0_77 = arith.constant 0 : index
      %151 = vector.load %arg7[%c1_75, %c1_76, %c0_77] : memref<18x24x64xf32, #tpu.memory_space<vmem>>, vector<16x16x64xf32>
      tpu.vector_store %arg7[%c1_75, %c1_76, %c0_77], %150 {strides = array<i32>} : memref<18x24x64xf32, #tpu.memory_space<vmem>>, vector<16x16x64xf32>,
    }
    %c18_i32_36 = arith.constant 18 : i32
    %c0_37 = arith.constant 0 : index
    %c0_38 = arith.constant 0 : index
    %c0_39 = arith.constant 0 : index
    %89 = vector.load %arg7[%c0_37, %c0_38, %c0_39] : memref<18x24x64xf32, #tpu.memory_space<vmem>>, vector<18x24x64xf32>
    %cst_40 = arith.constant 0.000000e+00 : f32
    %90 = vector.broadcast %cst_40 : f32 to vector<18x1x64xf32>
    %91 = vector.extract_strided_slice %89 {offsets = [0, 0, 0], sizes = [18, 23, 64], strides = [1, 1, 1]} : vector<18x24x64xf32> to vector<18x23x64xf32>
    %92 = tpu.concatenate %90, %91 in 1 : vector<18x1x64xf32>, vector<18x23x64xf32> -> vector<18x24x64xf32>
    %93 = vector.extract_strided_slice %89 {offsets = [0, 1, 0], sizes = [18, 23, 64], strides = [1, 1, 1]} : vector<18x24x64xf32> to vector<18x23x64xf32>
    %94 = tpu.concatenate %93, %90 in 1 : vector<18x23x64xf32>, vector<18x1x64xf32> -> vector<18x24x64xf32>
    %95 = tpu.concatenate %92, %89, %94 in 2 : vector<18x24x64xf32>, vector<18x24x64xf32>, vector<18x24x64xf32> -> vector<18x24x192xf32>
    %cst_41 = arith.constant 0.000000e+00 : f32
    %96 = vector.broadcast %cst_41 : f32 to vector<384x1xf32>
    %97 = vector.extract_strided_slice %95 {offsets = [0, 0, 0], sizes = [16, 24, 192], strides = [1, 1, 1]} : vector<18x24x192xf32> to vector<16x24x192xf32>
    %98 = vector.shape_cast %97 : vector<16x24x192xf32> to vector<384x192xf32>
    %c0_42 = arith.constant 0 : index
    %c0_43 = arith.constant 0 : index
    %c0_44 = arith.constant 0 : index
    %99 = vector.load %arg5[%c0_42, %c0_43, %c0_44] : memref<3x192x1xf32, #tpu.memory_space<vmem>>, vector<1x192x1xf32>
    %100 = vector.shape_cast %99 : vector<1x192x1xf32> to vector<192x1xf32>
    %cst_45 = arith.constant dense<0.000000e+00> : vector<384x1xf32>
    %101 = tpu.matmul %98, %100, %cst_45 {dimension_numbers = #tpu.dot_dimension_numbers<[1], [0], [0], [1], [0, 0, 1, 1], [], []>} : vector<384x192xf32>, vector<192x1xf32>, vector<384x1xf32> -> vector<384x1xf32>
    %102 = arith.addf %96, %101 : vector<384x1xf32>
    %103 = vector.extract_strided_slice %95 {offsets = [1, 0, 0], sizes = [16, 24, 192], strides = [1, 1, 1]} : vector<18x24x192xf32> to vector<16x24x192xf32>
    %104 = vector.shape_cast %103 : vector<16x24x192xf32> to vector<384x192xf32>
    %c1_46 = arith.constant 1 : index
    %c0_47 = arith.constant 0 : index
    %c0_48 = arith.constant 0 : index
    %105 = vector.load %arg5[%c1_46, %c0_47, %c0_48] : memref<3x192x1xf32, #tpu.memory_space<vmem>>, vector<1x192x1xf32>
    %106 = vector.shape_cast %105 : vector<1x192x1xf32> to vector<192x1xf32>
    %cst_49 = arith.constant dense<0.000000e+00> : vector<384x1xf32>
    %107 = tpu.matmul %104, %106, %cst_49 {dimension_numbers = #tpu.dot_dimension_numbers<[1], [0], [0], [1], [0, 0, 1, 1], [], []>} : vector<384x192xf32>, vector<192x1xf32>, vector<384x1xf32> -> vector<384x1xf32>
    %108 = arith.addf %102, %107 : vector<384x1xf32>
    %109 = vector.extract_strided_slice %95 {offsets = [2, 0, 0], sizes = [16, 24, 192], strides = [1, 1, 1]} : vector<18x24x192xf32> to vector<16x24x192xf32>
    %110 = vector.shape_cast %109 : vector<16x24x192xf32> to vector<384x192xf32>
    %c2_50 = arith.constant 2 : index
    %c0_51 = arith.constant 0 : index
    %c0_52 = arith.constant 0 : index
    %111 = vector.load %arg5[%c2_50, %c0_51, %c0_52] : memref<3x192x1xf32, #tpu.memory_space<vmem>>, vector<1x192x1xf32>
    %112 = vector.shape_cast %111 : vector<1x192x1xf32> to vector<192x1xf32>
    %cst_53 = arith.constant dense<0.000000e+00> : vector<384x1xf32>
    %113 = tpu.matmul %110, %112, %cst_53 {dimension_numbers = #tpu.dot_dimension_numbers<[1], [0], [0], [1], [0, 0, 1, 1], [], []>} : vector<384x192xf32>, vector<192x1xf32>, vector<384x1xf32> -> vector<384x1xf32>
    %114 = arith.addf %108, %113 : vector<384x1xf32>
    %115 = vector.shape_cast %114 : vector<384x1xf32> to vector<16x24x1xf32>
    %116 = vector.extract_strided_slice %115 {offsets = [0, 1, 0], sizes = [16, 16, 1], strides = [1, 1, 1]} : vector<16x24x1xf32> to vector<16x16x1xf32>
    %117 = vector.extract_strided_slice %2 {offsets = [0, 1, 1, 0], sizes = [1, 16, 16, 1], strides = [1, 1, 1, 1]} : vector<1x18x24x1xf32> to vector<1x16x16x1xf32>
    %118 = vector.shape_cast %117 : vector<1x16x16x1xf32> to vector<16x16x1xf32>
    %119 = arith.addf %116, %118 : vector<16x16x1xf32>
    %120 = vector.shape_cast %119 : vector<16x16x1xf32> to vector<1x16x16x1xf32>
    %c0_54 = arith.constant 0 : index
    %c0_55 = arith.constant 0 : index
    %c0_56 = arith.constant 0 : index
    %c0_57 = arith.constant 0 : index
    %121 = vector.load %arg6[%c0_54, %c0_55, %c0_56, %c0_57] : memref<1x16x16x1xf32, #tpu.memory_space<vmem>>, vector<1x16x16x1xf32>
    tpu.vector_store %arg6[%c0_54, %c0_55, %c0_56, %c0_57], %120 {strides = array<i32>} : memref<1x16x16x1xf32, #tpu.memory_space<vmem>>, vector<1x16x16x1xf32>,
    return
  }
  func.func @transform_0(%arg0: i32) -> (i32, i32, i32, i32) {
    %c0_i32 = arith.constant 0 : i32
    %c0_i32_0 = arith.constant 0 : i32
    %c0_i32_1 = arith.constant 0 : i32
    %c0_i32_2 = arith.constant 0 : i32
    return %arg0, %c0_i32, %c0_i32_0, %c0_i32_1 : i32, i32, i32, i32
  }
  func.func @transform_1(%arg0: i32) -> (i32, i32, i32) {
    %c0_i32 = arith.constant 0 : i32
    %c0_i32_0 = arith.constant 0 : i32
    %c0_i32_1 = arith.constant 0 : i32
    %c0_i32_2 = arith.constant 0 : i32
    return %c0_i32, %c0_i32_0, %c0_i32_1 : i32, i32, i32
  }
  func.func @transform_2(%arg0: i32) -> (i32, i32, i32) {
    %c0_i32 = arith.constant 0 : i32
    %c0_i32_0 = arith.constant 0 : i32
    %c0_i32_1 = arith.constant 0 : i32
    %c0_i32_2 = arith.constant 0 : i32
    return %c0_i32, %c0_i32_0, %c0_i32_1 : i32, i32, i32
  }
  func.func @transform_3(%arg0: i32) -> (i32, i32, i32) {
    %c0_i32 = arith.constant 0 : i32
    %c0_i32_0 = arith.constant 0 : i32
    %c0_i32_1 = arith.constant 0 : i32
    %c0_i32_2 = arith.constant 0 : i32
    return %c0_i32, %c0_i32_0, %c0_i32_1 : i32, i32, i32
  }
  func.func @transform_4(%arg0: i32) -> (i32, i32, i32) {
    %c0_i32 = arith.constant 0 : i32
    %c0_i32_0 = arith.constant 0 : i32
    %c0_i32_1 = arith.constant 0 : i32
    %c0_i32_2 = arith.constant 0 : i32
    return %c0_i32, %c0_i32_0, %c0_i32_1 : i32, i32, i32
  }
  func.func @transform_5(%arg0: i32) -> (i32, i32, i32, i32) {
    %c0_i32 = arith.constant 0 : i32
    %c0_i32_0 = arith.constant 0 : i32
    %c0_i32_1 = arith.constant 0 : i32
    %c0_i32_2 = arith.constant 0 : i32
    return %arg0, %c0_i32, %c0_i32_0, %c0_i32_1 : i32, i32, i32, i32
  }
}

</mosaic_0001>

<bundles_post_ra>
// kernel: asym_net_forward.1
= control target key start
LH: loop header
LB: loop body
LE: loop exit
PB: predicated region body
PF: predicated region fallthrough
CT: control target
= control target key end

     0   :  { %s6980_s18 = smov 0   ;;  %s12142_s0 = inlined_call_operand.vmem [shape: f32[2,18,24,1], index: 0, kind: input, shape index: {}]   ;;  %s12143_s1 = inlined_call_operand.vmem [shape: f32[3,3,64], index: 1, kind: input, shape index: {}]   ;;  %s12144_s2 = inlined_call_operand.vmem [shape: bf16[18,192,64], index: 2, kind: input, shape index: {}]   ;;  %s12145_s3 = inlined_call_operand.vmem [shape: bf16[18,192,64], index: 3, kind: input, shape index: {}]   ;;  %s12146_s4 = inlined_call_operand.vmem [shape: f32[3,192,1], index: 4, kind: input, shape index: {}]   ;;  %s12147_s5 = inlined_call_operand.vmem [shape: f32[2,16,16,1], index: 5, kind: output, shape index: {}]  }
   0x1 LB: > { %s6195_s19 = sadd.s32 4294967295, %s6938_s18   ;;  %p6199_p0 = scmp.ge.s32.totalorder %s6938_s18, 1  ;;  %s6938_s18 = sphi %s6980_s18, %s15_s18  }
   0x2   : > { %p187_p1 = scmp.lt.s32.totalorder %s6938_s18, 3 }
   0x4   : > { %p188_p2 = pnand %p6199_p0, %p187_p1 }
   0x6   : > { %191 = sbr.rel (%p188_p2) target bundleno = 1929 (0x789), region = 40 }
   0xd   : > { %p215_p3 = scmp.lt.s32.totalorder %s6195_s19, 1  ;;  %v6944_v0 = vmov 0   ;;  %vm226_vm0 = vcmask 523264   ;;  %v6945_v45 = vmov 0.0   ;;  %v7253_v58 = vld [vmem:[%s12143_s1 + $0x1] ss:$0 sm:$0xff] }
   0xe   : > { %6645 = vset.pattern.permute.xlu1 %v6944_v0  ;;  %6644 = vset.pattern.permute.xlu0 %v6944_v0  ;;  %230 = vst.msk [vmem:[#allocation2 + $0x18] sm:$0xff] %vm226_vm0, %v6945_v45  ;;  %231 = vst.msk [vmem:[#allocation2 + $0x20] sm:$0xff] %vm226_vm0, %v6945_v45  ;;  %v7258_v59 = vld [vmem:[%s12143_s1 + $0x2] ss:$0 sm:$0xff]  ;;  %v7263_v60 = vld [vmem:[%s12143_s1 + $0x5] ss:$0 sm:$0xff] }
   0xf   : > { %s13166_s19 = smov (!%p215_p3, %s6195_s19), 1  ;;  %232 = vst.msk [vmem:[#allocation2 + $0x28] sm:$0xff] %vm226_vm0, %v6945_v45  ;;  %233 = vst.msk [vmem:[#allocation2 + $0x30] sm:$0xff] %vm226_vm0, %v6945_v45  ;;  %v7269_v62 = vld [vmem:[%s12143_s1] ss:$0 sm:$0xff]  ;;  %vm745_vm1 = vcmask 1046528  }
  0x10   : > { %s6621_s20 = smul.u32 432, %s13166_s19  ;;  %s6486_s21 = sshll.u32 %s13166_s19, 8  ;;  %234 = vst.msk [vmem:[#allocation2 + $0x38] sm:$0xff] %vm226_vm0, %v6945_v45  ;;  %235 = vst.msk [vmem:[#allocation2 + $0x40] sm:$0xff] %vm226_vm0, %v6945_v45  ;;  %vm991_vm2 = vcmask 1045504  }
  0x11   : > { %s6991_s24 = scalar_lea.vmem %s12147_s5, %s6486_s21  ;;  %227 = vst.msk [vmem:[#allocation2] sm:$0xff] %vm226_vm0, %v6945_v45  ;;  %228 = vst.msk [vmem:[#allocation2 + $0x8] sm:$0xff] %vm226_vm0, %v6945_v45  ;;  %s9202_s11 = smov 0  }
  0x12   : > { %s6996_s27 = scalar_lea.vmem %s12142_s0, %s6621_s20  ;;  %229 = vst.msk [vmem:[#allocation2 + $0x10] sm:$0xff] %vm226_vm0, %v6945_v45  ;;  %236 = vst.msk [vmem:[#allocation2 + $0x48] sm:$0xff] %vm226_vm0, %v6945_v45 }
  0x13   : > { %v6999_v1 = vld [vmem:[%s6996_s27 + $0x18] sm:$0xff]  ;;  %v281_v2 = vld [vmem:[%s6996_s27] sm:$0xff]  ;;  %v282_v4 = vld [vmem:[%s6996_s27 + $0x8] sm:$0xff]  ;;  %237 = vst.msk [vmem:[#allocation2 + $0x50] sm:$0xff] %vm226_vm0, %v6945_v45 }
  0x14   : > { %12453 = vst [vmem:[#allocation3_spill] sm:$0xff] %v6999_v1  ;;  %348 = vperm.xlu1 %6645, %v6999_v1   ;;  %338 = vperm.xlu0 %6644, %v281_v2   ;;  %v7004_v3 = vld [vmem:[%s6996_s27 + $0x20] sm:$0xff]  ;;  %v7009_v5 = vld [vmem:[%s6996_s27 + $0x38] sm:$0xff]  ;;  %v7012_v6 = vld [vmem:[%s6996_s27 + $0x30] sm:$0xff] }
  0x15   : > { %12454 = vst [vmem:[#allocation4_spill] sm:$0xff] %v7004_v3  ;;  %12455 = vst [vmem:[#allocation5_spill] sm:$0xff] %v7009_v5  ;;  %v7017_v7 = vld [vmem:[%s6996_s27 + $0x50] sm:$0xff]  ;;  %v7020_v8 = vld [vmem:[%s6996_s27 + $0x48] sm:$0xff] }
  0x16   : > { %12456 = vst [vmem:[#allocation6_spill] sm:$0xff] %v7012_v6  ;;  %12457 = vst [vmem:[#allocation7_spill] sm:$0xff] %v7017_v7  ;;  %v7025_v9 = vld [vmem:[%s6996_s27 + $0x68] sm:$0xff]  ;;  %v7028_v10 = vld [vmem:[%s6996_s27 + $0x60] sm:$0xff] }
  0x17   : > { %12458 = vst [vmem:[#allocation8_spill] sm:$0xff] %v7020_v8  ;;  %12459 = vst [vmem:[#allocation9_spill] sm:$0xff] %v7025_v9  ;;  %v7033_v11 = vld [vmem:[%s6996_s27 + $0x80] sm:$0xff]  ;;  %v7036_v12 = vld [vmem:[%s6996_s27 + $0x78] sm:$0xff] }
  0x18   : > { %353 = vperm.xlu1 %6645, %v7004_v3   ;;  %343 = vperm.xlu0 %6644, %v282_v4   ;;  %12460 = vst [vmem:[#allocation10_spill] sm:$0xff] %v7028_v10  ;;  %12461 = vst [vmem:[#allocation11_spill] sm:$0xff] %v7033_v11  ;;  %v7041_v13 = vld [vmem:[%s6996_s27 + $0x98] sm:$0xff]  ;;  %v7044_v14 = vld [vmem:[%s6996_s27 + $0x90] sm:$0xff] }
  0x19   : > { %12462 = vst [vmem:[#allocation12_spill] sm:$0xff] %v7036_v12  ;;  %12463 = vst [vmem:[#allocation13_spill] sm:$0xff] %v7041_v13  ;;  %v7049_v15 = vld [vmem:[%s6996_s27 + $0xb0] sm:$0xff]  ;;  %v7052_v16 = vld [vmem:[%s6996_s27 + $0xa8] sm:$0xff] }
  0x1a   : > { %12464 = vst [vmem:[#allocation14_spill] sm:$0xff] %v7044_v14  ;;  %12465 = vst [vmem:[#allocation15_spill] sm:$0xff] %v7049_v15  ;;  %v7057_v17 = vld [vmem:[%s6996_s27 + $0xc8] sm:$0xff]  ;;  %v7060_v18 = vld [vmem:[%s6996_s27 + $0xc0] sm:$0xff] }
  0x1b   : > { %12466 = vst [vmem:[#allocation16_spill] sm:$0xff] %v7052_v16  ;;  %12467 = vst [vmem:[#allocation17_spill] sm:$0xff] %v7057_v17  ;;  %v7065_v19 = vld [vmem:[%s6996_s27 + $0xe0] sm:$0xff]  ;;  %v7068_v20 = vld [vmem:[%s6996_s27 + $0xd8] sm:$0xff] }
  0x1c   : > { %363 = vperm.xlu1 %6645, %v7009_v5   ;;  %358 = vperm.xlu0 %6644, %v7012_v6   ;;  %12468 = vst [vmem:[#allocation18_spill] sm:$0xff] %v7060_v18  ;;  %12469 = vst [vmem:[#allocation19_spill] sm:$0xff] %v7065_v19  ;;  %v7073_v21 = vld [vmem:[%s6996_s27 + $0xf8] sm:$0xff]  ;;  %v7076_v22 = vld [vmem:[%s6996_s27 + $0xf0] sm:$0xff] }
  0x1d   : > { %12470 = vst [vmem:[#allocation20_spill] sm:$0xff] %v7068_v20  ;;  %12471 = vst [vmem:[#allocation21_spill] sm:$0xff] %v7073_v21  ;;  %v7081_v23 = vld [vmem:[%s6996_s27 + $0x110] sm:$0xff]  ;;  %v7084_v24 = vld [vmem:[%s6996_s27 + $0x108] sm:$0xff] }
  0x1e   : > { %12472 = vst [vmem:[#allocation22_spill] sm:$0xff] %v7076_v22  ;;  %12473 = vst [vmem:[#allocation23_spill] sm:$0xff] %v7081_v23  ;;  %v7089_v25 = vld [vmem:[%s6996_s27 + $0x128] sm:$0xff]  ;;  %v7092_v26 = vld [vmem:[%s6996_s27 + $0x120] sm:$0xff] }
  0x1f   : > { %12474 = vst [vmem:[#allocation24_spill] sm:$0xff] %v7084_v24  ;;  %12475 = vst [vmem:[#allocation25_spill] sm:$0xff] %v7089_v25  ;;  %v7097_v27 = vld [vmem:[%s6996_s27 + $0x140] sm:$0xff]  ;;  %v7100_v28 = vld [vmem:[%s6996_s27 + $0x138] sm:$0xff] }
  0x20   : > { %373 = vperm.xlu1 %6645, %v7017_v7   ;;  %368 = vperm.xlu0 %6644, %v7020_v8   ;;  %12476 = vst [vmem:[#allocation26_spill] sm:$0xff] %v7092_v26  ;;  %12477 = vst [vmem:[#allocation27_spill] sm:$0xff] %v7097_v27  ;;  %v7105_v29 = vld [vmem:[%s6996_s27 + $0x158] sm:$0xff]  ;;  %v7108_v30 = vld [vmem:[%s6996_s27 + $0x150] sm:$0xff] }
  0x21   : > { %12478 = vst [vmem:[#allocation28_spill] sm:$0xff] %v7100_v28  ;;  %12479 = vst [vmem:[#allocation29_spill] sm:$0xff] %v7105_v29  ;;  %v7113_v31 = vld [vmem:[%s6996_s27 + $0x170] sm:$0xff]  ;;  %v7116_v32 = vld [vmem:[%s6996_s27 + $0x168] sm:$0xff] }
  0x22   : > { %12480 = vst [vmem:[#allocation30_spill] sm:$0xff] %v7108_v30  ;;  %12481 = vst [vmem:[#allocation31_spill] sm:$0xff] %v7113_v31  ;;  %v7121_v33 = vld [vmem:[%s6996_s27 + $0x28] sm:$0xff]  ;;  %v283_v34 = vld [vmem:[%s6996_s27 + $0x10] sm:$0xff] }
  0x23   : > { %12482 = vst [vmem:[#allocation32_spill] sm:$0xff] %v7116_v32  ;;  %12483 = vst [vmem:[#allocation33_spill] sm:$0xff] %v7121_v33  ;;  %v7126_v35 = vld [vmem:[%s6996_s27 + $0x58] sm:$0xff]  ;;  %v7129_v36 = vld [vmem:[%s6996_s27 + $0x40] sm:$0xff] }
  0x24   : > { %383 = vperm.xlu1 %6645, %v7025_v9   ;;  %378 = vperm.xlu0 %6644, %v7028_v10   ;;  %12484 = vst [vmem:[#allocation34_spill] sm:$0xff] %v7126_v35  ;;  %12485 = vst [vmem:[#allocation35_spill] sm:$0xff] %v7129_v36  ;;  %v7134_v37 = vld [vmem:[%s6996_s27 + $0x88] sm:$0xff]  ;;  %v7137_v38 = vld [vmem:[%s6996_s27 + $0x70] sm:$0xff] }
  0x25   : > { %12486 = vst [vmem:[#allocation36_spill] sm:$0xff] %v7134_v37  ;;  %12487 = vst [vmem:[#allocation37_spill] sm:$0xff] %v7137_v38  ;;  %v7142_v39 = vld [vmem:[%s6996_s27 + $0xb8] sm:$0xff]  ;;  %v7145_v40 = vld [vmem:[%s6996_s27 + $0xa0] sm:$0xff] }
  0x26   : > { %12488 = vst [vmem:[#allocation38_spill] sm:$0xff] %v7142_v39  ;;  %12489 = vst [vmem:[#allocation39_spill] sm:$0xff] %v7145_v40  ;;  %v7150_v41 = vld [vmem:[%s6996_s27 + $0xe8] sm:$0xff]  ;;  %v7153_v42 = vld [vmem:[%s6996_s27 + $0xd0] sm:$0xff] }
  0x27   : > { %12490 = vst [vmem:[#allocation40_spill] sm:$0xff] %v7150_v41  ;;  %12491 = vst [vmem:[#allocation41_spill] sm:$0xff] %v7153_v42  ;;  %v7158_v43 = vld [vmem:[%s6996_s27 + $0x118] sm:$0xff]  ;;  %v7161_v44 = vld [vmem:[%s6996_s27 + $0x100] sm:$0xff] }
  0x28   : > { %393 = vperm.xlu1 %6645, %v7033_v11   ;;  %388 = vperm.xlu0 %6644, %v7036_v12   ;;  %12492 = vst [vmem:[#allocation42_spill] sm:$0xff] %v7158_v43  ;;  %12493 = vst [vmem:[#allocation43_spill] sm:$0xff] %v7161_v44  ;;  %v7220_v46 = vld [vmem:[%s6996_s27 + $0x148] sm:$0xff]  ;;  %v7223_v47 = vld [vmem:[%s6996_s27 + $0x130] sm:$0xff] }
  0x29   : > { %238 = vst.msk [vmem:[#allocation2 + $0x58] sm:$0xff] %vm226_vm0, %v6945_v45  ;;  %239 = vst.msk [vmem:[#allocation2 + $0x60] sm:$0xff] %vm226_vm0, %v6945_v45  ;;  %v7228_v48 = vld [vmem:[%s6996_s27 + $0x178] sm:$0xff]  ;;  %v7231_v49 = vld [vmem:[%s6996_s27 + $0x160] sm:$0xff] }
  0x2a   : > { %240 = vst.msk [vmem:[#allocation2 + $0x68] sm:$0xff] %vm226_vm0, %v6945_v45  ;;  %241 = vst.msk [vmem:[#allocation2 + $0x70] sm:$0xff] %vm226_vm0, %v6945_v45  ;;  %v7236_v50 = vld [vmem:[%s6996_s27 + $0x188] sm:$0xff]  ;;  %v7239_v51 = vld [vmem:[%s6996_s27 + $0x180] sm:$0xff] }
  0x2b   : > { %242 = vst.msk [vmem:[#allocation2 + $0x78] sm:$0xff] %vm226_vm0, %v6945_v45  ;;  %243 = vst.msk [vmem:[#allocation2 + $0x80] sm:$0xff] %vm226_vm0, %v6945_v45  ;;  %v332_v52 = vld [vmem:[%s6996_s27 + $0x198] sm:$0xff]  ;;  %v7245_v53 = vld [vmem:[%s6996_s27 + $0x190] sm:$0xff] }
  0x2c   : > { %403 = vperm.xlu1 %6645, %v7041_v13   ;;  %398 = vperm.xlu0 %6644, %v7044_v14   ;;  %244 = vst.msk [vmem:[#allocation2 + $0x88] sm:$0xff] %vm226_vm0, %v6945_v45  ;;  %245 = vst.msk [vmem:[#allocation2 + $0x90] sm:$0xff] %vm226_vm0, %v6945_v45  ;;  %v334_v54 = vld [vmem:[%s6996_s27 + $0x1a8] sm:$0xff]  ;;  %v333_v55 = vld [vmem:[%s6996_s27 + $0x1a0] sm:$0xff] }
  0x2d   : > { %246 = vst.msk [vmem:[#allocation2 + $0x98] sm:$0xff] %vm226_vm0, %v6945_v45  ;;  %247 = vst.msk [vmem:[#allocation2 + $0xa0] sm:$0xff] %vm226_vm0, %v6945_v45  ;;  %v7275_v4 = vld [vmem:[%s12143_s1 + $0x4] ss:$0 sm:$0xff] }
  0x2e   : > { %248 = vst.msk [vmem:[#allocation2 + $0xa8] sm:$0xff] %vm226_vm0, %v6945_v45  ;;  %249 = vst.msk [vmem:[#allocation2 + $0xb0] sm:$0xff] %vm226_vm0, %v6945_v45 }
  0x2f   : > { %250 = vst.msk [vmem:[#allocation2 + $0xb8] sm:$0xff] %vm226_vm0, %v6945_v45  ;;  %251 = vst.msk [vmem:[#allocation2 + $0xc0] sm:$0xff] %vm226_vm0, %v6945_v45 }
  0x30   : > { %413 = vperm.xlu1 %6645, %v7049_v15   ;;  %408 = vperm.xlu0 %6644, %v7052_v16   ;;  %252 = vst.msk [vmem:[#allocation2 + $0xc8] sm:$0xff] %vm226_vm0, %v6945_v45  ;;  %253 = vst.msk [vmem:[#allocation2 + $0xd0] sm:$0xff] %vm226_vm0, %v6945_v45 }
  0x31   : > { %254 = vst.msk [vmem:[#allocation2 + $0xd8] sm:$0xff] %vm226_vm0, %v6945_v45  ;;  %255 = vst.msk [vmem:[#allocation2 + $0xe0] sm:$0xff] %vm226_vm0, %v6945_v45 }
  0x32   : > { %256 = vst.msk [vmem:[#allocation2 + $0xe8] sm:$0xff] %vm226_vm0, %v6945_v45  ;;  %257 = vst.msk [vmem:[#allocation2 + $0xf0] sm:$0xff] %vm226_vm0, %v6945_v45 }
  0x33   : > { %258 = vst.msk [vmem:[#allocation2 + $0xf8] sm:$0xff] %vm226_vm0, %v6945_v45  ;;  %259 = vst.msk [vmem:[#allocation2 + $0x100] sm:$0xff] %vm226_vm0, %v6945_v45 }
  0x34   : > { %423 = vperm.xlu1 %6645, %v7057_v17   ;;  %418 = vperm.xlu0 %6644, %v7060_v18   ;;  %260 = vst.msk [vmem:[#allocation2 + $0x108] sm:$0xff] %vm226_vm0, %v6945_v45  ;;  %261 = vst.msk [vmem:[#allocation2 + $0x110] sm:$0xff] %vm226_vm0, %v6945_v45 }
  0x35   : > { %262 = vst.msk [vmem:[#allocation2 + $0x118] sm:$0xff] %vm226_vm0, %v6945_v45  ;;  %263 = vst.msk [vmem:[#allocation2 + $0x120] sm:$0xff] %vm226_vm0, %v6945_v45 }
  0x36   : > { %264 = vst.msk [vmem:[#allocation2 + $0x128] sm:$0xff] %vm226_vm0, %v6945_v45  ;;  %265 = vst.msk [vmem:[#allocation2 + $0x130] sm:$0xff] %vm226_vm0, %v6945_v45 }
  0x37   : > { %266 = vst.msk [vmem:[#allocation2 + $0x138] sm:$0xff] %vm226_vm0, %v6945_v45  ;;  %267 = vst.msk [vmem:[#allocation2 + $0x140] sm:$0xff] %vm226_vm0, %v6945_v45 }
  0x38   : > { %433 = vperm.xlu1 %6645, %v7065_v19   ;;  %428 = vperm.xlu0 %6644, %v7068_v20   ;;  %268 = vst.msk [vmem:[#allocation2 + $0x148] sm:$0xff] %vm226_vm0, %v6945_v45  ;;  %269 = vst.msk [vmem:[#allocation2 + $0x150] sm:$0xff] %vm226_vm0, %v6945_v45 }
  0x39   : > { %270 = vst.msk [vmem:[#allocation2 + $0x158] sm:$0xff] %vm226_vm0, %v6945_v45  ;;  %271 = vst.msk [vmem:[#allocation2 + $0x160] sm:$0xff] %vm226_vm0, %v6945_v45 }
  0x3a   : > { %272 = vst.msk [vmem:[#allocation2 + $0x168] sm:$0xff] %vm226_vm0, %v6945_v45  ;;  %273 = vst.msk [vmem:[#allocation2 + $0x170] sm:$0xff] %vm226_vm0, %v6945_v45 }
  0x3b   : > { %274 = vst.msk [vmem:[#allocation2 + $0x178] sm:$0xff] %vm226_vm0, %v6945_v45  ;;  %275 = vst.msk [vmem:[#allocation2 + $0x180] sm:$0xff] %vm226_vm0, %v6945_v45 }
  0x3c   : > { %443 = vperm.xlu1 %6645, %v7073_v21   ;;  %438 = vperm.xlu0 %6644, %v7076_v22   ;;  %276 = vst.msk [vmem:[#allocation2 + $0x188] sm:$0xff] %vm226_vm0, %v6945_v45  ;;  %277 = vst.msk [vmem:[#allocation2 + $0x190] sm:$0xff] %vm226_vm0, %v6945_v45 }
  0x3d   : > { %278 = vst.msk [vmem:[#allocation2 + $0x198] sm:$0xff] %vm226_vm0, %v6945_v45  ;;  %279 = vst.msk [vmem:[#allocation2 + $0x1a0] sm:$0xff] %vm226_vm0, %v6945_v45 }
  0x3e   : > { %280 = vst.msk [vmem:[#allocation2 + $0x1a8] sm:$0xff] %vm226_vm0, %v6945_v45  ;;  %12494 = vst [vmem:[#allocation44_spill] sm:$0xff] %v7220_v46 }
  0x3f   : > { %12495 = vst [vmem:[#allocation45_spill] sm:$0xff] %v7223_v47  ;;  %12496 = vst [vmem:[#allocation46_spill] sm:$0xff] %v7228_v48 }
  0x40   : > { %453 = vperm.xlu1 %6645, %v7081_v23   ;;  %448 = vperm.xlu0 %6644, %v7084_v24   ;;  %12497 = vst [vmem:[#allocation47_spill] sm:$0xff] %v7231_v49  ;;  %12498 = vst [vmem:[#allocation48_spill] sm:$0xff] %v7236_v50 }
  0x41   : > { %12499 = vst [vmem:[#allocation49_spill] sm:$0xff] %v7239_v51  ;;  %12500 = vst [vmem:[#allocation50_spill] sm:$0xff] %v7245_v53 }
  0x42   : > { %12501 = vst [vmem:[#allocation51_spill] sm:$0xff] %v7275_v4 }
  0x44   : > { %463 = vperm.xlu1 %6645, %v7089_v25   ;;  %458 = vperm.xlu0 %6644, %v7092_v26  }
  0x48   : > { %473 = vperm.xlu1 %6645, %v7097_v27   ;;  %468 = vperm.xlu0 %6644, %v7100_v28  }
  0x4c   : > { %483 = vperm.xlu1 %6645, %v7105_v29   ;;  %478 = vperm.xlu0 %6644, %v7108_v30  }
  0x50   : > { %493 = vperm.xlu1 %6645, %v7113_v31   ;;  %488 = vperm.xlu0 %6644, %v7116_v32  }
  0x54   : > { %572 = vperm.xlu1 %6645, %v7121_v33   ;;  %567 = vperm.xlu0 %6644, %v283_v34   ;;  %v7280_v34 = vld [vmem:[%s12143_s1 + $0x6] ss:$0 sm:$0xff] }
  0x58   : > { %582 = vperm.xlu1 %6645, %v7126_v35   ;;  %577 = vperm.xlu0 %6644, %v7129_v36  }
  0x5c   : > { %592 = vperm.xlu1 %6645, %v7134_v37   ;;  %587 = vperm.xlu0 %6644, %v7137_v38  }
  0x60   : > { %602 = vperm.xlu1 %6645, %v7142_v39   ;;  %597 = vperm.xlu0 %6644, %v7145_v40  }
  0x64   : > { %612 = vperm.xlu1 %6645, %v7150_v41   ;;  %607 = vperm.xlu0 %6644, %v7153_v42  }
  0x68   : > { %622 = vperm.xlu1 %6645, %v7158_v43   ;;  %617 = vperm.xlu0 %6644, %v7161_v44  }
  0x6c   : > { %632 = vperm.xlu1 %6645, %v7220_v46   ;;  %627 = vperm.xlu0 %6644, %v7223_v47  }
  0x70   : > { %642 = vperm.xlu1 %6645, %v7228_v48   ;;  %637 = vperm.xlu0 %6644, %v7231_v49  }
  0x74   : > { %1145 = vperm.xlu1 %6645, %v7236_v50   ;;  %1140 = vperm.xlu0 %6644, %v7239_v51  }
  0x78   : > { %1715 = vperm.xlu1 %6645, %v332_v52   ;;  %1219 = vperm.xlu0 %6644, %v7245_v53  }
  0x7c   : > { %1794 = vperm.xlu1 %6645, %v334_v54   ;;  %1720 = vperm.xlu0 %6644, %v333_v55  }
  0x93   : > { %v349_v56 = vpop.permute.xlu1 %348  ;;  %v339_v57 = vpop.permute.xlu0 %338 }
  0x94   : > { %v652_v61 = vmul.f32 %v7253_v58, %v349_v56  ;;  %v649_v63 = vmul.f32 %v7253_v58, %v339_v57  ;;  %v502_v45 = vmul.f32 %v7269_v62, %v349_v56  ;;  %v898_v52 = vmul.f32 %v7258_v59, %v349_v56 }
  0x95   : > { %v1226_v53 = vmul.f32 %v7263_v60, %v349_v56  ;;  %v895_v50 = vmul.f32 %v7258_v59, %v339_v57  ;;  %v1152_v30 = vmul.f32 %v7275_v4, %v349_v56  ;;  %v1471_v46 = vmul.f32 %v7280_v34, %v349_v56 }
  0x96   : > { %v751_v31 = vrot.slane %v652_v61, 1  ;;  %v746_v27 = vrot.slane %v649_v63, 1  ;;  %v500_v61 = vmul.f32 %v7269_v62, %v339_v57  ;;  %v997_v21 = vrot.slane %v898_v52, 2  ;;  %v7344_v52 = vld [vmem:[%s12143_s1 + $0x9] ss:$0 sm:$0xff] }
  0x97   : > { %v354_v0 = vpop.permute.xlu1 %353  ;;  %v344_v2 = vpop.permute.xlu0 %343  ;;  %v992_v24 = vrot.slane %v895_v50, 2  ;;  %v1322_v22 = vrot.slane %v1226_v53, 1  ;;  %v1567_v19 = vrot.slane %v1471_v46, 2 }
  0x98   : > { %v7285_v54 = vmul.f32 %v7253_v58, %v354_v0  ;;  %v7288_v55 = vmul.f32 %v7258_v59, %v354_v0  ;;  %v7293_v51 = vmul.f32 %v7263_v60, %v354_v0  ;;  %v7296_v48 = vmul.f32 %v7253_v58, %v344_v2 }
  0x99   : > { %v7300_v49 = vmul.f32 %v7280_v34, %v354_v0  ;;  %v7303_v29 = vmul.f32 %v7258_v59, %v344_v2  ;;  %v7339_v53 = vmul.f32 %v7269_v62, %v344_v2 }
  0x9a   : > { %v12171_v32 = vrot.slane %v7285_v54, 1  ;;  %v12176_v28 = vrot.slane %v7296_v48, 1  ;;  %v12174_v43 = vrot.slane %v7288_v55, 2  ;;  %v12173_v56 = vrot.slane %v7293_v51, 1 }
  0x9b   : > { %v7308_v47 = vpop.permute.xlu1 %363  ;;  %v359_v25 = vpop.permute.xlu0 %358  ;;  %v12172_v23 = vrot.slane %v7303_v29, 2  ;;  %v12175_v57 = vrot.slane %v7300_v49, 2 }
  0x9c   : > { %v753_v26 = vsel %vm745_vm1, %v751_v31, %v12171_v32  ;;  %v748_v63 = vsel %vm745_vm1, %v746_v27, %v12176_v28  ;;  %v7325_v32 = vmul.f32 %v7253_v58, %v359_v25  ;;  %v7333_v27 = vmul.f32 %v7269_v62, %v354_v0 }
  0x9d   : > { %v860_v44 = vadd.f32 %v753_v26, %v502_v45  ;;  %v858_v41 = vadd.f32 %v748_v63, %v500_v61  ;;  %v994_v31 = vsel %vm991_vm2, %v992_v24, %v12172_v23  ;;  %v7328_v26 = vmul.f32 %v7258_v59, %v359_v25  ;;  %v7352_v23 = vld [vmem:[%s12143_s1 + $0xa] ss:$0 sm:$0xff] }
  0x9e   : > { %v999_v46 = vsel %vm991_vm2, %v997_v21, %v12174_v43  ;;  %v1324_v63 = vsel %vm745_vm1, %v1322_v22, %v12173_v56  ;;  %v7355_v21 = vmul.f32 %v7269_v62, %v359_v25  ;;  %v1569_v2 = vsel %vm991_vm2, %v1567_v19, %v12175_v57  ;;  %v7366_v22 = vld [vmem:[%s12143_s1 + $0x8] ss:$0 sm:$0xff] }
  0x9f   : > { %v7330_v50 = vpop.permute.xlu1 %373  ;;  %v369_v45 = vpop.permute.xlu0 %368  ;;  %v1104_v24 = vadd.f32 %v994_v31, %v858_v41  ;;  %v1106_v61 = vadd.f32 %v999_v46, %v860_v44  ;;  %v7358_v41 = vmul.f32 %v7275_v4, %v354_v0  ;;  %v7369_v31 = vmul.f32 %v7263_v60, %v359_v25 }
  0xa0   : > { %v7372_v46 = vmul.f32 %v7280_v34, %v359_v25  ;;  %v1154_v43 = vmul.f32 %v7275_v4, %v359_v25  ;;  %v7378_v19 = vmul.f32 %v7344_v52, %v359_v25  ;;  %v7383_v28 = vmul.f32 %v7352_v23, %v359_v25 }
  0xa1   : > { %v1184_v44 = vadd.f32 %v1152_v30, %v1104_v24  ;;  %v7386_v20 = vmul.f32 %v7253_v58, %v369_v45  ;;  %v7389_v42 = vmul.f32 %v7258_v59, %v369_v45  ;;  %v1727_v0 = vmul.f32 %v7366_v22, %v359_v25 }
  0xa2   : > { %v7391_v56 = vadd.f32 %v1154_v43, %v1106_v61  ;;  %v7395_v17 = vmul.f32 %v7263_v60, %v369_v45  ;;  %v7398_v18 = vmul.f32 %v7280_v34, %v369_v45  ;;  %v7403_v39 = vmul.f32 %v7269_v62, %v369_v45 }
  0xa3   : > { %v7380_v30 = vpop.permute.xlu1 %383  ;;  %v379_v24 = vpop.permute.xlu0 %378  ;;  %v1434_v57 = vadd.f32 %v1324_v63, %v1184_v44  ;;  %v7406_v15 = vmul.f32 %v7344_v52, %v369_v45  ;;  %v7410_v25 = vmul.f32 %v7275_v4, %v369_v45  ;;  %v7413_v16 = vmul.f32 %v7352_v23, %v369_v45 }
  0xa4   : > { %12502 = vst [vmem:[#allocation52_spill] sm:$0xff] %v7380_v30  ;;  %v7421_v37 = vmul.f32 %v7253_v58, %v379_v24  ;;  %v7426_v61 = vmul.f32 %v7366_v22, %v369_v45  ;;  %v7429_v11 = vmul.f32 %v7258_v59, %v379_v24  ;;  %v7433_v44 = vmul.f32 %v7269_v62, %v379_v24 }
  0xa5   : > { %v1679_v43 = vadd.f32 %v1569_v2, %v1434_v57  ;;  %v7436_v14 = vmul.f32 %v7263_v60, %v379_v24  ;;  %v7439_v13 = vmul.f32 %v7280_v34, %v379_v24  ;;  %v7445_v45 = vmul.f32 %v7275_v4, %v379_v24 }
  0xa6   : > { %12503 = vst [vmem:[#allocation53_spill] sm:$0xff] %v7421_v37  ;;  %12504 = vst [vmem:[#allocation54_spill] sm:$0xff] %v7429_v11  ;;  %v7448_v38 = vmul.f32 %v7344_v52, %v379_v24  ;;  %v7454_v35 = vmul.f32 %v7352_v23, %v379_v24  ;;  %v7464_v2 = vmul.f32 %v7366_v22, %v379_v24 }
  0xa7   : > { %v7415_v40 = vpop.permute.xlu1 %393  ;;  %v389_v63 = vpop.permute.xlu0 %388  ;;  %12505 = vst [vmem:[#allocation55_spill] sm:$0xff] %v7433_v44  ;;  %12506 = vst [vmem:[#allocation56_spill] sm:$0xff] %v7436_v14  ;;  %v7441_v57 = vadd.f32 %v1727_v0, %v1679_v43 }
  0xa8   : > { %12507 = vst [vmem:[#allocation57_spill] sm:$0xff] %v7439_v13  ;;  %12508 = vst [vmem:[#allocation58_spill] sm:$0xff] %v7448_v38  ;;  %v7457_v7 = vmul.f32 %v7253_v58, %v389_v63  ;;  %v7460_v0 = vmul.f32 %v7258_v59, %v389_v63  ;;  %v7467_v8 = vmul.f32 %v7263_v60, %v389_v63 }
  0xa9   : > { %12510 = vst [vmem:[#allocation60_spill] sm:$0xff] %v7454_v35  ;;  %v7470_v36 = vmul.f32 %v7280_v34, %v389_v63  ;;  %v7475_v6 = vmul.f32 %v7269_v62, %v389_v63  ;;  %v7478_v33 = vmul.f32 %v7344_v52, %v389_v63  ;;  %v7482_v24 = vmul.f32 %v7275_v4, %v389_v63 }
  0xaa   : > { %12511 = vst [vmem:[#allocation61_spill] sm:$0xff] %v7457_v7  ;;  %12512 = vst [vmem:[#allocation62_spill] sm:$0xff] %v7460_v0  ;;  %v7485_v3 = vmul.f32 %v7352_v23, %v389_v63  ;;  %v7496_v43 = vmul.f32 %v7366_v22, %v389_v63  ;;  %v12613_v0 = vrot.slane %v7285_v54, 1  ;;  %v7848_v7 = vmul.f32 %v7263_v60, %v7330_v50 }
  0xab   : > { %v7450_v12 = vpop.permute.xlu1 %403  ;;  %v399_v9 = vpop.permute.xlu0 %398  ;;  %12513 = vst [vmem:[#allocation63_spill] sm:$0xff] %v7467_v8  ;;  %12514 = vst [vmem:[#allocation64_spill] sm:$0xff] %v7470_v36  ;;  %v7860_v54 = vmul.f32 %v7344_v52, %v7330_v50 }
  0xac   : > { %12509 = vst [vmem:[#allocation59_spill] sm:$0xff] %v7450_v12  ;;  %12515 = vst [vmem:[#allocation65_spill] sm:$0xff] %v7475_v6  ;;  %v7488_v1 = vmul.f32 %v7253_v58, %v399_v9  ;;  %v7501_v11 = vmul.f32 %v7258_v59, %v399_v9  ;;  %v7504_v44 = vmul.f32 %v7263_v60, %v399_v9 }
  0xad   : > { %12516 = vst [vmem:[#allocation66_spill] sm:$0xff] %v7478_v33  ;;  %12517 = vst [vmem:[#allocation67_spill] sm:$0xff] %v7482_v24  ;;  %v7508_v12 = vmul.f32 %v7269_v62, %v399_v9  ;;  %v7511_v14 = vmul.f32 %v7280_v34, %v399_v9  ;;  %v7514_v63 = vmul.f32 %v7344_v52, %v399_v9 }
  0xae   : > { %12518 = vst [vmem:[#allocation68_spill] sm:$0xff] %v7485_v3  ;;  %12519 = vst [vmem:[#allocation69_spill] sm:$0xff] %v7488_v1  ;;  %v7519_v13 = vmul.f32 %v7275_v4, %v399_v9  ;;  %v7522_v35 = vmul.f32 %v7352_v23, %v399_v9 }
  0xaf   : > { %v7490_v10 = vpop.permute.xlu1 %413  ;;  %v409_v5 = vpop.permute.xlu0 %408  ;;  %12521 = vst [vmem:[#allocation71_spill] sm:$0xff] %v7496_v43  ;;  %12522 = vst [vmem:[#allocation72_spill] sm:$0xff] %v7501_v11 }
  0xb0   : > { %12520 = vst [vmem:[#allocation70_spill] sm:$0xff] %v7490_v10  ;;  %12523 = vst [vmem:[#allocation73_spill] sm:$0xff] %v7504_v44  ;;  %v7530_v37 = vmul.f32 %v7253_v58, %v409_v5  ;;  %v7533_v33 = vmul.f32 %v7258_v59, %v409_v5  ;;  %v7536_v24 = vmul.f32 %v7263_v60, %v409_v5 }
  0xb1   : > { %12524 = vst [vmem:[#allocation74_spill] sm:$0xff] %v7508_v12  ;;  %12525 = vst [vmem:[#allocation75_spill] sm:$0xff] %v7511_v14  ;;  %v7527_v12 = vmul.f32 %v7366_v22, %v399_v9  ;;  %v7541_v3 = vmul.f32 %v7269_v62, %v409_v5  ;;  %v7549_v30 = vmul.f32 %v7344_v52, %v409_v5 }
  0xb2   : > { %12526 = vst [vmem:[#allocation76_spill] sm:$0xff] %v7514_v63  ;;  %12527 = vst [vmem:[#allocation77_spill] sm:$0xff] %v7519_v13  ;;  %v7552_v36 = vmul.f32 %v7352_v23, %v409_v5  ;;  %v7556_v1 = vmul.f32 %v7275_v4, %v409_v5  ;;  %v7570_v38 = vmul.f32 %v7366_v22, %v409_v5 }
  0xb3   : > { %12528 = vst [vmem:[#allocation78_spill] sm:$0xff] %v7522_v35  ;;  %v7524_v10 = vpop.permute.xlu1 %423  ;;  %v419_v43 = vpop.permute.xlu0 %418  ;;  %12530 = vst [vmem:[#allocation80_spill] sm:$0xff] %v7527_v12 }
  0xb4   : > { %12529 = vst [vmem:[#allocation79_spill] sm:$0xff] %v7524_v10  ;;  %12531 = vst [vmem:[#allocation81_spill] sm:$0xff] %v7530_v37  ;;  %v7544_v10 = vmul.f32 %v7280_v34, %v409_v5  ;;  %v7559_v44 = vmul.f32 %v7253_v58, %v419_v43  ;;  %v7562_v11 = vmul.f32 %v7258_v59, %v419_v43 }
  0xb5   : > { %12532 = vst [vmem:[#allocation82_spill] sm:$0xff] %v7533_v33  ;;  %12533 = vst [vmem:[#allocation83_spill] sm:$0xff] %v7536_v24  ;;  %v7577_v8 = vmul.f32 %v7263_v60, %v419_v43  ;;  %v7588_v5 = vmul.f32 %v7344_v52, %v419_v43  ;;  %v7601_v14 = vmul.f32 %v7366_v22, %v419_v43 }
  0xb6   : > { %12534 = vst [vmem:[#allocation84_spill] sm:$0xff] %v7541_v3  ;;  %12535 = vst [vmem:[#allocation85_spill] sm:$0xff] %v7544_v10  ;;  %v7585_v3 = vmul.f32 %v7275_v4, %v419_v43 }
  0xb7   : > { %12536 = vst [vmem:[#allocation86_spill] sm:$0xff] %v7549_v30  ;;  %12537 = vst [vmem:[#allocation87_spill] sm:$0xff] %v7552_v36  ;;  %v7564_v9 = vpop.permute.xlu1 %433  ;;  %v429_v12 = vpop.permute.xlu0 %428 }
  0xb8   : > { %12538 = vst [vmem:[#allocation88_spill] sm:$0xff] %v7556_v1  ;;  %12539 = vst [vmem:[#allocation89_spill] sm:$0xff] %v7559_v44  ;;  %v7574_v1 = vmul.f32 %v7269_v62, %v419_v43  ;;  %v7596_v10 = vmul.f32 %v7253_v58, %v429_v12  ;;  %v7604_v36 = vmul.f32 %v7258_v59, %v429_v12 }
  0xb9   : > { %12540 = vst [vmem:[#allocation90_spill] sm:$0xff] %v7562_v11  ;;  %12541 = vst [vmem:[#allocation91_spill] sm:$0xff] %v7564_v9  ;;  %v7580_v9 = vmul.f32 %v7280_v34, %v419_v43  ;;  %v7607_v30 = vmul.f32 %v7263_v60, %v429_v12  ;;  %v7615_v44 = vmul.f32 %v7269_v62, %v429_v12 }
  0xba   : > { %12542 = vst [vmem:[#allocation92_spill] sm:$0xff] %v7570_v38  ;;  %12543 = vst [vmem:[#allocation93_spill] sm:$0xff] %v7574_v1  ;;  %v7593_v38 = vmul.f32 %v7352_v23, %v419_v43  ;;  %v7610_v1 = vmul.f32 %v7280_v34, %v429_v12 }
  0xbb   : > { %12544 = vst [vmem:[#allocation94_spill] sm:$0xff] %v7577_v8  ;;  %12545 = vst [vmem:[#allocation95_spill] sm:$0xff] %v7580_v9  ;;  %v7598_v24 = vpop.permute.xlu1 %443  ;;  %v439_v63 = vpop.permute.xlu0 %438  ;;  %v7633_v9 = vmul.f32 %v7366_v22, %v429_v12 }
  0xbc   : > { %12546 = vst [vmem:[#allocation96_spill] sm:$0xff] %v7585_v3  ;;  %12547 = vst [vmem:[#allocation97_spill] sm:$0xff] %v7588_v5  ;;  %v7625_v3 = vmul.f32 %v7352_v23, %v429_v12  ;;  %v7628_v33 = vmul.f32 %v7253_v58, %v439_v63  ;;  %v7636_v8 = vmul.f32 %v7258_v59, %v439_v63 }
  0xbd   : > { %12548 = vst [vmem:[#allocation98_spill] sm:$0xff] %v7593_v38  ;;  %12549 = vst [vmem:[#allocation99_spill] sm:$0xff] %v7596_v10  ;;  %v7644_v13 = vmul.f32 %v7263_v60, %v439_v63  ;;  %v7651_v11 = vmul.f32 %v7280_v34, %v439_v63  ;;  %v7659_v37 = vmul.f32 %v7275_v4, %v439_v63 }
  0xbe   : > { %12550 = vst [vmem:[#allocation100_spill] sm:$0xff] %v7598_v24  ;;  %12551 = vst [vmem:[#allocation101_spill] sm:$0xff] %v7601_v14  ;;  %v7618_v24 = vmul.f32 %v7344_v52, %v429_v12  ;;  %v7622_v14 = vmul.f32 %v7275_v4, %v429_v12  ;;  %v7648_v12 = vmul.f32 %v7269_v62, %v439_v63 }
  0xbf   : > { %12552 = vst [vmem:[#allocation102_spill] sm:$0xff] %v7604_v36  ;;  %12553 = vst [vmem:[#allocation103_spill] sm:$0xff] %v7607_v30  ;;  %v7638_v43 = vpop.permute.xlu1 %453  ;;  %v449_v5 = vpop.permute.xlu0 %448  ;;  %v7662_v38 = vmul.f32 %v7352_v23, %v439_v63 }
  0xc0   : > { %12554 = vst [vmem:[#allocation104_spill] sm:$0xff] %v7610_v1  ;;  %12555 = vst [vmem:[#allocation105_spill] sm:$0xff] %v7615_v44  ;;  %v7681_v1 = vmul.f32 %v7263_v60, %v449_v5 }
  0xc1   : > { %12556 = vst [vmem:[#allocation106_spill] sm:$0xff] %v7618_v24  ;;  %12557 = vst [vmem:[#allocation107_spill] sm:$0xff] %v7622_v14  ;;  %v7672_v24 = vmul.f32 %v7258_v59, %v449_v5 }
  0xc2   : > { %12558 = vst [vmem:[#allocation108_spill] sm:$0xff] %v7625_v3  ;;  %12559 = vst [vmem:[#allocation109_spill] sm:$0xff] %v7628_v33  ;;  %v7678_v3 = vmul.f32 %v7269_v62, %v449_v5 }
  0xc3   : > { %12560 = vst [vmem:[#allocation110_spill] sm:$0xff] %v7633_v9  ;;  %12561 = vst [vmem:[#allocation111_spill] sm:$0xff] %v7636_v8  ;;  %v7669_v9 = vmul.f32 %v7253_v58, %v449_v5  ;;  %v7674_v14 = vpop.permute.xlu1 %463  ;;  %v459_v44 = vpop.permute.xlu0 %458 }
  0xc4   : > { %12562 = vst [vmem:[#allocation112_spill] sm:$0xff] %v7638_v43  ;;  %12563 = vst [vmem:[#allocation113_spill] sm:$0xff] %v7644_v13  ;;  %v7654_v43 = vmul.f32 %v7344_v52, %v439_v63  ;;  %v7696_v13 = vmul.f32 %v7275_v4, %v449_v5  ;;  %v7702_v30 = vmul.f32 %v7258_v59, %v459_v44 }
  0xc5   : > { %12564 = vst [vmem:[#allocation114_spill] sm:$0xff] %v7648_v12  ;;  %12565 = vst [vmem:[#allocation115_spill] sm:$0xff] %v7651_v11  ;;  %v7666_v12 = vmul.f32 %v7366_v22, %v439_v63  ;;  %v7684_v63 = vmul.f32 %v7280_v34, %v449_v5  ;;  %v7710_v11 = vmul.f32 %v7263_v60, %v459_v44 }
  0xc6   : > { %12566 = vst [vmem:[#allocation116_spill] sm:$0xff] %v7654_v43  ;;  %12567 = vst [vmem:[#allocation117_spill] sm:$0xff] %v7659_v37  ;;  %v7707_v43 = vmul.f32 %v7366_v22, %v449_v5  ;;  %v7717_v36 = vmul.f32 %v7269_v62, %v459_v44  ;;  %v7720_v35 = vmul.f32 %v7280_v34, %v459_v44 }
  0xc7   : > { %12568 = vst [vmem:[#allocation118_spill] sm:$0xff] %v7662_v38  ;;  %12569 = vst [vmem:[#allocation119_spill] sm:$0xff] %v7666_v12  ;;  %v7689_v12 = vmul.f32 %v7344_v52, %v449_v5  ;;  %v7712_v33 = vpop.permute.xlu1 %473  ;;  %v469_v38 = vpop.permute.xlu0 %468 }
  0xc8   : > { %12570 = vst [vmem:[#allocation120_spill] sm:$0xff] %v7669_v9  ;;  %12571 = vst [vmem:[#allocation121_spill] sm:$0xff] %v7672_v24 }
  0xc9   : > { %12572 = vst [vmem:[#allocation122_spill] sm:$0xff] %v7674_v14  ;;  %12573 = vst [vmem:[#allocation123_spill] sm:$0xff] %v7678_v3  ;;  %v7692_v14 = vmul.f32 %v7352_v23, %v449_v5  ;;  %v7699_v3 = vmul.f32 %v7253_v58, %v459_v44  ;;  %v7740_v5 = vmul.f32 %v7366_v22, %v459_v44 }
  0xca   : > { %12574 = vst [vmem:[#allocation124_spill] sm:$0xff] %v7681_v1  ;;  %12575 = vst [vmem:[#allocation125_spill] sm:$0xff] %v7684_v63  ;;  %v7733_v63 = vmul.f32 %v7352_v23, %v459_v44  ;;  %v7755_v1 = vmul.f32 %v7280_v34, %v469_v38 }
  0xcb   : > { %12576 = vst [vmem:[#allocation126_spill] sm:$0xff] %v7689_v12  ;;  %12577 = vst [vmem:[#allocation127_spill] sm:$0xff] %v7692_v14  ;;  %v7743_v14 = vmul.f32 %v7258_v59, %v469_v38  ;;  %v7746_v12 = vmul.f32 %v7263_v60, %v469_v38  ;;  %v479_v37 = vpop.permute.xlu0 %478 }
  0xcc   : > { %12578 = vst [vmem:[#allocation128_spill] sm:$0xff] %v7696_v13  ;;  %12579 = vst [vmem:[#allocation129_spill] sm:$0xff] %v7699_v3  ;;  %v7748_v13 = vpop.permute.xlu1 %483  ;;  %v7752_v3 = vmul.f32 %v7269_v62, %v469_v38  ;;  %v7784_v24 = vmul.f32 %v7280_v34, %v479_v37  ;;  %v7796_v8 = vmul.f32 %v7344_v52, %v479_v37 }
  0xcd   : > { %12580 = vst [vmem:[#allocation130_spill] sm:$0xff] %v7702_v30  ;;  %12581 = vst [vmem:[#allocation131_spill] sm:$0xff] %v7707_v43  ;;  %v7725_v43 = vmul.f32 %v7275_v4, %v459_v44 }
  0xce   : > { %12582 = vst [vmem:[#allocation132_spill] sm:$0xff] %v7710_v11  ;;  %12583 = vst [vmem:[#allocation133_spill] sm:$0xff] %v7712_v33  ;;  %v7728_v33 = vmul.f32 %v7344_v52, %v459_v44  ;;  %v7758_v44 = vmul.f32 %v7344_v52, %v469_v38  ;;  %v7762_v11 = vmul.f32 %v7275_v4, %v469_v38 }
  0xcf   : > { %12584 = vst [vmem:[#allocation134_spill] sm:$0xff] %v7717_v36  ;;  %12585 = vst [vmem:[#allocation135_spill] sm:$0xff] %v7720_v35  ;;  %v7736_v36 = vmul.f32 %v7253_v58, %v469_v38  ;;  %v7788_v30 = vpop.permute.xlu0 %488  ;;  %v7808_v35 = vmul.f32 %v7366_v22, %v479_v37 }
  0xd0   : > { %12586 = vst [vmem:[#allocation136_spill] sm:$0xff] %v7725_v43  ;;  %12587 = vst [vmem:[#allocation137_spill] sm:$0xff] %v7728_v33  ;;  %v7776_v43 = vmul.f32 %v7258_v59, %v479_v37  ;;  %v7786_v9 = vpop.permute.xlu1 %493  ;;  %v905_v33 = vmul.f32 %v7258_v59, %v7330_v50 }
  0xd1   : > { %12588 = vst [vmem:[#allocation138_spill] sm:$0xff] %v7733_v63  ;;  %12589 = vst [vmem:[#allocation139_spill] sm:$0xff] %v7736_v36  ;;  %v7793_v63 = vmul.f32 %v7269_v62, %v479_v37 }
  0xd2   : > { %12590 = vst [vmem:[#allocation140_spill] sm:$0xff] %v7740_v5  ;;  %12591 = vst [vmem:[#allocation141_spill] sm:$0xff] %v7743_v14  ;;  %v7765_v5 = vmul.f32 %v7352_v23, %v469_v38 }
  0xd3   : > { %12592 = vst [vmem:[#allocation142_spill] sm:$0xff] %v7746_v12  ;;  %12593 = vst [vmem:[#allocation143_spill] sm:$0xff] %v7748_v13  ;;  %v7768_v13 = vmul.f32 %v7253_v58, %v479_v37  ;;  %v7801_v12 = vmul.f32 %v7275_v4, %v479_v37 }
  0xd4   : > { %12594 = vst [vmem:[#allocation144_spill] sm:$0xff] %v7752_v3  ;;  %12595 = vst [vmem:[#allocation145_spill] sm:$0xff] %v7755_v1  ;;  %v7773_v3 = vmul.f32 %v7366_v22, %v469_v38  ;;  %v7822_v38 = vmul.f32 %v7344_v52, %v7788_v30 }
  0xd5   : > { %12596 = vst [vmem:[#allocation146_spill] sm:$0xff] %v7758_v44  ;;  %12597 = vst [vmem:[#allocation147_spill] sm:$0xff] %v7762_v11  ;;  %v7781_v11 = vmul.f32 %v7263_v60, %v479_v37  ;;  %v659_v44 = vmul.f32 %v7253_v58, %v7330_v50 }
  0xd6   : > { %12598 = vst [vmem:[#allocation148_spill] sm:$0xff] %v7765_v5  ;;  %12599 = vst [vmem:[#allocation149_spill] sm:$0xff] %v7768_v13  ;;  %v7818_v13 = vmul.f32 %v7366_v22, %v7788_v30 }
  0xd7   : > { %12600 = vst [vmem:[#allocation150_spill] sm:$0xff] %v7773_v3  ;;  %12601 = vst [vmem:[#allocation151_spill] sm:$0xff] %v7776_v43  ;;  %v568_v43 = vpop.permute.xlu0 %567  ;;  %v762_v14 = vrot.slane %v659_v44, 1  ;;  %v12614_v44 = vrot.slane %v7296_v48, 1 }
  0xd8   : > { %12602 = vst [vmem:[#allocation152_spill] sm:$0xff] %v7781_v11  ;;  %12603 = vst [vmem:[#allocation153_spill] sm:$0xff] %v7784_v24  ;;  %v651_v24 = vmul.f32 %v7253_v58, %v568_v43  ;;  %v897_v11 = vmul.f32 %v7258_v59, %v568_v43 }
  0xd9   : > { %12604 = vst [vmem:[#allocation154_spill] sm:$0xff] %v7786_v9  ;;  %12605 = vst [vmem:[#allocation155_spill] sm:$0xff] %v7788_v30  ;;  %v7804_v9 = vmul.f32 %v7352_v23, %v479_v37  ;;  %v573_v37 = vpop.permute.xlu1 %572 }
  0xda   : > { %12606 = vst [vmem:[#allocation156_spill] sm:$0xff] %v7793_v63  ;;  %12607 = vst [vmem:[#allocation157_spill] sm:$0xff] %v7796_v8  ;;  %v1155_v63 = vmul.f32 %v7275_v4, %v7308_v47  ;;  %v654_v5 = vmul.f32 %v7253_v58, %v573_v37  ;;  %v900_v1 = vmul.f32 %v7258_v59, %v573_v37  ;;  %v995_v10 = vrot.slane %v897_v11, 2 }
  0xdb   : > { %12608 = vst [vmem:[#allocation158_spill] sm:$0xff] %v7801_v12  ;;  %12609 = vst [vmem:[#allocation159_spill] sm:$0xff] %v7804_v9  ;;  %v7839_v8 = vmul.f32 %v7366_v22, %v7308_v47  ;;  %v1473_v3 = vmul.f32 %v7280_v34, %v573_v37  ;;  %v749_v9 = vrot.slane %v651_v24, 1  ;;  %v7856_v11 = vmul.f32 %v7280_v34, %v7330_v50 }
  0xdc   : > { %12610 = vst [vmem:[#allocation160_spill] sm:$0xff] %v7808_v35  ;;  %12611 = vst [vmem:[#allocation161_spill] sm:$0xff] %v7818_v13  ;;  %v7832_v13 = vmul.f32 %v7352_v23, %v7788_v30  ;;  %v754_v12 = vrot.slane %v654_v5, 1  ;;  %v1228_v35 = vmul.f32 %v7263_v60, %v573_v37  ;;  %v1000_v43 = vrot.slane %v900_v1, 2 }
  0xdd   : > { %12612 = vst [vmem:[#allocation162_spill] sm:$0xff] %v7822_v38  ;;  %v583_v30 = vpop.permute.xlu1 %582  ;;  %v1008_v5 = vrot.slane %v905_v33, 2  ;;  %v750_v36 = vsel %vm745_vm1, %v12614_v44, %v749_v9  ;;  %v12615_v24 = vrot.slane %v7386_v20, 1  ;;  %v1570_v48 = vrot.slane %v1473_v3, 2 }
  0xde   : > { %v755_v6 = vsel %vm745_vm1, %v12613_v0, %v754_v12  ;;  %v1325_v1 = vrot.slane %v1228_v35, 1  ;;  %v859_v33 = vadd.f32 %v750_v36, %v7339_v53  ;;  %v660_v0 = vmul.f32 %v7253_v58, %v583_v30 }
  0xdf   : > { %v861_v4 = vadd.f32 %v755_v6, %v7333_v27  ;;  %v763_v6 = vsel %vm745_vm1, %v12615_v24, %v762_v14  ;;  %v12616_v27 = vrot.slane %v7303_v29, 2  ;;  %v906_v37 = vmul.f32 %v7258_v59, %v583_v30 }
  0xe0   : > { %v864_v12 = vadd.f32 %v763_v6, %v7403_v39  ;;  %v12617_v44 = vrot.slane %v7288_v55, 2  ;;  %v764_v53 = vrot.slane %v660_v0, 1  ;;  %v12618_v38 = vrot.slane %v7389_v42, 2 }
  0xe1   : > { %v996_v9 = vsel %vm991_vm2, %v12616_v27, %v995_v10  ;;  %v12285_v3 = vrot.slane %v7848_v7, 1  ;;  %v7881_v10 = vmul.f32 %v7352_v23, %v7330_v50  ;;  %v12284_v55 = vrot.slane %v7856_v11, 2 }
  0xe2   : > { %v1001_v35 = vsel %vm991_vm2, %v12617_v44, %v1000_v43  ;;  %v1105_v36 = vadd.f32 %v996_v9, %v859_v33  ;;  %v1009_v20 = vsel %vm991_vm2, %v12618_v38, %v1008_v5  ;;  %v1010_v6 = vrot.slane %v906_v37, 2 }
  0xe3   : > { %v1107_v24 = vadd.f32 %v1001_v35, %v861_v4  ;;  %v1110_v29 = vadd.f32 %v1009_v20, %v864_v12  ;;  %v7886_v43 = vmul.f32 %v7263_v60, %v583_v30  ;;  %v507_v42 = vmul.f32 %v7269_v62, %v7330_v50 }
  0xe4   : > { %v1185_v39 = vadd.f32 %v7358_v41, %v1105_v36  ;;  %v765_v4 = vsel %vm745_vm1, %v762_v14, %v764_v53  ;;  %v7895_v33 = vmul.f32 %v7280_v34, %v583_v30  ;;  %v12619_v41 = vrot.slane %v7293_v51, 1 }
  0xe5   : > { %v7892_v38 = vadd.f32 %v7445_v45, %v1110_v29  ;;  %v12620_v9 = vrot.slane %v7300_v49, 2  ;;  %v1903_v37 = vrot.slane %v7860_v54, 1  ;;  %v1187_v44 = vadd.f32 %v1155_v63, %v1107_v24 }
  0xe6   : > { %v1326_v27 = vsel %vm745_vm1, %v12619_v41, %v1325_v1  ;;  %v2148_v45 = vrot.slane %v7881_v10, 2  ;;  %v12621_v35 = vrot.slane %v7395_v17, 1  ;;  %v7911_v53 = vadd.f32 %v765_v4, %v507_v42  ;;  %v578_v42 = vpop.permute.xlu0 %577 }
  0xe7   : > { %v1571_v12 = vsel %vm991_vm2, %v12620_v9, %v1570_v48  ;;  %v1435_v14 = vadd.f32 %v1326_v27, %v1185_v39  ;;  %v7914_v51 = vsel %vm991_vm2, %v1008_v5, %v1010_v6  ;;  %v12622_v63 = vrot.slane %v7398_v18, 2 }
  0xe8   : > { %v1334_v36 = vsel %vm745_vm1, %v12621_v35, %v12285_v3  ;;  %v7924_v20 = vmul.f32 %v7344_v52, %v583_v30  ;;  %v656_v17 = vmul.f32 %v7253_v58, %v7308_v47  ;;  %v7930_v5 = vmul.f32 %v7258_v59, %v7308_v47 }
  0xe9   : > { %v1579_v1 = vsel %vm991_vm2, %v12622_v63, %v12284_v55  ;;  %v12623_v24 = vrot.slane %v7406_v15, 1  ;;  %v7938_v29 = vmul.f32 %v7352_v23, %v583_v30  ;;  %v1230_v39 = vmul.f32 %v7263_v60, %v7308_v47 }
  0xea   : > { %v1475_v6 = vmul.f32 %v7280_v34, %v7308_v47  ;;  %v1680_v4 = vadd.f32 %v1571_v12, %v1435_v14  ;;  %v12624_v41 = vrot.slane %v7413_v16, 2  ;;  %v757_v15 = vrot.slane %v656_v17, 1 }
  0xeb   : > { %v1904_v18 = vsel %vm745_vm1, %v12623_v24, %v1903_v37  ;;  %v1003_v9 = vrot.slane %v7930_v5, 2  ;;  %v1328_v35 = vrot.slane %v1230_v39, 1  ;;  %v1802_v63 = vmul.f32 %v7344_v52, %v7308_v47 }
  0xec   : > { %v2149_v27 = vsel %vm991_vm2, %v12624_v41, %v2148_v45  ;;  %v1573_v30 = vrot.slane %v1475_v6, 2  ;;  %v2047_v24 = vmul.f32 %v7352_v23, %v7308_v47  ;;  %v1905_v0 = vrot.slane %v7924_v20, 1 }
  0xed   : > { %v12625_v12 = vrot.slane %v7325_v32, 1  ;;  %v12626_v16 = vrot.slane %v7328_v26, 2  ;;  %v657_v5 = vmul.f32 %v7253_v58, %v578_v42  ;;  %v12627_v6 = vrot.slane %v7369_v31, 1 }
  0xee   : > { %v1898_v55 = vrot.slane %v1802_v63, 1  ;;  %v903_v48 = vmul.f32 %v7258_v59, %v578_v42  ;;  %v12628_v32 = vrot.slane %v7372_v46, 2  ;;  %v2143_v26 = vrot.slane %v2047_v24, 2 }
  0xef   : > { %v758_v14 = vsel %vm745_vm1, %v12625_v12, %v757_v15  ;;  %v1004_v17 = vsel %vm991_vm2, %v12626_v16, %v1003_v9  ;;  %v1329_v41 = vsel %vm745_vm1, %v12627_v6, %v1328_v35  ;;  %v759_v3 = vrot.slane %v657_v5, 1 }
  0xf0   : > { %v862_v39 = vadd.f32 %v758_v14, %v7355_v21  ;;  %v1436_v20 = vadd.f32 %v1329_v41, %v7391_v56  ;;  %v1574_v12 = vsel %vm991_vm2, %v12628_v32, %v1573_v30  ;;  %v12629_v49 = vrot.slane %v7378_v19, 1 }
  0xf1   : > { %v1231_v31 = vmul.f32 %v7263_v60, %v578_v42  ;;  %v1476_v14 = vmul.f32 %v7280_v34, %v578_v42  ;;  %v1760_v63 = vadd.f32 %v7839_v8, %v1680_v4  ;;  %v505_v56 = vmul.f32 %v7269_v62, %v7308_v47 }
  0xf2   : > { %v1108_v16 = vadd.f32 %v1004_v17, %v862_v39  ;;  %v1899_v21 = vsel %vm745_vm1, %v12629_v49, %v1898_v55  ;;  %v1681_v6 = vadd.f32 %v1574_v12, %v1436_v20  ;;  %v12630_v17 = vrot.slane %v7383_v28, 2 }
  0xf3   : > { %v2009_v46 = vadd.f32 %v1899_v21, %v7441_v57  ;;  %v760_v49 = vsel %vm745_vm1, %v757_v15, %v759_v3  ;;  %v1330_v5 = vrot.slane %v1231_v31, 1  ;;  %v1575_v32 = vrot.slane %v1476_v14, 2 }
  0xf4   : > { %v1188_v24 = vadd.f32 %v7410_v25, %v1108_v16  ;;  %v2144_v19 = vsel %vm991_vm2, %v12630_v17, %v2143_v26  ;;  %v1761_v39 = vadd.f32 %v7426_v61, %v1681_v6  ;;  %v1803_v8 = vmul.f32 %v7344_v52, %v578_v42 }
  0xf5   : > { %v2254_v41 = vadd.f32 %v2144_v19, %v2009_v46  ;;  %v1005_v47 = vrot.slane %v903_v48, 2  ;;  %v1331_v20 = vsel %vm745_vm1, %v1328_v35, %v1330_v5  ;;  %v2048_v57 = vmul.f32 %v7352_v23, %v578_v42  ;;  %v593_v35 = vpop.permute.xlu1 %592 }
  0xf6   : > { %v1438_v4 = vadd.f32 %v1334_v36, %v1188_v24  ;;  %v2011_v25 = vadd.f32 %v1904_v18, %v1761_v39  ;;  %v863_v28 = vadd.f32 %v760_v49, %v505_v56  ;;  %v1437_v16 = vadd.f32 %v1331_v20, %v1187_v44 }
  0xf7   : > { %v2286_v12 = vmax.f32 %v2254_v41, 0.0  ;;  %v1576_v3 = vsel %vm991_vm2, %v1573_v30, %v1575_v32  ;;  %v1900_v15 = vrot.slane %v1803_v8, 1  ;;  %v2145_v31 = vrot.slane %v2048_v57, 2  ;;  %v12632_v41 = vld [vmem:[#allocation61_spill] sm:$0xff] }
  0xf8   : > { %v1683_v21 = vadd.f32 %v1579_v1, %v1438_v4  ;;  %v1730_v61 = vmul.f32 %v7366_v22, %v7330_v50  ;;  %v2256_v14 = vadd.f32 %v2149_v27, %v2011_v25  ;;  %v1682_v36 = vadd.f32 %v1576_v3, %v1437_v16  ;;  %v12634_v4 = vld [vmem:[#allocation65_spill] sm:$0xff] }
  0xf9   : > { %2319 = vst.msk [vmem:[#allocation2 + $0x19] sm:$0xff] %vm226_vm0, %v2286_v12  ;;  %v665_v48 = vmul.f32 %v7253_v58, %v7415_v40  ;;  %v2150_v18 = vrot.slane %v7938_v29, 2  ;;  %v1006_v44 = vsel %vm991_vm2, %v1003_v9, %v1005_v47  ;;  %v1901_v1 = vsel %vm745_vm1, %v1898_v55, %v1900_v15  ;;  %v12635_v12 = vld [vmem:[#allocation62_spill] sm:$0xff] }
  0xfa   : > { %v7997_v42 = vadd.f32 %v7464_v2, %v1683_v21  ;;  %v2288_v30 = vmax.f32 %v2256_v14, 0.0  ;;  %v1762_v56 = vadd.f32 %v1730_v61, %v1682_v36  ;;  %v2010_v6 = vadd.f32 %v1901_v1, %v1760_v63 }
  0xfb   : > { %v772_v27 = vrot.slane %v665_v48, 1  ;;  %v1906_v46 = vsel %vm745_vm1, %v1903_v37, %v1905_v0  ;;  %v1109_v24 = vadd.f32 %v1006_v44, %v863_v28  ;;  %v2146_v17 = vsel %vm991_vm2, %v2143_v26, %v2145_v31  ;;  %v12631_v0 = vld [vmem:[#allocation51_spill] sm:$0xff] }
  0xfc   : > { %v8007_v2 = vmul.f32 %v7258_v59, %v7415_v40  ;;  %2321 = vst.msk [vmem:[#allocation2 + $0x31] sm:$0xff] %vm226_vm0, %v2288_v30  ;;  %v2012_v29 = vadd.f32 %v1906_v46, %v1762_v56  ;;  %v2255_v55 = vadd.f32 %v2146_v17, %v2010_v6  ;;  %v8012_v9 = vmul.f32 %v7263_v60, %v7415_v40  ;;  %v12642_v46 = vld [vmem:[#allocation63_spill] sm:$0xff] }
  0xfd   : > { %v666_v63 = vmul.f32 %v7253_v58, %v593_v35  ;;  %v2151_v54 = vsel %vm991_vm2, %v2148_v45, %v2150_v18  ;;  %v1157_v37 = vmul.f32 %v12631_v0, %v7330_v50  ;;  %v8023_v19 = vmul.f32 %v7280_v34, %v7415_v40 }
  0xfe   : > { %v1018_v26 = vrot.slane %v8007_v2, 2  ;;  %v2257_v49 = vadd.f32 %v2151_v54, %v2012_v29  ;;  %v2287_v5 = vmax.f32 %v2255_v55, 0.0  ;;  %v8027_v39 = vmul.f32 %v7344_v52, %v7415_v40  ;;  %v12644_v55 = vld [vmem:[#allocation64_spill] sm:$0xff] }
  0xff   : > { %v12633_v32 = vrot.slane %v12632_v41, 1  ;;  %v1189_v45 = vadd.f32 %v1157_v37, %v1109_v24  ;;  %v8034_v50 = vmul.f32 %v7352_v23, %v7415_v40  ;;  %v774_v8 = vrot.slane %v666_v63, 1  ;;  %v12646_v37 = vld [vmem:[#allocation52_spill] sm:$0xff]  ;;  %v12647_v41 = vld [vmem:[#allocation66_spill] sm:$0xff] }
 0x100   : > { %v2289_v20 = vmax.f32 %v2257_v49, 0.0  ;;  %2320 = vst.msk [vmem:[#allocation2 + $0x21] sm:$0xff] %vm226_vm0, %v2287_v5  ;;  %v1343_v57 = vrot.slane %v8012_v9, 1  ;;  %v8040_v25 = vmul.f32 %v7258_v59, %v593_v35  ;;  %v12636_v28 = vrot.slane %v12635_v12, 2 }
 0x101   : > { %v773_v10 = vsel %vm745_vm1, %v12633_v32, %v772_v27  ;;  %v12637_v21 = vrot.slane %v7886_v43, 1  ;;  %v12638_v3 = vrot.slane %v7848_v7, 1  ;;  %v12286_v31 = vrot.slane %v8023_v19, 2 }
 0x102   : > { %v868_v47 = vadd.f32 %v773_v10, %v12634_v4  ;;  %v1019_v16 = vsel %vm991_vm2, %v12636_v28, %v1018_v26  ;;  %v8054_v14 = vmul.f32 %v7263_v60, %v593_v35  ;;  %v1111_v36 = vadd.f32 %v7914_v51, %v7911_v53  ;;  %2322 = vst.msk [vmem:[#allocation2 + $0x39] sm:$0xff] %vm226_vm0, %v2289_v20  ;;  %v12641_v53 = vld [vmem:[#allocation77_spill] sm:$0xff] }
 0x103   : > { %v1336_v15 = vsel %vm745_vm1, %v12638_v3, %v12637_v21  ;;  %v1913_v48 = vrot.slane %v8027_v39, 1  ;;  %v775_v18 = vsel %vm745_vm1, %v772_v27, %v774_v8  ;;  %v8062_v43 = vmul.f32 %v7280_v34, %v593_v35 }
 0x104   : > { %v1114_v61 = vadd.f32 %v1019_v16, %v868_v47  ;;  %v12639_v7 = vrot.slane %v7895_v33, 2  ;;  %v12640_v44 = vrot.slane %v7856_v11, 2  ;;  %v1439_v30 = vadd.f32 %v1336_v15, %v1189_v45 }
 0x105   : > { %v511_v56 = vmul.f32 %v7269_v62, %v7415_v40  ;;  %v2158_v6 = vrot.slane %v8034_v50, 2  ;;  %v1020_v27 = vrot.slane %v8040_v25, 2  ;;  %v12643_v24 = vrot.slane %v12642_v46, 1  ;;  %v12653_v46 = vld [vmem:[#allocation55_spill] sm:$0xff]  ;;  %v8209_v25 = vld [vmem:[%s12143_s1 + $0x4] ss:$0 sm:$0xff] }
 0x106   : > { %v1581_v1 = vsel %vm991_vm2, %v12640_v44, %v12639_v7  ;;  %v8072_v51 = vadd.f32 %v12641_v53, %v1114_v61  ;;  %v8082_v11 = vmul.f32 %v7344_v52, %v593_v35  ;;  %v1345_v29 = vrot.slane %v8054_v14, 1  ;;  %v12651_v61 = vld [vmem:[#allocation53_spill] sm:$0xff] }
 0x107   : > { %v1344_v33 = vsel %vm745_vm1, %v12643_v24, %v1343_v57  ;;  %v8084_v17 = vadd.f32 %v775_v18, %v511_v56  ;;  %v12645_v63 = vrot.slane %v12644_v55, 2  ;;  %v662_v49 = vmul.f32 %v7253_v58, %v12646_v37 }
 0x108   : > { %v1590_v5 = vrot.slane %v8062_v43, 2  ;;  %v12648_v32 = vrot.slane %v12647_v41, 1  ;;  %v8101_v45 = vmul.f32 %v7352_v23, %v593_v35  ;;  %v8105_v8 = vmul.f32 %v7258_v59, %v12646_v37  ;;  %v12649_v35 = vld [vmem:[#allocation68_spill] sm:$0xff] }
 0x109   : > { %v1589_v54 = vsel %vm991_vm2, %v12645_v63, %v12286_v31  ;;  %v767_v4 = vrot.slane %v662_v49, 1  ;;  %v1159_v47 = vmul.f32 %v12631_v0, %v12646_v37  ;;  %v1236_v20 = vmul.f32 %v7263_v60, %v12646_v37  ;;  %v588_v0 = vpop.permute.xlu0 %587 }
 0x10a   : > { %v1914_v10 = vsel %vm745_vm1, %v12648_v32, %v1913_v48  ;;  %v1481_v12 = vmul.f32 %v7280_v34, %v12646_v37  ;;  %v1915_v28 = vrot.slane %v8082_v11, 1  ;;  %v12650_v16 = vrot.slane %v12649_v35, 2  ;;  %v12656_v32 = vld [vmem:[#allocation56_spill] sm:$0xff] }
 0x10b   : > { %v509_v3 = vmul.f32 %v7269_v62, %v12646_v37  ;;  %v1013_v15 = vrot.slane %v8105_v8, 2  ;;  %v12652_v18 = vrot.slane %v12651_v61, 1  ;;  %v1191_v44 = vadd.f32 %v1159_v47, %v1111_v36  ;;  %v12654_v62 = vld [vmem:[#allocation54_spill] sm:$0xff] }
 0x10c   : > { %v2159_v21 = vsel %vm991_vm2, %v12650_v16, %v2158_v6  ;;  %v1338_v56 = vrot.slane %v1236_v20, 1  ;;  %v1583_v53 = vrot.slane %v1481_v12, 2  ;;  %v1684_v11 = vadd.f32 %v1581_v1, %v1439_v30  ;;  %v12658_v20 = vld [vmem:[#allocation57_spill] sm:$0xff] }
 0x10d   : > { %v768_v7 = vsel %vm745_vm1, %v12652_v18, %v767_v4  ;;  %v1732_v55 = vmul.f32 %v7366_v22, %v12646_v37  ;;  %v1808_v63 = vmul.f32 %v7344_v52, %v12646_v37  ;;  %v12655_v49 = vrot.slane %v12654_v62, 2 }
 0x10e   : > { %v866_v24 = vadd.f32 %v768_v7, %v12653_v46  ;;  %v12657_v8 = vrot.slane %v12656_v32, 1  ;;  %v2053_v36 = vmul.f32 %v7352_v23, %v12646_v37  ;;  %v663_v47 = vmul.f32 %v7253_v58, %v588_v0  ;;  %v12661_v37 = vld [vmem:[#allocation58_spill] sm:$0xff] }
 0x10f   : > { %v1014_v41 = vsel %vm991_vm2, %v12655_v49, %v1013_v15  ;;  %v12659_v12 = vrot.slane %v12658_v20, 2  ;;  %v1908_v61 = vrot.slane %v1808_v63, 1  ;;  %v1237_v46 = vmul.f32 %v7263_v60, %v588_v0  ;;  %v12660_v49 = vld [vmem:[#allocation67_spill] sm:$0xff] }
 0x110   : > { %v1339_v35 = vsel %vm745_vm1, %v12657_v8, %v1338_v56  ;;  %v1112_v1 = vadd.f32 %v1014_v41, %v866_v24  ;;  %v2153_v18 = vrot.slane %v2053_v36, 2  ;;  %v769_v7 = vrot.slane %v663_v47, 1  ;;  %v12663_v60 = vld [vmem:[#allocation71_spill] sm:$0xff] }
 0x111   : > { %v1440_v30 = vadd.f32 %v1339_v35, %v7892_v38  ;;  %v1584_v16 = vsel %vm991_vm2, %v12659_v12, %v1583_v53  ;;  %v1482_v62 = vmul.f32 %v7280_v34, %v588_v0  ;;  %v12662_v31 = vrot.slane %v12661_v37, 1  ;;  %v12664_v34 = vld [vmem:[#allocation60_spill] sm:$0xff] }
 0x112   : > { %v1192_v32 = vadd.f32 %v12660_v49, %v1112_v1  ;;  %v909_v38 = vmul.f32 %v7258_v59, %v588_v0  ;;  %v1734_v24 = vmul.f32 %v7366_v22, %v7415_v40  ;;  %v1764_v41 = vadd.f32 %v1732_v55, %v1684_v11 }
 0x113   : > { %v1685_v8 = vadd.f32 %v1584_v16, %v1440_v30  ;;  %v1909_v58 = vsel %vm745_vm1, %v12662_v31, %v1908_v61  ;;  %v1340_v35 = vrot.slane %v1237_v46, 1  ;;  %v12665_v20 = vrot.slane %v12664_v34, 2 }
 0x114   : > { %v2013_v63 = vadd.f32 %v1909_v58, %v7997_v42  ;;  %v1442_v36 = vadd.f32 %v1344_v33, %v1192_v32  ;;  %v770_v30 = vsel %vm745_vm1, %v767_v4, %v769_v7  ;;  %v1585_v59 = vrot.slane %v1482_v62, 2 }
 0x115   : > { %v1765_v47 = vadd.f32 %v12663_v60, %v1685_v8  ;;  %v2154_v1 = vsel %vm991_vm2, %v12665_v20, %v2153_v18  ;;  %v1341_v31 = vsel %vm745_vm1, %v1338_v56, %v1340_v35  ;;  %v1809_v16 = vmul.f32 %v7344_v52, %v588_v0  ;;  %v12666_v8 = vld [vmem:[#allocation80_spill] sm:$0xff] }
 0x116   : > { %v2258_v12 = vadd.f32 %v2154_v1, %v2013_v63  ;;  %v1687_v22 = vadd.f32 %v1589_v54, %v1442_v36  ;;  %v1015_v55 = vrot.slane %v909_v38, 2  ;;  %v1441_v42 = vadd.f32 %v1341_v31, %v1191_v44  ;;  %v8171_v44 = vld [vmem:[%s12143_s1 + $0x1] ss:$0 sm:$0xff]  ;;  %v603_v38 = vpop.permute.xlu1 %602  ;;  %v8183_v36 = vld [vmem:[%s12143_s1 + $0x2] ss:$0 sm:$0xff] }
 0x117   : > { %v2015_v11 = vadd.f32 %v1914_v10, %v1765_v47  ;;  %v1586_v33 = vsel %vm991_vm2, %v1583_v53, %v1585_v59  ;;  %v1910_v49 = vrot.slane %v1809_v16, 1  ;;  %v2054_v32 = vmul.f32 %v7352_v23, %v588_v0  ;;  %v12667_v53 = vld [vmem:[#allocation70_spill] sm:$0xff]  ;;  %v8216_v47 = vld [vmem:[%s12143_s1 + $0x6] ss:$0 sm:$0xff] }
 0x118   : > { %v2290_v46 = vmax.f32 %v2258_v12, 0.0  ;;  %v8163_v37 = vadd.f32 %v12666_v8, %v1687_v22  ;;  %v867_v7 = vadd.f32 %v770_v30, %v509_v3  ;;  %v1686_v58 = vadd.f32 %v1586_v33, %v1441_v42  ;;  %v12668_v1 = vld [vmem:[#allocation81_spill] sm:$0xff] }
 0x119   : > { %v2260_v4 = vadd.f32 %v2159_v21, %v2015_v11  ;;  %v2160_v56 = vrot.slane %v8101_v45, 2  ;;  %v1911_v54 = vsel %vm745_vm1, %v1908_v61, %v1910_v49  ;;  %v2155_v10 = vrot.slane %v2054_v32, 2  ;;  %v12670_v11 = vld [vmem:[#allocation84_spill] sm:$0xff] }
 0x11a   : > { %2323 = vst.msk [vmem:[#allocation2 + $0x49] sm:$0xff] %vm226_vm0, %v2290_v46  ;;  %v671_v0 = vmul.f32 %v8171_v44, %v12667_v53  ;;  %v1916_v21 = vsel %vm745_vm1, %v1913_v48, %v1915_v28  ;;  %v1766_v62 = vadd.f32 %v1734_v24, %v1686_v58  ;;  %v2014_v45 = vadd.f32 %v1911_v54, %v1764_v41  ;;  %v8199_v41 = vld [vmem:[%s12143_s1 + $0x5] ss:$0 sm:$0xff]  ;;  %v12671_v46 = vld [vmem:[#allocation82_spill] sm:$0xff]  ;;  %v8260_v54 = vld [vmem:[%s12143_s1] ss:$0 sm:$0xff] }
 0x11b   : > { %v2292_v3 = vmax.f32 %v2260_v4, 0.0  ;;  %v1016_v63 = vsel %vm991_vm2, %v1013_v15, %v1015_v55  ;;  %v2156_v61 = vsel %vm991_vm2, %v2153_v18, %v2155_v10  ;;  %v917_v60 = vmul.f32 %v8183_v36, %v12667_v53 }
 0x11c   : > { %v782_v35 = vrot.slane %v671_v0, 1  ;;  %v1021_v39 = vsel %vm991_vm2, %v1018_v26, %v1020_v27  ;;  %v1113_v48 = vadd.f32 %v1016_v63, %v867_v7  ;;  %v2016_v28 = vadd.f32 %v1916_v21, %v1766_v62  ;;  %v12675_v21 = vld [vmem:[#allocation83_spill] sm:$0xff] }
 0x11d   : > { %2325 = vst.msk [vmem:[#allocation2 + $0x61] sm:$0xff] %vm226_vm0, %v2292_v3  ;;  %v2259_v15 = vadd.f32 %v2156_v61, %v2014_v45  ;;  %v2161_v18 = vsel %vm991_vm2, %v2158_v6, %v2160_v56  ;;  %v1028_v24 = vrot.slane %v917_v60, 2  ;;  %v8203_v2 = vmul.f32 %v8199_v41, %v12667_v53 }
 0x11e   : > { %v672_v26 = vmul.f32 %v8171_v44, %v603_v38  ;;  %v1161_v50 = vmul.f32 %v8209_v25, %v7415_v40  ;;  %v2261_v6 = vadd.f32 %v2161_v18, %v2016_v28  ;;  %v8220_v34 = vmul.f32 %v8216_v47, %v12667_v53  ;;  %v12680_v18 = vld [vmem:[#allocation86_spill] sm:$0xff] }
 0x11f   : > { %v2291_v27 = vmax.f32 %v2259_v15, 0.0  ;;  %v8224_v20 = vmul.f32 %v7344_v52, %v12667_v53  ;;  %v12669_v30 = vrot.slane %v12668_v1, 1  ;;  %v918_v31 = vmul.f32 %v8183_v36, %v603_v38 }
 0x120   : > { %v784_v40 = vrot.slane %v672_v26, 1  ;;  %v1193_v59 = vadd.f32 %v1161_v50, %v1113_v48  ;;  %v2293_v16 = vmax.f32 %v2261_v6, 0.0  ;;  %v8233_v22 = vmul.f32 %v7352_v23, %v12667_v53  ;;  %v12679_v48 = vld [vmem:[#allocation59_spill] sm:$0xff]  ;;  %v8310_v50 = vld [vmem:[%s12143_s1 + $0xa] ss:$0 sm:$0xff] }
 0x121   : > { %v783_v12 = vsel %vm745_vm1, %v12669_v30, %v782_v35  ;;  %2324 = vst.msk [vmem:[#allocation2 + $0x51] sm:$0xff] %vm226_vm0, %v2291_v27  ;;  %v1115_v52 = vadd.f32 %v1021_v39, %v8084_v17  ;;  %v12288_v42 = vrot.slane %v8203_v2, 1  ;;  %v12672_v33 = vrot.slane %v12671_v46, 2 }
 0x122   : > { %v872_v55 = vadd.f32 %v783_v12, %v12670_v11  ;;  %v8242_v32 = vmul.f32 %v8199_v41, %v603_v38  ;;  %2326 = vst.msk [vmem:[#allocation2 + $0x69] sm:$0xff] %vm226_vm0, %v2293_v16  ;;  %v12287_v8 = vrot.slane %v8220_v34, 2  ;;  %v785_v23 = vsel %vm745_vm1, %v782_v35, %v784_v40  ;;  %v12677_v35 = vld [vmem:[#allocation85_spill] sm:$0xff] }
 0x123   : > { %v1029_v49 = vsel %vm991_vm2, %v12672_v33, %v1028_v24  ;;  %v1030_v4 = vrot.slane %v918_v31, 2  ;;  %v1346_v17 = vsel %vm745_vm1, %v1343_v57, %v1345_v29  ;;  %v12673_v58 = vrot.slane %v8023_v19, 2  ;;  %v12674_v57 = vld [vmem:[#allocation96_spill] sm:$0xff]  ;;  %v8272_v19 = vld [vmem:[%s12143_s1 + $0x9] ss:$0 sm:$0xff]  ;;  %v598_v33 = vpop.permute.xlu0 %597 }
 0x124   : > { %v1118_v7 = vadd.f32 %v1029_v49, %v872_v55  ;;  %v515_v10 = vmul.f32 %v8260_v54, %v12667_v53  ;;  %v1923_v14 = vrot.slane %v8224_v20, 1  ;;  %v1443_v0 = vadd.f32 %v1346_v17, %v1193_v59  ;;  %v12682_v59 = vld [vmem:[#allocation87_spill] sm:$0xff]  ;;  %v12684_v49 = vld [vmem:[#allocation69_spill] sm:$0xff] }
 0x125   : > { %v1591_v56 = vsel %vm991_vm2, %v12673_v58, %v1590_v5  ;;  %v2168_v9 = vrot.slane %v8233_v22, 2  ;;  %v8275_v43 = vmul.f32 %v8272_v19, %v603_v38  ;;  %v12676_v3 = vrot.slane %v12675_v21, 1  ;;  %v12687_v21 = vld [vmem:[#allocation72_spill] sm:$0xff] }
 0x126   : > { %v8267_v29 = vadd.f32 %v12674_v57, %v1118_v7  ;;  %v8277_v5 = vadd.f32 %v785_v23, %v515_v10  ;;  %v8286_v63 = vmul.f32 %v8216_v47, %v603_v38  ;;  %v8289_v61 = vsel %vm991_vm2, %v1028_v24, %v1030_v4  ;;  %v12686_v10 = vld [vmem:[#allocation74_spill] sm:$0xff] }
 0x127   : > { %v1354_v62 = vsel %vm745_vm1, %v12676_v3, %v12288_v42  ;;  %v12678_v60 = vrot.slane %v12677_v35, 2  ;;  %v668_v28 = vmul.f32 %v8171_v44, %v12679_v48  ;;  %v8300_v15 = vmul.f32 %v8183_v36, %v12679_v48 }
 0x128   : > { %v12681_v26 = vrot.slane %v12680_v18, 1  ;;  %v8313_v6 = vmul.f32 %v8310_v50, %v603_v38  ;;  %v1242_v27 = vmul.f32 %v8199_v41, %v12679_v48  ;;  %v1487_v1 = vmul.f32 %v8216_v47, %v12679_v48  ;;  %v12691_v18 = vld [vmem:[#allocation75_spill] sm:$0xff] }
 0x129   : > { %v1599_v39 = vsel %vm991_vm2, %v12678_v60, %v12287_v8  ;;  %v1925_v30 = vrot.slane %v8275_v43, 1  ;;  %v777_v12 = vrot.slane %v668_v28, 1  ;;  %v1023_v40 = vrot.slane %v8300_v15, 2  ;;  %v12689_v60 = vld [vmem:[#allocation73_spill] sm:$0xff] }
 0x12a   : > { %v1924_v24 = vsel %vm745_vm1, %v12681_v26, %v1923_v14  ;;  %v1163_v31 = vmul.f32 %v8209_v25, %v12679_v48  ;;  %v12683_v16 = vrot.slane %v12682_v59, 2  ;;  %v513_v11 = vmul.f32 %v8260_v54, %v12679_v48 }
 0x12b   : > { %v1348_v55 = vrot.slane %v1242_v27, 1  ;;  %v1593_v46 = vrot.slane %v1487_v1, 2  ;;  %v12685_v23 = vrot.slane %v12684_v49, 1  ;;  %v1688_v17 = vadd.f32 %v1591_v56, %v1443_v0 }
 0x12c   : > { %v2169_v38 = vsel %vm991_vm2, %v12683_v16, %v2168_v9  ;;  %v1195_v7 = vadd.f32 %v1163_v31, %v1115_v52  ;;  %v1814_v58 = vmul.f32 %v8272_v19, %v12679_v48  ;;  %v12688_v3 = vrot.slane %v12687_v21, 2 }
 0x12d   : > { %v778_v4 = vsel %vm745_vm1, %v12685_v23, %v777_v12  ;;  %v12690_v28 = vrot.slane %v12689_v60, 1  ;;  %v12692_v26 = vrot.slane %v12691_v18, 2  ;;  %v2059_v0 = vmul.f32 %v8310_v50, %v12679_v48  ;;  %v12696_v18 = vld [vmem:[#allocation92_spill] sm:$0xff] }
 0x12e   : > { %v870_v57 = vadd.f32 %v778_v4, %v12686_v10  ;;  %v1024_v35 = vsel %vm991_vm2, %v12688_v3, %v1023_v40  ;;  %v1918_v56 = vrot.slane %v1814_v58, 1  ;;  %v669_v1 = vmul.f32 %v8171_v44, %v598_v33  ;;  %v12693_v4 = vld [vmem:[#allocation76_spill] sm:$0xff] }
 0x12f   : > { %v1349_v15 = vsel %vm745_vm1, %v12690_v28, %v1348_v55  ;;  %v1594_v27 = vsel %vm991_vm2, %v12692_v26, %v1593_v46  ;;  %v915_v59 = vmul.f32 %v8183_v36, %v598_v33  ;;  %v1243_v16 = vmul.f32 %v8199_v41, %v598_v33  ;;  %v12695_v58 = vld [vmem:[#allocation88_spill] sm:$0xff]  ;;  %v8359_v28 = vld [vmem:[%s12143_s1 + $0x8] ss:$0 sm:$0xff] }
 0x130   : > { %v1444_v52 = vadd.f32 %v1349_v15, %v8072_v51  ;;  %v1116_v31 = vadd.f32 %v1024_v35, %v870_v57  ;;  %v1488_v49 = vmul.f32 %v8216_v47, %v598_v33  ;;  %v12694_v10 = vrot.slane %v12693_v4, 1 }
 0x131   : > { %v2163_v3 = vrot.slane %v2059_v0, 2  ;;  %v779_v51 = vrot.slane %v669_v1, 1  ;;  %v1736_v57 = vmul.f32 %v8359_v28, %v12679_v48  ;;  %v1350_v15 = vrot.slane %v1243_v16, 1 }
 0x132   : > { %v1689_v23 = vadd.f32 %v1594_v27, %v1444_v52  ;;  %v1919_v21 = vsel %vm745_vm1, %v12694_v10, %v1918_v56  ;;  %v1196_v60 = vadd.f32 %v12695_v58, %v1116_v31  ;;  %v12697_v27 = vld [vmem:[#allocation78_spill] sm:$0xff]  ;;  %v1595_v31 = vrot.slane %v1488_v49, 2 }
 0x133   : > { %v2017_v35 = vadd.f32 %v1919_v21, %v8163_v37  ;;  %v12698_v52 = vrot.slane %v12697_v27, 2  ;;  %v780_v1 = vsel %vm745_vm1, %v777_v12, %v779_v51  ;;  %v2170_v4 = vrot.slane %v8313_v6, 2  ;;  %v12699_v6 = vld [vmem:[#allocation101_spill] sm:$0xff]  ;;  %v613_v51 = vpop.permute.xlu1 %612 }
 0x134   : > { %v1769_v26 = vadd.f32 %v12696_v18, %v1689_v23  ;;  %v1446_v10 = vadd.f32 %v1354_v62, %v1196_v60  ;;  %v1768_v58 = vadd.f32 %v1736_v57, %v1688_v17  ;;  %v1025_v45 = vrot.slane %v915_v59, 2  ;;  %v12700_v17 = vld [vmem:[#allocation91_spill] sm:$0xff] }
 0x135   : > { %v2164_v0 = vsel %vm991_vm2, %v12698_v52, %v2163_v3  ;;  %v1351_v48 = vsel %vm745_vm1, %v1348_v55, %v1350_v15  ;;  %v1815_v37 = vmul.f32 %v8272_v19, %v598_v33  ;;  %v871_v21 = vadd.f32 %v780_v1, %v513_v11 }
 0x136   : > { %v2262_v8 = vadd.f32 %v2164_v0, %v2017_v35  ;;  %v2019_v42 = vadd.f32 %v1924_v24, %v1769_v26  ;;  %v1691_v16 = vadd.f32 %v1599_v39, %v1446_v10  ;;  %v1445_v18 = vadd.f32 %v1351_v48, %v1195_v7 }
 0x137   : > { %v1596_v52 = vsel %vm991_vm2, %v1593_v46, %v1595_v31  ;;  %v1920_v12 = vrot.slane %v1815_v37, 1  ;;  %v2060_v49 = vmul.f32 %v8310_v50, %v598_v33  ;;  %v1738_v62 = vmul.f32 %v8359_v28, %v12667_v53 }
 0x138   : > { %v2294_v23 = vmax.f32 %v2262_v8, 0.0  ;;  %v2264_v27 = vadd.f32 %v2169_v38, %v2019_v42  ;;  %v8377_v24 = vadd.f32 %v12699_v6, %v1691_v16  ;;  %v1690_v55 = vadd.f32 %v1596_v52, %v1445_v18 }
 0x139   : > { %v677_v8 = vmul.f32 %v8171_v44, %v12700_v17  ;;  %v1921_v42 = vsel %vm745_vm1, %v1918_v56, %v1920_v12  ;;  %v2165_v38 = vrot.slane %v2060_v49, 2  ;;  %v8385_v11 = vmul.f32 %v8183_v36, %v12700_v17 }
 0x13a   : > { %2327 = vst.msk [vmem:[#allocation2 + $0x79] sm:$0xff] %vm226_vm0, %v2294_v23  ;;  %v2296_v39 = vmax.f32 %v2264_v27, 0.0  ;;  %v1026_v46 = vsel %vm991_vm2, %v1023_v40, %v1025_v45  ;;  %v1770_v33 = vadd.f32 %v1738_v62, %v1690_v55  ;;  %v2018_v7 = vadd.f32 %v1921_v42, %v1768_v58  ;;  %v12703_v58 = vld [vmem:[#allocation105_spill] sm:$0xff]  ;;  %v12704_v23 = vld [vmem:[#allocation102_spill] sm:$0xff] }
 0x13b   : > { %v792_v59 = vrot.slane %v677_v8, 1  ;;  %v1600_v60 = vrot.slane %v8286_v63, 2  ;;  %v1926_v57 = vsel %vm745_vm1, %v1923_v14, %v1925_v30  ;;  %v1117_v56 = vadd.f32 %v1026_v46, %v871_v21  ;;  %v12701_v63 = vld [vmem:[#allocation99_spill] sm:$0xff] }
 0x13c   : > { %2329 = vst.msk [vmem:[#allocation2 + $0x91] sm:$0xff] %vm226_vm0, %v2296_v39  ;;  %v2166_v35 = vsel %vm991_vm2, %v2163_v3, %v2165_v38  ;;  %v2020_v15 = vadd.f32 %v1926_v57, %v1770_v33  ;;  %v12291_v45 = vrot.slane %v8385_v11, 2  ;;  %v8399_v40 = vmul.f32 %v8199_v41, %v12700_v17  ;;  %v12709_v38 = vld [vmem:[#allocation117_spill] sm:$0xff] }
 0x13d   : > { %v2263_v26 = vadd.f32 %v2166_v35, %v2018_v7  ;;  %v2171_v43 = vsel %vm991_vm2, %v2168_v9, %v2170_v4  ;;  %v8406_v20 = vmul.f32 %v8216_v47, %v12700_v17  ;;  %v678_v14 = vmul.f32 %v8171_v44, %v613_v51  ;;  %v12710_v7 = vld [vmem:[#allocation103_spill] sm:$0xff] }
 0x13e   : > { %v12702_v30 = vrot.slane %v12701_v63, 1  ;;  %v1165_v0 = vmul.f32 %v8209_v25, %v12667_v53  ;;  %v2265_v1 = vadd.f32 %v2171_v43, %v2020_v15  ;;  %v8416_v22 = vmul.f32 %v8272_v19, %v12700_v17  ;;  %v12712_v15 = vld [vmem:[#allocation104_spill] sm:$0xff] }
 0x13f   : > { %v2295_v31 = vmax.f32 %v2263_v26, 0.0  ;;  %v8420_v9 = vadd.f32 %v8289_v61, %v8277_v5  ;;  %v8424_v4 = vmul.f32 %v8310_v50, %v12700_v17  ;;  %v794_v10 = vrot.slane %v678_v14, 1  ;;  %v12714_v14 = vld [vmem:[#allocation79_spill] sm:$0xff] }
 0x140   : > { %v793_v3 = vsel %vm745_vm1, %v12702_v30, %v792_v59  ;;  %v1197_v37 = vadd.f32 %v1165_v0, %v1117_v56  ;;  %v2297_v16 = vmax.f32 %v2265_v1, 0.0  ;;  %v12290_v53 = vrot.slane %v8399_v40, 1 }
 0x141   : > { %v876_v48 = vadd.f32 %v793_v3, %v12703_v58  ;;  %2328 = vst.msk [vmem:[#allocation2 + $0x81] sm:$0xff] %vm226_vm0, %v2295_v31  ;;  %v12705_v21 = vrot.slane %v12704_v23, 2  ;;  %v12706_v61 = vrot.slane %v8242_v32, 1  ;;  %v12707_v18 = vrot.slane %v8203_v2, 1  ;;  %v12715_v3 = vld [vmem:[#allocation106_spill] sm:$0xff] }
 0x142   : > { %v12289_v52 = vrot.slane %v8406_v20, 2  ;;  %v8441_v12 = vmul.f32 %v8183_v36, %v613_v51  ;;  %2330 = vst.msk [vmem:[#allocation2 + $0x99] sm:$0xff] %vm226_vm0, %v2297_v16  ;;  %v1933_v62 = vrot.slane %v8416_v22, 1  ;;  %v795_v6 = vsel %vm745_vm1, %v792_v59, %v794_v10  ;;  %v12717_v10 = vld [vmem:[#allocation108_spill] sm:$0xff] }
 0x143   : > { %v1039_v5 = vsel %vm991_vm2, %v12705_v21, %v12291_v45  ;;  %v1356_v27 = vsel %vm745_vm1, %v12707_v18, %v12706_v61  ;;  %v8447_v55 = vmul.f32 %v8199_v41, %v613_v51  ;;  %v8450_v32 = vmul.f32 %v8272_v19, %v613_v51 }
 0x144   : > { %v1122_v49 = vadd.f32 %v1039_v5, %v876_v48  ;;  %v12708_v2 = vrot.slane %v8220_v34, 2  ;;  %v519_v39 = vmul.f32 %v8260_v54, %v12700_v17  ;;  %v12292_v42 = vrot.slane %v8424_v4, 2 }
 0x145   : > { %v1447_v33 = vadd.f32 %v1356_v27, %v1197_v37  ;;  %v12711_v59 = vrot.slane %v12710_v7, 1  ;;  %v8467_v56 = vmul.f32 %v8216_v47, %v613_v51  ;;  %v8470_v34 = vmul.f32 %v8310_v50, %v613_v51  ;;  %v608_v27 = vpop.permute.xlu0 %607  ;;  %v12721_v7 = vld [vmem:[#allocation93_spill] sm:$0xff] }
 0x146   : > { %v1601_v8 = vsel %vm991_vm2, %v12708_v2, %v1600_v60  ;;  %v8459_v46 = vadd.f32 %v12709_v38, %v1122_v49  ;;  %v8472_v60 = vadd.f32 %v795_v6, %v519_v39  ;;  %v12713_v26 = vrot.slane %v12712_v15, 2  ;;  %v12719_v49 = vld [vmem:[#allocation89_spill] sm:$0xff]  ;;  %v12722_v15 = vld [vmem:[#allocation90_spill] sm:$0xff] }
 0x147   : > { %v1364_v57 = vsel %vm745_vm1, %v12711_v59, %v12290_v53  ;;  %v674_v63 = vmul.f32 %v8171_v44, %v12714_v14  ;;  %v12716_v51 = vrot.slane %v12715_v3, 1  ;;  %v1935_v1 = vrot.slane %v8450_v32, 1 }
 0x148   : > { %v1609_v43 = vsel %vm991_vm2, %v12713_v26, %v12289_v52  ;;  %v8491_v31 = vmul.f32 %v8183_v36, %v12714_v14  ;;  %v12718_v58 = vrot.slane %v12717_v10, 2  ;;  %v1248_v16 = vmul.f32 %v8199_v41, %v12714_v14 }
 0x149   : > { %v1934_v0 = vsel %vm745_vm1, %v12716_v51, %v1933_v62  ;;  %v787_v37 = vrot.slane %v674_v63, 1  ;;  %v1493_v23 = vmul.f32 %v8216_v47, %v12714_v14  ;;  %v517_v5 = vmul.f32 %v8260_v54, %v12714_v14 }
 0x14a   : > { %v2179_v48 = vsel %vm991_vm2, %v12718_v58, %v12292_v42  ;;  %v1033_v61 = vrot.slane %v8491_v31, 2  ;;  %v1167_v18 = vmul.f32 %v8209_v25, %v12714_v14  ;;  %v12720_v6 = vrot.slane %v12719_v49, 1  ;;  %v12724_v31 = vld [vmem:[#allocation94_spill] sm:$0xff]  ;;  %v12726_v49 = vld [vmem:[#allocation95_spill] sm:$0xff] }
 0x14b   : > { %v1358_v2 = vrot.slane %v1248_v16, 1  ;;  %v1603_v39 = vrot.slane %v1493_v23, 2  ;;  %v1692_v38 = vadd.f32 %v1601_v8, %v1447_v33  ;;  %v12723_v26 = vrot.slane %v12722_v15, 2  ;;  %v12732_v42 = vld [vmem:[#allocation98_spill] sm:$0xff] }
 0x14c   : > { %v788_v32 = vsel %vm745_vm1, %v12720_v6, %v787_v37  ;;  %v1740_v3 = vmul.f32 %v8359_v28, %v12714_v14  ;;  %v1820_v51 = vmul.f32 %v8272_v19, %v12714_v14  ;;  %v12725_v10 = vrot.slane %v12724_v31, 1 }
 0x14d   : > { %v874_v59 = vadd.f32 %v788_v32, %v12721_v7  ;;  %v1034_v63 = vsel %vm991_vm2, %v12723_v26, %v1033_v61  ;;  %v12727_v16 = vrot.slane %v12726_v49, 2  ;;  %v2065_v33 = vmul.f32 %v8310_v50, %v12714_v14  ;;  %v12729_v14 = vld [vmem:[#allocation97_spill] sm:$0xff] }
 0x14e   : > { %v1359_v58 = vsel %vm745_vm1, %v12725_v10, %v1358_v2  ;;  %v675_v23 = vmul.f32 %v8171_v44, %v608_v27  ;;  %v1928_v7 = vrot.slane %v1820_v51, 1  ;;  %v921_v15 = vmul.f32 %v8183_v36, %v608_v27 }
 0x14f   : > { %v1604_v8 = vsel %vm991_vm2, %v12727_v16, %v1603_v39  ;;  %v1120_v6 = vadd.f32 %v1034_v63, %v874_v59  ;;  %v1448_v32 = vadd.f32 %v1359_v58, %v8267_v29  ;;  %v2173_v26 = vrot.slane %v2065_v33, 2  ;;  %v12728_v16 = vld [vmem:[#allocation107_spill] sm:$0xff] }
 0x150   : > { %v789_v52 = vrot.slane %v675_v23, 1  ;;  %v1249_v31 = vmul.f32 %v8199_v41, %v608_v27  ;;  %v1494_v10 = vmul.f32 %v8216_v47, %v608_v27  ;;  %v1199_v49 = vadd.f32 %v1167_v18, %v8420_v9  ;;  %v12731_v23 = vld [vmem:[#allocation110_spill] sm:$0xff] }
 0x151   : > { %v1200_v53 = vadd.f32 %v12728_v16, %v1120_v6  ;;  %v1693_v30 = vadd.f32 %v1604_v8, %v1448_v32  ;;  %v12730_v45 = vrot.slane %v12729_v14, 1  ;;  %v1772_v63 = vadd.f32 %v1740_v3, %v1692_v38  ;;  %v623_v14 = vpop.permute.xlu1 %622 }
 0x152   : > { %v790_v51 = vsel %vm745_vm1, %v787_v37, %v789_v52  ;;  %v1360_v58 = vrot.slane %v1249_v31, 1  ;;  %v12733_v21 = vrot.slane %v12732_v42, 2  ;;  %v1035_v18 = vrot.slane %v921_v15, 2  ;;  %v12734_v37 = vld [vmem:[#allocation119_spill] sm:$0xff] }
 0x153   : > { %v1929_v59 = vsel %vm745_vm1, %v12730_v45, %v1928_v7  ;;  %v1450_v33 = vadd.f32 %v1364_v57, %v1200_v53  ;;  %v1773_v35 = vadd.f32 %v12731_v23, %v1693_v30  ;;  %v1605_v32 = vrot.slane %v1494_v10, 2 }
 0x154   : > { %v2021_v29 = vadd.f32 %v1929_v59, %v8377_v24  ;;  %v2174_v9 = vsel %vm991_vm2, %v12733_v21, %v2173_v26  ;;  %v1361_v8 = vsel %vm745_vm1, %v1358_v2, %v1360_v58  ;;  %v1821_v45 = vmul.f32 %v8272_v19, %v608_v27 }
 0x155   : > { %v1695_v38 = vadd.f32 %v1609_v43, %v1450_v33  ;;  %v2023_v3 = vadd.f32 %v1934_v0, %v1773_v35  ;;  %v875_v24 = vadd.f32 %v790_v51, %v517_v5  ;;  %v1449_v16 = vadd.f32 %v1361_v8, %v1199_v49  ;;  %v12735_v5 = vld [vmem:[#allocation112_spill] sm:$0xff] }
 0x156   : > { %v2266_v6 = vadd.f32 %v2174_v9, %v2021_v29  ;;  %v1606_v53 = vsel %vm991_vm2, %v1603_v39, %v1605_v32  ;;  %v1930_v57 = vrot.slane %v1821_v45, 1  ;;  %v2066_v30 = vmul.f32 %v8310_v50, %v608_v27  ;;  %v12740_v32 = vld [vmem:[#allocation120_spill] sm:$0xff] }
 0x157   : > { %v1742_v42 = vmul.f32 %v8359_v28, %v12700_v17  ;;  %v8550_v21 = vadd.f32 %v12734_v37, %v1695_v38  ;;  %v2268_v2 = vadd.f32 %v2179_v48, %v2023_v3  ;;  %v1694_v15 = vadd.f32 %v1606_v53, %v1449_v16 }
 0x158   : > { %v2298_v52 = vmax.f32 %v2266_v6, 0.0  ;;  %v1936_v35 = vsel %vm745_vm1, %v1933_v62, %v1935_v1  ;;  %v1931_v43 = vsel %vm745_vm1, %v1928_v7, %v1930_v57  ;;  %v2175_v0 = vrot.slane %v2066_v30, 2 }
 0x159   : > { %v683_v27 = vmul.f32 %v8171_v44, %v12735_v5  ;;  %v2300_v39 = vmax.f32 %v2268_v2, 0.0  ;;  %v1036_v31 = vsel %vm991_vm2, %v1033_v61, %v1035_v18  ;;  %v1774_v10 = vadd.f32 %v1742_v42, %v1694_v15  ;;  %v12745_v2 = vld [vmem:[#allocation121_spill] sm:$0xff] }
 0x15a   : > { %2331 = vst.msk [vmem:[#allocation2 + $0xa9] sm:$0xff] %vm226_vm0, %v2298_v52  ;;  %v2022_v49 = vadd.f32 %v1931_v43, %v1772_v63  ;;  %v1121_v48 = vadd.f32 %v1036_v31, %v875_v24  ;;  %v2176_v59 = vsel %vm991_vm2, %v2173_v26, %v2175_v0  ;;  %v8563_v62 = vmul.f32 %v8183_v36, %v12735_v5  ;;  %v12742_v24 = vld [vmem:[#allocation123_spill] sm:$0xff] }
 0x15b   : > { %v802_v22 = vrot.slane %v683_v27, 1  ;;  %v1610_v1 = vrot.slane %v8467_v56, 2  ;;  %v1169_v7 = vmul.f32 %v8209_v25, %v12700_v17  ;;  %2333 = vst.msk [vmem:[#allocation2 + $0xc1] sm:$0xff] %vm226_vm0, %v2300_v39  ;;  %v2024_v29 = vadd.f32 %v1936_v35, %v1774_v10 }
 0x15c   : > { %v2267_v61 = vadd.f32 %v2176_v59, %v2022_v49  ;;  %v12736_v63 = vrot.slane %v8470_v34, 2  ;;  %v12737_v51 = vrot.slane %v8424_v4, 2  ;;  %v12295_v58 = vrot.slane %v8563_v62, 2 }
 0x15d   : > { %v8577_v33 = vmul.f32 %v8199_v41, %v12735_v5  ;;  %v684_v56 = vmul.f32 %v8171_v44, %v623_v14  ;;  %v12738_v17 = vrot.slane %v8441_v12, 2  ;;  %v12739_v23 = vrot.slane %v8385_v11, 2 }
 0x15e   : > { %v2181_v26 = vsel %vm991_vm2, %v12737_v51, %v12736_v63  ;;  %v2299_v34 = vmax.f32 %v2267_v61, 0.0  ;;  %v8587_v4 = vmul.f32 %v8216_v47, %v12735_v5  ;;  %v1201_v6 = vadd.f32 %v1169_v7, %v1121_v48 }
 0x15f   : > { %v1041_v9 = vsel %vm991_vm2, %v12739_v23, %v12738_v17  ;;  %v2269_v18 = vadd.f32 %v2181_v26, %v2024_v29  ;;  %v8591_v8 = vmul.f32 %v8272_v19, %v12735_v5  ;;  %v12741_v45 = vrot.slane %v12740_v32, 1  ;;  %v12771_v26 = vld [vmem:[#allocation118_spill] sm:$0xff] }
 0x160   : > { %v804_v12 = vrot.slane %v684_v56, 1  ;;  %2332 = vst.msk [vmem:[#allocation2 + $0xb1] sm:$0xff] %vm226_vm0, %v2299_v34  ;;  %v8599_v11 = vmul.f32 %v8310_v50, %v12735_v5  ;;  %v8603_v52 = vmul.f32 %v8183_v36, %v623_v14  ;;  %v1123_v53 = vadd.f32 %v1041_v9, %v8472_v60  ;;  %v12751_v56 = vld [vmem:[#allocation125_spill] sm:$0xff]  ;;  %v12753_v9 = vld [vmem:[#allocation100_spill] sm:$0xff] }
 0x161   : > { %v803_v38 = vsel %vm745_vm1, %v12741_v45, %v802_v22  ;;  %v2301_v3 = vmax.f32 %v2269_v18, 0.0  ;;  %v12743_v57 = vrot.slane %v8447_v55, 1  ;;  %v12744_v30 = vrot.slane %v8399_v40, 1 }
 0x162   : > { %v880_v16 = vadd.f32 %v803_v38, %v12742_v24  ;;  %v12294_v37 = vrot.slane %v8577_v33, 1  ;;  %v12746_v15 = vrot.slane %v12745_v2, 2  ;;  %v12293_v43 = vrot.slane %v8587_v4, 2 }
 0x163   : > { %v1366_v42 = vsel %vm745_vm1, %v12744_v30, %v12743_v57  ;;  %2334 = vst.msk [vmem:[#allocation2 + $0xc9] sm:$0xff] %vm226_vm0, %v2301_v3  ;;  %v805_v60 = vsel %vm745_vm1, %v802_v22, %v804_v12  ;;  %v8621_v55 = vmul.f32 %v8199_v41, %v623_v14  ;;  %v12747_v40 = vrot.slane %v8406_v20, 2  ;;  %v12748_v22 = vld [vmem:[#allocation136_spill] sm:$0xff]  ;;  %v12756_v12 = vld [vmem:[#allocation127_spill] sm:$0xff] }
 0x164   : > { %v1049_v35 = vsel %vm991_vm2, %v12746_v15, %v12295_v58  ;;  %v523_v39 = vmul.f32 %v8260_v54, %v12735_v5  ;;  %v1943_v31 = vrot.slane %v8591_v8, 1  ;;  %v1830_v10 = vmul.f32 %v8272_v19, %v623_v14  ;;  %v12749_v20 = vld [vmem:[#allocation124_spill] sm:$0xff] }
 0x165   : > { %v1126_v0 = vadd.f32 %v1049_v35, %v880_v16  ;;  %v1611_v27 = vsel %vm991_vm2, %v12747_v40, %v1610_v1  ;;  %v1451_v49 = vadd.f32 %v1366_v42, %v1201_v6  ;;  %v2188_v48 = vrot.slane %v8599_v11, 2  ;;  %v12754_v6 = vld [vmem:[#allocation126_spill] sm:$0xff] }
 0x166   : > { %v8635_v29 = vadd.f32 %v805_v60, %v523_v39  ;;  %v12750_v1 = vrot.slane %v12749_v20, 1  ;;  %v8643_v63 = vmul.f32 %v8216_v47, %v623_v14  ;;  %v8646_v51 = vmul.f32 %v8310_v50, %v623_v14  ;;  %v618_v60 = vpop.permute.xlu0 %617 }
 0x167   : > { %v8633_v7 = vadd.f32 %v12748_v22, %v1126_v0  ;;  %v12752_v17 = vrot.slane %v12751_v56, 2  ;;  %v680_v18 = vmul.f32 %v8171_v44, %v12753_v9  ;;  %v8658_v34 = vmul.f32 %v8183_v36, %v12753_v9  ;;  %v12758_v0 = vld [vmem:[#allocation109_spill] sm:$0xff] }
 0x168   : > { %v1374_v61 = vsel %vm745_vm1, %v12750_v1, %v12294_v37  ;;  %v12755_v8 = vrot.slane %v12754_v6, 1  ;;  %v1945_v32 = vrot.slane %v1830_v10, 1  ;;  %v1254_v45 = vmul.f32 %v8199_v41, %v12753_v9  ;;  %v12760_v1 = vld [vmem:[#allocation114_spill] sm:$0xff]  ;;  %v12763_v6 = vld [vmem:[#allocation113_spill] sm:$0xff] }
 0x169   : > { %v1619_v23 = vsel %vm991_vm2, %v12752_v17, %v12293_v43  ;;  %v1499_v38 = vmul.f32 %v8216_v47, %v12753_v9  ;;  %v12757_v3 = vrot.slane %v12756_v12, 2  ;;  %v797_v16 = vrot.slane %v680_v18, 1  ;;  %v12761_v17 = vld [vmem:[#allocation111_spill] sm:$0xff] }
 0x16a   : > { %v1944_v14 = vsel %vm745_vm1, %v12755_v8, %v1943_v31  ;;  %v1043_v57 = vrot.slane %v8658_v34, 2  ;;  %v1171_v30 = vmul.f32 %v8209_v25, %v12753_v9  ;;  %v2190_v42 = vrot.slane %v8646_v51, 2  ;;  %v12770_v43 = vld [vmem:[#allocation131_spill] sm:$0xff] }
 0x16b   : > { %v2189_v24 = vsel %vm991_vm2, %v12757_v3, %v2188_v48  ;;  %v521_v2 = vmul.f32 %v8260_v54, %v12753_v9  ;;  %v1368_v15 = vrot.slane %v1254_v45, 1  ;;  %v1613_v35 = vrot.slane %v1499_v38, 2  ;;  %v12765_v38 = vld [vmem:[#allocation115_spill] sm:$0xff] }
 0x16c   : > { %v12759_v40 = vrot.slane %v12758_v0, 1  ;;  %v1203_v10 = vadd.f32 %v1171_v30, %v1123_v53  ;;  %v1696_v22 = vadd.f32 %v1611_v27, %v1451_v49  ;;  %v1826_v20 = vmul.f32 %v8272_v19, %v12753_v9  ;;  %v12775_v51 = vld [vmem:[#allocation139_spill] sm:$0xff] }
 0x16d   : > { %v12762_v18 = vrot.slane %v12761_v17, 2  ;;  %v12764_v8 = vrot.slane %v12763_v6, 1  ;;  %v12766_v12 = vrot.slane %v12765_v38, 2  ;;  %v2071_v49 = vmul.f32 %v8310_v50, %v12753_v9 }
 0x16e   : > { %v798_v39 = vsel %vm745_vm1, %v12759_v40, %v797_v16  ;;  %v1938_v27 = vrot.slane %v1826_v20, 1  ;;  %v681_v30 = vmul.f32 %v8171_v44, %v618_v60  ;;  %v927_v40 = vmul.f32 %v8183_v36, %v618_v60  ;;  %v12769_v20 = vld [vmem:[#allocation128_spill] sm:$0xff] }
 0x16f   : > { %v878_v56 = vadd.f32 %v798_v39, %v12760_v1  ;;  %v1044_v34 = vsel %vm991_vm2, %v12762_v18, %v1043_v57  ;;  %v1369_v45 = vsel %vm745_vm1, %v12764_v8, %v1368_v15  ;;  %v1614_v3 = vsel %vm991_vm2, %v12766_v12, %v1613_v35  ;;  %v12767_v18 = vld [vmem:[#allocation116_spill] sm:$0xff] }
 0x170   : > { %v1452_v53 = vadd.f32 %v1369_v45, %v8459_v46  ;;  %v1255_v39 = vmul.f32 %v8199_v41, %v618_v60  ;;  %v1500_v1 = vmul.f32 %v8216_v47, %v618_v60  ;;  %v12768_v6 = vrot.slane %v12767_v18, 1 }
 0x171   : > { %v1124_v0 = vadd.f32 %v1044_v34, %v878_v56  ;;  %v2183_v38 = vrot.slane %v2071_v49, 2  ;;  %v799_v46 = vrot.slane %v681_v30, 1  ;;  %v1744_v12 = vmul.f32 %v8359_v28, %v12753_v9 }
 0x172   : > { %v1697_v17 = vadd.f32 %v1614_v3, %v1452_v53  ;;  %v1939_v8 = vsel %vm745_vm1, %v12768_v6, %v1938_v27  ;;  %v1370_v34 = vrot.slane %v1255_v39, 1  ;;  %v12772_v58 = vrot.slane %v12771_v26, 2 }
 0x173   : > { %v1204_v45 = vadd.f32 %v12769_v20, %v1124_v0  ;;  %v2025_v56 = vadd.f32 %v1939_v8, %v8550_v21  ;;  %v800_v53 = vsel %vm745_vm1, %v797_v16, %v799_v46  ;;  %v1615_v18 = vrot.slane %v1500_v1, 2  ;;  %v633_v46 = vpop.permute.xlu1 %632 }
 0x174   : > { %v1777_v37 = vadd.f32 %v12770_v43, %v1697_v17  ;;  %v2184_v3 = vsel %vm991_vm2, %v12772_v58, %v2183_v38  ;;  %v1946_v49 = vsel %vm745_vm1, %v1943_v31, %v1945_v32  ;;  %v1776_v6 = vadd.f32 %v1744_v12, %v1696_v22  ;;  %v12774_v32 = vld [vmem:[#allocation133_spill] sm:$0xff] }
 0x175   : > { %v1454_v30 = vadd.f32 %v1374_v61, %v1204_v45  ;;  %v2270_v0 = vadd.f32 %v2184_v3, %v2025_v56  ;;  %v1045_v59 = vrot.slane %v927_v40, 2  ;;  %v1371_v9 = vsel %vm745_vm1, %v1368_v15, %v1370_v34  ;;  %v12773_v61 = vld [vmem:[#allocation140_spill] sm:$0xff] }
 0x176   : > { %v2027_v20 = vadd.f32 %v1944_v14, %v1777_v37  ;;  %v1827_v21 = vmul.f32 %v8272_v19, %v618_v60  ;;  %v879_v17 = vadd.f32 %v800_v53, %v521_v2  ;;  %v1453_v26 = vadd.f32 %v1371_v9, %v1203_v10 }
 0x177   : > { %v1699_v39 = vadd.f32 %v1619_v23, %v1454_v30  ;;  %v2302_v43 = vmax.f32 %v2270_v0, 0.0  ;;  %v1616_v58 = vsel %vm991_vm2, %v1613_v35, %v1615_v18  ;;  %v2072_v1 = vmul.f32 %v8310_v50, %v618_v60 }
 0x178   : > { %v2272_v8 = vadd.f32 %v2189_v24, %v2027_v20  ;;  %v1940_v16 = vrot.slane %v1827_v21, 1  ;;  %v1746_v31 = vmul.f32 %v8359_v28, %v12735_v5  ;;  %v1698_v14 = vadd.f32 %v1616_v58, %v1453_v26 }
 0x179   : > { %v8720_v37 = vadd.f32 %v12773_v61, %v1699_v39  ;;  %2335 = vst.msk [vmem:[#allocation2 + $0xd9] sm:$0xff] %vm226_vm0, %v2302_v43  ;;  %v689_v23 = vmul.f32 %v8171_v44, %v12774_v32  ;;  %v2185_v15 = vrot.slane %v2072_v1, 2  ;;  %v8728_v35 = vmul.f32 %v8183_v36, %v12774_v32  ;;  %v12779_v39 = vld [vmem:[#allocation144_spill] sm:$0xff] }
 0x17a   : > { %v2304_v2 = vmax.f32 %v2272_v8, 0.0  ;;  %v1941_v24 = vsel %vm745_vm1, %v1938_v27, %v1940_v16  ;;  %v1046_v60 = vsel %vm991_vm2, %v1043_v57, %v1045_v59  ;;  %v1778_v10 = vadd.f32 %v1746_v31, %v1698_v14 }
 0x17b   : > { %v2026_v22 = vadd.f32 %v1941_v24, %v1776_v6  ;;  %v812_v40 = vrot.slane %v689_v23, 1  ;;  %v2191_v45 = vsel %vm991_vm2, %v2188_v48, %v2190_v42  ;;  %v1173_v27 = vmul.f32 %v8209_v25, %v12735_v5 }
 0x17c   : > { %2337 = vst.msk [vmem:[#allocation2 + $0xf1] sm:$0xff] %vm226_vm0, %v2304_v2  ;;  %v1125_v12 = vadd.f32 %v1046_v60, %v879_v17  ;;  %v2186_v56 = vsel %vm991_vm2, %v2183_v38, %v2185_v15  ;;  %v2028_v34 = vadd.f32 %v1946_v49, %v1778_v10  ;;  %v12299_v57 = vrot.slane %v8728_v35, 2 }
 0x17d   : > { %v2271_v59 = vadd.f32 %v2186_v56, %v2026_v22  ;;  %v8743_v3 = vmul.f32 %v8199_v41, %v12774_v32  ;;  %v8747_v11 = vmul.f32 %v8216_v47, %v12774_v32  ;;  %v8751_v5 = vmul.f32 %v8272_v19, %v12774_v32 }
 0x17e   : > { %v690_v48 = vmul.f32 %v8171_v44, %v633_v46  ;;  %v12776_v42 = vrot.slane %v12775_v51, 1  ;;  %v12777_v53 = vrot.slane %v8603_v52, 2  ;;  %v12778_v18 = vrot.slane %v8563_v62, 2 }
 0x17f   : > { %v1620_v30 = vrot.slane %v8643_v63, 2  ;;  %v2273_v6 = vadd.f32 %v2191_v45, %v2028_v34  ;;  %v2303_v0 = vmax.f32 %v2271_v59, 0.0  ;;  %v1205_v20 = vadd.f32 %v1173_v27, %v1125_v12  ;;  %v12780_v63 = vld [vmem:[#allocation141_spill] sm:$0xff] }
 0x180   : > { %v813_v38 = vsel %vm745_vm1, %v12776_v42, %v812_v40  ;;  %v1051_v49 = vsel %vm991_vm2, %v12778_v18, %v12777_v53  ;;  %v8765_v9 = vmul.f32 %v8310_v50, %v12774_v32  ;;  %v814_v21 = vrot.slane %v690_v48, 1  ;;  %v12788_v59 = vld [vmem:[#allocation145_spill] sm:$0xff]  ;;  %v12790_v42 = vld [vmem:[#allocation146_spill] sm:$0xff] }
 0x181   : > { %v884_v43 = vadd.f32 %v813_v38, %v12779_v39  ;;  %v2305_v17 = vmax.f32 %v2273_v6, 0.0  ;;  %2336 = vst.msk [vmem:[#allocation2 + $0xe1] sm:$0xff] %vm226_vm0, %v2303_v0  ;;  %v12298_v52 = vrot.slane %v8743_v3, 1  ;;  %v8771_v62 = vmul.f32 %v8183_v36, %v633_v46  ;;  %v12792_v18 = vld [vmem:[#allocation122_spill] sm:$0xff] }
 0x182   : > { %v12781_v26 = vrot.slane %v12780_v63, 2  ;;  %v1127_v58 = vadd.f32 %v1051_v49, %v8635_v29  ;;  %v12296_v16 = vrot.slane %v8747_v11, 2  ;;  %v12300_v1 = vrot.slane %v8751_v5, 1 }
 0x183   : > { %v12782_v61 = vrot.slane %v8621_v55, 1  ;;  %v12783_v14 = vrot.slane %v8577_v33, 1  ;;  %v12784_v2 = vrot.slane %v8587_v4, 2  ;;  %2338 = vst.msk [vmem:[#allocation2 + $0xf9] sm:$0xff] %vm226_vm0, %v2305_v17  ;;  %v815_v15 = vsel %vm745_vm1, %v812_v40, %v814_v21  ;;  %v12785_v33 = vld [vmem:[#allocation158_spill] sm:$0xff]  ;;  %v12793_v21 = vld [vmem:[#allocation148_spill] sm:$0xff] }
 0x184   : > { %v1059_v8 = vsel %vm991_vm2, %v12781_v26, %v12299_v57  ;;  %v8792_v29 = vmul.f32 %v8272_v19, %v633_v46  ;;  %v527_v10 = vmul.f32 %v8260_v54, %v12774_v32  ;;  %v12297_v55 = vrot.slane %v8765_v9, 2  ;;  %v12786_v40 = vld [vmem:[#allocation142_spill] sm:$0xff] }
 0x185   : > { %v1130_v31 = vadd.f32 %v1059_v8, %v884_v43  ;;  %v1376_v23 = vsel %vm745_vm1, %v12783_v14, %v12782_v61  ;;  %v1621_v24 = vsel %vm991_vm2, %v12784_v2, %v1620_v30  ;;  %v8802_v45 = vmul.f32 %v8199_v41, %v633_v46  ;;  %v628_v14 = vpop.permute.xlu0 %627  ;;  %v12808_v57 = vld [vmem:[#allocation138_spill] sm:$0xff] }
 0x186   : > { %v1455_v60 = vadd.f32 %v1376_v23, %v1205_v20  ;;  %v12787_v27 = vrot.slane %v12786_v40, 1  ;;  %v8810_v56 = vmul.f32 %v8216_v47, %v633_v46  ;;  %v8812_v34 = vadd.f32 %v815_v15, %v527_v10  ;;  %v12795_v23 = vld [vmem:[#allocation129_spill] sm:$0xff] }
 0x187   : > { %v8798_v22 = vadd.f32 %v12785_v33, %v1130_v31  ;;  %v12789_v48 = vrot.slane %v12788_v59, 2  ;;  %v12791_v38 = vrot.slane %v12790_v42, 1  ;;  %v686_v49 = vmul.f32 %v8171_v44, %v12792_v18 }
 0x188   : > { %v1384_v12 = vsel %vm745_vm1, %v12787_v27, %v12298_v52  ;;  %v1955_v30 = vrot.slane %v8792_v29, 1  ;;  %v8828_v6 = vmul.f32 %v8310_v50, %v633_v46  ;;  %v932_v0 = vmul.f32 %v8183_v36, %v12792_v18  ;;  %v12797_v27 = vld [vmem:[#allocation134_spill] sm:$0xff] }
 0x189   : > { %v1629_v51 = vsel %vm991_vm2, %v12789_v48, %v12296_v16  ;;  %v1954_v53 = vsel %vm745_vm1, %v12791_v38, %v12300_v1  ;;  %v1175_v20 = vmul.f32 %v8209_v25, %v12792_v18  ;;  %v12794_v39 = vrot.slane %v12793_v21, 2  ;;  %v12798_v48 = vld [vmem:[#allocation130_spill] sm:$0xff]  ;;  %v12805_v16 = vld [vmem:[#allocation137_spill] sm:$0xff] }
 0x18a   : > { %v807_v17 = vrot.slane %v686_v49, 1  ;;  %v1260_v63 = vmul.f32 %v8199_v41, %v12792_v18  ;;  %v1505_v46 = vmul.f32 %v8216_v47, %v12792_v18  ;;  %v525_v26 = vmul.f32 %v8260_v54, %v12792_v18 }
 0x18b   : > { %v2199_v43 = vsel %vm991_vm2, %v12794_v39, %v12297_v55  ;;  %v1053_v8 = vrot.slane %v932_v0, 2  ;;  %v1207_v31 = vadd.f32 %v1175_v20, %v1127_v58  ;;  %v1700_v61 = vadd.f32 %v1621_v24, %v1455_v60  ;;  %v12800_v24 = vld [vmem:[#allocation132_spill] sm:$0xff]  ;;  %v12802_v0 = vld [vmem:[#allocation135_spill] sm:$0xff] }
 0x18c   : > { %v12796_v2 = vrot.slane %v12795_v23, 1  ;;  %v1378_v10 = vrot.slane %v1260_v63, 1  ;;  %v1623_v33 = vrot.slane %v1505_v46, 2  ;;  %v1748_v40 = vmul.f32 %v8359_v28, %v12792_v18 }
 0x18d   : > { %v12799_v42 = vrot.slane %v12798_v48, 2  ;;  %v1750_v54 = vmul.f32 %v8359_v28, %v12774_v32  ;;  %v1832_v58 = vmul.f32 %v8272_v19, %v12792_v18  ;;  %v12801_v60 = vrot.slane %v12800_v24, 1 }
 0x18e   : > { %v808_v15 = vsel %vm745_vm1, %v12796_v2, %v807_v17  ;;  %v12803_v20 = vrot.slane %v12802_v0, 2  ;;  %v2077_v39 = vmul.f32 %v8310_v50, %v12792_v18  ;;  %v687_v63 = vmul.f32 %v8171_v44, %v628_v14 }
 0x18f   : > { %v882_v59 = vadd.f32 %v808_v15, %v12797_v27  ;;  %v1054_v38 = vsel %vm991_vm2, %v12799_v42, %v1053_v8  ;;  %v1379_v49 = vsel %vm745_vm1, %v12801_v60, %v1378_v10  ;;  %v1948_v2 = vrot.slane %v1832_v58, 1  ;;  %v12804_v60 = vld [vmem:[#allocation147_spill] sm:$0xff] }
 0x190   : > { %v1624_v21 = vsel %vm991_vm2, %v12803_v20, %v1623_v33  ;;  %v1456_v23 = vadd.f32 %v1379_v49, %v8633_v7  ;;  %v933_v15 = vmul.f32 %v8183_v36, %v628_v14  ;;  %v2193_v27 = vrot.slane %v2077_v39, 2  ;;  %v12807_v39 = vld [vmem:[#allocation150_spill] sm:$0xff] }
 0x191   : > { %v1128_v46 = vadd.f32 %v1054_v38, %v882_v59  ;;  %v809_v48 = vrot.slane %v687_v63, 1  ;;  %v1261_v42 = vmul.f32 %v8199_v41, %v628_v14  ;;  %v1506_v24 = vmul.f32 %v8216_v47, %v628_v14 }
 0x192   : > { %v1701_v20 = vadd.f32 %v1624_v21, %v1456_v23  ;;  %v12806_v55 = vrot.slane %v12805_v16, 1  ;;  %v1055_v52 = vrot.slane %v933_v15, 2  ;;  %v1780_v59 = vadd.f32 %v1748_v40, %v1700_v61 }
 0x193   : > { %v1208_v0 = vadd.f32 %v12804_v60, %v1128_v46  ;;  %v810_v38 = vsel %vm745_vm1, %v807_v17, %v809_v48  ;;  %v1380_v58 = vrot.slane %v1261_v42, 1  ;;  %v12809_v4 = vrot.slane %v12808_v57, 2  ;;  %v12810_v42 = vld [vmem:[#allocation160_spill] sm:$0xff] }
 0x194   : > { %v1949_v18 = vsel %vm745_vm1, %v12806_v55, %v1948_v2  ;;  %v1781_v63 = vadd.f32 %v12807_v39, %v1701_v20  ;;  %v883_v46 = vadd.f32 %v810_v38, %v525_v26  ;;  %v1625_v23 = vrot.slane %v1506_v24, 2 }
 0x195   : > { %v2029_v7 = vadd.f32 %v1949_v18, %v8720_v37  ;;  %v1458_v49 = vadd.f32 %v1384_v12, %v1208_v0  ;;  %v2194_v1 = vsel %vm991_vm2, %v12809_v4, %v2193_v27  ;;  %v1381_v16 = vsel %vm745_vm1, %v1378_v10, %v1380_v58 }
 0x196   : > { %v1833_v55 = vmul.f32 %v8272_v19, %v628_v14  ;;  %v2031_v40 = vadd.f32 %v1954_v53, %v1781_v63  ;;  %v1056_v37 = vsel %vm991_vm2, %v1053_v8, %v1055_v52  ;;  %v1457_v17 = vadd.f32 %v1381_v16, %v1207_v31 }
 0x197   : > { %v2274_v21 = vadd.f32 %v2194_v1, %v2029_v7  ;;  %v1703_v61 = vadd.f32 %v1629_v51, %v1458_v49  ;;  %v1626_v12 = vsel %vm991_vm2, %v1623_v33, %v1625_v23  ;;  %v2078_v57 = vmul.f32 %v8310_v50, %v628_v14 }
 0x198   : > { %v1950_v48 = vrot.slane %v1833_v55, 1  ;;  %v2276_v1 = vadd.f32 %v2199_v43, %v2031_v40  ;;  %v1129_v26 = vadd.f32 %v1056_v37, %v883_v46  ;;  %v1702_v10 = vadd.f32 %v1626_v12, %v1457_v17 }
 0x199   : > { %v2306_v15 = vmax.f32 %v2274_v21, 0.0  ;;  %v8887_v4 = vadd.f32 %v12810_v42, %v1703_v61  ;;  %v1385_v24 = vrot.slane %v8802_v45, 1  ;;  %v2200_v51 = vrot.slane %v8828_v6, 2  ;;  %v12812_v6 = vld [vmem:[#allocation154_spill] sm:$0xff] }
 0x19a   : > { %v1951_v52 = vsel %vm745_vm1, %v1948_v2, %v1950_v48  ;;  %v2195_v53 = vrot.slane %v2078_v57, 2  ;;  %v1177_v8 = vmul.f32 %v8209_v25, %v12774_v32  ;;  %v2308_v31 = vmax.f32 %v2276_v1, 0.0  ;;  %v643_v32 = vpop.permute.xlu1 %642  ;;  %v12819_v42 = vld [vmem:[#allocation162_spill] sm:$0xff] }
 0x19b   : > { %2339 = vst.msk [vmem:[#allocation2 + $0x109] sm:$0xff] %vm226_vm0, %v2306_v15  ;;  %v1782_v14 = vadd.f32 %v1750_v54, %v1702_v10  ;;  %v2030_v33 = vadd.f32 %v1951_v52, %v1780_v59  ;;  %v12811_v43 = vrot.slane %v8751_v5, 1  ;;  %v8903_v0 = vmul.f32 %v8272_v19, %v12812_v6 }
 0x19c   : > { %v2196_v45 = vsel %vm991_vm2, %v2193_v27, %v2195_v53  ;;  %v8907_v2 = vmul.f32 %v8310_v50, %v12812_v6  ;;  %v1630_v54 = vrot.slane %v8810_v56, 2  ;;  %2341 = vst.msk [vmem:[#allocation2 + $0x121] sm:$0xff] %vm226_vm0, %v2308_v31  ;;  %v1209_v29 = vadd.f32 %v1177_v8, %v1129_v26  ;;  %v638_v31 = vpop.permute.xlu0 %637 }
 0x19d   : > { %v1956_v60 = vsel %vm745_vm1, %v12811_v43, %v1955_v30  ;;  %v2275_v5 = vadd.f32 %v2196_v45, %v2030_v33  ;;  %v12813_v30 = vrot.slane %v8771_v62, 2  ;;  %v12814_v27 = vrot.slane %v8728_v35, 2  ;;  %v12822_v45 = vld [vmem:[#allocation152_spill] sm:$0xff] }
 0x19e   : > { %v2032_v20 = vadd.f32 %v1956_v60, %v1782_v14  ;;  %v12815_v59 = vrot.slane %v8743_v3, 1  ;;  %v12816_v38 = vrot.slane %v8765_v9, 2  ;;  %v8924_v56 = vmul.f32 %v8199_v41, %v12812_v6 }
 0x19f   : > { %v1061_v18 = vsel %vm991_vm2, %v12814_v27, %v12813_v30  ;;  %v2307_v39 = vmax.f32 %v2275_v5, 0.0  ;;  %v8927_v62 = vmul.f32 %v8171_v44, %v643_v32  ;;  %v8930_v35 = vmul.f32 %v8183_v36, %v643_v32  ;;  %v9006_v27 = vld [vmem:[%s12143_s1 + $0x5] ss:$0 sm:$0xff] }
 0x1a0   : > { %v1386_v7 = vsel %vm745_vm1, %v12815_v59, %v1385_v24  ;;  %v2201_v58 = vsel %vm991_vm2, %v12816_v38, %v2200_v51  ;;  %v1963_v3 = vrot.slane %v8903_v0, 1  ;;  %v2208_v63 = vrot.slane %v8907_v2, 2  ;;  %v12824_v59 = vld [vmem:[#allocation153_spill] sm:$0xff]  ;;  %v9061_v2 = vld [vmem:[%s12143_s1 + $0x9] ss:$0 sm:$0xff] }
 0x1a1   : > { %v2277_v49 = vadd.f32 %v2201_v58, %v2032_v20  ;;  %v8935_v9 = vmul.f32 %v8199_v41, %v643_v32  ;;  %v8938_v46 = vmul.f32 %v8272_v19, %v643_v32  ;;  %v1131_v21 = vadd.f32 %v1061_v18, %v8812_v34  ;;  %2340 = vst.msk [vmem:[#allocation2 + $0x111] sm:$0xff] %vm226_vm0, %v2307_v39  ;;  %v8955_v34 = vld [vmem:[%s12143_s1 + $0x1] ss:$0 sm:$0xff] }
 0x1a2   : > { %v12817_v16 = vrot.slane %v8747_v11, 2  ;;  %v1459_v23 = vadd.f32 %v1386_v7, %v1209_v29  ;;  %v1393_v36 = vrot.slane %v8924_v56, 1  ;;  %v8947_v61 = vmul.f32 %v8216_v47, %v643_v32  ;;  %v12818_v11 = vld [vmem:[#allocation143_spill] sm:$0xff] }
 0x1a3   : > { %v2309_v55 = vmax.f32 %v2277_v49, 0.0  ;;  %v8950_v40 = vmul.f32 %v8310_v50, %v643_v32  ;;  %v8959_v37 = vmul.f32 %v8955_v34, %v12818_v11  ;;  %v824_v17 = vrot.slane %v8927_v62, 1  ;;  %v9016_v49 = vld [vmem:[%s12143_s1 + $0x6] ss:$0 sm:$0xff] }
 0x1a4   : > { %v1631_v44 = vsel %vm991_vm2, %v12817_v16, %v1630_v54  ;;  %v1070_v15 = vrot.slane %v8930_v35, 2  ;;  %v1266_v12 = vmul.f32 %v8199_v41, %v12818_v11  ;;  %v1511_v48 = vmul.f32 %v8216_v47, %v12818_v11  ;;  %v8983_v41 = vld [vmem:[%s12143_s1 + $0x2] ss:$0 sm:$0xff] }
 0x1a5   : > { %2342 = vst.msk [vmem:[#allocation2 + $0x129] sm:$0xff] %vm226_vm0, %v2309_v55  ;;  %v1395_v57 = vrot.slane %v8935_v9, 1  ;;  %v12820_v1 = vrot.slane %v12819_v42, 1  ;;  %v1965_v10 = vrot.slane %v8938_v46, 1  ;;  %v12821_v24 = vrot.slane %v7832_v13, 2  ;;  %v12828_v42 = vld [vmem:[#allocation161_spill] sm:$0xff] }
 0x1a6   : > { %v8987_v47 = vmul.f32 %v8983_v41, %v12818_v11  ;;  %v1179_v52 = vmul.f32 %v8209_v25, %v12818_v11  ;;  %v1388_v53 = vrot.slane %v1266_v12, 1  ;;  %v1633_v8 = vrot.slane %v1511_v48, 2 }
 0x1a7   : > { %v1964_v26 = vsel %vm745_vm1, %v12820_v1, %v1963_v3  ;;  %v2209_v51 = vsel %vm991_vm2, %v12821_v24, %v2208_v63  ;;  %v2210_v14 = vrot.slane %v8950_v40, 2  ;;  %v817_v13 = vrot.slane %v8959_v37, 1  ;;  %v12829_v24 = vld [vmem:[#allocation159_spill] sm:$0xff] }
 0x1a8   : > { %v1838_v33 = vmul.f32 %v8272_v19, %v12818_v11  ;;  %v2083_v43 = vmul.f32 %v8310_v50, %v12818_v11  ;;  %v1211_v60 = vadd.f32 %v1179_v52, %v1131_v21  ;;  %v12823_v32 = vrot.slane %v12822_v45, 1  ;;  %v12826_v21 = vld [vmem:[#allocation157_spill] sm:$0xff] }
 0x1a9   : > { %v1704_v29 = vadd.f32 %v1631_v44, %v1459_v23  ;;  %v1752_v25 = vmul.f32 %v8359_v28, %v12818_v11  ;;  %v1267_v18 = vmul.f32 %v9006_v27, %v638_v31  ;;  %v12825_v7 = vrot.slane %v12824_v59, 2 }
 0x1aa   : > { %v1389_v54 = vsel %vm745_vm1, %v12823_v32, %v1388_v53  ;;  %v1958_v5 = vrot.slane %v1838_v33, 1  ;;  %v2203_v30 = vrot.slane %v2083_v43, 2  ;;  %v693_v58 = vmul.f32 %v8955_v34, %v638_v31 }
 0x1ab   : > { %v1460_v20 = vadd.f32 %v1389_v54, %v8798_v22  ;;  %v1634_v38 = vsel %vm991_vm2, %v12825_v7, %v1633_v8  ;;  %v1512_v22 = vmul.f32 %v9016_v49, %v638_v31  ;;  %v1839_v39 = vmul.f32 %v8272_v19, %v638_v31 }
 0x1ac   : > { %v12827_v16 = vrot.slane %v12826_v21, 1  ;;  %v939_v23 = vmul.f32 %v8983_v41, %v638_v31  ;;  %v1390_v55 = vrot.slane %v1267_v18, 1  ;;  %v1754_v40 = vmul.f32 %v8359_v28, %v12812_v6 }
 0x1ad   : > { %v1705_v46 = vadd.f32 %v1634_v38, %v1460_v20  ;;  %v1784_v37 = vadd.f32 %v1752_v25, %v1704_v29  ;;  %v1635_v48 = vrot.slane %v1512_v22, 2  ;;  %v12830_v52 = vrot.slane %v12829_v24, 2 }
 0x1ae   : > { %v1959_v44 = vsel %vm745_vm1, %v12827_v16, %v1958_v5  ;;  %v1391_v33 = vsel %vm745_vm1, %v1388_v53, %v1390_v55  ;;  %v1960_v43 = vrot.slane %v1839_v39, 1  ;;  %v819_v32 = vrot.slane %v693_v58, 1  ;;  %v12831_v39 = vld [vmem:[#allocation149_spill] sm:$0xff] }
 0x1af   : > { %v2033_v12 = vadd.f32 %v1959_v44, %v8887_v4  ;;  %v1785_v1 = vadd.f32 %v12828_v42, %v1705_v46  ;;  %v2204_v19 = vsel %vm991_vm2, %v12830_v52, %v2203_v30  ;;  %v1461_v54 = vadd.f32 %v1391_v33, %v1211_v60  ;;  %v9041_v60 = vld [vmem:[%s12143_s1] ss:$0 sm:$0xff]  ;;  %v12834_v44 = vld [vmem:[#allocation151_spill] sm:$0xff] }
 0x1b0   : > { %v2084_v20 = vmul.f32 %v8310_v50, %v638_v31  ;;  %v1065_v28 = vrot.slane %v939_v23, 2  ;;  %v1636_v29 = vsel %vm991_vm2, %v1633_v8, %v1635_v48  ;;  %v1961_v4 = vsel %vm745_vm1, %v1958_v5, %v1960_v43  ;;  %v9046_v31 = vpop.permute.xlu1 %1145 }
 0x1b1   : > { %v2278_v45 = vadd.f32 %v2204_v19, %v2033_v12  ;;  %v2035_v18 = vadd.f32 %v1964_v26, %v1785_v1  ;;  %v1706_v59 = vadd.f32 %v1636_v29, %v1461_v54  ;;  %v2034_v7 = vadd.f32 %v1961_v4, %v1784_v37  ;;  %v12836_v37 = vld [vmem:[#allocation155_spill] sm:$0xff]  ;;  %v1141_v19 = vpop.permute.xlu0 %1140 }
 0x1b2   : > { %v2205_v38 = vrot.slane %v2084_v20, 2  ;;  %v1966_v53 = vsel %vm745_vm1, %v1963_v3, %v1965_v10  ;;  %v529_v50 = vmul.f32 %v9041_v60, %v12818_v11  ;;  %v1063_v26 = vrot.slane %v8987_v47, 2 }
 0x1b3   : > { %v2310_v25 = vmax.f32 %v2278_v45, 0.0  ;;  %v2280_v8 = vadd.f32 %v2209_v51, %v2035_v18  ;;  %v2211_v5 = vsel %vm991_vm2, %v2208_v63, %v2210_v14  ;;  %v820_v0 = vsel %vm745_vm1, %v817_v13, %v819_v32  ;;  %v9070_v14 = vld [vmem:[%s12143_s1 + $0xa] ss:$0 sm:$0xff] }
 0x1b4   : > { %v1786_v3 = vadd.f32 %v1754_v40, %v1706_v59  ;;  %v2206_v10 = vsel %vm991_vm2, %v2203_v30, %v2205_v38  ;;  %v1066_v22 = vsel %vm991_vm2, %v1063_v26, %v1065_v28  ;;  %v12832_v47 = vrot.slane %v12831_v39, 1  ;;  %v9084_v40 = vld [vmem:[%s12143_s1 + $0x4] ss:$0 sm:$0xff]  ;;  %v9116_v38 = vld [vmem:[%s12143_s1 + $0x8] ss:$0 sm:$0xff] }
 0x1b5   : > { %2343 = vst.msk [vmem:[#allocation2 + $0x139] sm:$0xff] %vm226_vm0, %v2310_v25  ;;  %v2312_v58 = vmax.f32 %v2280_v8, 0.0  ;;  %v2279_v11 = vadd.f32 %v2206_v10, %v2034_v7  ;;  %v9065_v63 = vmul.f32 %v9061_v2, %v9046_v31  ;;  %v9074_v30 = vmul.f32 %v9070_v14, %v9046_v31 }
 0x1b6   : > { %v818_v51 = vsel %vm745_vm1, %v12832_v47, %v817_v13  ;;  %v2036_v46 = vadd.f32 %v1966_v53, %v1786_v3  ;;  %v12833_v13 = vld [vmem:[#allocation156_spill] sm:$0xff]  ;;  %v12835_v23 = vrot.slane %v12834_v44, 2  ;;  %v1180_v12 = vmul.f32 %v9084_v40, %v12836_v37 }
 0x1b7   : > { %v886_v21 = vadd.f32 %v818_v51, %v12833_v13  ;;  %2345 = vst.msk [vmem:[#allocation2 + $0x151] sm:$0xff] %vm226_vm0, %v2312_v58  ;;  %v2311_v16 = vmax.f32 %v2279_v11, 0.0  ;;  %v1268_v48 = vmul.f32 %v9006_v27, %v12836_v37  ;;  %v1513_v24 = vmul.f32 %v9016_v49, %v12836_v37 }
 0x1b8   : > { %v1064_v55 = vsel %vm991_vm2, %v12835_v23, %v1063_v26  ;;  %v2281_v42 = vadd.f32 %v2211_v5, %v2036_v46  ;;  %v9094_v52 = vmul.f32 %v9016_v49, %v12812_v6  ;;  %v887_v33 = vadd.f32 %v820_v0, %v529_v50 }
 0x1b9   : > { %v1132_v1 = vadd.f32 %v1064_v55, %v886_v21  ;;  %2344 = vst.msk [vmem:[#allocation2 + $0x141] sm:$0xff] %vm226_vm0, %v2311_v16  ;;  %v9099_v43 = vmul.f32 %v9006_v27, %v9046_v31  ;;  %v9103_v45 = vmul.f32 %v9016_v49, %v9046_v31  ;;  %v1392_v32 = vrot.slane %v1268_v48, 1 }
 0x1ba   : > { %v2313_v54 = vmax.f32 %v2281_v42, 0.0  ;;  %v1637_v18 = vrot.slane %v1513_v24, 2  ;;  %v1638_v28 = vrot.slane %v9094_v52, 2  ;;  %v1968_v29 = vrot.slane %v9065_v63, 1  ;;  %v1220_v52 = vpop.permute.xlu0 %1219 }
 0x1bb   : > { %v1212_v20 = vadd.f32 %v1180_v12, %v1132_v1  ;;  %v2213_v4 = vrot.slane %v9074_v30, 2  ;;  %v1394_v25 = vsel %vm745_vm1, %v1392_v32, %v1393_v36  ;;  %v1271_v59 = vmul.f32 %v9006_v27, %v1141_v19 }
 0x1bc   : > { %2346 = vst.msk [vmem:[#allocation2 + $0x159] sm:$0xff] %vm226_vm0, %v2313_v54  ;;  %v1755_v53 = vmul.f32 %v9116_v38, %v1141_v19  ;;  %v1843_v50 = vmul.f32 %v9061_v2, %v1141_v19  ;;  %v2088_v26 = vmul.f32 %v9070_v14, %v1141_v19  ;;  %v1639_v8 = vsel %vm991_vm2, %v1637_v18, %v1638_v28 }
 0x1bd   : > { %v1462_v7 = vadd.f32 %v1394_v25, %v1212_v20  ;;  %v695_v5 = vmul.f32 %v8955_v34, %v12812_v6  ;;  %v9126_v0 = vmul.f32 %v8983_v41, %v12812_v6  ;;  %v694_v3 = vmul.f32 %v8955_v34, %v12836_v37 }
 0x1be   : > { %v1516_v58 = vmul.f32 %v9016_v49, %v1141_v19  ;;  %v1967_v11 = vrot.slane %v1843_v50, 1  ;;  %v940_v39 = vmul.f32 %v8983_v41, %v12836_v37  ;;  %v2212_v47 = vrot.slane %v2088_v26, 2 }
 0x1bf   : > { %v1707_v10 = vadd.f32 %v1639_v8, %v1462_v7  ;;  %v822_v51 = vrot.slane %v695_v5, 1  ;;  %v1068_v46 = vrot.slane %v9126_v0, 2  ;;  %v821_v13 = vrot.slane %v694_v3, 1 }
 0x1c0   : > { %v1969_v16 = vsel %vm745_vm1, %v1967_v11, %v1968_v29  ;;  %v530_v34 = vmul.f32 %v9041_v60, %v12836_v37  ;;  %v1067_v44 = vrot.slane %v940_v39, 2  ;;  %v1133_v23 = vadd.f32 %v1066_v22, %v887_v33  ;;  %v1716_v37 = vpop.permute.xlu1 %1715 }
 0x1c1   : > { %v1787_v21 = vadd.f32 %v1755_v53, %v1707_v10  ;;  %v1398_v55 = vrot.slane %v9099_v43, 1  ;;  %v1397_v12 = vrot.slane %v1271_v59, 1  ;;  %v823_v41 = vsel %vm745_vm1, %v821_v13, %v822_v51 }
 0x1c2   : > { %v1643_v48 = vrot.slane %v9103_v45, 2  ;;  %v1182_v42 = vmul.f32 %v9084_v40, %v1141_v19  ;;  %v888_v24 = vadd.f32 %v823_v41, %v530_v34  ;;  %v1642_v32 = vrot.slane %v1516_v58, 2 }
 0x1c3   : > { %v2037_v1 = vadd.f32 %v1969_v16, %v1787_v21  ;;  %v2214_v54 = vsel %vm991_vm2, %v2212_v47, %v2213_v4  ;;  %v1069_v22 = vsel %vm991_vm2, %v1067_v44, %v1068_v46  ;;  %v1181_v33 = vmul.f32 %v9084_v40, %v12812_v6  ;;  %v1721_v47 = vpop.permute.xlu0 %1720 }
 0x1c4   : > { %v1396_v19 = vsel %vm745_vm1, %v1393_v36, %v1395_v57  ;;  %v1640_v43 = vrot.slane %v8947_v61, 2  ;;  %v1134_v18 = vadd.f32 %v1069_v22, %v888_v24  ;;  %v1399_v25 = vsel %vm745_vm1, %v1397_v12, %v1398_v55  ;;  %v1795_v34 = vpop.permute.xlu1 %1794 }
 0x1c5   : > { %v2282_v20 = vadd.f32 %v2214_v54, %v2037_v1  ;;  %v1213_v59 = vadd.f32 %v1181_v33, %v1133_v23  ;;  %v1273_v7 = vmul.f32 %v9006_v27, %v1220_v52  ;;  %v1845_v53 = vmul.f32 %v9061_v2, %v1220_v52 }
 0x1c6   : > { %v1214_v26 = vadd.f32 %v1182_v42, %v1134_v18  ;;  %v1846_v8 = vmul.f32 %v9061_v2, %v1716_v37  ;;  %v2090_v9 = vmul.f32 %v9070_v14, %v1220_v52  ;;  %v1756_v56 = vmul.f32 %v9116_v38, %v9046_v31 }
 0x1c7   : > { %v2314_v50 = vmax.f32 %v2282_v20, 0.0  ;;  %v1644_v36 = vsel %vm991_vm2, %v1642_v32, %v1643_v48  ;;  %v1463_v61 = vadd.f32 %v1396_v19, %v1213_v59  ;;  %v1970_v57 = vrot.slane %v1845_v53, 1 }
 0x1c8   : > { %v1464_v27 = vadd.f32 %v1399_v25, %v1214_v26  ;;  %v1641_v5 = vsel %vm991_vm2, %v1638_v28, %v1640_v43  ;;  %v531_v0 = vmul.f32 %v9041_v60, %v12812_v6  ;;  %v825_v3 = vsel %vm745_vm1, %v822_v51, %v824_v17 }
 0x1c9   : > { %2347 = vst.msk [vmem:[#allocation2 + $0x169] sm:$0xff] %vm226_vm0, %v2314_v50  ;;  %v1757_v10 = vmul.f32 %v9116_v38, %v1716_v37  ;;  %v1708_v58 = vadd.f32 %v1641_v5, %v1463_v61  ;;  %v1400_v11 = vrot.slane %v1273_v7, 1  ;;  %v1518_v39 = vmul.f32 %v9016_v49, %v1220_v52 }
 0x1ca   : > { %v1972_v13 = vrot.slane %v1846_v8, 1  ;;  %v2091_v21 = vmul.f32 %v9070_v14, %v1716_v37  ;;  %v2215_v16 = vrot.slane %v2090_v9, 2  ;;  %v889_v28 = vadd.f32 %v825_v3, %v531_v0 }
 0x1cb   : > { %v1709_v44 = vadd.f32 %v1644_v36, %v1464_v27  ;;  %v1788_v23 = vadd.f32 %v1756_v56, %v1708_v58  ;;  %v1971_v6 = vsel %vm745_vm1, %v1968_v29, %v1970_v57  ;;  %v1071_v62 = vsel %vm991_vm2, %v1068_v46, %v1070_v15 }
 0x1cc   : > { %v1135_v17 = vadd.f32 %v1071_v62, %v889_v28  ;;  %v1183_v49 = vmul.f32 %v9084_v40, %v9046_v31  ;;  %v1847_v60 = vmul.f32 %v9061_v2, %v1721_v47  ;;  %v2092_v51 = vmul.f32 %v9070_v14, %v1721_v47 }
 0x1cd   : > { %v1645_v12 = vrot.slane %v1518_v39, 2  ;;  %v2038_v41 = vadd.f32 %v1971_v6, %v1788_v23  ;;  %v1848_v42 = vmul.f32 %v9061_v2, %v1795_v34  ;;  %v1401_v63 = vsel %vm745_vm1, %v1398_v55, %v1400_v11 }
 0x1ce   : > { %v2216_v35 = vsel %vm991_vm2, %v2213_v4, %v2215_v16  ;;  %v1215_v29 = vadd.f32 %v1183_v49, %v1135_v17  ;;  %v1973_v15 = vrot.slane %v1847_v60, 1  ;;  %v2218_v46 = vrot.slane %v2092_v51, 2 }
 0x1cf   : > { %v1789_v1 = vadd.f32 %v1757_v10, %v1709_v44  ;;  %v2283_v24 = vadd.f32 %v2216_v35, %v2038_v41  ;;  %v2093_v31 = vmul.f32 %v9070_v14, %v1795_v34  ;;  %v2217_v40 = vrot.slane %v2091_v21, 2 }
 0x1d0   : > { %v1465_v52 = vadd.f32 %v1401_v63, %v1215_v29  ;;  %v1974_v32 = vsel %vm745_vm1, %v1972_v13, %v1973_v15  ;;  %v1975_v37 = vrot.slane %v1848_v42, 1  ;;  %v1646_v2 = vsel %vm991_vm2, %v1643_v48, %v1645_v12 }
 0x1d1   : > { %v2315_v54 = vmax.f32 %v2283_v24, 0.0  ;;  %v2039_v30 = vadd.f32 %v1974_v32, %v1789_v1  ;;  %v1758_v4 = vmul.f32 %v9116_v38, %v1721_v47  ;;  %v2219_v22 = vsel %vm991_vm2, %v2217_v40, %v2218_v46 }
 0x1d2   : > { %v1710_v55 = vadd.f32 %v1646_v2, %v1465_v52  ;;  %v2220_v33 = vrot.slane %v2093_v31, 2  ;;  %v1976_v43 = vsel %vm745_vm1, %v1973_v15, %v1975_v37 }
 0x1d3   : > { %2348 = vst.msk [vmem:[#allocation2 + $0x171] sm:$0xff] %vm226_vm0, %v2315_v54  ;;  %v2284_v14 = vadd.f32 %v2219_v22, %v2039_v30 }
 0x1d4   : > { %v1790_v19 = vadd.f32 %v1758_v4, %v1710_v55  ;;  %v2221_v25 = vsel %vm991_vm2, %v2218_v46, %v2220_v33 }
 0x1d5   : > { %v2316_v20 = vmax.f32 %v2284_v14, 0.0 }
 0x1d6   : > { %v2040_v18 = vadd.f32 %v1976_v43, %v1790_v19 }
 0x1d7   : > { %2349 = vst.msk [vmem:[#allocation2 + $0x181] sm:$0xff] %vm226_vm0, %v2316_v20 }
 0x1d8   : > { %v2285_v45 = vadd.f32 %v2221_v25, %v2040_v18 }
 0x1da   : > { %v2317_v48 = vmax.f32 %v2285_v45, 0.0 }
 0x1dc   : > { %2350 = vst.msk [vmem:[#allocation2 + $0x189] sm:$0xff] %vm226_vm0, %v2317_v48 }
 0x1dd LB: >> { %v9207_v38 = vld [vmem:[#allocation2 + $0x18] sm:$0xff]  ;;  %v9209_v59 = vld [vmem:[#allocation2 + $0x20] sm:$0xff]  ;;  %v9211_v7 = vld [vmem:[#allocation2 + $0x28] sm:$0xff]  ;;  %v6946_v9 = vmov 0   ;;  %s6487_s12 = smul.u32 96, %s6942_s11  ;;  %s6947_s13 = smov 64   ;;  %s6942_s11 = sphi %s9202_s11, %s2356_s11  }
 0x1de   : >> { %v6664_v53 = vpack.i.bf16 %v9209_v59, %v9207_v38  ;;  %v9215_v50 = vld [vmem:[#allocation2 + $0x30] sm:$0xff]  ;;  %v9217_v26 = vld [vmem:[#allocation2 + $0x38] sm:$0xff]  ;;  %v9219_v8 = vld [vmem:[#allocation2 + $0x40] sm:$0xff]  ;;  %2987 = vmatprep.subr.bf16.mxu0 %v6946_v9  ;;  %3933 = vmatprep.subr.bf16.mxu1 %v6946_v9  ;;  %vm3260_vm3 = vcmask 1040384   ;;  %vm4206_vm4 = vcmask 523265   ;;  %vm4209_vm5 = vcmask 516096  }
 0x1df   : >> { %v6674_v56 = vpack.i.bf16 %v9219_v8, %v9217_v26  ;;  %v9225_v36 = vld [vmem:[#allocation2 + $0x48] sm:$0xff]  ;;  %v9227_v61 = vld [vmem:[#allocation2 + $0x50] sm:$0xff]  ;;  %v2796_v57 = vpack.c.bf16 %v9217_v26, %v9215_v50  ;;  %v6669_v27 = vpack.i.bf16 %v9215_v50, %v9211_v7  ;;  %v9238_v0 = vld [vmem:[#allocation2 + $0x58] sm:$0xff]  ;;  %s9247_s16 = scalar_lea.vmem %s12144_s2, %s6487_s12  ;;  %s9559_s20 = scalar_lea.vmem %s12145_s3, %s6487_s12 }
 0x1e0   : >> { %6665 = vrot.lane.b32.xlu0 %v6664_v53, %s6947_s13  ;;  %v6679_v5 = vpack.i.bf16 %v9227_v61, %v9225_v36  ;;  %v9240_v3 = vld [vmem:[#allocation2 + $0x60] sm:$0xff]  ;;  %v9250_v10 = vld [vmem:[#allocation2 + $0x68] sm:$0xff]  ;;  %v9252_v58 = vld [vmem:[#allocation2 + $0x70] sm:$0xff]  ;;  %s2356_s11 = sadd.s32 1, %s6942_s11  }
 0x1e1   : >> { %6675 = vrot.lane.b32.xlu1 %v6674_v56, %s6947_s13  ;;  %6232 = vmatprep.mubr.msk.bf16.mxu0 %vm226_vm0, %v2796_v57  ;;  %v9254_v11 = vld [vmem:[#allocation2 + $0x78] sm:$0xff]  ;;  %v9256_v39 = vld [vmem:[#allocation2 + $0x80] sm:$0xff]  ;;  %v6684_v47 = vpack.i.bf16 %v9240_v3, %v9238_v0  ;;  %v6689_v21 = vpack.i.bf16 %v9252_v58, %v9250_v10  ;;  %v9265_v16 = vld [vmem:[#allocation2 + $0x88] sm:$0xff]  ;;  %p2353_p4 = scmp.ge.s32.totalorder %s2356_s11, 18  }
 0x1e2   : >> { %v6904_v13 = vld [vmem:[%s9247_s16] sm:$0xff]   ;;  %v9267_v34 = vld [vmem:[#allocation2 + $0x90] sm:$0xff]  ;;  %v6905_v28 = vld [vmem:[%s9247_s16 + $0x8] sm:$0xff]   ;;  %v6694_v44 = vpack.i.bf16 %v9256_v39, %v9254_v11  ;;  %s6948_s21 = smov (%p2353_p4), 64   ;;  %vm6080_vm6 = vcmask (%p2353_p4), 7169   ;;  %vm6082_vm7 = vcmask (%p2353_p4), 7168  }
 0x1e3   : >> { %2988 = vmatpush1.bf16.msra.mxu0 %v6904_v13  ;;  %v9274_v23 = vld [vmem:[#allocation2 + $0x98] sm:$0xff]  ;;  %v9276_v6 = vld [vmem:[#allocation2 + $0xa0] sm:$0xff]  ;;  %v9278_v62 = vld [vmem:[#allocation2 + $0xa8] sm:$0xff]  ;;  %v6699_v17 = vpack.i.bf16 %v9267_v34, %v9265_v16  ;;  %vm6084_vm8 = vcmask (%p2353_p4), 0  }
 0x1e4   : >> { %6670 = vrot.lane.b32.xlu0 %v6669_v27, %s6947_s13  ;;  %2989 = vmatprep.subr.bf16.mxu0 %v6946_v9  ;;  %v9283_v49 = vld [vmem:[#allocation2 + $0xb0] sm:$0xff]  ;;  %v9286_v51 = vld [vmem:[#allocation2 + $0xb8] sm:$0xff]  ;;  %v6704_v12 = vpack.i.bf16 %v9276_v6, %v9274_v23  ;;  %v9292_v41 = vld [vmem:[#allocation2 + $0xc0] sm:$0xff] }
 0x1e5   : >> { %6680 = vrot.lane.b32.xlu1 %v6679_v5, %s6947_s13  ;;  %v6906_v60 = vld [vmem:[%s9247_s16 + $0x10] sm:$0xff]   ;;  %v6709_v42 = vpack.i.bf16 %v9283_v49, %v9278_v62  ;;  %v6907_v63 = vld [vmem:[%s9247_s16 + $0x18] sm:$0xff]   ;;  %v9298_v35 = vld [vmem:[#allocation2 + $0xc8] sm:$0xff]  ;;  %v6714_v15 = vpack.i.bf16 %v9292_v41, %v9286_v51 }
 0x1e6   : >> { %v9300_v29 = vld [vmem:[#allocation2 + $0xd0] sm:$0xff]  ;;  %v6908_v46 = vld [vmem:[%s9247_s16 + $0x20] sm:$0xff]   ;;  %v9307_v1 = vld [vmem:[#allocation2 + $0xd8] sm:$0xff] }
 0x1e7   : >> { %2990 = vmatpush1.bf16.msra.mxu0 %v6905_v28  ;;  %v6719_v24 = vpack.i.bf16 %v9300_v29, %v9298_v35  ;;  %v9312_v31 = vld [vmem:[#allocation2 + $0xe0] sm:$0xff]  ;;  %v9314_v40 = vld [vmem:[#allocation2 + $0xe8] sm:$0xff]  ;;  %v9316_v52 = vld [vmem:[#allocation2 + $0xf0] sm:$0xff] }
 0x1e8   : >> { %6685 = vrot.lane.b32.xlu0 %v6684_v47, %s6947_s13  ;;  %2991 = vmatprep.subr.bf16.mxu0 %v6946_v9  ;;  %v6724_v32 = vpack.i.bf16 %v9312_v31, %v9307_v1  ;;  %v6729_v54 = vpack.i.bf16 %v9316_v52, %v9314_v40  ;;  %v9325_v37 = vld [vmem:[#allocation2 + $0xf8] sm:$0xff]  ;;  %v9327_v2 = vld [vmem:[#allocation2 + $0x100] sm:$0xff]  ;;  %v6909_v30 = vld [vmem:[%s9247_s16 + $0x28] sm:$0xff]  }
 0x1e9   : >> { %6690 = vrot.lane.b32.xlu1 %v6689_v21, %s6947_s13  ;;  %v9330_v55 = vld [vmem:[#allocation2 + $0x108] sm:$0xff]  ;;  %v9332_v4 = vld [vmem:[#allocation2 + $0x110] sm:$0xff]  ;;  %v6734_v22 = vpack.i.bf16 %v9327_v2, %v9325_v37  ;;  %v9341_v14 = vld [vmem:[#allocation2 + $0x118] sm:$0xff] }
 0x1ea   : >> { %v6739_v33 = vpack.i.bf16 %v9332_v4, %v9330_v55  ;;  %v9343_v19 = vld [vmem:[#allocation2 + $0x120] sm:$0xff]  ;;  %v6910_v43 = vld [vmem:[%s9247_s16 + $0x30] sm:$0xff]   ;;  %v9346_v20 = vld [vmem:[#allocation2 + $0x128] sm:$0xff] }
 0x1eb   : >> { %2992 = vmatpush1.bf16.msra.mxu0 %v6906_v60  ;;  %v9348_v18 = vld [vmem:[#allocation2 + $0x130] sm:$0xff]  ;;  %v6744_v25 = vpack.i.bf16 %v9343_v19, %v9341_v14  ;;  %v9357_v48 = vld [vmem:[#allocation2 + $0x138] sm:$0xff]  ;;  %v9359_v53 = vld [vmem:[#allocation2 + $0x140] sm:$0xff] }
 0x1ec   : >> { %6695 = vrot.lane.b32.xlu0 %v6694_v44, %s6947_s13  ;;  %2993 = vmatprep.subr.bf16.mxu0 %v6946_v9  ;;  %v6749_v45 = vpack.i.bf16 %v9348_v18, %v9346_v20  ;;  %v6911_v56 = vld [vmem:[%s9247_s16 + $0x38] sm:$0xff]   ;;  %v9362_v57 = vld [vmem:[#allocation2 + $0x148] sm:$0xff]  ;;  %v9364_v27 = vld [vmem:[#allocation2 + $0x150] sm:$0xff]  ;;  %v6754_v5 = vpack.i.bf16 %v9359_v53, %v9357_v48 }
 0x1ed   : >> { %6700 = vrot.lane.b32.xlu1 %v6699_v17, %s6947_s13  ;;  %v6759_v47 = vpack.i.bf16 %v9364_v27, %v9362_v57  ;;  %v9373_v13 = vld [vmem:[#allocation2 + $0x158] sm:$0xff]  ;;  %v9375_v21 = vld [vmem:[#allocation2 + $0x160] sm:$0xff]  ;;  %v9378_v44 = vld [vmem:[#allocation2 + $0x168] sm:$0xff] }
 0x1ee   : >> { %v6912_v28 = vld [vmem:[%s9247_s16 + $0x40] sm:$0xff]   ;;  %v9380_v17 = vld [vmem:[#allocation2 + $0x170] sm:$0xff]  ;;  %v6764_v60 = vpack.i.bf16 %v9375_v21, %v9373_v13 }
 0x1ef   : >> { %2994 = vmatpush1.bf16.msra.mxu0 %v6907_v63  ;;  %v9393_v63 = vld [vmem:[#allocation2 + $0x178] sm:$0xff] }
 0x1f0   : >> { %6705 = vrot.lane.b32.xlu0 %v6704_v12, %s6947_s13  ;;  %2995 = vmatprep.subr.bf16.mxu0 %v6946_v9  ;;  %v6769_v12 = vpack.i.bf16 %v9380_v17, %v9378_v44 }
 0x1f1   : >> { %6710 = vrot.lane.b32.xlu1 %v6709_v42, %s6947_s13  ;;  %v6913_v42 = vld [vmem:[%s9247_s16 + $0x48] sm:$0xff]  }
 0x1f3   : >> { %2996 = vmatpush1.bf16.msra.mxu0 %v6908_v46  ;;  %v6914_v46 = vld [vmem:[%s9247_s16 + $0x50] sm:$0xff]  }
 0x1f4   : >> { %6715 = vrot.lane.b32.xlu0 %v6714_v15, %s6947_s13  ;;  %2997 = vmatprep.subr.bf16.mxu0 %v6946_v9  ;;  %v9395_v15 = vld [vmem:[#allocation2 + $0x180] sm:$0xff] }
 0x1f5   : >> { %6720 = vrot.lane.b32.xlu1 %v6719_v24, %s6947_s13  ;;  %v6774_v24 = vpack.i.bf16 %v9395_v15, %v9393_v63 }
 0x1f7   : >> { %2998 = vmatpush1.bf16.msra.mxu0 %v6909_v30  ;;  %v9406_v30 = vld [vmem:[#allocation2 + $0x190] sm:$0xff] }
 0x1f8   : >> { %6725 = vrot.lane.b32.xlu0 %v6724_v32, %s6947_s13  ;;  %2999 = vmatprep.subr.bf16.mxu0 %v6946_v9  ;;  %v6915_v32 = vld [vmem:[%s9247_s16 + $0x58] sm:$0xff]  }
 0x1f9   : >> { %6730 = vrot.lane.b32.xlu1 %v6729_v54, %s6947_s13  ;;  %v9404_v54 = vld [vmem:[#allocation2 + $0x188] sm:$0xff] }
 0x1fb   : >> { %3000 = vmatpush1.bf16.msra.mxu0 %v6910_v43  ;;  %v2410_v43 = vld [vmem:[#allocation2] sm:$0xff] }
 0x1fc   : >> { %6735 = vrot.lane.b32.xlu0 %v6734_v22, %s6947_s13  ;;  %3001 = vmatprep.subr.bf16.mxu0 %v6946_v9  ;;  %v6779_v22 = vpack.i.bf16 %v9406_v30, %v9404_v54 }
 0x1fd   : >> { %6740 = vrot.lane.b32.xlu1 %v6739_v33, %s6947_s13 }
 0x1ff   : >> { %3002 = vmatpush1.bf16.msra.mxu0 %v6911_v56 }
 0x200   : >> { %6745 = vrot.lane.b32.xlu0 %v6744_v25, %s6947_s13  ;;  %3003 = vmatprep.subr.bf16.mxu0 %v6946_v9  ;;  %v2411_v25 = vld [vmem:[#allocation2 + $0x8] sm:$0xff] }
 0x201   : >> { %6750 = vrot.lane.b32.xlu1 %v6749_v45, %s6947_s13 }
 0x203   : >> { %3004 = vmatpush1.bf16.msra.mxu0 %v6912_v28  ;;  %v2798_v28 = vpack.c.bf16 %v9225_v36, %v9219_v8 }
 0x204   : >> { %6755 = vrot.lane.b32.xlu0 %v6754_v5, %s6947_s13  ;;  %3005 = vmatprep.subr.bf16.mxu0 %v6946_v9 }
 0x205   : >> { %6760 = vrot.lane.b32.xlu1 %v6759_v47, %s6947_s13 }
 0x207   : >> { %3006 = vmatpush1.bf16.msra.mxu0 %v6913_v42  ;;  %v2412_v42 = vld [vmem:[#allocation2 + $0x10] sm:$0xff] }
 0x208   : >> { %6765 = vrot.lane.b32.xlu0 %v6764_v60, %s6947_s13  ;;  %3007 = vmatprep.subr.bf16.mxu0 %v6946_v9 }
 0x209   : >> { %6770 = vrot.lane.b32.xlu1 %v6769_v12, %s6947_s13 }
 0x20b   : >> { %3008 = vmatpush1.bf16.msra.mxu0 %v6914_v46 }
 0x20c   : >> { %6775 = vrot.lane.b32.xlu0 %v6774_v24, %s6947_s13  ;;  %3009 = vmatprep.subr.bf16.mxu0 %v6946_v9 }
 0x20d   : >> { %6780 = vrot.lane.b32.xlu1 %v6779_v22, %s6947_s13 }
 0x20f   : >> { %3010 = vmatpush1.bf16.msra.mxu0 %v6915_v32 }
 0x252   : >> { %v6666_v33 = vpop.permute.xlu0 %6665 }
 0x253   : >> { %v6668_v45 = vunpack.i.h.bf16 %v6666_v33  ;;  %v6667_v56 = vunpack.i.l.bf16 %v6666_v33  ;;  %v6676_v33 = vpop.permute.xlu1 %6675 }
 0x255   : >> { %v2747_v5 = vsel %vm226_vm0, %v2410_v43, %v6667_v56  ;;  %v2748_v47 = vsel %vm226_vm0, %v2411_v25, %v6668_v45  ;;  %v6678_v56 = vunpack.i.h.bf16 %v6676_v33  ;;  %v6677_v25 = vunpack.i.l.bf16 %v6676_v33 }
 0x256   : >> { %v2795_v60 = vpack.c.bf16 %v2748_v47, %v2747_v5  ;;  %v6671_v12 = vpop.permute.xlu0 %6670  ;;  %v2800_v45 = vpack.c.bf16 %v9238_v0, %v9227_v61  ;;  %v2804_v33 = vpack.c.bf16 %v9254_v11, %v9252_v58 }
 0x257   : >> { %v6673_v46 = vunpack.i.h.bf16 %v6671_v12  ;;  %v6672_v24 = vunpack.i.l.bf16 %v6671_v12  ;;  %v2751_v5 = vsel %vm226_vm0, %v9209_v59, %v6677_v25  ;;  %v2752_v47 = vsel %vm226_vm0, %v9211_v7, %v6678_v56 }
 0x258   : >> { %3020 = vmatmul.mubr.bf16.vlgmr.msra.gmra.mrb[0].mxu0 %v2795_v60  ;;  %v6681_v60 = vpop.permute.xlu1 %6680 }
 0x259   : >> { %v2749_v32 = vsel %vm226_vm0, %v2412_v42, %v6672_v24  ;;  %v2750_v22 = vsel %vm226_vm0, %v9207_v38, %v6673_v46  ;;  %6233 = vmatprep.mubr.msk.bf16.mxu0 %vm226_vm0, %v2798_v28  ;;  %v2799_v38 = vpack.c.bf16 %v2752_v47, %v2751_v5  ;;  %v6683_v12 = vunpack.i.h.bf16 %v6681_v60 }
 0x25a   : >> { %v2797_v43 = vpack.c.bf16 %v2750_v22, %v2749_v32  ;;  %v6682_v28 = vunpack.i.l.bf16 %v6681_v60  ;;  %v2802_v42 = vpack.c.bf16 %v9250_v10, %v9240_v3  ;;  %v6686_v59 = vpop.permute.xlu0 %6685  ;;  %v2806_v5 = vpack.c.bf16 %v9265_v16, %v9256_v39 }
 0x25b   : >> { %v2754_v24 = vsel %vm226_vm0, %v9217_v26, %v6683_v12  ;;  %v6688_v32 = vunpack.i.h.bf16 %v6686_v59  ;;  %v6687_v22 = vunpack.i.l.bf16 %v6686_v59 }
 0x25c   : >> { %v2753_v46 = vsel %vm226_vm0, %v9215_v50, %v6682_v28  ;;  %v6691_v50 = vpop.permute.xlu1 %6690  ;;  %v2808_v28 = vpack.c.bf16 %v9274_v23, %v9267_v34 }
 0x25d   : >> { %v2801_v7 = vpack.c.bf16 %v2754_v24, %v2753_v46  ;;  %v2756_v56 = vsel %vm226_vm0, %v9225_v36, %v6688_v32  ;;  %v6693_v25 = vunpack.i.h.bf16 %v6691_v50 }
 0x25f   : >> { %v2758_v60 = vsel %vm226_vm0, %v9238_v0, %v6693_v25 }
 0x260   : >> { %3028 = vmatmul.mubr.bf16.gmra.mrb[4].mxu0 %v2797_v43  ;;  %v2755_v43 = vsel %vm226_vm0, %v9219_v8, %v6687_v22  ;;  %v6696_v8 = vpop.permute.xlu0 %6695 }
 0x261   : >> { %6234 = vmatprep.mubr.msk.bf16.mxu0 %vm226_vm0, %v2800_v45  ;;  %v2803_v26 = vpack.c.bf16 %v2756_v56, %v2755_v43  ;;  %v6692_v45 = vunpack.i.l.bf16 %v6691_v50  ;;  %v6697_v12 = vunpack.i.l.bf16 %v6696_v8  ;;  %v2812_v56 = vpack.c.bf16 %v9286_v51, %v9283_v49 }
 0x263   : >> { %v2757_v47 = vsel %vm226_vm0, %v9227_v61, %v6692_v45  ;;  %v6701_v61 = vpop.permute.xlu1 %6700 }
 0x264   : >> { %v2805_v36 = vpack.c.bf16 %v2758_v60, %v2757_v47  ;;  %v6703_v24 = vunpack.i.h.bf16 %v6701_v61  ;;  %v6702_v59 = vunpack.i.l.bf16 %v6701_v61  ;;  %v2818_v61 = vpack.c.bf16 %v9314_v40, %v9312_v31 }
 0x266   : >> { %v2761_v32 = vsel %vm226_vm0, %v9252_v58, %v6702_v59  ;;  %v2762_v22 = vsel %vm226_vm0, %v9254_v11, %v6703_v24 }
 0x267   : >> { %v6711_v58 = vpop.permute.xlu1 %6710 }
 0x268   : >> { %3036 = vmatmul.mubr.bf16.gmra.mrb[8].mxu0 %v2799_v38  ;;  %v6698_v38 = vunpack.i.h.bf16 %v6696_v8  ;;  %v6713_v25 = vunpack.i.h.bf16 %v6711_v58  ;;  %v6712_v45 = vunpack.i.l.bf16 %v6711_v58 }
 0x269   : >> { %6235 = vmatprep.mubr.msk.bf16.mxu0 %vm226_vm0, %v2802_v42  ;;  %v2759_v42 = vsel %vm226_vm0, %v9240_v3, %v6697_v12  ;;  %v6706_v3 = vpop.permute.xlu0 %6705 }
 0x26a   : >> { %v2760_v46 = vsel %vm226_vm0, %v9250_v10, %v6698_v38  ;;  %v2809_v10 = vpack.c.bf16 %v2762_v22, %v2761_v32  ;;  %v6707_v43 = vunpack.i.l.bf16 %v6706_v3  ;;  %v2765_v47 = vsel %vm226_vm0, %v9267_v34, %v6712_v45 }
 0x26b   : >> { %v2807_v0 = vpack.c.bf16 %v2760_v46, %v2759_v42  ;;  %v2766_v60 = vsel %vm226_vm0, %v9274_v23, %v6713_v25  ;;  %v2816_v38 = vpack.c.bf16 %v9307_v1, %v9300_v29  ;;  %v6721_v34 = vpop.permute.xlu1 %6720  ;;  %v2820_v32 = vpack.c.bf16 %v9325_v37, %v9316_v52 }
 0x26c   : >> { %v2763_v50 = vsel %vm226_vm0, %v9256_v39, %v6707_v43  ;;  %v6723_v42 = vunpack.i.h.bf16 %v6721_v34  ;;  %v6722_v46 = vunpack.i.l.bf16 %v6721_v34  ;;  %v2822_v43 = vpack.c.bf16 %v9330_v55, %v9327_v2 }
 0x26d   : >> { %v6716_v39 = vpop.permute.xlu0 %6715 }
 0x26e   : >> { %v6718_v8 = vunpack.i.h.bf16 %v6716_v39  ;;  %v2770_v24 = vsel %vm226_vm0, %v9286_v51, %v6723_v42  ;;  %v2830_v42 = vpack.c.bf16 %v9362_v57, %v9359_v53 }
 0x270   : >> { %3044 = vmatmul.mubr.bf16.gmra.mrb[12].mxu0 %v2801_v7  ;;  %v2810_v7 = vpack.c.bf16 %v9278_v62, %v9276_v6 }
 0x271   : >> { %6236 = vmatprep.mubr.msk.bf16.mxu0 %vm226_vm0, %v2804_v33  ;;  %v6708_v33 = vunpack.i.h.bf16 %v6706_v3 }
 0x278   : >> { %3052 = vmatmul.mubr.bf16.gmra.mrb[16].mxu0 %v2803_v26  ;;  %v2764_v26 = vsel %vm226_vm0, %v9265_v16, %v6708_v33  ;;  %v2813_v16 = vpack.c.bf16 %v2766_v60, %v2765_v47  ;;  %v2826_v60 = vpack.c.bf16 %v9346_v20, %v9343_v19 }
 0x279   : >> { %6237 = vmatprep.mubr.msk.bf16.mxu0 %vm226_vm0, %v2806_v5  ;;  %v2811_v11 = vpack.c.bf16 %v2764_v26, %v2763_v50  ;;  %v2814_v5 = vpack.c.bf16 %v9298_v35, %v9292_v41 }
 0x280   : >> { %3060 = vmatmul.mubr.bf16.gmra.mrb[20].mxu0 %v2805_v36  ;;  %v6717_v36 = vunpack.i.l.bf16 %v6716_v39 }
 0x281   : >> { %6238 = vmatprep.mubr.msk.bf16.mxu0 %vm226_vm0, %v2808_v28  ;;  %v2768_v28 = vsel %vm226_vm0, %v9278_v62, %v6718_v8 }
 0x282   : >> { %v2767_v12 = vsel %vm226_vm0, %v9276_v6, %v6717_v36  ;;  %v6726_v6 = vpop.permute.xlu0 %6725 }
 0x283   : >> { %v2815_v23 = vpack.c.bf16 %v2768_v28, %v2767_v12  ;;  %v6728_v59 = vunpack.i.h.bf16 %v6726_v6 }
 0x285   : >> { %v2772_v3 = vsel %vm226_vm0, %v9298_v35, %v6728_v59 }
 0x288   : >> { %3068 = vmatmul.mubr.bf16.gmra.mrb[24].mxu0 %v2807_v0  ;;  %v2769_v0 = vsel %vm226_vm0, %v9283_v49, %v6722_v46  ;;  %v6731_v49 = vpop.permute.xlu1 %6730 }
 0x289   : >> { %6239 = vmatprep.mubr.msk.bf16.mxu0 %vm226_vm0, %v2810_v7  ;;  %v2817_v62 = vpack.c.bf16 %v2770_v24, %v2769_v0  ;;  %v6727_v7 = vunpack.i.l.bf16 %v6726_v6  ;;  %v6732_v33 = vunpack.i.l.bf16 %v6731_v49  ;;  %v2832_v6 = vpack.c.bf16 %v9373_v13, %v9364_v27 }
 0x28b   : >> { %v2771_v22 = vsel %vm226_vm0, %v9292_v41, %v6727_v7  ;;  %v6736_v41 = vpop.permute.xlu0 %6735 }
 0x28c   : >> { %v2819_v51 = vpack.c.bf16 %v2772_v3, %v2771_v22  ;;  %v6738_v26 = vunpack.i.h.bf16 %v6736_v41  ;;  %v6737_v58 = vunpack.i.l.bf16 %v6736_v41  ;;  %v2834_v22 = vpack.c.bf16 %v9378_v44, %v9375_v21 }
 0x28e   : >> { %v2775_v25 = vsel %vm226_vm0, %v9312_v31, %v6737_v58  ;;  %v2776_v45 = vsel %vm226_vm0, %v9314_v40, %v6738_v26 }
 0x28f   : >> { %v6746_v31 = vpop.permute.xlu0 %6745 }
 0x290   : >> { %3076 = vmatmul.mubr.bf16.gmra.mrb[28].mxu0 %v2809_v10  ;;  %v6733_v10 = vunpack.i.h.bf16 %v6731_v49  ;;  %v6748_v8 = vunpack.i.h.bf16 %v6746_v31  ;;  %v6747_v36 = vunpack.i.l.bf16 %v6746_v31 }
 0x291   : >> { %6240 = vmatprep.mubr.msk.bf16.mxu0 %vm226_vm0, %v2812_v56  ;;  %v2773_v56 = vsel %vm226_vm0, %v9300_v29, %v6732_v33  ;;  %v6741_v29 = vpop.permute.xlu1 %6740  ;;  %v2836_v33 = vpack.c.bf16 %v9393_v63, %v9380_v17 }
 0x292   : >> { %v2774_v50 = vsel %vm226_vm0, %v9307_v1, %v6733_v10  ;;  %v2823_v1 = vpack.c.bf16 %v2776_v45, %v2775_v25  ;;  %v6742_v47 = vunpack.i.l.bf16 %v6741_v29  ;;  %v2779_v12 = vsel %vm226_vm0, %v9327_v2, %v6747_v36  ;;  %v6921_v36 = vld [vmem:[%s9559_s20 + $0x28] sm:$0xff]  }
 0x293   : >> { %v2821_v35 = vpack.c.bf16 %v2774_v50, %v2773_v56  ;;  %v2780_v28 = vsel %vm226_vm0, %v9330_v55, %v6748_v8  ;;  %v6756_v2 = vpop.permute.xlu0 %6755 }
 0x294   : >> { %v2777_v39 = vsel %vm226_vm0, %v9316_v52, %v6742_v47  ;;  %v6758_v0 = vunpack.i.h.bf16 %v6756_v2  ;;  %v6757_v24 = vunpack.i.l.bf16 %v6756_v2  ;;  %v2553_v47 = vld [vmem:[#allocation2 + $0x1a0] sm:$0xff] }
 0x295   : >> { %v6751_v52 = vpop.permute.xlu1 %6750 }
 0x296   : >> { %v6753_v34 = vunpack.i.h.bf16 %v6751_v52  ;;  %v2784_v59 = vsel %vm226_vm0, %v9346_v20, %v6758_v0 }
 0x298   : >> { %3084 = vmatmul.mubr.bf16.gmra.mrb[32].mxu0 %v2811_v11  ;;  %v2824_v11 = vpack.c.bf16 %v9341_v14, %v9332_v4 }
 0x299   : >> { %6241 = vmatprep.mubr.msk.bf16.mxu0 %vm226_vm0, %v2814_v5  ;;  %v6743_v5 = vunpack.i.h.bf16 %v6741_v29 }
 0x2a0   : >> { %3092 = vmatmul.mubr.bf16.gmra.mrb[36].mxu0 %v2813_v16  ;;  %v2778_v16 = vsel %vm226_vm0, %v9325_v37, %v6743_v5  ;;  %v2827_v37 = vpack.c.bf16 %v2780_v28, %v2779_v12  ;;  %v6922_v12 = vld [vmem:[%s9559_s20 + $0x30] sm:$0xff]   ;;  %v6925_v28 = vld [vmem:[%s9559_s20 + $0x48] sm:$0xff]  }
 0x2a1   : >> { %6242 = vmatprep.mubr.msk.bf16.mxu0 %vm226_vm0, %v2816_v38  ;;  %v2825_v40 = vpack.c.bf16 %v2778_v16, %v2777_v39  ;;  %v2828_v38 = vpack.c.bf16 %v9357_v48, %v9348_v18 }
 0x2a8   : >> { %3100 = vmatmul.mubr.bf16.gmra.mrb[40].mxu0 %v2815_v23  ;;  %v6752_v23 = vunpack.i.l.bf16 %v6751_v52  ;;  %v6926_v52 = vld [vmem:[%s9559_s20 + $0x50] sm:$0xff]  }
 0x2a9   : >> { %6243 = vmatprep.mubr.msk.bf16.mxu0 %vm226_vm0, %v2818_v61  ;;  %v2782_v61 = vsel %vm226_vm0, %v9341_v14, %v6753_v34 }
 0x2aa   : >> { %v2781_v46 = vsel %vm226_vm0, %v9332_v4, %v6752_v23  ;;  %v6761_v4 = vpop.permute.xlu1 %6760 }
 0x2ab   : >> { %v2829_v55 = vpack.c.bf16 %v2782_v61, %v2781_v46  ;;  %v6763_v7 = vunpack.i.h.bf16 %v6761_v4 }
 0x2ad   : >> { %v2786_v49 = vsel %vm226_vm0, %v9357_v48, %v6763_v7 }
 0x2ae   : >> { %v6771_v48 = vpop.permute.xlu1 %6770 }
 0x2af   : >> { %v6773_v50 = vunpack.i.h.bf16 %v6771_v48  ;;  %v6772_v41 = vunpack.i.l.bf16 %v6771_v48 }
 0x2b0   : >> { %3108 = vmatmul.mubr.bf16.gmra.mrb[44].mxu0 %v2817_v62  ;;  %v2783_v62 = vsel %vm226_vm0, %v9343_v19, %v6757_v24  ;;  %v6766_v19 = vpop.permute.xlu0 %6765 }
 0x2b1   : >> { %6244 = vmatprep.mubr.msk.bf16.mxu0 %vm226_vm0, %v2820_v32  ;;  %v2831_v14 = vpack.c.bf16 %v2784_v59, %v2783_v62  ;;  %v6762_v32 = vunpack.i.l.bf16 %v6761_v4  ;;  %v6767_v10 = vunpack.i.l.bf16 %v6766_v19  ;;  %v2789_v26 = vsel %vm226_vm0, %v9364_v27, %v6772_v41  ;;  %v6918_v27 = vld [vmem:[%s9559_s20 + $0x10] sm:$0xff]  }
 0x2b2   : >> { %v2790_v58 = vsel %vm226_vm0, %v9373_v13, %v6773_v50  ;;  %v6781_v5 = vpop.permute.xlu1 %6780 }
 0x2b3   : >> { %v2785_v3 = vsel %vm226_vm0, %v9348_v18, %v6762_v32  ;;  %v6783_v16 = vunpack.i.h.bf16 %v6781_v5  ;;  %v6782_v31 = vunpack.i.l.bf16 %v6781_v5 }
 0x2b4   : >> { %v2833_v20 = vpack.c.bf16 %v2786_v49, %v2785_v3 }
 0x2b5   : >> { %v2794_v8 = vsel %vm226_vm0, %v9393_v63, %v6783_v16  ;;  %v6924_v63 = vld [vmem:[%s9559_s20 + $0x40] sm:$0xff]  }
 0x2b8   : >> { %3116 = vmatmul.mubr.bf16.gmra.mrb[48].mxu0 %v2819_v51  ;;  %v6768_v51 = vunpack.i.h.bf16 %v6766_v19 }
 0x2b9   : >> { %6245 = vmatprep.mubr.msk.bf16.mxu0 %vm226_vm0, %v2822_v43  ;;  %v2787_v43 = vsel %vm226_vm0, %v9359_v53, %v6767_v10  ;;  %v6916_v53 = vld [vmem:[%s9559_s20] sm:$0xff]  }
 0x2ba   : >> { %v2788_v18 = vsel %vm226_vm0, %v9362_v57, %v6768_v51  ;;  %v2552_v57 = vld [vmem:[#allocation2 + $0x198] sm:$0xff]  ;;  %3934 = vmatpush1.bf16.msra.mxu1 %v6916_v53 }
 0x2bb   : >> { %v2835_v56 = vpack.c.bf16 %v2788_v18, %v2787_v43  ;;  %3935 = vmatprep.subr.bf16.mxu1 %v6946_v9  ;;  %v2840_v29 = vpack.c.bf16 %v2552_v57, %v9406_v30  ;;  %v6919_v30 = vld [vmem:[%s9559_s20 + $0x18] sm:$0xff]  }
 0x2c0   : >> { %3124 = vmatmul.mubr.bf16.gmra.mrb[52].mxu0 %v2821_v35  ;;  %v2838_v35 = vpack.c.bf16 %v9404_v54, %v9395_v15  ;;  %v6776_v15 = vpop.permute.xlu0 %6775  ;;  %v6917_v54 = vld [vmem:[%s9559_s20 + $0x8] sm:$0xff]  }
 0x2c1   : >> { %6246 = vmatprep.mubr.msk.bf16.mxu0 %vm226_vm0, %v2824_v11  ;;  %v2837_v11 = vpack.c.bf16 %v2790_v58, %v2789_v26  ;;  %v6778_v25 = vunpack.i.h.bf16 %v6776_v15  ;;  %v6777_v45 = vunpack.i.l.bf16 %v6776_v15  ;;  %3936 = vmatpush1.bf16.msra.mxu1 %v6917_v54 }
 0x2c2   : >> { %3937 = vmatprep.subr.bf16.mxu1 %v6946_v9 }
 0x2c3   : >> { %v2791_v13 = vsel %vm226_vm0, %v9375_v21, %v6777_v45  ;;  %v6920_v21 = vld [vmem:[%s9559_s20 + $0x20] sm:$0xff]  }
 0x2c5   : >> { %3938 = vmatpush1.bf16.msra.mxu1 %v6918_v27 }
 0x2c6   : >> { %3939 = vmatprep.subr.bf16.mxu1 %v6946_v9 }
 0x2c8   : >> { %3132 = vmatmul.mubr.bf16.gmra.mrb[56].mxu0 %v2823_v1  ;;  %v2792_v1 = vsel %vm226_vm0, %v9378_v44, %v6778_v25  ;;  %v2793_v44 = vsel %vm226_vm0, %v9380_v17, %v6782_v31  ;;  %v6923_v17 = vld [vmem:[%s9559_s20 + $0x38] sm:$0xff]  }
 0x2c9   : >> { %6247 = vmatprep.mubr.msk.bf16.mxu0 %vm226_vm0, %v2826_v60  ;;  %v2554_v60 = vld [vmem:[#allocation2 + $0x1a8] sm:$0xff]  ;;  %v2839_v39 = vpack.c.bf16 %v2792_v1, %v2791_v13  ;;  %3940 = vmatpush1.bf16.msra.mxu1 %v6919_v30 }
 0x2ca   : >> { %3941 = vmatprep.subr.bf16.mxu1 %v6946_v9 }
 0x2cd   : >> { %3942 = vmatpush1.bf16.msra.mxu1 %v6920_v21 }
 0x2ce   : >> { %3943 = vmatprep.subr.bf16.mxu1 %v6946_v9 }
 0x2d0   : >> { %3140 = vmatmul.mubr.bf16.gmra.mrb[60].mxu0 %v2825_v40  ;;  %v2842_v40 = vpack.c.bf16 %v2554_v60, %v2553_v47 }
 0x2d1   : >> { %6248 = vmatprep.mubr.msk.bf16.mxu0 %vm226_vm0, %v2828_v38  ;;  %v2841_v38 = vpack.c.bf16 %v2794_v8, %v2793_v44  ;;  %3944 = vmatpush1.bf16.msra.mxu1 %v6921_v36 }
 0x2d2   : >> { %3945 = vmatprep.subr.bf16.mxu1 %v6946_v9 }
 0x2d5   : >> { %3946 = vmatpush1.bf16.msra.mxu1 %v6922_v12 }
 0x2d6   : >> { %3947 = vmatprep.subr.bf16.mxu1 %v6946_v9 }
 0x2d8   : >> { %3148 = vmatmul.mubr.bf16.gmra.mrb[64].mxu0 %v2827_v37  ;;  %v6927_v37 = vld [vmem:[%s9559_s20 + $0x58] sm:$0xff]  }
 0x2d9   : >> { %6249 = vmatprep.mubr.msk.bf16.mxu0 %vm226_vm0, %v2830_v42  ;;  %3948 = vmatpush1.bf16.msra.mxu1 %v6923_v17 }
 0x2da   : >> { %3949 = vmatprep.subr.bf16.mxu1 %v6946_v9 }
 0x2dd   : >> { %3950 = vmatpush1.bf16.msra.mxu1 %v6924_v63 }
 0x2de   : >> { %3951 = vmatprep.subr.bf16.mxu1 %v6946_v9 }
 0x2e0   : >> { %3156 = vmatmul.mubr.bf16.gmra.mrb[68].mxu0 %v2829_v55 }
 0x2e1   : >> { %6250 = vmatprep.mubr.msk.bf16.mxu0 %vm226_vm0, %v2832_v6  ;;  %3952 = vmatpush1.bf16.msra.mxu1 %v6925_v28 }
 0x2e2   : >> { %3953 = vmatprep.subr.bf16.mxu1 %v6946_v9 }
 0x2e5   : >> { %3954 = vmatpush1.bf16.msra.mxu1 %v6926_v52 }
 0x2e6   : >> { %3955 = vmatprep.subr.bf16.mxu1 %v6946_v9 }
 0x2e8   : >> { %3164 = vmatmul.mubr.bf16.gmra.mrb[72].mxu0 %v2831_v14 }
 0x2e9   : >> { %6251 = vmatprep.mubr.msk.bf16.mxu0 %vm226_vm0, %v2834_v22  ;;  %3956 = vmatpush1.bf16.msra.mxu1 %v6927_v37 }
 0x2f0   : >> { %3172 = vmatmul.mubr.bf16.gmra.mrb[76].mxu0 %v2833_v20 }
 0x2f1   : >> { %6252 = vmatprep.mubr.msk.bf16.mxu0 %vm226_vm0, %v2836_v33 }
 0x2f8   : >> { %3180 = vmatmul.mubr.bf16.gmra.mrb[80].mxu0 %v2835_v56 }
 0x2f9   : >> { %6253 = vmatprep.mubr.msk.bf16.mxu0 %vm226_vm0, %v2838_v35 }
 0x300   : >> { %3188 = vmatmul.mubr.bf16.gmra.mrb[84].mxu0 %v2837_v11 }
 0x301   : >> { %6254 = vmatprep.mubr.msk.bf16.mxu0 %vm226_vm0, %v2840_v29 }
 0x308   : >> { %3196 = vmatmul.mubr.bf16.gmra.mrb[88].mxu0 %v2839_v39 }
 0x309   : >> { %6255 = vmatprep.mubr.msk.bf16.mxu0 %vm226_vm0, %v2842_v40 }
 0x310   : >> { %3204 = vmatmul.mubr.bf16.gmra.mrb[92].mxu0 %v2841_v38 }
 0x32b   : >> { %v9600_v34 = vpop.f32.mrb[0].mxu0 }
 0x32c   : >> { %v3023_v23 = vpop.f32.mrb[1].mxu0  ;;  %v12309_v42 = vrot.slane %v9600_v34, 7  ;;  %v3405_v0 = vrot.slane %v9600_v34, 1 }
 0x32d   : >> { %v3024_v46 = vpop.f32.mrb[2].mxu0 }
 0x32e   : >> { %v6784_v61 = vpack.i.bf16 %v3024_v46, %v9600_v34  ;;  %v3262_v2 = vrot.slane %v3024_v46, 7  ;;  %v3026_v55 = vpop.f32.mrb[3].mxu0  ;;  %v3406_v24 = vrot.slane %v3024_v46, 1 }
 0x330   : >> { %6785 = vrot.lane.b32.xlu0 %v6784_v61, %s6947_s13  ;;  %v3407_v9 = vsel %vm745_vm1, %v3405_v0, %v3406_v24  ;;  %v9610_v6 = vsel %vm3260_vm3, %v12309_v42, %v3262_v2 }
 0x333   : >> { %v3029_v62 = vpop.f32.mrb[4].mxu0 }
 0x334   : >> { %v3264_v59 = vrot.slane %v3029_v62, 7  ;;  %v3031_v4 = vpop.f32.mrb[5].mxu0  ;;  %v3408_v14 = vrot.slane %v3029_v62, 1 }
 0x335   : >> { %v9612_v7 = vpop.f32.mrb[6].mxu0 }
 0x336   : >> { %v6789_v32 = vpack.i.bf16 %v9612_v7, %v3029_v62  ;;  %v3034_v22 = vpop.f32.mrb[7].mxu0  ;;  %v3409_v3 = vsel %vm745_vm1, %v3406_v24, %v3408_v14  ;;  %v9617_v19 = vsel %vm3260_vm3, %v3262_v2, %v3264_v59  ;;  %v3410_v51 = vrot.slane %v9612_v7, 1 }
 0x337   : >> { %v3742_v49 = vpack.c.bf16 %v3409_v3, %v3407_v9  ;;  %v12307_v18 = vrot.slane %v9612_v7, 7  ;;  %v9624_v56 = vsel %vm745_vm1, %v3408_v14, 0.0 }
 0x338   : >> { %6790 = vrot.lane.b32.xlu1 %v6789_v32, %s6947_s13 }
 0x339   : >> { %6268 = vmatprep.mubr.msk.bf16.mxu1 %vm226_vm0, %v3742_v49 }
 0x33b   : >> { %v3037_v20 = vpop.f32.mrb[8].mxu0 }
 0x33c   : >> { %v3267_v10 = vrot.slane %v3037_v20, 7  ;;  %v3411_v33 = vrot.slane %v3037_v20, 1  ;;  %v3039_v43 = vpop.f32.mrb[9].mxu0 }
 0x33d   : >> { %v3040_v48 = vpop.f32.mrb[10].mxu0 }
 0x33e   : >> { %v6794_v50 = vpack.i.bf16 %v3040_v48, %v3037_v20  ;;  %v3269_v41 = vrot.slane %v3040_v48, 7  ;;  %v3413_v35 = vrot.slane %v3040_v48, 1  ;;  %v3042_v53 = vpop.f32.mrb[11].mxu0  ;;  %v9627_v57 = vsel %vm745_vm1, %v3410_v51, %v3411_v33 }
 0x33f   : >> { %v9634_v58 = vsel %vm3260_vm3, %v12307_v18, %v3267_v10 }
 0x340   : >> { %6795 = vrot.lane.b32.xlu0 %v6794_v50, %s6947_s13  ;;  %v9638_v15 = vsel %vm745_vm1, %v3411_v33, %v3413_v35  ;;  %v9641_v54 = vsel %vm745_vm1, %v3413_v35, 0.0  ;;  %v9644_v11 = vsel %vm3260_vm3, %v3267_v10, %v3269_v41 }
 0x343   : >> { %v9648_v45 = vpop.f32.mrb[12].mxu0 }
 0x344   : >> { %v3047_v29 = vpop.f32.mrb[13].mxu0  ;;  %v12306_v27 = vrot.slane %v9648_v45, 7  ;;  %v3415_v1 = vrot.slane %v9648_v45, 1 }
 0x345   : >> { %v3048_v13 = vpop.f32.mrb[14].mxu0 }
 0x346   : >> { %v6799_v5 = vpack.i.bf16 %v3048_v13, %v9648_v45  ;;  %v3272_v47 = vrot.slane %v3048_v13, 7  ;;  %v3416_v60 = vrot.slane %v3048_v13, 1  ;;  %v3050_v30 = vpop.f32.mrb[15].mxu0 }
 0x348   : >> { %6800 = vrot.lane.b32.xlu1 %v6799_v5, %s6947_s13  ;;  %v9655_v39 = vsel %vm745_vm1, %v3415_v1, %v3416_v60  ;;  %v9660_v16 = vsel %vm3260_vm3, %v12306_v27, %v3272_v47 }
 0x34b   : >> { %v3053_v31 = vpop.f32.mrb[16].mxu0 }
 0x34c   : >> { %v3274_v40 = vrot.slane %v3053_v31, 7  ;;  %v3418_v21 = vrot.slane %v3053_v31, 1  ;;  %v3055_v44 = vpop.f32.mrb[17].mxu0 }
 0x34d   : >> { %v9662_v8 = vpop.f32.mrb[18].mxu0 }
 0x34e   : >> { %v6804_v36 = vpack.i.bf16 %v9662_v8, %v3053_v31  ;;  %v3058_v38 = vpop.f32.mrb[19].mxu0  ;;  %v9666_v12 = vsel %vm745_vm1, %v3416_v60, %v3418_v21  ;;  %v9671_v63 = vsel %vm3260_vm3, %v3272_v47, %v3274_v40  ;;  %v3420_v52 = vrot.slane %v9662_v8, 1 }
 0x34f   : >> { %v12305_v61 = vrot.slane %v9662_v8, 7  ;;  %v9677_v55 = vsel %vm745_vm1, %v3418_v21, 0.0 }
 0x350   : >> { %6805 = vrot.lane.b32.xlu0 %v6804_v36, %s6947_s13 }
 0x353   : >> { %v3061_v28 = vpop.f32.mrb[20].mxu0 }
 0x354   : >> { %v3277_v37 = vrot.slane %v3061_v28, 7  ;;  %v3421_v23 = vrot.slane %v3061_v28, 1  ;;  %v3063_v46 = vpop.f32.mrb[21].mxu0 }
 0x355   : >> { %v3064_v2 = vpop.f32.mrb[22].mxu0 }
 0x356   : >> { %v6809_v0 = vpack.i.bf16 %v3064_v2, %v3061_v28  ;;  %v3279_v24 = vrot.slane %v3064_v2, 7  ;;  %v3423_v9 = vrot.slane %v3064_v2, 1  ;;  %v3066_v62 = vpop.f32.mrb[23].mxu0  ;;  %v9680_v59 = vsel %vm745_vm1, %v3420_v52, %v3421_v23 }
 0x357   : >> { %v9687_v14 = vsel %vm3260_vm3, %v12305_v61, %v3277_v37 }
 0x358   : >> { %6810 = vrot.lane.b32.xlu1 %v6809_v0, %s6947_s13  ;;  %v9691_v32 = vsel %vm745_vm1, %v3421_v23, %v3423_v9  ;;  %v9694_v22 = vsel %vm745_vm1, %v3423_v9, 0.0  ;;  %v9697_v3 = vsel %vm3260_vm3, %v3277_v37, %v3279_v24 }
 0x35b   : >> { %v9701_v20 = vpop.f32.mrb[24].mxu0 }
 0x35c   : >> { %v3071_v51 = vpop.f32.mrb[25].mxu0  ;;  %v12303_v10 = vrot.slane %v9701_v20, 7  ;;  %v3425_v43 = vrot.slane %v9701_v20, 1 }
 0x35d   : >> { %v3072_v33 = vpop.f32.mrb[26].mxu0 }
 0x35e   : >> { %v6814_v48 = vpack.i.bf16 %v3072_v33, %v9701_v20  ;;  %v3282_v50 = vrot.slane %v3072_v33, 7  ;;  %v3426_v41 = vrot.slane %v3072_v33, 1  ;;  %v3074_v35 = vpop.f32.mrb[27].mxu0 }
 0x360   : >> { %6815 = vrot.lane.b32.xlu0 %v6814_v48, %s6947_s13  ;;  %v9708_v53 = vsel %vm745_vm1, %v3425_v43, %v3426_v41  ;;  %v9713_v29 = vsel %vm3260_vm3, %v12303_v10, %v3282_v50 }
 0x363   : >> { %v3077_v13 = vpop.f32.mrb[28].mxu0 }
 0x364   : >> { %v3284_v1 = vrot.slane %v3077_v13, 7  ;;  %v3428_v5 = vrot.slane %v3077_v13, 1  ;;  %v3079_v47 = vpop.f32.mrb[29].mxu0 }
 0x365   : >> { %v9715_v60 = vpop.f32.mrb[30].mxu0 }
 0x366   : >> { %v6819_v30 = vpack.i.bf16 %v9715_v60, %v3077_v13  ;;  %v3082_v31 = vpop.f32.mrb[31].mxu0  ;;  %v9719_v40 = vsel %vm745_vm1, %v3426_v41, %v3428_v5  ;;  %v9724_v44 = vsel %vm3260_vm3, %v3282_v50, %v3284_v1  ;;  %v3430_v38 = vrot.slane %v9715_v60, 1 }
 0x367   : >> { %v12302_v23 = vrot.slane %v9715_v60, 7  ;;  %v9730_v2 = vsel %vm745_vm1, %v3428_v5, 0.0 }
 0x368   : >> { %6820 = vrot.lane.b32.xlu1 %v6819_v30, %s6947_s13 }
 0x36b   : >> { %v3085_v36 = vpop.f32.mrb[32].mxu0 }
 0x36c   : >> { %v3287_v28 = vrot.slane %v3085_v36, 7  ;;  %v3431_v52 = vrot.slane %v3085_v36, 1  ;;  %v3087_v37 = vpop.f32.mrb[33].mxu0 }
 0x36d   : >> { %v3088_v46 = vpop.f32.mrb[34].mxu0 }
 0x36e   : >> { %v6824_v0 = vpack.i.bf16 %v3088_v46, %v3085_v36  ;;  %v3289_v24 = vrot.slane %v3088_v46, 7  ;;  %v3433_v9 = vrot.slane %v3088_v46, 1  ;;  %v3090_v62 = vpop.f32.mrb[35].mxu0  ;;  %v9733_v51 = vsel %vm745_vm1, %v3430_v38, %v3431_v52 }
 0x36f   : >> { %v9740_v43 = vsel %vm3260_vm3, %v12302_v23, %v3287_v28 }
 0x370   : >> { %6825 = vrot.lane.b32.xlu0 %v6824_v0, %s6947_s13  ;;  %v9744_v48 = vsel %vm745_vm1, %v3431_v52, %v3433_v9  ;;  %v9747_v50 = vsel %vm745_vm1, %v3433_v9, 0.0  ;;  %v9750_v41 = vsel %vm3260_vm3, %v3287_v28, %v3289_v24 }
 0x373   : >> { %v9754_v13 = vpop.f32.mrb[36].mxu0 }
 0x374   : >> { %v3095_v1 = vpop.f32.mrb[37].mxu0  ;;  %v12301_v5 = vrot.slane %v9754_v13, 7  ;;  %v3435_v30 = vrot.slane %v9754_v13, 1 }
 0x375   : >> { %v3096_v47 = vpop.f32.mrb[38].mxu0 }
 0x376   : >> { %v6829_v31 = vpack.i.bf16 %v3096_v47, %v9754_v13  ;;  %v3292_v36 = vrot.slane %v3096_v47, 7  ;;  %v3436_v38 = vrot.slane %v3096_v47, 1  ;;  %v3098_v52 = vpop.f32.mrb[39].mxu0 }
 0x378   : >> { %6830 = vrot.lane.b32.xlu1 %v6829_v31, %s6947_s13  ;;  %v9761_v28 = vsel %vm745_vm1, %v3435_v30, %v3436_v38  ;;  %v9766_v37 = vsel %vm3260_vm3, %v12301_v5, %v3292_v36 }
 0x37b   : >> { %v3101_v46 = vpop.f32.mrb[40].mxu0 }
 0x37c   : >> { %v3294_v0 = vrot.slane %v3101_v46, 7  ;;  %v3438_v24 = vrot.slane %v3101_v46, 1  ;;  %v3103_v9 = vpop.f32.mrb[41].mxu0 }
 0x37d   : >> { %v9768_v62 = vpop.f32.mrb[42].mxu0 }
 0x37e   : >> { %v6834_v1 = vpack.i.bf16 %v9768_v62, %v3101_v46  ;;  %v3106_v47 = vpop.f32.mrb[43].mxu0  ;;  %v9772_v52 = vsel %vm745_vm1, %v3436_v38, %v3438_v24  ;;  %v9777_v31 = vsel %vm3260_vm3, %v3292_v36, %v3294_v0  ;;  %v3440_v35 = vrot.slane %v9768_v62, 1 }
 0x37f   : >> { %v12304_v46 = vrot.slane %v9768_v62, 7  ;;  %v9783_v38 = vsel %vm745_vm1, %v3438_v24, 0.0 }
 0x380   : >> { %6835 = vrot.lane.b32.xlu0 %v6834_v1, %s6947_s13 }
 0x383   : >> { %v3109_v5 = vpop.f32.mrb[44].mxu0 }
 0x384   : >> { %v3297_v9 = vrot.slane %v3109_v5, 7  ;;  %v3441_v23 = vrot.slane %v3109_v5, 1  ;;  %v3111_v33 = vpop.f32.mrb[45].mxu0 }
 0x385   : >> { %v3112_v47 = vpop.f32.mrb[46].mxu0 }
 0x386   : >> { %v6839_v10 = vpack.i.bf16 %v3112_v47, %v3109_v5  ;;  %v3299_v21 = vrot.slane %v3112_v47, 7  ;;  %v3443_v30 = vrot.slane %v3112_v47, 1  ;;  %v3114_v49 = vpop.f32.mrb[47].mxu0  ;;  %v9786_v36 = vsel %vm745_vm1, %v3440_v35, %v3441_v23 }
 0x387   : >> { %v9793_v33 = vsel %vm3260_vm3, %v12304_v46, %v3297_v9 }
 0x388   : >> { %6840 = vrot.lane.b32.xlu1 %v6839_v10, %s6947_s13  ;;  %v9797_v24 = vsel %vm745_vm1, %v3441_v23, %v3443_v30  ;;  %v9800_v5 = vsel %vm745_vm1, %v3443_v30, 0.0  ;;  %v9803_v49 = vsel %vm3260_vm3, %v3297_v9, %v3299_v21 }
 0x389   : >> { %12837 = vst [vmem:[#allocation163_spill] sm:$0xff] %v9803_v49 }
 0x38b   : >> { %v9807_v1 = vpop.f32.mrb[48].mxu0 }
 0x38c   : >> { %12838 = vst [vmem:[#allocation164_spill] sm:$0xff] %v9807_v1  ;;  %v3119_v47 = vpop.f32.mrb[49].mxu0  ;;  %v12308_v46 = vrot.slane %v9807_v1, 7  ;;  %v3445_v10 = vrot.slane %v9807_v1, 1 }
 0x38d   : >> { %v3120_v0 = vpop.f32.mrb[50].mxu0 }
 0x38e   : >> { %v6844_v23 = vpack.i.bf16 %v3120_v0, %v9807_v1  ;;  %v3302_v61 = vrot.slane %v3120_v0, 7  ;;  %v3446_v4 = vrot.slane %v3120_v0, 1  ;;  %v3122_v30 = vpop.f32.mrb[51].mxu0 }
 0x390   : >> { %6845 = vrot.lane.b32.xlu0 %v6844_v23, %s6947_s13  ;;  %v9814_v21 = vsel %vm745_vm1, %v3445_v10, %v3446_v4  ;;  %v9819_v9 = vsel %vm3260_vm3, %v12308_v46, %v3302_v61 }
 0x391   : >> { %12839 = vst [vmem:[#allocation165_spill] sm:$0xff] %v9814_v21  ;;  %12840 = vst [vmem:[#allocation166_spill] sm:$0xff] %v9819_v9 }
 0x393   : >> { %v3125_v47 = vpop.f32.mrb[52].mxu0 }
 0x394   : >> { %v3304_v35 = vrot.slane %v3125_v47, 7  ;;  %v3448_v27 = vrot.slane %v3125_v47, 1  ;;  %v3127_v17 = vpop.f32.mrb[53].mxu0 }
 0x395   : >> { %v9821_v25 = vpop.f32.mrb[54].mxu0 }
 0x396   : >> { %12841 = vst [vmem:[#allocation167_spill] sm:$0xff] %v9821_v25  ;;  %v6849_v18 = vpack.i.bf16 %v9821_v25, %v3125_v47  ;;  %v3130_v0 = vpop.f32.mrb[55].mxu0  ;;  %v9825_v30 = vsel %vm745_vm1, %v3446_v4, %v3448_v27  ;;  %v9830_v23 = vsel %vm3260_vm3, %v3302_v61, %v3304_v35  ;;  %v3450_v26 = vrot.slane %v9821_v25, 1 }
 0x397   : >> { %12842 = vst [vmem:[#allocation168_spill] sm:$0xff] %v9830_v23  ;;  %v12312_v47 = vrot.slane %v9821_v25, 7  ;;  %v9836_v4 = vsel %vm745_vm1, %v3448_v27, 0.0 }
 0x398   : >> { %6850 = vrot.lane.b32.xlu1 %v6849_v18, %s6947_s13 }
 0x39b   : >> { %v3133_v46 = vpop.f32.mrb[56].mxu0 }
 0x39c   : >> { %v3307_v17 = vrot.slane %v3133_v46, 7  ;;  %v3451_v42 = vrot.slane %v3133_v46, 1  ;;  %v3135_v9 = vpop.f32.mrb[57].mxu0 }
 0x39d   : >> { %v3136_v0 = vpop.f32.mrb[58].mxu0 }
 0x39e   : >> { %v6854_v1 = vpack.i.bf16 %v3136_v0, %v3133_v46  ;;  %v3309_v49 = vrot.slane %v3136_v0, 7  ;;  %v3453_v10 = vrot.slane %v3136_v0, 1  ;;  %v3138_v21 = vpop.f32.mrb[59].mxu0  ;;  %v9839_v61 = vsel %vm745_vm1, %v3450_v26, %v3451_v42 }
 0x39f   : >> { %v9846_v35 = vsel %vm3260_vm3, %v12312_v47, %v3307_v17  ;;  %v12847_v47 = vrot.slane %v9600_v34, 7 }
 0x3a0   : >> { %12843 = vst [vmem:[#allocation169_spill] sm:$0xff] %v9846_v35  ;;  %6855 = vrot.lane.b32.xlu0 %v6854_v1, %s6947_s13  ;;  %v9850_v27 = vsel %vm745_vm1, %v3451_v42, %v3453_v10  ;;  %v9853_v46 = vsel %vm745_vm1, %v3453_v10, 0.0  ;;  %v9856_v21 = vsel %vm3260_vm3, %v3307_v17, %v3309_v49 }
 0x3a1   : >> { %12844 = vst [vmem:[#allocation170_spill] sm:$0xff] %v9850_v27  ;;  %12845 = vst [vmem:[#allocation171_spill] sm:$0xff] %v9853_v46  ;;  %v3389_v1 = vsel %vm3260_vm3, 0.0, %v12847_v47  ;;  %v12848_v47 = vpack.c.bf16 %v9627_v57, %v9624_v56 }
 0x3a2   : >> { %12846 = vst [vmem:[#allocation172_spill] sm:$0xff] %v9856_v21  ;;  %v6786_v9 = vpop.permute.xlu0 %6785 }
 0x3a3   : >> { %v6788_v0 = vunpack.i.h.bf16 %v6786_v9  ;;  %v6787_v18 = vunpack.i.l.bf16 %v6786_v9  ;;  %v9860_v23 = vpop.f32.mrb[60].mxu0 }
 0x3a4   : >> { %v3143_v42 = vpop.f32.mrb[61].mxu0  ;;  %v12316_v49 = vrot.slane %v9860_v23, 7  ;;  %v3455_v17 = vrot.slane %v9860_v23, 1 }
 0x3a5   : >> { %v3693_v35 = vsel %vm226_vm0, %v3389_v1, %v6787_v18  ;;  %v3694_v10 = vsel %vm226_vm0, %v9610_v6, %v6788_v0  ;;  %v3144_v26 = vpop.f32.mrb[62].mxu0 }
 0x3a6   : >> { %v6859_v21 = vpack.i.bf16 %v3144_v26, %v9860_v23  ;;  %v3312_v9 = vrot.slane %v3144_v26, 7  ;;  %v3456_v27 = vrot.slane %v3144_v26, 1  ;;  %v3146_v46 = vpop.f32.mrb[63].mxu0  ;;  %v3741_v25 = vpack.c.bf16 %v3694_v10, %v3693_v35 }
 0x3a8   : >> { %3966 = vmatmul.mubr.bf16.vlgmr.msra.gmra.mrb[0].mxu1 %v3741_v25  ;;  %6860 = vrot.lane.b32.xlu1 %v6859_v21, %s6947_s13  ;;  %v9873_v34 = vsel %vm745_vm1, %v3455_v17, %v3456_v27  ;;  %v9878_v6 = vsel %vm3260_vm3, %v12316_v49, %v3312_v9  ;;  %v12849_v25 = vrot.slane %v9612_v7, 7 }
 0x3a9   : >> { %6269 = vmatprep.mubr.msk.bf16.mxu1 %vm226_vm0, %v12848_v47 }
 0x3aa   : >> { %v6791_v18 = vpop.permute.xlu1 %6790  ;;  %v3390_v21 = vsel %vm3260_vm3, 0.0, %v12849_v25 }
 0x3ab   : >> { %v6793_v26 = vunpack.i.h.bf16 %v6791_v18  ;;  %v6792_v46 = vunpack.i.l.bf16 %v6791_v18  ;;  %v3149_v35 = vpop.f32.mrb[64].mxu0 }
 0x3ac   : >> { %v3314_v0 = vrot.slane %v3149_v35, 7  ;;  %v3458_v1 = vrot.slane %v3149_v35, 1  ;;  %v3151_v42 = vpop.f32.mrb[65].mxu0 }
 0x3ad   : >> { %v3695_v10 = vsel %vm226_vm0, %v9617_v19, %v6792_v46  ;;  %v3696_v17 = vsel %vm226_vm0, %v3390_v21, %v6793_v26  ;;  %v9890_v49 = vpop.f32.mrb[66].mxu0  ;;  %v12851_v26 = vpack.c.bf16 %v9641_v54, %v9638_v15 }
 0x3ae   : >> { %v6864_v56 = vpack.i.bf16 %v9890_v49, %v3149_v35  ;;  %v3154_v57 = vpop.f32.mrb[67].mxu0  ;;  %v3743_v47 = vpack.c.bf16 %v3696_v17, %v3695_v10  ;;  %v9894_v18 = vsel %vm745_vm1, %v3456_v27, %v3458_v1  ;;  %v9897_v7 = vsel %vm3260_vm3, %v3312_v9, %v3314_v0 }
 0x3af   : >> { %12850 = vst [vmem:[#allocation173_spill] sm:$0xff] %v9897_v7  ;;  %v12317_v9 = vrot.slane %v9890_v49, 7  ;;  %v3460_v0 = vrot.slane %v9890_v49, 1 }
 0x3b0   : >> { %3974 = vmatmul.mubr.bf16.gmra.mrb[4].mxu1 %v3743_v47  ;;  %6865 = vrot.lane.b32.xlu0 %v6864_v56, %s6947_s13 }
 0x3b1   : >> { %6270 = vmatprep.mubr.msk.bf16.mxu1 %vm226_vm0, %v12851_v26 }
 0x3b2   : >> { %v6796_v46 = vpop.permute.xlu0 %6795 }
 0x3b3   : >> { %v6798_v35 = vunpack.i.h.bf16 %v6796_v46  ;;  %v6797_v25 = vunpack.i.l.bf16 %v6796_v46  ;;  %v3157_v21 = vpop.f32.mrb[68].mxu0 }
 0x3b4   : >> { %v3317_v27 = vrot.slane %v3157_v21, 7  ;;  %v3461_v42 = vrot.slane %v3157_v21, 1  ;;  %v3159_v10 = vpop.f32.mrb[69].mxu0 }
 0x3b5   : >> { %v3697_v17 = vsel %vm226_vm0, %v9634_v58, %v6797_v25  ;;  %v3698_v56 = vsel %vm226_vm0, %v9644_v11, %v6798_v35  ;;  %v3160_v15 = vpop.f32.mrb[70].mxu0  ;;  %v9916_v10 = vsel %vm745_vm1, %v3458_v1, 0.0  ;;  %v12852_v25 = vpack.c.bf16 %v9666_v12, %v9655_v39 }
 0x3b6   : >> { %v6869_v54 = vpack.i.bf16 %v3160_v15, %v3157_v21  ;;  %v3319_v57 = vrot.slane %v3160_v15, 7  ;;  %v3463_v47 = vrot.slane %v3160_v15, 1  ;;  %v3162_v26 = vpop.f32.mrb[71].mxu0  ;;  %v3745_v46 = vpack.c.bf16 %v3698_v56, %v3697_v17 }
 0x3b7   : >> { %v9913_v19 = vsel %vm745_vm1, %v3460_v0, %v3461_v42  ;;  %v9921_v7 = vsel %vm3260_vm3, %v12317_v9, %v3317_v27 }
 0x3b8   : >> { %3982 = vmatmul.mubr.bf16.gmra.mrb[8].mxu1 %v3745_v46  ;;  %6870 = vrot.lane.b32.xlu1 %v6869_v54, %s6947_s13  ;;  %v9927_v11 = vsel %vm745_vm1, %v3461_v42, %v3463_v47  ;;  %v9930_v35 = vsel %vm745_vm1, %v3463_v47, 0.0  ;;  %v9933_v1 = vsel %vm3260_vm3, %v3317_v27, %v3319_v57  ;;  %v12853_v42 = vrot.slane %v9648_v45, 7 }
 0x3b9   : >> { %6271 = vmatprep.mubr.msk.bf16.mxu1 %vm226_vm0, %v12852_v25 }
 0x3ba   : >> { %v6801_v0 = vpop.permute.xlu1 %6800  ;;  %v3391_v54 = vsel %vm3260_vm3, 0.0, %v12853_v42 }
 0x3bb   : >> { %v6803_v17 = vunpack.i.h.bf16 %v6801_v0  ;;  %v6802_v56 = vunpack.i.l.bf16 %v6801_v0  ;;  %v9941_v15 = vpop.f32.mrb[72].mxu0 }
 0x3bc   : >> { %v3167_v47 = vpop.f32.mrb[73].mxu0  ;;  %v12318_v12 = vrot.slane %v9941_v15, 7  ;;  %v3465_v57 = vrot.slane %v9941_v15, 1 }
 0x3bd   : >> { %v3699_v27 = vsel %vm226_vm0, %v3391_v54, %v6802_v56  ;;  %v3700_v39 = vsel %vm226_vm0, %v9660_v16, %v6803_v17  ;;  %v3168_v26 = vpop.f32.mrb[74].mxu0  ;;  %v12854_v17 = vpack.c.bf16 %v9680_v59, %v9677_v55 }
 0x3be   : >> { %v6874_v46 = vpack.i.bf16 %v3168_v26, %v9941_v15  ;;  %v3322_v25 = vrot.slane %v3168_v26, 7  ;;  %v3466_v0 = vrot.slane %v3168_v26, 1  ;;  %v3170_v21 = vpop.f32.mrb[75].mxu0  ;;  %v3747_v9 = vpack.c.bf16 %v3700_v39, %v3699_v27 }
 0x3c0   : >> { %3990 = vmatmul.mubr.bf16.gmra.mrb[12].mxu1 %v3747_v9  ;;  %6875 = vrot.lane.b32.xlu0 %v6874_v46, %s6947_s13  ;;  %v9954_v45 = vsel %vm745_vm1, %v3465_v57, %v3466_v0  ;;  %v9959_v16 = vsel %vm3260_vm3, %v12318_v12, %v3322_v25  ;;  %v12855_v9 = vrot.slane %v9662_v8, 7 }
 0x3c1   : >> { %6272 = vmatprep.mubr.msk.bf16.mxu1 %vm226_vm0, %v12854_v17 }
 0x3c2   : >> { %v6806_v56 = vpop.permute.xlu0 %6805  ;;  %v3392_v47 = vsel %vm3260_vm3, 0.0, %v12855_v9 }
 0x3c3   : >> { %v6808_v42 = vunpack.i.h.bf16 %v6806_v56  ;;  %v6807_v21 = vunpack.i.l.bf16 %v6806_v56  ;;  %v3173_v54 = vpop.f32.mrb[76].mxu0 }
 0x3c4   : >> { %v3324_v27 = vrot.slane %v3173_v54, 7  ;;  %v3468_v39 = vrot.slane %v3173_v54, 1  ;;  %v3175_v57 = vpop.f32.mrb[77].mxu0 }
 0x3c5   : >> { %v3701_v26 = vsel %vm226_vm0, %v9671_v63, %v6807_v21  ;;  %v3702_v46 = vsel %vm226_vm0, %v3392_v47, %v6808_v42  ;;  %v9971_v12 = vpop.f32.mrb[78].mxu0  ;;  %v12856_v42 = vpack.c.bf16 %v9694_v22, %v9691_v32 }
 0x3c6   : >> { %v6879_v55 = vpack.i.bf16 %v9971_v12, %v3173_v54  ;;  %v3178_v59 = vpop.f32.mrb[79].mxu0  ;;  %v3749_v17 = vpack.c.bf16 %v3702_v46, %v3701_v26  ;;  %v9975_v56 = vsel %vm745_vm1, %v3466_v0, %v3468_v39  ;;  %v9978_v8 = vsel %vm3260_vm3, %v3322_v25, %v3324_v27 }
 0x3c7   : >> { %v12319_v25 = vrot.slane %v9971_v12, 7  ;;  %v3470_v27 = vrot.slane %v9971_v12, 1 }
 0x3c8   : >> { %3998 = vmatmul.mubr.bf16.gmra.mrb[16].mxu1 %v3749_v17  ;;  %6880 = vrot.lane.b32.xlu1 %v6879_v55, %s6947_s13 }
 0x3c9   : >> { %6273 = vmatprep.mubr.msk.bf16.mxu1 %vm226_vm0, %v12856_v42 }
 0x3ca   : >> { %v6811_v21 = vpop.permute.xlu1 %6810 }
 0x3cb   : >> { %v6813_v54 = vunpack.i.h.bf16 %v6811_v21  ;;  %v6812_v9 = vunpack.i.l.bf16 %v6811_v21  ;;  %v3181_v47 = vpop.f32.mrb[80].mxu0 }
 0x3cc   : >> { %v3327_v0 = vrot.slane %v3181_v47, 7  ;;  %v3471_v57 = vrot.slane %v3181_v47, 1  ;;  %v3183_v26 = vpop.f32.mrb[81].mxu0 }
 0x3cd   : >> { %v3703_v46 = vsel %vm226_vm0, %v9687_v14, %v6812_v9  ;;  %v3704_v55 = vsel %vm226_vm0, %v9697_v3, %v6813_v54  ;;  %v3184_v32 = vpop.f32.mrb[82].mxu0  ;;  %v9997_v26 = vsel %vm745_vm1, %v3468_v39, 0.0  ;;  %v12857_v9 = vpack.c.bf16 %v9719_v40, %v9708_v53 }
 0x3ce   : >> { %v6884_v22 = vpack.i.bf16 %v3184_v32, %v3181_v47  ;;  %v3329_v59 = vrot.slane %v3184_v32, 7  ;;  %v3473_v17 = vrot.slane %v3184_v32, 1  ;;  %v3186_v42 = vpop.f32.mrb[83].mxu0  ;;  %v3751_v21 = vpack.c.bf16 %v3704_v55, %v3703_v46 }
 0x3cf   : >> { %v9994_v63 = vsel %vm745_vm1, %v3470_v27, %v3471_v57  ;;  %v10002_v58 = vsel %vm3260_vm3, %v12319_v25, %v3327_v0 }
 0x3d0   : >> { %4006 = vmatmul.mubr.bf16.gmra.mrb[20].mxu1 %v3751_v21  ;;  %6885 = vrot.lane.b32.xlu0 %v6884_v22, %s6947_s13  ;;  %v10008_v3 = vsel %vm745_vm1, %v3471_v57, %v3473_v17  ;;  %v10011_v54 = vsel %vm745_vm1, %v3473_v17, 0.0  ;;  %v10014_v39 = vsel %vm3260_vm3, %v3327_v0, %v3329_v59  ;;  %v12858_v57 = vrot.slane %v9701_v20, 7 }
 0x3d1   : >> { %6274 = vmatprep.mubr.msk.bf16.mxu1 %vm226_vm0, %v12857_v9 }
 0x3d2   : >> { %v6816_v27 = vpop.permute.xlu0 %6815  ;;  %v3393_v22 = vsel %vm3260_vm3, 0.0, %v12858_v57 }
 0x3d3   : >> { %v6818_v46 = vunpack.i.h.bf16 %v6816_v27  ;;  %v6817_v55 = vunpack.i.l.bf16 %v6816_v27  ;;  %v10022_v32 = vpop.f32.mrb[84].mxu0 }
 0x3d4   : >> { %v3191_v17 = vpop.f32.mrb[85].mxu0  ;;  %v12320_v40 = vrot.slane %v10022_v32, 7  ;;  %v3475_v59 = vrot.slane %v10022_v32, 1 }
 0x3d5   : >> { %v3705_v0 = vsel %vm226_vm0, %v3393_v22, %v6817_v55  ;;  %v3706_v53 = vsel %vm226_vm0, %v9713_v29, %v6818_v46  ;;  %v3192_v42 = vpop.f32.mrb[86].mxu0  ;;  %v12859_v46 = vpack.c.bf16 %v9733_v51, %v9730_v2 }
 0x3d6   : >> { %v6889_v21 = vpack.i.bf16 %v3192_v42, %v10022_v32  ;;  %v3332_v9 = vrot.slane %v3192_v42, 7  ;;  %v3476_v27 = vrot.slane %v3192_v42, 1  ;;  %v3194_v47 = vpop.f32.mrb[87].mxu0  ;;  %v3753_v25 = vpack.c.bf16 %v3706_v53, %v3705_v0 }
 0x3d8   : >> { %4014 = vmatmul.mubr.bf16.gmra.mrb[24].mxu1 %v3753_v25  ;;  %6890 = vrot.lane.b32.xlu1 %v6889_v21, %s6947_s13  ;;  %v10035_v20 = vsel %vm745_vm1, %v3475_v59, %v3476_v27  ;;  %v10040_v29 = vsel %vm3260_vm3, %v12320_v40, %v3332_v9  ;;  %v12860_v25 = vrot.slane %v9715_v60, 7 }
 0x3d9   : >> { %6275 = vmatprep.mubr.msk.bf16.mxu1 %vm226_vm0, %v12859_v46 }
 0x3da   : >> { %v6821_v55 = vpop.permute.xlu1 %6820  ;;  %v3394_v17 = vsel %vm3260_vm3, 0.0, %v12860_v25 }
 0x3db   : >> { %v6823_v57 = vunpack.i.h.bf16 %v6821_v55  ;;  %v6822_v47 = vunpack.i.l.bf16 %v6821_v55  ;;  %v3197_v22 = vpop.f32.mrb[88].mxu0 }
 0x3dc   : >> { %v3334_v0 = vrot.slane %v3197_v22, 7  ;;  %v3478_v53 = vrot.slane %v3197_v22, 1  ;;  %v3199_v59 = vpop.f32.mrb[89].mxu0 }
 0x3dd   : >> { %v3707_v42 = vsel %vm226_vm0, %v9724_v44, %v6822_v47  ;;  %v3708_v21 = vsel %vm226_vm0, %v3394_v17, %v6823_v57  ;;  %v10052_v40 = vpop.f32.mrb[90].mxu0  ;;  %v12861_v57 = vpack.c.bf16 %v9747_v50, %v9744_v48 }
 0x3de   : >> { %v6894_v2 = vpack.i.bf16 %v10052_v40, %v3197_v22  ;;  %v3202_v51 = vpop.f32.mrb[91].mxu0  ;;  %v3755_v46 = vpack.c.bf16 %v3708_v21, %v3707_v42  ;;  %v10056_v55 = vsel %vm745_vm1, %v3476_v27, %v3478_v53  ;;  %v10059_v60 = vsel %vm3260_vm3, %v3332_v9, %v3334_v0 }
 0x3df   : >> { %v3336_v9 = vrot.slane %v10052_v40, 7  ;;  %v3480_v0 = vrot.slane %v10052_v40, 1 }
 0x3e0   : >> { %4022 = vmatmul.mubr.bf16.gmra.mrb[28].mxu1 %v3755_v46  ;;  %6895 = vrot.lane.b32.xlu0 %v6894_v2, %s6947_s13 }
 0x3e1   : >> { %6276 = vmatprep.mubr.msk.bf16.mxu1 %vm226_vm0, %v12861_v57 }
 0x3e2   : >> { %v6826_v47 = vpop.permute.xlu0 %6825 }
 0x3e3   : >> { %v6828_v22 = vunpack.i.h.bf16 %v6826_v47  ;;  %v6827_v25 = vunpack.i.l.bf16 %v6826_v47  ;;  %v3205_v17 = vpop.f32.mrb[92].mxu0 }
 0x3e4   : >> { %v3337_v27 = vrot.slane %v3205_v17, 7  ;;  %v3481_v59 = vrot.slane %v3205_v17, 1  ;;  %v3207_v42 = vpop.f32.mrb[93].mxu0 }
 0x3e5   : >> { %v3709_v21 = vsel %vm226_vm0, %v9740_v43, %v6827_v25  ;;  %v3710_v2 = vsel %vm226_vm0, %v9750_v41, %v6828_v22  ;;  %v3208_v48 = vpop.f32.mrb[94].mxu0  ;;  %v10078_v42 = vsel %vm745_vm1, %v3478_v53, 0.0  ;;  %v12862_v25 = vpack.c.bf16 %v9772_v52, %v9761_v28 }
 0x3e6   : >> { %v6899_v50 = vpack.i.bf16 %v3208_v48, %v3205_v17  ;;  %v3339_v51 = vrot.slane %v3208_v48, 7  ;;  %v3483_v46 = vrot.slane %v3208_v48, 1  ;;  %v3210_v57 = vpop.f32.mrb[95].mxu0  ;;  %v3757_v47 = vpack.c.bf16 %v3710_v2, %v3709_v21 }
 0x3e7   : >> { %v10075_v44 = vsel %vm745_vm1, %v3480_v0, %v3481_v59  ;;  %v10083_v14 = vsel %vm3260_vm3, %v3336_v9, %v3337_v27  ;;  %v12864_v28 = vpack.c.bf16 %v9786_v36, %v9783_v38 }
 0x3e8   : >> { %4030 = vmatmul.mubr.bf16.gmra.mrb[32].mxu1 %v3757_v47  ;;  %6900 = vrot.lane.b32.xlu1 %v6899_v50, %s6947_s13  ;;  %v3786_v43 = vpack.c.bf16 %v10075_v44, %v10078_v42  ;;  %v10089_v41 = vsel %vm745_vm1, %v3481_v59, %v3483_v46  ;;  %v10092_v22 = vsel %vm745_vm1, %v3483_v46, 0.0  ;;  %v10095_v53 = vsel %vm3260_vm3, %v3337_v27, %v3339_v51 }
 0x3e9   : >> { %6277 = vmatprep.mubr.msk.bf16.mxu1 %vm226_vm0, %v12862_v25  ;;  %v3788_v17 = vpack.c.bf16 %v10092_v22, %v10089_v41  ;;  %v12863_v59 = vrot.slane %v9754_v13, 7  ;;  %v12865_v47 = vrot.slane %v9768_v62, 7 }
 0x3ea   : >> { %v6831_v0 = vpop.permute.xlu1 %6830 }
 0x3eb   : >> { %v6833_v21 = vunpack.i.h.bf16 %v6831_v0  ;;  %v6832_v2 = vunpack.i.l.bf16 %v6831_v0  ;;  %v3395_v48 = vsel %vm3260_vm3, 0.0, %v12863_v59  ;;  %v3396_v13 = vsel %vm3260_vm3, 0.0, %v12865_v47  ;;  %v12867_v59 = vld [vmem:[#allocation163_spill] sm:$0xff] }
 0x3ed   : >> { %v3711_v50 = vsel %vm226_vm0, %v3395_v48, %v6832_v2  ;;  %v3712_v27 = vsel %vm226_vm0, %v9766_v37, %v6833_v21  ;;  %v12866_v21 = vpack.c.bf16 %v9800_v5, %v9797_v24 }
 0x3ee   : >> { %v3759_v51 = vpack.c.bf16 %v3712_v27, %v3711_v50 }
 0x3f0   : >> { %4038 = vmatmul.mubr.bf16.gmra.mrb[36].mxu1 %v3759_v51 }
 0x3f1   : >> { %6278 = vmatprep.mubr.msk.bf16.mxu1 %vm226_vm0, %v12864_v28  ;;  %v12870_v28 = vld [vmem:[#allocation164_spill] sm:$0xff] }
 0x3f2   : >> { %v6836_v52 = vpop.permute.xlu0 %6835 }
 0x3f3   : >> { %v6838_v46 = vunpack.i.h.bf16 %v6836_v52  ;;  %v6837_v57 = vunpack.i.l.bf16 %v6836_v52  ;;  %v12871_v52 = vrot.slane %v12870_v28, 7  ;;  %v12881_v28 = vld [vmem:[#allocation172_spill] sm:$0xff] }
 0x3f5   : >> { %v3713_v25 = vsel %vm226_vm0, %v9777_v31, %v6837_v57  ;;  %v3714_v0 = vsel %vm226_vm0, %v3396_v13, %v6838_v46  ;;  %v12868_v31 = vld [vmem:[#allocation165_spill] sm:$0xff]  ;;  %v3397_v46 = vsel %vm3260_vm3, 0.0, %v12871_v52 }
 0x3f6   : >> { %v3761_v37 = vpack.c.bf16 %v3714_v0, %v3713_v25  ;;  %v12869_v27 = vpack.c.bf16 %v9825_v30, %v12868_v31  ;;  %v12873_v25 = vpack.c.bf16 %v9839_v61, %v9836_v4  ;;  %v12878_v31 = vld [vmem:[#allocation170_spill] sm:$0xff] }
 0x3f8   : >> { %4046 = vmatmul.mubr.bf16.gmra.mrb[40].mxu1 %v3761_v37 }
 0x3f9   : >> { %6279 = vmatprep.mubr.msk.bf16.mxu1 %vm226_vm0, %v12866_v21  ;;  %v12874_v21 = vld [vmem:[#allocation167_spill] sm:$0xff] }
 0x3fa   : >> { %v6841_v38 = vpop.permute.xlu1 %6840 }
 0x3fb   : >> { %v6843_v36 = vunpack.i.h.bf16 %v6841_v38  ;;  %v6842_v2 = vunpack.i.l.bf16 %v6841_v38  ;;  %v12875_v38 = vrot.slane %v12874_v21, 7 }
 0x3fd   : >> { %v3715_v62 = vsel %vm226_vm0, %v9793_v33, %v6842_v2  ;;  %v3716_v48 = vsel %vm226_vm0, %v12867_v59, %v6843_v36  ;;  %v12872_v33 = vld [vmem:[#allocation166_spill] sm:$0xff]  ;;  %v3398_v36 = vsel %vm3260_vm3, 0.0, %v12875_v38  ;;  %v12876_v2 = vld [vmem:[#allocation168_spill] sm:$0xff]  ;;  %v12884_v38 = vpack.c.bf16 %v9913_v19, %v9916_v10 }
 0x3fe   : >> { %v3763_v50 = vpack.c.bf16 %v3716_v48, %v3715_v62 }
 0x400   : >> { %4054 = vmatmul.mubr.bf16.gmra.mrb[44].mxu1 %v3763_v50  ;;  %v12877_v50 = vld [vmem:[#allocation171_spill] sm:$0xff] }
 0x401   : >> { %6280 = vmatprep.mubr.msk.bf16.mxu1 %vm226_vm0, %v12869_v27  ;;  %v12879_v27 = vpack.c.bf16 %v12877_v50, %v12878_v31  ;;  %v12887_v50 = vpack.c.bf16 %v9930_v35, %v9927_v11 }
 0x402   : >> { %v6846_v51 = vpop.permute.xlu0 %6845 }
 0x403   : >> { %v6848_v24 = vunpack.i.h.bf16 %v6846_v51  ;;  %v6847_v5 = vunpack.i.l.bf16 %v6846_v51 }
 0x405   : >> { %v3717_v57 = vsel %vm226_vm0, %v3397_v46, %v6847_v5  ;;  %v3718_v47 = vsel %vm226_vm0, %v12872_v33, %v6848_v24  ;;  %v12880_v24 = vld [vmem:[#allocation169_spill] sm:$0xff] }
 0x406   : >> { %v3765_v13 = vpack.c.bf16 %v3718_v47, %v3717_v57  ;;  %v12882_v57 = vpack.c.bf16 %v9894_v18, %v9873_v34 }
 0x408   : >> { %4062 = vmatmul.mubr.bf16.gmra.mrb[48].mxu1 %v3765_v13 }
 0x409   : >> { %6281 = vmatprep.mubr.msk.bf16.mxu1 %vm226_vm0, %v12873_v25  ;;  %v12883_v25 = vrot.slane %v9860_v23, 7 }
 0x40a   : >> { %v6851_v30 = vpop.permute.xlu1 %6850 }
 0x40b   : >> { %v6853_v0 = vunpack.i.h.bf16 %v6851_v30  ;;  %v6852_v37 = vunpack.i.l.bf16 %v6851_v30  ;;  %v3399_v30 = vsel %vm3260_vm3, 0.0, %v12883_v25 }
 0x40d   : >> { %v3719_v62 = vsel %vm226_vm0, %v12876_v2, %v6852_v37  ;;  %v3720_v59 = vsel %vm226_vm0, %v3398_v36, %v6853_v0  ;;  %v12885_v2 = vrot.slane %v9890_v49, 7 }
 0x40e   : >> { %v3767_v48 = vpack.c.bf16 %v3720_v59, %v3719_v62  ;;  %v12886_v62 = vld [vmem:[#allocation173_spill] sm:$0xff] }
 0x40f   : >> { %v3400_v23 = vsel %vm3260_vm3, 0.0, %v12885_v2 }
 0x410   : >> { %4070 = vmatmul.mubr.bf16.gmra.mrb[52].mxu1 %v3767_v48 }
 0x411   : >> { %6282 = vmatprep.mubr.msk.bf16.mxu1 %vm226_vm0, %v12879_v27 }
 0x412   : >> { %v6856_v4 = vpop.permute.xlu0 %6855 }
 0x413   : >> { %v6858_v61 = vunpack.i.h.bf16 %v6856_v4  ;;  %v6857_v51 = vunpack.i.l.bf16 %v6856_v4 }
 0x415   : >> { %v3721_v5 = vsel %vm226_vm0, %v12880_v24, %v6857_v51  ;;  %v3722_v52 = vsel %vm226_vm0, %v12881_v28, %v6858_v61  ;;  %v12888_v61 = vpack.c.bf16 %v9975_v56, %v9954_v45  ;;  %v12889_v24 = vrot.slane %v9941_v15, 7 }
 0x416   : >> { %v3769_v46 = vpack.c.bf16 %v3722_v52, %v3721_v5  ;;  %v12890_v52 = vpack.c.bf16 %v9994_v63, %v9997_v26 }
 0x417   : >> { %v3401_v5 = vsel %vm3260_vm3, 0.0, %v12889_v24 }
 0x418   : >> { %4078 = vmatmul.mubr.bf16.gmra.mrb[56].mxu1 %v3769_v46 }
 0x419   : >> { %6283 = vmatprep.mubr.msk.bf16.mxu1 %vm226_vm0, %v12882_v57  ;;  %v12891_v57 = vrot.slane %v9971_v12, 7 }
 0x41a   : >> { %v6861_v33 = vpop.permute.xlu1 %6860 }
 0x41b   : >> { %v6863_v47 = vunpack.i.h.bf16 %v6861_v33  ;;  %v6862_v13 = vunpack.i.l.bf16 %v6861_v33  ;;  %v3402_v15 = vsel %vm3260_vm3, 0.0, %v12891_v57 }
 0x41d   : >> { %v3723_v0 = vsel %vm226_vm0, %v3399_v30, %v6862_v13  ;;  %v3724_v37 = vsel %vm226_vm0, %v9878_v6, %v6863_v47  ;;  %v12892_v13 = vpack.c.bf16 %v10011_v54, %v10008_v3 }
 0x41e   : >> { %v3771_v21 = vpack.c.bf16 %v3724_v37, %v3723_v0 }
 0x420   : >> { %4086 = vmatmul.mubr.bf16.gmra.mrb[60].mxu1 %v3771_v21  ;;  %v12894_v21 = vrot.slane %v10022_v32, 7  ;;  %v3404_v32 = vsel %vm3260_vm3, 0.0, %v3336_v9 }
 0x421   : >> { %6284 = vmatprep.mubr.msk.bf16.mxu1 %vm226_vm0, %v12884_v38 }
 0x422   : >> { %v6866_v34 = vpop.permute.xlu0 %6865  ;;  %v3403_v38 = vsel %vm3260_vm3, 0.0, %v12894_v21 }
 0x423   : >> { %v6868_v18 = vunpack.i.h.bf16 %v6866_v34  ;;  %v6867_v36 = vunpack.i.l.bf16 %v6866_v34 }
 0x425   : >> { %v3725_v59 = vsel %vm226_vm0, %v12886_v62, %v6867_v36  ;;  %v3726_v48 = vsel %vm226_vm0, %v3400_v23, %v6868_v18 }
 0x426   : >> { %v3773_v6 = vpack.c.bf16 %v3726_v48, %v3725_v59 }
 0x428   : >> { %4094 = vmatmul.mubr.bf16.gmra.mrb[64].mxu1 %v3773_v6 }
 0x429   : >> { %6285 = vmatprep.mubr.msk.bf16.mxu1 %vm226_vm0, %v12887_v50 }
 0x42a   : >> { %v6871_v19 = vpop.permute.xlu1 %6870 }
 0x42b   : >> { %v6873_v10 = vunpack.i.h.bf16 %v6871_v19  ;;  %v6872_v31 = vunpack.i.l.bf16 %v6871_v19 }
 0x42d   : >> { %v3727_v49 = vsel %vm226_vm0, %v9921_v7, %v6872_v31  ;;  %v3728_v27 = vsel %vm226_vm0, %v9933_v1, %v6873_v10 }
 0x42e   : >> { %v3775_v4 = vpack.c.bf16 %v3728_v27, %v3727_v49 }
 0x430   : >> { %4102 = vmatmul.mubr.bf16.gmra.mrb[68].mxu1 %v3775_v4 }
 0x431   : >> { %6286 = vmatprep.mubr.msk.bf16.mxu1 %vm226_vm0, %v12888_v61 }
 0x432   : >> { %v6876_v51 = vpop.permute.xlu0 %6875 }
 0x433   : >> { %v6878_v11 = vunpack.i.h.bf16 %v6876_v51  ;;  %v6877_v35 = vunpack.i.l.bf16 %v6876_v51 }
 0x435   : >> { %v3729_v28 = vsel %vm226_vm0, %v3401_v5, %v6877_v35  ;;  %v3730_v7 = vsel %vm226_vm0, %v9959_v16, %v6878_v11 }
 0x436   : >> { %v3777_v1 = vpack.c.bf16 %v3730_v7, %v3729_v28 }
 0x438   : >> { %4110 = vmatmul.mubr.bf16.gmra.mrb[72].mxu1 %v3777_v1 }
 0x439   : >> { %6287 = vmatprep.mubr.msk.bf16.mxu1 %vm226_vm0, %v12890_v52 }
 0x43a   : >> { %v6881_v45 = vpop.permute.xlu1 %6880 }
 0x43b   : >> { %v6883_v56 = vunpack.i.h.bf16 %v6881_v45  ;;  %v6882_v46 = vunpack.i.l.bf16 %v6881_v45 }
 0x43d   : >> { %v3731_v33 = vsel %vm226_vm0, %v9978_v8, %v6882_v46  ;;  %v3732_v47 = vsel %vm226_vm0, %v3402_v15, %v6883_v56  ;;  %v12893_v8 = vpack.c.bf16 %v10056_v55, %v10035_v20 }
 0x43e   : >> { %v3779_v16 = vpack.c.bf16 %v3732_v47, %v3731_v33 }
 0x440   : >> { %4118 = vmatmul.mubr.bf16.gmra.mrb[76].mxu1 %v3779_v16 }
 0x441   : >> { %6288 = vmatprep.mubr.msk.bf16.mxu1 %vm226_vm0, %v12892_v13 }
 0x442   : >> { %v6886_v63 = vpop.permute.xlu0 %6885 }
 0x443   : >> { %v6888_v26 = vunpack.i.h.bf16 %v6886_v63  ;;  %v6887_v25 = vunpack.i.l.bf16 %v6886_v63 }
 0x445   : >> { %v3733_v12 = vsel %vm226_vm0, %v10002_v58, %v6887_v25  ;;  %v3734_v30 = vsel %vm226_vm0, %v10014_v39, %v6888_v26 }
 0x446   : >> { %v3781_v0 = vpack.c.bf16 %v3734_v30, %v3733_v12 }
 0x448   : >> { %4126 = vmatmul.mubr.bf16.gmra.mrb[80].mxu1 %v3781_v0 }
 0x449   : >> { %6289 = vmatprep.mubr.msk.bf16.mxu1 %vm226_vm0, %v12893_v8 }
 0x44a   : >> { %v6891_v37 = vpop.permute.xlu1 %6890 }
 0x44b   : >> { %v6893_v3 = vunpack.i.h.bf16 %v6891_v37  ;;  %v6892_v54 = vunpack.i.l.bf16 %v6891_v37 }
 0x44d   : >> { %v3735_v34 = vsel %vm226_vm0, %v3403_v38, %v6892_v54  ;;  %v3736_v58 = vsel %vm226_vm0, %v10040_v29, %v6893_v3 }
 0x44e   : >> { %v3783_v39 = vpack.c.bf16 %v3736_v58, %v3735_v34 }
 0x450   : >> { %4134 = vmatmul.mubr.bf16.gmra.mrb[84].mxu1 %v3783_v39 }
 0x451   : >> { %6290 = vmatprep.mubr.msk.bf16.mxu1 %vm226_vm0, %v3786_v43 }
 0x452   : >> { %v6896_v20 = vpop.permute.xlu0 %6895 }
 0x453   : >> { %v6898_v55 = vunpack.i.h.bf16 %v6896_v20  ;;  %v6897_v18 = vunpack.i.l.bf16 %v6896_v20 }
 0x455   : >> { %v3737_v36 = vsel %vm226_vm0, %v10059_v60, %v6897_v18  ;;  %v3738_v2 = vsel %vm226_vm0, %v3404_v32, %v6898_v55 }
 0x456   : >> { %v3785_v29 = vpack.c.bf16 %v3738_v2, %v3737_v36 }
 0x458   : >> { %4142 = vmatmul.mubr.bf16.gmra.mrb[88].mxu1 %v3785_v29 }
 0x459   : >> { %6291 = vmatprep.mubr.msk.bf16.mxu1 %vm226_vm0, %v3788_v17 }
 0x45a   : >> { %v6901_v44 = vpop.permute.xlu1 %6900 }
 0x45b   : >> { %v6903_v42 = vunpack.i.h.bf16 %v6901_v44  ;;  %v6902_v43 = vunpack.i.l.bf16 %v6901_v44 }
 0x45d   : >> { %v3739_v40 = vsel %vm226_vm0, %v10083_v14, %v6902_v43  ;;  %v3740_v9 = vsel %vm226_vm0, %v10095_v53, %v6903_v42 }
 0x45e   : >> { %v3787_v23 = vpack.c.bf16 %v3740_v9, %v3739_v40 }
 0x460   : >> { %4150 = vmatmul.mubr.bf16.gmra.mrb[92].mxu1 %v3787_v23 }
 0x47b   : >> { %v3967_v60 = vpop.f32.mrb[0].mxu1 }
 0x47c   : >> { %v4158_v62 = vmax.f32 %v3967_v60, 0.0  ;;  %v3969_v59 = vpop.f32.mrb[1].mxu1 }
 0x47d   : >> { %v3970_v48 = vpop.f32.mrb[2].mxu1 }
 0x47e   : >> { %4207 = vst.msk [vmem:[#allocation2 + $0x18] sm:$0xfe] %vm4206_vm4, %v4158_v62  ;;  %v4159_v41 = vmax.f32 %v3970_v48, 0.0  ;;  %v3972_v22 = vpop.f32.mrb[3].mxu1 }
 0x480   : >> { %4208 = vst.msk [vmem:[#allocation2 + $0x20] sm:$0xff] %vm226_vm0, %v4159_v41 }
 0x483   : >> { %v3975_v17 = vpop.f32.mrb[4].mxu1 }
 0x484   : >> { %v4160_v6 = vmax.f32 %v3975_v17, 0.0  ;;  %v3977_v14 = vpop.f32.mrb[5].mxu1 }
 0x485   : >> { %v3978_v50 = vpop.f32.mrb[6].mxu1 }
 0x486   : >> { %4210 = vst.msk [vmem:[#allocation2 + $0x28] sm:$0x1] %vm4209_vm5, %v4160_v6  ;;  %v4161_v53 = vmax.f32 %v3978_v50, 0.0  ;;  %v3980_v19 = vpop.f32.mrb[7].mxu1 }
 0x488   : >> { %4211 = vst.msk [vmem:[#allocation2 + $0x30] sm:$0xfe] %vm4206_vm4, %v4161_v53 }
 0x48b   : >> { %v3983_v10 = vpop.f32.mrb[8].mxu1 }
 0x48c   : >> { %v4162_v31 = vmax.f32 %v3983_v10, 0.0  ;;  %v3985_v49 = vpop.f32.mrb[9].mxu1 }
 0x48d   : >> { %v3986_v27 = vpop.f32.mrb[10].mxu1 }
 0x48e   : >> { %4212 = vst.msk [vmem:[#allocation2 + $0x38] sm:$0xff] %vm226_vm0, %v4162_v31  ;;  %v4163_v4 = vmax.f32 %v3986_v27, 0.0  ;;  %v3988_v61 = vpop.f32.mrb[11].mxu1 }
 0x490   : >> { %4213 = vst.msk [vmem:[#allocation2 + $0x40] sm:$0x1] %vm4209_vm5, %v4163_v4 }
 0x493   : >> { %v3991_v51 = vpop.f32.mrb[12].mxu1 }
 0x494   : >> { %v4164_v11 = vmax.f32 %v3991_v51, 0.0  ;;  %v3993_v35 = vpop.f32.mrb[13].mxu1 }
 0x495   : >> { %v3994_v24 = vpop.f32.mrb[14].mxu1 }
 0x496   : >> { %4214 = vst.msk [vmem:[#allocation2 + $0x48] sm:$0xfe] %vm4206_vm4, %v4164_v11  ;;  %v4165_v5 = vmax.f32 %v3994_v24, 0.0  ;;  %v3996_v28 = vpop.f32.mrb[15].mxu1 }
 0x498   : >> { %4215 = vst.msk [vmem:[#allocation2 + $0x50] sm:$0xff] %vm226_vm0, %v4165_v5 }
 0x49b   : >> { %v3999_v7 = vpop.f32.mrb[16].mxu1 }
 0x49c   : >> { %v4166_v1 = vmax.f32 %v3999_v7, 0.0  ;;  %v4001_v52 = vpop.f32.mrb[17].mxu1 }
 0x49d   : >> { %v4002_v45 = vpop.f32.mrb[18].mxu1 }
 0x49e   : >> { %4216 = vst.msk [vmem:[#allocation2 + $0x58] sm:$0x1] %vm4209_vm5, %v4166_v1  ;;  %v4167_v56 = vmax.f32 %v4002_v45, 0.0  ;;  %v4004_v46 = vpop.f32.mrb[19].mxu1 }
 0x4a0   : >> { %4217 = vst.msk [vmem:[#allocation2 + $0x60] sm:$0xfe] %vm4206_vm4, %v4167_v56 }
 0x4a3   : >> { %v4007_v57 = vpop.f32.mrb[20].mxu1 }
 0x4a4   : >> { %v4168_v15 = vmax.f32 %v4007_v57, 0.0  ;;  %v4009_v33 = vpop.f32.mrb[21].mxu1 }
 0x4a5   : >> { %v4010_v47 = vpop.f32.mrb[22].mxu1 }
 0x4a6   : >> { %4218 = vst.msk [vmem:[#allocation2 + $0x68] sm:$0xff] %vm226_vm0, %v4168_v15  ;;  %v4169_v16 = vmax.f32 %v4010_v47, 0.0  ;;  %v4012_v13 = vpop.f32.mrb[23].mxu1 }
 0x4a8   : >> { %4219 = vst.msk [vmem:[#allocation2 + $0x70] sm:$0x1] %vm4209_vm5, %v4169_v16 }
 0x4ab   : >> { %v4015_v63 = vpop.f32.mrb[24].mxu1 }
 0x4ac   : >> { %v4170_v26 = vmax.f32 %v4015_v63, 0.0  ;;  %v4017_v25 = vpop.f32.mrb[25].mxu1 }
 0x4ad   : >> { %v4018_v12 = vpop.f32.mrb[26].mxu1 }
 0x4ae   : >> { %4220 = vst.msk [vmem:[#allocation2 + $0x78] sm:$0xfe] %vm4206_vm4, %v4170_v26  ;;  %v4171_v30 = vmax.f32 %v4018_v12, 0.0  ;;  %v4020_v0 = vpop.f32.mrb[27].mxu1 }
 0x4b0   : >> { %4221 = vst.msk [vmem:[#allocation2 + $0x80] sm:$0xff] %vm226_vm0, %v4171_v30 }
 0x4b3   : >> { %v4023_v8 = vpop.f32.mrb[28].mxu1 }
 0x4b4   : >> { %v4172_v37 = vmax.f32 %v4023_v8, 0.0  ;;  %v4025_v3 = vpop.f32.mrb[29].mxu1 }
 0x4b5   : >> { %v4026_v54 = vpop.f32.mrb[30].mxu1 }
 0x4b6   : >> { %4222 = vst.msk [vmem:[#allocation2 + $0x88] sm:$0x1] %vm4209_vm5, %v4172_v37  ;;  %v4173_v21 = vmax.f32 %v4026_v54, 0.0  ;;  %v4028_v38 = vpop.f32.mrb[31].mxu1 }
 0x4b8   : >> { %4223 = vst.msk [vmem:[#allocation2 + $0x90] sm:$0xfe] %vm4206_vm4, %v4173_v21 }
 0x4bb   : >> { %v4031_v34 = vpop.f32.mrb[32].mxu1 }
 0x4bc   : >> { %v4174_v58 = vmax.f32 %v4031_v34, 0.0  ;;  %v4033_v39 = vpop.f32.mrb[33].mxu1 }
 0x4bd   : >> { %v4034_v20 = vpop.f32.mrb[34].mxu1 }
 0x4be   : >> { %4224 = vst.msk [vmem:[#allocation2 + $0x98] sm:$0xff] %vm226_vm0, %v4174_v58  ;;  %v4175_v55 = vmax.f32 %v4034_v20, 0.0  ;;  %v4036_v18 = vpop.f32.mrb[35].mxu1 }
 0x4c0   : >> { %4225 = vst.msk [vmem:[#allocation2 + $0xa0] sm:$0x1] %vm4209_vm5, %v4175_v55 }
 0x4c3   : >> { %v4039_v32 = vpop.f32.mrb[36].mxu1 }
 0x4c4   : >> { %v4176_v36 = vmax.f32 %v4039_v32, 0.0  ;;  %v4041_v2 = vpop.f32.mrb[37].mxu1 }
 0x4c5   : >> { %v4042_v29 = vpop.f32.mrb[38].mxu1 }
 0x4c6   : >> { %4226 = vst.msk [vmem:[#allocation2 + $0xa8] sm:$0xfe] %vm4206_vm4, %v4176_v36  ;;  %v4177_v44 = vmax.f32 %v4042_v29, 0.0  ;;  %v4044_v42 = vpop.f32.mrb[39].mxu1 }
 0x4c8   : >> { %4227 = vst.msk [vmem:[#allocation2 + $0xb0] sm:$0xff] %vm226_vm0, %v4177_v44 }
 0x4cb   : >> { %v4047_v43 = vpop.f32.mrb[40].mxu1 }
 0x4cc   : >> { %v4178_v40 = vmax.f32 %v4047_v43, 0.0  ;;  %v4049_v9 = vpop.f32.mrb[41].mxu1 }
 0x4cd   : >> { %v4050_v23 = vpop.f32.mrb[42].mxu1 }
 0x4ce   : >> { %4228 = vst.msk [vmem:[#allocation2 + $0xb8] sm:$0x1] %vm4209_vm5, %v4178_v40  ;;  %v4179_v60 = vmax.f32 %v4050_v23, 0.0  ;;  %v4052_v62 = vpop.f32.mrb[43].mxu1 }
 0x4d0   : >> { %4229 = vst.msk [vmem:[#allocation2 + $0xc0] sm:$0xfe] %vm4206_vm4, %v4179_v60 }
 0x4d3   : >> { %v4055_v59 = vpop.f32.mrb[44].mxu1 }
 0x4d4   : >> { %v4180_v48 = vmax.f32 %v4055_v59, 0.0  ;;  %v4057_v41 = vpop.f32.mrb[45].mxu1 }
 0x4d5   : >> { %v4058_v22 = vpop.f32.mrb[46].mxu1 }
 0x4d6   : >> { %4230 = vst.msk [vmem:[#allocation2 + $0xc8] sm:$0xff] %vm226_vm0, %v4180_v48  ;;  %v4181_v17 = vmax.f32 %v4058_v22, 0.0  ;;  %v4060_v6 = vpop.f32.mrb[47].mxu1 }
 0x4d8   : >> { %4231 = vst.msk [vmem:[#allocation2 + $0xd0] sm:$0x1] %vm4209_vm5, %v4181_v17 }
 0x4db   : >> { %v4063_v14 = vpop.f32.mrb[48].mxu1 }
 0x4dc   : >> { %v4182_v50 = vmax.f32 %v4063_v14, 0.0  ;;  %v4065_v53 = vpop.f32.mrb[49].mxu1 }
 0x4dd   : >> { %v4066_v19 = vpop.f32.mrb[50].mxu1 }
 0x4de   : >> { %4232 = vst.msk [vmem:[#allocation2 + $0xd8] sm:$0xfe] %vm4206_vm4, %v4182_v50  ;;  %v4183_v10 = vmax.f32 %v4066_v19, 0.0  ;;  %v4068_v31 = vpop.f32.mrb[51].mxu1 }
 0x4e0   : >> { %4233 = vst.msk [vmem:[#allocation2 + $0xe0] sm:$0xff] %vm226_vm0, %v4183_v10 }
 0x4e3   : >> { %v4071_v49 = vpop.f32.mrb[52].mxu1 }
 0x4e4   : >> { %v4184_v27 = vmax.f32 %v4071_v49, 0.0  ;;  %v4073_v4 = vpop.f32.mrb[53].mxu1 }
 0x4e5   : >> { %v4074_v61 = vpop.f32.mrb[54].mxu1  ;;  %v10290_v4 = vld [vmem:[#allocation2 + $0xd8] sm:$0xff] (%p2353_p4) }
 0x4e6   : >> { %4234 = vst.msk [vmem:[#allocation2 + $0xe8] sm:$0x1] %vm4209_vm5, %v4184_v27  ;;  %v4185_v51 = vmax.f32 %v4074_v61, 0.0  ;;  %v4076_v11 = vpop.f32.mrb[55].mxu1  ;;  %4707 = vrot.lane.b32.xlu0 (%p2353_p4), %v10290_v4, %s6948_s21 }
 0x4e7   : > { %v4284_v61 = vld [vmem:[#allocation2 + $0xe0] sm:$0xff] (%p2353_p4)  ;;  %v4572_v11 = vrot.slane (%p2353_p4), %v10290_v4, 1 }
 0x4e8   : >> { %4235 = vst.msk [vmem:[#allocation2 + $0xf0] sm:$0xfe] %vm4206_vm4, %v4185_v51  ;;  %4709 = vrot.lane.b32.xlu1 (%p2353_p4), %v4284_v61, %s6948_s21  ;;  %v10295_v51 = vld [vmem:[#allocation2 + $0x18] sm:$0xff] (%p2353_p4) }
 0x4ea   : > { %4659 = vrot.lane.b32.xlu0 (%p2353_p4), %v10295_v51, %s6948_s21 }
 0x4eb   : >> { %v4079_v35 = vpop.f32.mrb[56].mxu1 }
 0x4ec   : >> { %v4186_v24 = vmax.f32 %v4079_v35, 0.0  ;;  %v4081_v5 = vpop.f32.mrb[57].mxu1  ;;  %v4573_v35 = vrot.slane (%p2353_p4), %v4284_v61, 1 }
 0x4ed   : >> { %v4082_v28 = vpop.f32.mrb[58].mxu1  ;;  %v10298_v5 = vld [vmem:[#allocation2 + $0xe8] sm:$0xff] (%p2353_p4) }
 0x4ee   : >> { %4236 = vst.msk [vmem:[#allocation2 + $0xf8] sm:$0xff] %vm226_vm0, %v4186_v24  ;;  %v4187_v7 = vmax.f32 %v4082_v28, 0.0  ;;  %v4084_v1 = vpop.f32.mrb[59].mxu1  ;;  %v4260_v24 = vld [vmem:[#allocation2 + $0x20] sm:$0xff] (%p2353_p4)  ;;  %v12339_v28 = vmov (%p2353_p4), 0.0|0.0   ;;  %4711 = vrot.lane.b32.xlu0 (%p2353_p4), %v10298_v5, %s6948_s21 }
 0x4ef   : > { %6597 = vmatprep.subr.bf16.mxu1 (%p2353_p4), %v12339_v28  ;;  %6489 = vmatprep.subr.bf16.mxu0 (%p2353_p4), %v12339_v28  ;;  %v4411_v1 = vrot.slane (%p2353_p4), %v4284_v61, 7 }
 0x4f0   : >> { %4237 = vst.msk [vmem:[#allocation2 + $0x100] sm:$0x1] %vm4209_vm5, %v4187_v7  ;;  %v12336_v7 = vrot.slane (%p2353_p4), %v10290_v4, 7  ;;  %4661 = vrot.lane.b32.xlu1 (%p2353_p4), %v4260_v24, %s6948_s21 }
 0x4f3   : >> { %v4087_v52 = vpop.f32.mrb[60].mxu1 }
 0x4f4   : >> { %v4188_v45 = vmax.f32 %v4087_v52, 0.0  ;;  %v4089_v56 = vpop.f32.mrb[61].mxu1  ;;  %v4532_v52 = vrot.slane (%p2353_p4), %v10295_v51, 1 }
 0x4f5   : >> { %v4090_v46 = vpop.f32.mrb[62].mxu1  ;;  %v4533_v56 = vrot.slane (%p2353_p4), %v4260_v24, 1 }
 0x4f6   : >> { %4238 = vst.msk [vmem:[#allocation2 + $0x108] sm:$0xfe] %vm4206_vm4, %v4188_v45  ;;  %v4189_v57 = vmax.f32 %v4090_v46, 0.0  ;;  %v4092_v15 = vpop.f32.mrb[63].mxu1  ;;  %v10305_v45 = vsel (%p2353_p4), %vm745_vm1, %v4572_v11, %v4573_v35  ;;  %v12333_v46 = vrot.slane (%p2353_p4), %v10298_v5, 1 }
 0x4f7   : > { %12895 = vst [vmem:[#allocation51_spill] sm:$0xff] (%p2353_p4), %v10305_v45  ;;  %6340 = vmatprep.mubr.msk.f32.mxu1 (%p2353_p4), %vm226_vm0, %v10305_v45  ;;  %v10315_v15 = vsel (%p2353_p4), %vm3260_vm3, %v12336_v7, %v4411_v1  ;;  %v6306_v7 = vld [vmem:[%s12146_s4 + $0x130] sm:$0xff] (%p2353_p4)  ;;  %v6307_v45 = vld [vmem:[%s12146_s4 + $0x138] sm:$0xff] (%p2353_p4) }
 0x4f8   : >> { %4239 = vst.msk [vmem:[#allocation2 + $0x110] sm:$0xff] %vm226_vm0, %v4189_v57  ;;  %v10308_v57 = vld [vmem:[#allocation2 + $0x28] sm:$0xff] (%p2353_p4) }
 0x4f9   : > { %4663 = vrot.lane.b32.xlu1 (%p2353_p4), %v10308_v57, %s6948_s21 }
 0x4fb   : >> { %v4095_v33 = vpop.f32.mrb[64].mxu1 }
 0x4fc   : >> { %v4190_v47 = vmax.f32 %v4095_v33, 0.0  ;;  %v4097_v16 = vpop.f32.mrb[65].mxu1  ;;  %v12335_v33 = vrot.slane (%p2353_p4), %v10295_v51, 7 }
 0x4fd   : >> { %v4098_v13 = vpop.f32.mrb[66].mxu1  ;;  %v4413_v16 = vrot.slane (%p2353_p4), %v10298_v5, 7 }
 0x4fe   : >> { %4240 = vst.msk [vmem:[#allocation2 + $0x118] sm:$0x1] %vm4209_vm5, %v4190_v47  ;;  %v4191_v63 = vmax.f32 %v4098_v13, 0.0  ;;  %v4100_v26 = vpop.f32.mrb[67].mxu1  ;;  %v4371_v47 = vrot.slane (%p2353_p4), %v4260_v24, 7  ;;  %v10323_v13 = vsel (%p2353_p4), %vm745_vm1, %v4532_v52, %v4533_v56  ;;  %v6296_v52 = vld [vmem:[%s12146_s4 + $0xe0] sm:$0xff] (%p2353_p4) }
 0x4ff   : > { %12896 = vst [vmem:[#allocation61_spill] sm:$0xff] (%p2353_p4), %v10323_v13  ;;  %v12332_v26 = vrot.slane (%p2353_p4), %v10308_v57, 1  ;;  %6316 = vmatprep.mubr.msk.f32.mxu0 (%p2353_p4), %vm226_vm0, %v10323_v13  ;;  %v10634_v13 = vld [vmem:[#allocation2 + $0x88] sm:$0xff] (%p2353_p4) }
 0x500   : >> { %4241 = vst.msk [vmem:[#allocation2 + $0x120] sm:$0xfe] %vm4206_vm4, %v4191_v63  ;;  %v10328_v63 = vsel (%p2353_p4), %vm745_vm1, %v4573_v35, %v12333_v46  ;;  %v10591_v46 = vld [vmem:[#allocation2 + $0x78] sm:$0xff] (%p2353_p4) }
 0x501   : > { %12908 = vst [vmem:[#allocation56_spill] sm:$0xff] (%p2353_p4), %v10591_v46 }
 0x503   : >> { %v4103_v25 = vpop.f32.mrb[68].mxu1 }
 0x504   : >> { %v4192_v12 = vmax.f32 %v4103_v25, 0.0  ;;  %v4105_v30 = vpop.f32.mrb[69].mxu1  ;;  %v10331_v25 = vld [vmem:[#allocation2 + $0xf0] sm:$0xff] (%p2353_p4) }
 0x505   : >> { %v4106_v0 = vpop.f32.mrb[70].mxu1  ;;  %v10338_v30 = vsel (%p2353_p4), %vm3260_vm3, %v12335_v33, %v4371_v47  ;;  %4713 = vrot.lane.b32.xlu0 (%p2353_p4), %v10331_v25, %s6948_s21  ;;  %v10428_v61 = vld [vmem:[#allocation2 + $0x118] sm:$0xff] (%p2353_p4)  ;;  %v10596_v33 = vld [vmem:[#allocation2 + $0x80] sm:$0xff] (%p2353_p4) }
 0x506   : >> { %4242 = vst.msk [vmem:[#allocation2 + $0x128] sm:$0xff] %vm226_vm0, %v4192_v12  ;;  %v4193_v8 = vmax.f32 %v4106_v0, 0.0  ;;  %v4108_v37 = vpop.f32.mrb[71].mxu1  ;;  %v4287_v12 = vld [vmem:[#allocation2 + $0xf8] sm:$0xff] (%p2353_p4)  ;;  %v10341_v0 = vsel (%p2353_p4), %vm3260_vm3, %v4411_v1, %v4413_v16 }
 0x507   : > { %v10347_v37 = vsel (%p2353_p4), %vm745_vm1, %v4533_v56, %v12332_v26  ;;  %v6297_v56 = vld [vmem:[%s12146_s4 + $0xe8] sm:$0xff] (%p2353_p4) }
 0x508   : >> { %4243 = vst.msk [vmem:[#allocation2 + $0x130] sm:$0x1] %vm4209_vm5, %v4193_v8  ;;  %v4373_v8 = vrot.slane (%p2353_p4), %v10308_v57, 7 }
 0x509   : > { %4715 = vrot.lane.b32.xlu0 (%p2353_p4), %v4287_v12, %s6948_s21 }
 0x50b   : >> { %v4111_v3 = vpop.f32.mrb[72].mxu1 }
 0x50c   : >> { %v4194_v54 = vmax.f32 %v4111_v3, 0.0  ;;  %v4113_v21 = vpop.f32.mrb[73].mxu1  ;;  %v4577_v3 = vrot.slane (%p2353_p4), %v10331_v25, 1 }
 0x50d   : >> { %v4114_v38 = vpop.f32.mrb[74].mxu1  ;;  %v10350_v21 = vld [vmem:[#allocation2 + $0x30] sm:$0xff] (%p2353_p4) }
 0x50e   : >> { %4244 = vst.msk [vmem:[#allocation2 + $0x138] sm:$0xfe] %vm4206_vm4, %v4194_v54  ;;  %v4195_v34 = vmax.f32 %v4114_v38, 0.0  ;;  %v4116_v58 = vpop.f32.mrb[75].mxu1  ;;  %v4578_v54 = vrot.slane (%p2353_p4), %v4287_v12, 1  ;;  %v4263_v38 = vld [vmem:[#allocation2 + $0x38] sm:$0xff] (%p2353_p4)  ;;  %4665 = vrot.lane.b32.xlu1 (%p2353_p4), %v10350_v21, %s6948_s21 }
 0x50f   : > { %v10355_v58 = vsel (%p2353_p4), %vm3260_vm3, %v4371_v47, %v4373_v8  ;;  %v12322_v8 = vrot.slane (%p2353_p4), %v10428_v61, 1 }
 0x510   : >> { %4245 = vst.msk [vmem:[#allocation2 + $0x140] sm:$0xff] %vm226_vm0, %v4195_v34  ;;  %v10352_v34 = vld [vmem:[#allocation2 + $0x100] sm:$0xff] (%p2353_p4) }
 0x511   : > { %4717 = vrot.lane.b32.xlu0 (%p2353_p4), %v10352_v34, %s6948_s21 }
 0x512   : > { %4667 = vrot.lane.b32.xlu1 (%p2353_p4), %v4263_v38, %s6948_s21 }
 0x513   : >> { %v4119_v39 = vpop.f32.mrb[76].mxu1 }
 0x514   : >> { %v4196_v20 = vmax.f32 %v4119_v39, 0.0  ;;  %v4121_v55 = vpop.f32.mrb[77].mxu1  ;;  %v12329_v39 = vrot.slane (%p2353_p4), %v10331_v25, 7 }
 0x515   : >> { %v4122_v18 = vpop.f32.mrb[78].mxu1  ;;  %v10363_v55 = vsel (%p2353_p4), %vm745_vm1, %v4577_v3, %v4578_v54 }
 0x516   : >> { %4246 = vst.msk [vmem:[#allocation2 + $0x148] sm:$0x1] %vm4209_vm5, %v4196_v20  ;;  %v4197_v32 = vmax.f32 %v4122_v18, 0.0  ;;  %v4124_v36 = vpop.f32.mrb[79].mxu1  ;;  %v4416_v20 = vrot.slane (%p2353_p4), %v4287_v12, 7  ;;  %v4537_v18 = vrot.slane (%p2353_p4), %v10350_v21, 1 }
 0x517   : > { %v12326_v36 = vrot.slane (%p2353_p4), %v10352_v34, 1 }
 0x518   : >> { %4247 = vst.msk [vmem:[#allocation2 + $0x150] sm:$0xfe] %vm4206_vm4, %v4197_v32  ;;  %v4538_v32 = vrot.slane (%p2353_p4), %v4263_v38, 1 }
 0x51b   : >> { %v4127_v2 = vpop.f32.mrb[80].mxu1 }
 0x51c   : >> { %v4198_v29 = vmax.f32 %v4127_v2, 0.0  ;;  %v4129_v44 = vpop.f32.mrb[81].mxu1  ;;  %v10367_v2 = vld [vmem:[#allocation2 + $0x40] sm:$0xff] (%p2353_p4) }
 0x51d   : >> { %v4130_v42 = vpop.f32.mrb[82].mxu1  ;;  %v10373_v44 = vsel (%p2353_p4), %vm3260_vm3, %v12329_v39, %v4416_v20  ;;  %4669 = vrot.lane.b32.xlu1 (%p2353_p4), %v10367_v2, %s6948_s21 }
 0x51e   : >> { %4248 = vst.msk [vmem:[#allocation2 + $0x158] sm:$0xff] %vm226_vm0, %v4198_v29  ;;  %v4199_v43 = vmax.f32 %v4130_v42, 0.0  ;;  %v4132_v40 = vpop.f32.mrb[83].mxu1  ;;  %v12328_v29 = vrot.slane (%p2353_p4), %v10350_v21, 7  ;;  %v4376_v42 = vrot.slane (%p2353_p4), %v4263_v38, 7  ;;  %v4423_v38 = vrot.slane (%p2353_p4), %v10428_v61, 7 }
 0x51f   : > { %v6292_v40 = vld [vmem:[%s12146_s4 + $0xc0] sm:$0xff] (%p2353_p4) }
 0x520   : >> { %4249 = vst.msk [vmem:[#allocation2 + $0x160] sm:$0x1] %vm4209_vm5, %v4199_v43  ;;  %v4418_v43 = vrot.slane (%p2353_p4), %v10352_v34, 7 }
 0x523   : >> { %v4135_v9 = vpop.f32.mrb[84].mxu1 }
 0x524   : >> { %v4200_v23 = vmax.f32 %v4135_v9, 0.0  ;;  %v4137_v60 = vpop.f32.mrb[85].mxu1  ;;  %v10380_v9 = vsel (%p2353_p4), %vm745_vm1, %v4537_v18, %v4538_v32  ;;  %v10455_v18 = vld [vmem:[#allocation2 + $0x58] sm:$0xff] (%p2353_p4) }
 0x525   : >> { %v4138_v62 = vpop.f32.mrb[86].mxu1  ;;  %v12325_v60 = vrot.slane (%p2353_p4), %v10367_v2, 1 }
 0x526   : >> { %4250 = vst.msk [vmem:[#allocation2 + $0x168] sm:$0xfe] %vm4206_vm4, %v4200_v23  ;;  %v4201_v59 = vmax.f32 %v4138_v62, 0.0  ;;  %v4140_v48 = vpop.f32.mrb[87].mxu1  ;;  %v10385_v23 = vsel (%p2353_p4), %vm745_vm1, %v4578_v54, %v12326_v36  ;;  %v10388_v62 = vld [vmem:[#allocation2 + $0x108] sm:$0xff] (%p2353_p4)  ;;  %v6303_v36 = vld [vmem:[%s12146_s4 + $0x118] sm:$0xff] (%p2353_p4) }
 0x527   : > { %12897 = vst [vmem:[#allocation65_spill] sm:$0xff] (%p2353_p4), %v10385_v23  ;;  %v10396_v48 = vsel (%p2353_p4), %vm3260_vm3, %v12328_v29, %v4376_v42  ;;  %v12324_v35 = vrot.slane (%p2353_p4), %v10388_v62, 7  ;;  %4719 = vrot.lane.b32.xlu0 (%p2353_p4), %v10388_v62, %s6948_s21 }
 0x528   : >> { %4251 = vst.msk [vmem:[#allocation2 + $0x170] sm:$0xff] %vm226_vm0, %v4201_v59  ;;  %v6293_v59 = vld [vmem:[%s12146_s4 + $0xc8] sm:$0xff] (%p2353_p4) }
 0x52b   : >> { %v4143_v41 = vpop.f32.mrb[88].mxu1 }
 0x52c   : >> { %v4202_v22 = vmax.f32 %v4143_v41, 0.0  ;;  %v4145_v17 = vpop.f32.mrb[89].mxu1  ;;  %v10399_v41 = vsel (%p2353_p4), %vm3260_vm3, %v4416_v20, %v4418_v43 }
 0x52d   : >> { %v4146_v6 = vpop.f32.mrb[90].mxu1  ;;  %v10406_v17 = vld [vmem:[#allocation2 + $0x110] sm:$0xff] (%p2353_p4) }
 0x52e   : >> { %4252 = vst.msk [vmem:[#allocation2 + $0x178] sm:$0x1] %vm4209_vm5, %v4202_v22  ;;  %v4203_v14 = vmax.f32 %v4146_v6, 0.0  ;;  %v4148_v50 = vpop.f32.mrb[91].mxu1  ;;  %v4378_v22 = vrot.slane (%p2353_p4), %v10367_v2, 7  ;;  %v6490_v6 = vpack.c.bf16 (%p2353_p4), %v6293_v59, %v6292_v40  ;;  %v4421_v24 = vrot.slane (%p2353_p4), %v10406_v17, 7  ;;  %4721 = vrot.lane.b32.xlu0 (%p2353_p4), %v10406_v17, %s6948_s21 }
 0x52f   : > { %v6295_v50 = vld [vmem:[%s12146_s4 + $0xd8] sm:$0xff] (%p2353_p4)  ;;  %v12321_v40 = vrot.slane (%p2353_p4), %v10455_v18, 1  ;;  %v6298_v59 = vld [vmem:[%s12146_s4 + $0xf0] sm:$0xff] (%p2353_p4) }
 0x530   : >> { %4253 = vst.msk [vmem:[#allocation2 + $0x180] sm:$0xfe] %vm4206_vm4, %v4203_v14  ;;  %v6294_v14 = vld [vmem:[%s12146_s4 + $0xd0] sm:$0xff] (%p2353_p4)  ;;  %6609 = vmatpush1.bf16.msra.mxu1 (%p2353_p4), %v6490_v6  ;;  %6491 = vmatpush1.bf16.msra.mxu0 (%p2353_p4), %v6490_v6  ;;  %v10452_v54 = vsel (%p2353_p4), %vm3260_vm3, %v12324_v35, %v4421_v24  ;;  %v10481_v6 = vsel (%p2353_p4), %vm3260_vm3, %v4421_v24, %v4423_v38 }
 0x531   : > { %v6493_v11 = vpack.c.bf16 (%p2353_p4), %v6295_v50, %v6294_v14  ;;  %6598 = vmatprep.subr.bf16.mxu1 (%p2353_p4), %v12339_v28  ;;  %6492 = vmatprep.subr.bf16.mxu0 (%p2353_p4), %v12339_v28  ;;  %v10487_v14 = vld [vmem:[#allocation2 + $0x120] sm:$0xff] (%p2353_p4)  ;;  %v10489_v50 = vld [vmem:[#allocation2 + $0x128] sm:$0xff] (%p2353_p4) }
 0x532   : > { %2355 = sbr.rel (!%p2353_p4) target bundleno = 477 (0x1dd), region = 85  ;;  %v4588_v24 = vrot.slane (%p2353_p4), %v10489_v50, 1  ;;  %4723 = vrot.lane.b32.xlu0 (%p2353_p4), %v10428_v61, %s6948_s21 }
 0x533   : >> { %v4151_v53 = vpop.f32.mrb[92].mxu1 }
 0x534   : >> { %v4204_v19 = vmax.f32 %v4151_v53, 0.0  ;;  %v4153_v10 = vpop.f32.mrb[93].mxu1  ;;  %v10417_v53 = vsel (%p2353_p4), %vm745_vm1, %v4538_v32, %v12325_v60  ;;  %6610 = vmatpush1.bf16.msra.mxu1 (%p2353_p4), %v6493_v11  ;;  %6494 = vmatpush1.bf16.msra.mxu0 (%p2353_p4), %v6493_v11  ;;  %v4587_v11 = vrot.slane (%p2353_p4), %v10487_v14, 1  ;;  %v6302_v60 = vld [vmem:[%s12146_s4 + $0x110] sm:$0xff] (%p2353_p4) }
 0x535   : >> { %v4154_v31 = vpop.f32.mrb[94].mxu1  ;;  %v10420_v10 = vld [vmem:[#allocation2 + $0x48] sm:$0xff] (%p2353_p4)  ;;  %6599 = vmatprep.subr.bf16.mxu1 (%p2353_p4), %v12339_v28  ;;  %6495 = vmatprep.subr.bf16.mxu0 (%p2353_p4), %v12339_v28 }
 0x536   : >> { %4254 = vst.msk [vmem:[#allocation2 + $0x188] sm:$0xff] %vm226_vm0, %v4204_v19  ;;  %v4205_v49 = vmax.f32 %v4154_v31, 0.0  ;;  %v4156_v27 = vpop.f32.mrb[95].mxu1  ;;  %v4582_v19 = vrot.slane (%p2353_p4), %v10388_v62, 1  ;;  %v10423_v31 = vsel (%p2353_p4), %vm3260_vm3, %v4376_v42, %v4378_v22  ;;  %v4542_v1 = vrot.slane (%p2353_p4), %v10420_v10, 1  ;;  %v6299_v22 = vld [vmem:[%s12146_s4 + $0xf8] sm:$0xff] (%p2353_p4)  ;;  %4671 = vrot.lane.b32.xlu1 (%p2353_p4), %v10420_v10, %s6948_s21  ;;  %4725 = vrot.lane.b32.xlu0 (%p2353_p4), %v10487_v14, %s6948_s21 }
 0x537   : > { %v10426_v27 = vld [vmem:[#allocation2 + $0x50] sm:$0xff] (%p2353_p4)  ;;  %v12323_v3 = vrot.slane (%p2353_p4), %v10420_v10, 7  ;;  %v6496_v42 = vpack.c.bf16 (%p2353_p4), %v6297_v56, %v6296_v52  ;;  %v6300_v56 = vld [vmem:[%s12146_s4 + $0x100] sm:$0xff] (%p2353_p4)  ;;  %v10511_v38 = vsel (%p2353_p4), %vm745_vm1, %v4587_v11, %v4588_v24 }
 0x538   : >> { %4255 = vst.msk [vmem:[#allocation2 + $0x190] sm:$0x1] %vm4209_vm5, %v4205_v49  ;;  %v4583_v49 = vrot.slane (%p2353_p4), %v10406_v17, 1  ;;  %v4543_v16 = vrot.slane (%p2353_p4), %v10426_v27, 1  ;;  %v4381_v20 = vrot.slane (%p2353_p4), %v10426_v27, 7  ;;  %12900 = vst [vmem:[#allocation63_spill] sm:$0xff] (%p2353_p4), %v10511_v38  ;;  %v6505_v17 = vpack.c.bf16 (%p2353_p4), %v6303_v36, %v6302_v60 }
 0x539   : > { %6611 = vmatpush1.bf16.msra.mxu1 %v6496_v42  ;;  %6497 = vmatpush1.bf16.msra.mxu0 %v6496_v42  ;;  %v10519_v42 = vld [vmem:[#allocation2 + $0x68] sm:$0xff]  ;;  %v10584_v60 = vld [vmem:[#allocation2 + $0x138] sm:$0xff] }
 0x53a   : > { %v10442_v47 = vsel %vm745_vm1, %v4582_v19, %v4583_v49  ;;  %v10458_v32 = vsel %vm745_vm1, %v4542_v1, %v4543_v16  ;;  %v10463_v12 = vsel %vm745_vm1, %v4583_v49, %v12322_v8  ;;  %v10469_v43 = vsel %vm3260_vm3, %v12323_v3, %v4381_v20  ;;  %6600 = vmatprep.subr.bf16.mxu1 %v12339_v28 }
 0x53b   : > { %12898 = vst [vmem:[#allocation62_spill] sm:$0xff] %v10442_v47  ;;  %12899 = vst [vmem:[#allocation77_spill] sm:$0xff] %v10463_v12  ;;  %v10494_v19 = vsel %vm745_vm1, %v4543_v16, %v12321_v40  ;;  %v4383_v49 = vrot.slane %v10455_v18, 7  ;;  %v6499_v1 = vpack.c.bf16 %v6299_v22, %v6298_v59  ;;  %6498 = vmatprep.subr.bf16.mxu0 %v12339_v28  ;;  %v6301_v16 = vld [vmem:[%s12146_s4 + $0x108] sm:$0xff]  ;;  %v10521_v59 = vld [vmem:[#allocation2 + $0x130] sm:$0xff]  ;;  %v12327_v22 = vrot.slane %v10487_v14, 7 }
 0x53c   : > { %v4548_v11 = vrot.slane %v10519_v42, 1  ;;  %v12330_v8 = vrot.slane %v10521_v59, 1  ;;  %v6502_v3 = vpack.c.bf16 %v6301_v16, %v6300_v56  ;;  %4673 = vrot.lane.b32.xlu1 %v10426_v27, %s6948_s21  ;;  %v10548_v56 = vld [vmem:[#allocation2 + $0x70] sm:$0xff]  ;;  %v4386_v29 = vrot.slane %v10519_v42, 7  ;;  %12907 = vst [vmem:[#allocation54_spill] sm:$0xff] %v10584_v60  ;;  %4727 = vrot.lane.b32.xlu0 %v10489_v50, %s6948_s21 }
 0x53d   : > { %v10500_v52 = vsel %vm3260_vm3, %v4381_v20, %v4383_v49  ;;  %v10517_v20 = vld [vmem:[#allocation2 + $0x60] sm:$0xff]  ;;  %v4426_v49 = vrot.slane %v10489_v50, 7  ;;  %6612 = vmatpush1.bf16.msra.mxu1 %v6499_v1  ;;  %6500 = vmatpush1.bf16.msra.mxu0 %v6499_v1  ;;  %12902 = vst [vmem:[#allocation52_spill] sm:$0xff] %v10548_v56  ;;  %v12334_v39 = vrot.slane %v10548_v56, 1  ;;  %v4388_v26 = vrot.slane %v10548_v56, 7 }
 0x53e   : > { %v4547_v40 = vrot.slane %v10517_v20, 1  ;;  %6601 = vmatprep.subr.bf16.mxu1 %v12339_v28  ;;  %6501 = vmatprep.subr.bf16.mxu0 %v12339_v28  ;;  %v12331_v16 = vrot.slane %v10517_v20, 7 }
 0x53f   : > { %v10531_v35 = vsel %vm3260_vm3, %v12327_v22, %v4426_v49  ;;  %v10554_v22 = vsel %vm745_vm1, %v4588_v24, %v12330_v8  ;;  %v6304_v24 = vld [vmem:[%s12146_s4 + $0x120] sm:$0xff]  ;;  %v6305_v8 = vld [vmem:[%s12146_s4 + $0x128] sm:$0xff]  ;;  %v10578_v36 = vsel %vm745_vm1, %v4548_v11, %v12334_v39  ;;  %v10594_v39 = vsel %vm3260_vm3, %v4386_v29, %v4388_v26 }
 0x540   : > { %12901 = vst [vmem:[#allocation64_spill] sm:$0xff] %v10531_v35  ;;  %v10542_v1 = vsel %vm745_vm1, %v4547_v40, %v4548_v11  ;;  %12903 = vst [vmem:[#allocation66_spill] sm:$0xff] %v10554_v22  ;;  %v4428_v40 = vrot.slane %v10521_v59, 7  ;;  %v10562_v27 = vsel %vm3260_vm3, %v12331_v16, %v4386_v29  ;;  %4675 = vrot.lane.b32.xlu1 %v10455_v18, %s6948_s21  ;;  %v10586_v16 = vld [vmem:[#allocation2 + $0x140] sm:$0xff]  ;;  %v10613_v26 = vld [vmem:[#allocation2 + $0x148] sm:$0xff]  ;;  %v12344_v29 = vrot.slane %v10584_v60, 7 }
 0x541   : > { %6613 = vmatpush1.bf16.msra.mxu1 %v6502_v3  ;;  %6503 = vmatpush1.bf16.msra.mxu0 %v6502_v3  ;;  %12904 = vst [vmem:[#allocation68_spill] sm:$0xff] %v10562_v27  ;;  %12906 = vst [vmem:[#allocation55_spill] sm:$0xff] %v10578_v36  ;;  %v6508_v11 = vpack.c.bf16 %v6305_v8, %v6304_v24  ;;  %v4431_v8 = vrot.slane %v10586_v16, 7  ;;  %v4552_v24 = vrot.slane %v10591_v46, 1  ;;  %v10651_v35 = vld [vmem:[#allocation2 + $0x150] sm:$0xff] }
 0x542   : > { %6602 = vmatprep.subr.bf16.mxu1 %v12339_v28  ;;  %6504 = vmatprep.subr.bf16.mxu0 %v12339_v28  ;;  %v10573_v3 = vsel %vm3260_vm3, %v4426_v49, %v4428_v40  ;;  %v4592_v49 = vrot.slane %v10584_v60, 1  ;;  %v4593_v40 = vrot.slane %v10586_v16, 1  ;;  %12909 = vst [vmem:[#allocation57_spill] sm:$0xff] %v10594_v39  ;;  %v6309_v39 = vld [vmem:[%s12146_s4 + $0x148] sm:$0xff]  ;;  %12916 = vst [vmem:[#allocation80_spill] sm:$0xff] %v10651_v35 }
 0x543   : > { %12905 = vst [vmem:[#allocation53_spill] sm:$0xff] %v10573_v3  ;;  %v10629_v3 = vsel %vm3260_vm3, %v12344_v29, %v4431_v8  ;;  %v4391_v29 = vrot.slane %v10596_v33, 7  ;;  %4729 = vrot.lane.b32.xlu0 %v10521_v59, %s6948_s21 }
 0x544   : > { %4677 = vrot.lane.b32.xlu1 %v10517_v20, %s6948_s21  ;;  %12911 = vst [vmem:[#allocation58_spill] sm:$0xff] %v10629_v3  ;;  %v4433_v3 = vrot.slane %v10613_v26, 7 }
 0x545   : > { %6614 = vmatpush1.bf16.msra.mxu1 %v6505_v17  ;;  %6506 = vmatpush1.bf16.msra.mxu0 %v6505_v17  ;;  %v10607_v17 = vsel %vm745_vm1, %v4592_v49, %v4593_v40  ;;  %v6511_v49 = vpack.c.bf16 %v6307_v45, %v6306_v7  ;;  %v12914_v7 = vrot.slane %v10613_v26, 1 }
 0x546   : > { %6603 = vmatprep.subr.bf16.mxu1 %v12339_v28  ;;  %6507 = vmatprep.subr.bf16.mxu0 %v12339_v28  ;;  %12910 = vst [vmem:[#allocation67_spill] sm:$0xff] %v10607_v17  ;;  %v4553_v28 = vrot.slane %v10596_v33, 1  ;;  %v6308_v17 = vld [vmem:[%s12146_s4 + $0x140] sm:$0xff] }
 0x547   : > { %v10641_v45 = vsel %vm745_vm1, %v4593_v40, %v12914_v7  ;;  %v6514_v27 = vpack.c.bf16 %v6309_v39, %v6308_v17  ;;  %v10666_v7 = vld [vmem:[#allocation2 + $0x158] sm:$0xff]  ;;  %v6310_v39 = vld [vmem:[%s12146_s4 + $0x150] sm:$0xff]  ;;  %v4597_v17 = vrot.slane %v10651_v35, 1  ;;  %4731 = vrot.lane.b32.xlu0 %v10584_v60, %s6948_s21 }
 0x548   : > { %v10632_v36 = vsel %vm745_vm1, %v4552_v24, %v4553_v28  ;;  %12915 = vst [vmem:[#allocation60_spill] sm:$0xff] %v10641_v45  ;;  %4679 = vrot.lane.b32.xlu1 %v10519_v42, %s6948_s21  ;;  %v12347_v24 = vrot.slane %v10591_v46, 7  ;;  %v10659_v42 = vsel %vm3260_vm3, %v4431_v8, %v4433_v3  ;;  %v6311_v3 = vld [vmem:[%s12146_s4 + $0x158] sm:$0xff]  ;;  %v4598_v8 = vrot.slane %v10666_v7, 1  ;;  %v6314_v45 = vld [vmem:[%s12146_s4 + $0x170] sm:$0xff] }
 0x549   : > { %6615 = vmatpush1.bf16.msra.mxu1 %v6508_v11  ;;  %6509 = vmatpush1.bf16.msra.mxu0 %v6508_v11  ;;  %12912 = vst [vmem:[#allocation71_spill] sm:$0xff] %v10632_v36  ;;  %v12913_v11 = vmov 0.0|0.0   ;;  %v12346_v36 = vrot.slane %v10634_v13, 1  ;;  %12918 = vst [vmem:[#allocation81_spill] sm:$0xff] %v10659_v42 }
 0x54a   : > { %6604 = vmatprep.subr.bf16.mxu1 %v12913_v11  ;;  %6510 = vmatprep.subr.bf16.mxu0 %v12913_v11  ;;  %v10656_v50 = vsel %vm3260_vm3, %v12347_v24, %v4391_v29  ;;  %v10689_v42 = vsel %vm745_vm1, %v4597_v17, %v4598_v8 }
 0x54b   : > { %12917 = vst [vmem:[#allocation70_spill] sm:$0xff] %v10656_v50  ;;  %v10664_v40 = vsel %vm745_vm1, %v4553_v28, %v12346_v36  ;;  %v4393_v28 = vrot.slane %v10634_v13, 7  ;;  %v6517_v36 = vpack.c.bf16 %v6311_v3, %v6310_v39  ;;  %12922 = vst [vmem:[#allocation83_spill] sm:$0xff] %v10689_v42  ;;  %v6312_v50 = vld [vmem:[%s12146_s4 + $0x160] sm:$0xff]  ;;  %v12354_v39 = vrot.slane %v10651_v35, 7  ;;  %4733 = vrot.lane.b32.xlu0 %v10586_v16, %s6948_s21 }
 0x54c   : > { %12919 = vst [vmem:[#allocation84_spill] sm:$0xff] %v10664_v40  ;;  %4681 = vrot.lane.b32.xlu1 %v10548_v56, %s6948_s21  ;;  %v10691_v40 = vld [vmem:[#allocation2 + $0x98] sm:$0xff]  ;;  %v4436_v3 = vrot.slane %v10666_v7, 7  ;;  %v10726_v42 = vld [vmem:[#allocation2 + $0xa0] sm:$0xff] }
 0x54d   : > { %6616 = vmatpush1.bf16.msra.mxu1 %v6511_v49  ;;  %6512 = vmatpush1.bf16.msra.mxu0 %v6511_v49  ;;  %v10683_v49 = vld [vmem:[#allocation2 + $0x90] sm:$0xff]  ;;  %v10686_v24 = vsel %vm3260_vm3, %v4391_v29, %v4393_v28  ;;  %v10705_v29 = vld [vmem:[#allocation2 + $0x160] sm:$0xff]  ;;  %v4558_v17 = vrot.slane %v10691_v40, 1  ;;  %12926 = vst [vmem:[#allocation87_spill] sm:$0xff] %v10726_v42 }
 0x54e   : > { %6605 = vmatprep.subr.bf16.mxu1 %v12913_v11  ;;  %6513 = vmatprep.subr.bf16.mxu0 %v12913_v11  ;;  %12920 = vst [vmem:[#allocation82_spill] sm:$0xff] %v10683_v49  ;;  %12921 = vst [vmem:[#allocation96_spill] sm:$0xff] %v10686_v24  ;;  %v4557_v28 = vrot.slane %v10683_v49, 1  ;;  %v10721_v60 = vsel %vm3260_vm3, %v12354_v39, %v4436_v3  ;;  %v4438_v39 = vrot.slane %v10705_v29, 7 }
 0x54f   : > { %12923 = vst [vmem:[#allocation85_spill] sm:$0xff] %v10705_v29  ;;  %12924 = vst [vmem:[#allocation59_spill] sm:$0xff] %v10721_v60  ;;  %v12357_v60 = vrot.slane %v10726_v42, 1  ;;  %4735 = vrot.lane.b32.xlu0 %v10613_v26, %s6948_s21 }
 0x550   : > { %4683 = vrot.lane.b32.xlu1 %v10591_v46, %s6948_s21  ;;  %v6315_v46 = vld [vmem:[%s12146_s4 + $0x178] sm:$0xff]  ;;  %v10724_v56 = vsel %vm745_vm1, %v4557_v28, %v4558_v17  ;;  %v4396_v28 = vrot.slane %v10691_v40, 7  ;;  %v10749_v16 = vsel %vm3260_vm3, %v4436_v3, %v4438_v39 }
 0x551   : > { %6617 = vmatpush1.bf16.msra.mxu1 %v6514_v27  ;;  %6515 = vmatpush1.bf16.msra.mxu0 %v6514_v27  ;;  %v6313_v27 = vld [vmem:[%s12146_s4 + $0x168] sm:$0xff]  ;;  %12925 = vst [vmem:[#allocation86_spill] sm:$0xff] %v10724_v56  ;;  %v6523_v56 = vpack.c.bf16 %v6315_v46, %v6314_v45  ;;  %12930 = vst [vmem:[#allocation72_spill] sm:$0xff] %v10749_v16  ;;  %v4398_v46 = vrot.slane %v10726_v42, 7 }
 0x552   : > { %6606 = vmatprep.subr.bf16.mxu1 %v12913_v11  ;;  %6516 = vmatprep.subr.bf16.mxu0 %v12913_v11  ;;  %v6520_v24 = vpack.c.bf16 %v6313_v27, %v6312_v50  ;;  %v12358_v27 = vrot.slane %v10683_v49, 7 }
 0x553   : > { %v10767_v39 = vsel %vm3260_vm3, %v4396_v28, %v4398_v46  ;;  %4737 = vrot.lane.b32.xlu0 %v10651_v35, %s6948_s21 }
 0x554   : > { %4685 = vrot.lane.b32.xlu1 %v10596_v33, %s6948_s21  ;;  %v10754_v33 = vsel %vm745_vm1, %v4558_v17, %v12357_v60  ;;  %12933 = vst [vmem:[#allocation76_spill] sm:$0xff] %v10767_v39  ;;  %v10772_v17 = vld [vmem:[#allocation2 + $0xa8] sm:$0xff]  ;;  %v4278_v60 = vld [vmem:[#allocation2 + $0xb0] sm:$0xff] }
 0x555   : > { %6618 = vmatpush1.bf16.msra.mxu1 %v6517_v36  ;;  %6518 = vmatpush1.bf16.msra.mxu0 %v6517_v36  ;;  %v12927_v36 = vrot.slane %v10705_v29, 1  ;;  %12931 = vst [vmem:[#allocation73_spill] sm:$0xff] %v10754_v33  ;;  %12935 = vst [vmem:[#allocation92_spill] sm:$0xff] %v10772_v17  ;;  %v10793_v33 = vld [vmem:[#allocation2 + $0xb8] sm:$0xff] }
 0x556   : > { %6607 = vmatprep.subr.bf16.mxu1 %v12913_v11  ;;  %6519 = vmatprep.subr.bf16.mxu0 %v12913_v11 }
 0x557   : > { %v10733_v50 = vsel %vm745_vm1, %v4598_v8, %v12927_v36  ;;  %v10746_v8 = vsel %vm3260_vm3, %v12358_v27, %v4396_v28  ;;  %v10756_v36 = vld [vmem:[#allocation2 + $0x168] sm:$0xff]  ;;  %v4563_v27 = vrot.slane %v4278_v60, 1  ;;  %4739 = vrot.lane.b32.xlu0 %v10666_v7, %s6948_s21 }
 0x558   : > { %12928 = vst [vmem:[#allocation69_spill] sm:$0xff] %v10733_v50  ;;  %12929 = vst [vmem:[#allocation74_spill] sm:$0xff] %v10746_v8  ;;  %v4302_v50 = vld [vmem:[#allocation2 + $0x170] sm:$0xff]  ;;  %4687 = vrot.lane.b32.xlu1 %v10634_v13, %s6948_s21  ;;  %v4602_v45 = vrot.slane %v10756_v36, 1  ;;  %v12362_v28 = vrot.slane %v10756_v36, 7 }
 0x559   : > { %6619 = vmatpush1.bf16.msra.mxu1 %v6520_v24  ;;  %6521 = vmatpush1.bf16.msra.mxu0 %v6520_v24  ;;  %12932 = vst [vmem:[#allocation75_spill] sm:$0xff] %v10756_v36  ;;  %v4603_v24 = vrot.slane %v4302_v50, 1  ;;  %v4441_v46 = vrot.slane %v4302_v50, 7 }
 0x55a   : > { %6608 = vmatprep.subr.bf16.mxu1 %v12913_v11  ;;  %6522 = vmatprep.subr.bf16.mxu0 %v12913_v11 }
 0x55b   : > { %v10770_v3 = vsel %vm745_vm1, %v4602_v45, %v4603_v24  ;;  %v4562_v45 = vrot.slane %v10772_v17, 1  ;;  %v10788_v39 = vsel %vm3260_vm3, %v12362_v28, %v4441_v46  ;;  %v4401_v28 = vrot.slane %v4278_v60, 7  ;;  %4741 = vrot.lane.b32.xlu0 %v10705_v29, %s6948_s21 }
 0x55c   : > { %12934 = vst [vmem:[#allocation88_spill] sm:$0xff] %v10770_v3  ;;  %4689 = vrot.lane.b32.xlu1 %v10683_v49, %s6948_s21  ;;  %12936 = vst [vmem:[#allocation78_spill] sm:$0xff] %v10788_v39  ;;  %v12365_v49 = vrot.slane %v10772_v17, 7 }
 0x55d   : > { %6620 = vmatpush1.bf16.msra.mxu1 %v6523_v56  ;;  %6524 = vmatpush1.bf16.msra.mxu0 %v6523_v56  ;;  %v10780_v56 = vld [vmem:[#allocation2 + $0x178] sm:$0xff]  ;;  %v10791_v16 = vsel %vm745_vm1, %v4562_v45, %v4563_v27  ;;  %v12366_v45 = vrot.slane %v10793_v33, 1 }
 0x55e   : > { %6525 = vmatprep.subr.bf16.mxu1 %v12913_v11  ;;  %6561 = vmatprep.subr.bf16.mxu0 %v12913_v11  ;;  %v12364_v3 = vrot.slane %v10780_v56, 1  ;;  %12937 = vst [vmem:[#allocation101_spill] sm:$0xff] %v10791_v16  ;;  %v4443_v39 = vrot.slane %v10780_v56, 7  ;;  %v10810_v16 = vsel %vm3260_vm3, %v12365_v49, %v4401_v28  ;;  %v4403_v49 = vrot.slane %v10793_v33, 7 }
 0x55f   : > { %12939 = vst [vmem:[#allocation99_spill] sm:$0xff] %v10810_v16  ;;  %v10818_v7 = vsel %vm745_vm1, %v4563_v27, %v12366_v45  ;;  %v10834_v45 = vld [vmem:[#allocation2 + $0xc0] sm:$0xff]  ;;  %4743 = vrot.lane.b32.xlu0 %v10756_v36, %s6948_s21  ;;  %v10853_v36 = vld [vmem:[#allocation2 + $0xd0] sm:$0xff] }
 0x560   : > { %v10798_v8 = vsel %vm745_vm1, %v4603_v24, %v12364_v3  ;;  %4691 = vrot.lane.b32.xlu1 %v10691_v40, %s6948_s21  ;;  %v10813_v24 = vsel %vm3260_vm3, %v4441_v46, %v4443_v39  ;;  %12941 = vst [vmem:[#allocation102_spill] sm:$0xff] %v10818_v7  ;;  %v10820_v40 = vld [vmem:[#allocation2 + $0x180] sm:$0xff]  ;;  %v4305_v3 = vld [vmem:[#allocation2 + $0x188] sm:$0xff]  ;;  %v10829_v46 = vsel %vm3260_vm3, %v4401_v28, %v4403_v49  ;;  %v10840_v7 = vld [vmem:[#allocation2 + $0x190] sm:$0xff]  ;;  %v4567_v49 = vrot.slane %v10834_v45, 1 }
 0x561   : > { %12938 = vst [vmem:[#allocation91_spill] sm:$0xff] %v10798_v8  ;;  %12940 = vst [vmem:[#allocation105_spill] sm:$0xff] %v10813_v24  ;;  %v4607_v16 = vrot.slane %v10820_v40, 1  ;;  %v4608_v39 = vrot.slane %v4305_v3, 1  ;;  %v4281_v24 = vld [vmem:[#allocation2 + $0xc8] sm:$0xff]  ;;  %v12375_v8 = vrot.slane %v10820_v40, 7 }
 0x562   : > { %12942 = vst [vmem:[#allocation117_spill] sm:$0xff] %v10829_v46  ;;  %v4568_v28 = vrot.slane %v4281_v24, 1  ;;  %v12378_v29 = vrot.slane %v10834_v45, 7  ;;  %v4406_v35 = vrot.slane %v4281_v24, 7 }
 0x563   : > { %v10832_v27 = vsel %vm745_vm1, %v4607_v16, %v4608_v39  ;;  %v12377_v16 = vrot.slane %v10840_v7, 1  ;;  %4745 = vrot.lane.b32.xlu0 %v4302_v50, %s6948_s21 }
 0x564   : > { %4693 = vrot.lane.b32.xlu1 %v10726_v42, %s6948_s21  ;;  %12943 = vst [vmem:[#allocation103_spill] sm:$0xff] %v10832_v27  ;;  %v4446_v42 = vrot.slane %v4305_v3, 7  ;;  %v10851_v46 = vsel %vm745_vm1, %v4567_v49, %v4568_v28  ;;  %v10868_v49 = vsel %vm3260_vm3, %v12378_v29, %v4406_v35 }
 0x565   : > { %12945 = vst [vmem:[#allocation79_spill] sm:$0xff] %v10851_v46  ;;  %12947 = vst [vmem:[#allocation108_spill] sm:$0xff] %v10868_v49 }
 0x566   : > { %v10848_v27 = vsel %vm3260_vm3, %v12375_v8, %v4446_v42  ;;  %v4448_v8 = vrot.slane %v10840_v7, 7 }
 0x567   : > { %12944 = vst [vmem:[#allocation104_spill] sm:$0xff] %v10848_v27  ;;  %v12379_v27 = vrot.slane %v10853_v36, 1  ;;  %4747 = vrot.lane.b32.xlu0 %v10780_v56, %s6948_s21 }
 0x568   : > { %4695 = vrot.lane.b32.xlu1 %v10772_v17, %s6948_s21  ;;  %v10858_v17 = vsel %vm745_vm1, %v4608_v39, %v12377_v16  ;;  %v10871_v46 = vsel %vm3260_vm3, %v4446_v42, %v4448_v8  ;;  %v4257_v39 = vld [vmem:[#allocation2 + $0x8] sm:$0xff]  ;;  %v4408_v16 = vrot.slane %v10853_v36, 7 }
 0x569   : > { %12946 = vst [vmem:[#allocation106_spill] sm:$0xff] %v10858_v17  ;;  %12948 = vst [vmem:[#allocation89_spill] sm:$0xff] %v10871_v46  ;;  %v10876_v50 = vsel %vm745_vm1, %v4568_v28, %v12379_v27  ;;  %v4528_v42 = vrot.slane %v4257_v39, 1  ;;  %v10892_v27 = vld [vmem:[#allocation2 + $0x10] sm:$0xff] }
 0x56a   : > { %12949 = vst [vmem:[#allocation93_spill] sm:$0xff] %v10876_v50  ;;  %v10887_v8 = vsel %vm3260_vm3, %v4406_v35, %v4408_v16  ;;  %12952 = vst [vmem:[#allocation95_spill] sm:$0xff] %v10892_v27  ;;  %v4366_v50 = vrot.slane %v4257_v39, 7  ;;  %v12381_v49 = vrot.slane %v10892_v27, 1  ;;  %v4368_v16 = vrot.slane %v10892_v27, 7 }
 0x56b   : > { %12950 = vst [vmem:[#allocation90_spill] sm:$0xff] %v10887_v8  ;;  %4749 = vrot.lane.b32.xlu0 %v10820_v40, %s6948_s21 }
 0x56c   : > { %4697 = vrot.lane.b32.xlu1 %v4278_v60, %s6948_s21  ;;  %v10878_v60 = vld [vmem:[#allocation2] sm:$0xff] }
 0x56d   : > { %v4527_v29 = vrot.slane %v10878_v60, 1  ;;  %v12382_v46 = vrot.slane %v10878_v60, 7 }
 0x56f   : > { %v10890_v28 = vsel %vm745_vm1, %v4527_v29, %v4528_v42  ;;  %v10903_v35 = vsel %vm3260_vm3, %v12382_v46, %v4366_v50  ;;  %v10908_v29 = vsel %vm745_vm1, %v4528_v42, %v12381_v49  ;;  %4751 = vrot.lane.b32.xlu0 %v4305_v3, %s6948_s21  ;;  %v4869_v3 = vld [vmem:[%s12146_s4] sm:$0xff]  ;;  %v4708_v49 = vpop.permute.xlu0 %4707  ;;  %v4710_v46 = vpop.permute.xlu1 %4709 }
 0x570   : > { %4699 = vrot.lane.b32.xlu1 %v10793_v33, %s6948_s21  ;;  %12951 = vst [vmem:[#allocation94_spill] sm:$0xff] %v10890_v28  ;;  %12953 = vst [vmem:[#allocation107_spill] sm:$0xff] %v10903_v35  ;;  %v10914_v28 = vsel %vm3260_vm3, %v4366_v50, %v4368_v16  ;;  %v12956_v50 = vrot.slane %v10290_v4, 7  ;;  %v4871_v4 = vld [vmem:[%s12146_s4 + $0x10] sm:$0xff] }
 0x571   : > { %12954 = vst [vmem:[#allocation97_spill] sm:$0xff] %v10908_v29  ;;  %12955 = vst [vmem:[#allocation110_spill] sm:$0xff] %v10914_v28  ;;  %v6413_v28 = vld [vmem:[%s12146_s4 + $0x188] sm:$0xff]  ;;  %v10955_v29 = vsel %vm226_vm0, %v10315_v15, %v4710_v46  ;;  %v12958_v15 = vrot.slane %v10298_v5, 1 }
 0x572   : > { %v4518_v42 = vsel %vm3260_vm3, 0.0, %v12956_v50 }
 0x573   : > { %4753 = vrot.lane.b32.xlu0 %v10840_v7, %s6948_s21  ;;  %v4662_v35 = vpop.permute.xlu1 %4661  ;;  %v10969_v46 = vsel %vm745_vm1, %v12958_v15, 0.0 }
 0x574   : > { %4701 = vrot.lane.b32.xlu1 %v10834_v45, %s6948_s21  ;;  %v10984_v5 = vsel %vm226_vm0, %v10338_v30, %v4662_v35  ;;  %v6416_v30 = vld [vmem:[%s12146_s4 + $0x1a0] sm:$0xff] }
 0x577   : > { %4653 = vrot.lane.b32.xlu0 %v10878_v60, %s6948_s21 }
 0x578   : > { %4703 = vrot.lane.b32.xlu1 %v4281_v24, %s6948_s21  ;;  %v4870_v24 = vld [vmem:[%s12146_s4 + $0x8] sm:$0xff] }
 0x579   : > { %v6526_v16 = vpack.c.bf16 %v4870_v24, %v4869_v3  ;;  %v4872_v3 = vld [vmem:[%s12146_s4 + $0x18] sm:$0xff]  ;;  %v12957_v24 = vrot.slane %v10295_v51, 7  ;;  %v6414_v51 = vld [vmem:[%s12146_s4 + $0x190] sm:$0xff] }
 0x57a   : > { %v6529_v8 = vpack.c.bf16 %v4872_v3, %v4871_v4  ;;  %v4664_v3 = vpop.permute.xlu1 %4663 }
 0x57b   : > { %4657 = vrot.lane.b32.xlu0 %v10892_v27, %s6948_s21  ;;  %v10941_v27 = vsel %vm226_vm0, %v4518_v42, %v4708_v49  ;;  %v4510_v50 = vsel %vm3260_vm3, 0.0, %v12957_v24  ;;  %v4660_v42 = vpop.permute.xlu0 %4659 }
 0x57c   : > { %4705 = vrot.lane.b32.xlu1 %v10853_v36, %s6948_s21  ;;  %5215 = vmatmul.mubr.f32.vlgmr.msra.gmra.mrb[0].mxu1 %v10941_v27  ;;  %v10964_v24 = vsel %vm226_vm0, %v4510_v50, %v4660_v42  ;;  %v12959_v50 = vrot.slane %v10308_v57, 1  ;;  %v6417_v57 = vld [vmem:[%s12146_s4 + $0x1a8] sm:$0xff] }
 0x57d   : > { %6527 = vmatpush1.bf16.msra.mxu1 %v6526_v16  ;;  %6341 = vmatprep.mubr.msk.f32.mxu1 %vm226_vm0, %v10328_v63  ;;  %v4873_v16 = vld [vmem:[%s12146_s4 + $0x20] sm:$0xff] }
 0x57e   : > { %6528 = vmatprep.subr.bf16.mxu1 %v12913_v11  ;;  %5095 = vmatmul.mubr.f32.vlgmr.msra.gmra.mrb[0].mxu0 %v10964_v24  ;;  %v10993_v42 = vsel %vm745_vm1, %v12959_v50, 0.0 }
 0x57f   : > { %6317 = vmatprep.mubr.msk.f32.mxu0 %vm226_vm0, %v10347_v37  ;;  %v4712_v4 = vpop.permute.xlu0 %4711 }
 0x580   : > { %4655 = vrot.lane.b32.xlu1 %v4257_v39, %s6948_s21  ;;  %v6412_v39 = vld [vmem:[%s12146_s4 + $0x180] sm:$0xff]  ;;  %5220 = vmatmul.mubr.f32.gmra.mrb[2].mxu1 %v10955_v29  ;;  %v11000_v35 = vsel %vm226_vm0, %v10341_v0, %v4712_v4  ;;  %v12961_v0 = vrot.slane %v10331_v25, 7  ;;  %v12962_v4 = vrot.slane %v10350_v21, 7  ;;  %v6568_v25 = vpack.c.bf16 %v6417_v57, %v6416_v30  ;;  %v6419_v21 = vld [vmem:[%s12146_s4 + $0x1b8] sm:$0xff] }
 0x581   : > { %v6562_v49 = vpack.c.bf16 %v6413_v28, %v6412_v39  ;;  %v6415_v28 = vld [vmem:[%s12146_s4 + $0x198] sm:$0xff]  ;;  %v4874_v39 = vld [vmem:[%s12146_s4 + $0x28] sm:$0xff]  ;;  %6342 = vmatprep.mubr.msk.f32.mxu1 %vm226_vm0, %v10969_v46  ;;  %6530 = vmatpush1.bf16.msra.mxu1 %v6529_v8  ;;  %12960 = vst [vmem:[#allocation98_spill] sm:$0xff] %v11000_v35  ;;  %v4875_v8 = vld [vmem:[%s12146_s4 + $0x30] sm:$0xff] }
 0x582   : > { %v6565_v15 = vpack.c.bf16 %v6415_v28, %v6414_v51  ;;  %6531 = vmatprep.subr.bf16.mxu1 %v12913_v11  ;;  %v4876_v51 = vld [vmem:[%s12146_s4 + $0x38] sm:$0xff]  ;;  %5100 = vmatmul.mubr.f32.gmra.mrb[2].mxu0 %v10984_v5  ;;  %v4519_v28 = vsel %vm3260_vm3, 0.0, %v12961_v0  ;;  %v4511_v50 = vsel %vm3260_vm3, 0.0, %v12962_v4 }
 0x583   : > { %6563 = vmatpush1.bf16.msra.mxu0 %v6562_v49  ;;  %v6532_v49 = vpack.c.bf16 %v4874_v39, %v4873_v16  ;;  %v11020_v16 = vsel %vm226_vm0, %v10355_v58, %v4664_v3  ;;  %6318 = vmatprep.mubr.msk.f32.mxu0 %vm226_vm0, %v10993_v42  ;;  %v4714_v39 = vpop.permute.xlu0 %4713  ;;  %v6535_v0 = vpack.c.bf16 %v4876_v51, %v4875_v8  ;;  %v6418_v58 = vld [vmem:[%s12146_s4 + $0x1b0] sm:$0xff]  ;;  %v12963_v51 = vrot.slane %v10352_v34, 1  ;;  %v6421_v34 = vld [vmem:[%s12146_s4 + $0x1c8] sm:$0xff] }
 0x584   : > { %6564 = vmatprep.subr.bf16.mxu0 %v12913_v11  ;;  %5225 = vmatmul.mubr.f32.gmra.mrb[4].mxu1 %v11000_v35  ;;  %v4666_v35 = vpop.permute.xlu1 %4665  ;;  %v11033_v3 = vsel %vm226_vm0, %v4519_v28, %v4714_v39  ;;  %v6571_v39 = vpack.c.bf16 %v6419_v21, %v6418_v58 }
 0x585   : > { %6343 = vmatprep.mubr.msk.f32.mxu1 %vm226_vm0, %v10363_v55  ;;  %6533 = vmatpush1.bf16.msra.mxu1 %v6532_v49  ;;  %v4878_v49 = vld [vmem:[%s12146_s4 + $0x48] sm:$0xff]  ;;  %v11049_v30 = vsel %vm226_vm0, %v4511_v50, %v4666_v35  ;;  %v11058_v28 = vsel %vm745_vm1, %v12963_v51, 0.0  ;;  %v6420_v35 = vld [vmem:[%s12146_s4 + $0x1c0] sm:$0xff] }
 0x586   : > { %6534 = vmatprep.subr.bf16.mxu1 %v12913_v11  ;;  %5105 = vmatmul.mubr.f32.gmra.mrb[4].mxu0 %v11020_v16  ;;  %12964 = vst [vmem:[#allocation119_spill] sm:$0xff] %v11058_v28 }
 0x587   : > { %6566 = vmatpush1.bf16.msra.mxu0 %v6565_v15  ;;  %v4877_v15 = vld [vmem:[%s12146_s4 + $0x40] sm:$0xff]  ;;  %6319 = vmatprep.mubr.msk.f32.mxu0 %vm226_vm0, %v10380_v9  ;;  %v4716_v57 = vpop.permute.xlu0 %4715 }
 0x588   : > { %6567 = vmatprep.subr.bf16.mxu0 %v12913_v11  ;;  %5230 = vmatmul.mubr.f32.gmra.mrb[6].mxu1 %v11033_v3  ;;  %v4668_v8 = vpop.permute.xlu1 %4667  ;;  %v6538_v4 = vpack.c.bf16 %v4878_v49, %v4877_v15  ;;  %v11065_v50 = vsel %vm226_vm0, %v10373_v44, %v4716_v57  ;;  %v12966_v15 = vrot.slane %v10367_v2, 1  ;;  %v6574_v57 = vpack.c.bf16 %v6421_v34, %v6420_v35  ;;  %v6423_v2 = vld [vmem:[%s12146_s4 + $0x1d8] sm:$0xff] }
 0x589   : > { %6344 = vmatprep.mubr.msk.f32.mxu1 %vm226_vm0, %v10385_v23  ;;  %6536 = vmatpush1.bf16.msra.mxu1 %v6535_v0  ;;  %12965 = vst [vmem:[#allocation112_spill] sm:$0xff] %v11065_v50  ;;  %v4880_v0 = vld [vmem:[%s12146_s4 + $0x58] sm:$0xff]  ;;  %v11082_v44 = vsel %vm226_vm0, %v10396_v48, %v4668_v8  ;;  %v6422_v48 = vld [vmem:[%s12146_s4 + $0x1d0] sm:$0xff] }
 0x58a   : > { %6537 = vmatprep.subr.bf16.mxu1 %v12913_v11  ;;  %5110 = vmatmul.mubr.f32.gmra.mrb[6].mxu0 %v11049_v30  ;;  %v11091_v49 = vsel %vm745_vm1, %v12966_v15, 0.0 }
 0x58b   : > { %6569 = vmatpush1.bf16.msra.mxu0 %v6568_v25  ;;  %v4879_v25 = vld [vmem:[%s12146_s4 + $0x50] sm:$0xff]  ;;  %6320 = vmatprep.mubr.msk.f32.mxu0 %vm226_vm0, %v10417_v53  ;;  %v4718_v58 = vpop.permute.xlu0 %4717 }
 0x58c   : > { %6570 = vmatprep.subr.bf16.mxu0 %v12913_v11  ;;  %5235 = vmatmul.mubr.f32.gmra.mrb[8].mxu1 %v11065_v50  ;;  %v6541_v51 = vpack.c.bf16 %v4880_v0, %v4879_v25  ;;  %v11098_v8 = vsel %vm226_vm0, %v10399_v41, %v4718_v58  ;;  %v12968_v41 = vrot.slane %v10388_v62, 7  ;;  %v12969_v0 = vrot.slane %v10420_v10, 7  ;;  %v6425_v10 = vld [vmem:[%s12146_s4 + $0x1e8] sm:$0xff] }
 0x58d   : > { %6345 = vmatprep.mubr.msk.f32.mxu1 %vm226_vm0, %v11058_v28  ;;  %6539 = vmatpush1.bf16.msra.mxu1 %v6538_v4  ;;  %12967 = vst [vmem:[#allocation120_spill] sm:$0xff] %v11098_v8  ;;  %v4882_v4 = vld [vmem:[%s12146_s4 + $0x68] sm:$0xff]  ;;  %v6577_v62 = vpack.c.bf16 %v6423_v2, %v6422_v48 }
 0x58e   : > { %6540 = vmatprep.subr.bf16.mxu1 %v12913_v11  ;;  %5115 = vmatmul.mubr.f32.gmra.mrb[8].mxu0 %v11082_v44  ;;  %v4520_v35 = vsel %vm3260_vm3, 0.0, %v12968_v41  ;;  %v4512_v58 = vsel %vm3260_vm3, 0.0, %v12969_v0 }
 0x58f   : > { %v4670_v21 = vpop.permute.xlu1 %4669  ;;  %6572 = vmatpush1.bf16.msra.mxu0 %v6571_v39  ;;  %v4881_v39 = vld [vmem:[%s12146_s4 + $0x60] sm:$0xff]  ;;  %6321 = vmatprep.mubr.msk.f32.mxu0 %vm226_vm0, %v11091_v49 }
 0x590   : > { %6573 = vmatprep.subr.bf16.mxu0 %v12913_v11  ;;  %5240 = vmatmul.mubr.f32.gmra.mrb[10].mxu1 %v11098_v8  ;;  %v11118_v34 = vsel %vm226_vm0, %v10423_v31, %v4670_v21  ;;  %v6544_v41 = vpack.c.bf16 %v4882_v4, %v4881_v39  ;;  %v6424_v31 = vld [vmem:[%s12146_s4 + $0x1e0] sm:$0xff]  ;;  %v12971_v4 = vrot.slane %v10428_v61, 1  ;;  %v6427_v61 = vld [vmem:[%s12146_s4 + $0x1f8] sm:$0xff] }
 0x591   : > { %6346 = vmatprep.mubr.msk.f32.mxu1 %vm226_vm0, %v10442_v47  ;;  %6542 = vmatpush1.bf16.msra.mxu1 %v6541_v51  ;;  %v4884_v51 = vld [vmem:[%s12146_s4 + $0x78] sm:$0xff] }
 0x592   : > { %6543 = vmatprep.subr.bf16.mxu1 %v12913_v11  ;;  %5120 = vmatmul.mubr.f32.gmra.mrb[10].mxu0 %v11118_v34 }
 0x593   : > { %6575 = vmatpush1.bf16.msra.mxu0 %v6574_v57  ;;  %v4883_v57 = vld [vmem:[%s12146_s4 + $0x70] sm:$0xff]  ;;  %6322 = vmatprep.mubr.msk.f32.mxu0 %vm226_vm0, %v10458_v32 }
 0x594   : > { %6576 = vmatprep.subr.bf16.mxu0 %v12913_v11  ;;  %v6547_v0 = vpack.c.bf16 %v4884_v51, %v4883_v57  ;;  %v12974_v57 = vrot.slane %v10455_v18, 1  ;;  %v6429_v18 = vld [vmem:[%s12146_s4 + $0x208] sm:$0xff] }
 0x595   : > { %6545 = vmatpush1.bf16.msra.mxu1 %v6544_v41  ;;  %v4886_v41 = vld [vmem:[%s12146_s4 + $0x88] sm:$0xff] }
 0x596   : > { %6546 = vmatprep.subr.bf16.mxu1 %v12913_v11  ;;  %v11189_v51 = vsel %vm745_vm1, %v12974_v57, 0.0 }
 0x597   : > { %6578 = vmatpush1.bf16.msra.mxu0 %v6577_v62  ;;  %v4885_v62 = vld [vmem:[%s12146_s4 + $0x80] sm:$0xff] }
 0x598   : > { %6579 = vmatprep.subr.bf16.mxu0 %v12913_v11 }
 0x599   : > { %v4720_v25 = vpop.permute.xlu0 %4719  ;;  %6548 = vmatpush1.bf16.msra.mxu1 %v6547_v0  ;;  %v4888_v0 = vld [vmem:[%s12146_s4 + $0x98] sm:$0xff] }
 0x59a   : > { %v11131_v21 = vsel %vm226_vm0, %v4520_v35, %v4720_v25  ;;  %v11156_v35 = vsel %vm745_vm1, %v12971_v4, 0.0  ;;  %v6580_v25 = vpack.c.bf16 %v6425_v10, %v6424_v31  ;;  %v6550_v4 = vpack.c.bf16 %v4886_v41, %v4885_v62  ;;  %6549 = vmatprep.subr.bf16.mxu1 %v12913_v11 }
 0x59b   : > { %12970 = vst [vmem:[#allocation123_spill] sm:$0xff] %v11131_v21  ;;  %5245 = vmatmul.mubr.f32.gmra.mrb[12].mxu1 %v11131_v21  ;;  %12972 = vst [vmem:[#allocation121_spill] sm:$0xff] %v11156_v35  ;;  %v12977_v41 = vrot.slane %v10517_v20, 7  ;;  %v6431_v20 = vld [vmem:[%s12146_s4 + $0x218] sm:$0xff] }
 0x59c   : > { %6347 = vmatprep.mubr.msk.f32.mxu1 %vm226_vm0, %v10463_v12  ;;  %6581 = vmatpush1.bf16.msra.mxu0 %v6580_v25  ;;  %v4887_v25 = vld [vmem:[%s12146_s4 + $0x90] sm:$0xff] }
 0x59d   : > { %6582 = vmatprep.subr.bf16.mxu0 %v12913_v11  ;;  %6551 = vmatpush1.bf16.msra.mxu1 %v6550_v4  ;;  %v4890_v4 = vld [vmem:[%s12146_s4 + $0xa8] sm:$0xff] }
 0x59e   : > { %6552 = vmatprep.subr.bf16.mxu1 %v12913_v11 }
 0x5a0   : > { %v4722_v2 = vpop.permute.xlu0 %4721 }
 0x5a4   : > { %v4724_v31 = vpop.permute.xlu0 %4723 }
 0x5a8   : > { %v4672_v15 = vpop.permute.xlu1 %4671  ;;  %v4726_v62 = vpop.permute.xlu0 %4725 }
 0x5a9   : > { %v11147_v48 = vsel %vm226_vm0, %v4512_v58, %v4672_v15  ;;  %v6426_v58 = vld [vmem:[%s12146_s4 + $0x1f0] sm:$0xff]  ;;  %v11163_v15 = vsel %vm226_vm0, %v10452_v54, %v4722_v2 }
 0x5aa   : > { %12973 = vst [vmem:[#allocation136_spill] sm:$0xff] %v11163_v15  ;;  %5125 = vmatmul.mubr.f32.gmra.mrb[12].mxu0 %v11147_v48  ;;  %5250 = vmatmul.mubr.f32.gmra.mrb[14].mxu1 %v11163_v15  ;;  %v6583_v2 = vpack.c.bf16 %v6427_v61, %v6426_v58 }
 0x5ab   : > { %6323 = vmatprep.mubr.msk.f32.mxu0 %vm226_vm0, %v10494_v19  ;;  %6348 = vmatprep.mubr.msk.f32.mxu1 %vm226_vm0, %v11156_v35 }
 0x5ac   : > { %6584 = vmatpush1.bf16.msra.mxu0 %v6583_v2  ;;  %v4889_v2 = vld [vmem:[%s12146_s4 + $0xa0] sm:$0xff] }
 0x5ad   : > { %6585 = vmatprep.subr.bf16.mxu0 %v12913_v11 }
 0x5ae   : > { %v4674_v39 = vpop.permute.xlu1 %4673 }
 0x5af   : > { %v11180_v54 = vsel %vm226_vm0, %v10469_v43, %v4674_v39  ;;  %v6428_v43 = vld [vmem:[%s12146_s4 + $0x200] sm:$0xff]  ;;  %v11196_v39 = vsel %vm226_vm0, %v10481_v6, %v4724_v31  ;;  %v12976_v6 = vrot.slane %v10487_v14, 7  ;;  %v4513_v31 = vsel %vm3260_vm3, 0.0, %v12977_v41 }
 0x5b0   : > { %12975 = vst [vmem:[#allocation124_spill] sm:$0xff] %v11196_v39  ;;  %5130 = vmatmul.mubr.f32.gmra.mrb[14].mxu0 %v11180_v54  ;;  %5255 = vmatmul.mubr.f32.gmra.mrb[16].mxu1 %v11196_v39  ;;  %v6586_v14 = vpack.c.bf16 %v6429_v18, %v6428_v43  ;;  %v4728_v18 = vpop.permute.xlu0 %4727  ;;  %v6556_v41 = vpack.c.bf16 %v4890_v4, %v4889_v2  ;;  %v12984_v2 = vld [vmem:[#allocation55_spill] sm:$0xff]  ;;  %v12987_v39 = vld [vmem:[#allocation53_spill] sm:$0xff] }
 0x5b1   : > { %v4521_v58 = vsel %vm3260_vm3, 0.0, %v12976_v6  ;;  %6324 = vmatprep.mubr.msk.f32.mxu0 %vm226_vm0, %v11189_v51  ;;  %6349 = vmatprep.mubr.msk.f32.mxu1 %vm226_vm0, %v10511_v38  ;;  %v6553_v6 = vpack.c.bf16 %v4888_v0, %v4887_v25  ;;  %v12979_v0 = vrot.slane %v10521_v59, 1  ;;  %v6433_v59 = vld [vmem:[%s12146_s4 + $0x228] sm:$0xff] }
 0x5b2   : > { %v4676_v10 = vpop.permute.xlu1 %4675  ;;  %6587 = vmatpush1.bf16.msra.mxu0 %v6586_v14  ;;  %v4891_v14 = vld [vmem:[%s12146_s4 + $0xb0] sm:$0xff] }
 0x5b3   : > { %v11216_v61 = vsel %vm226_vm0, %v10500_v52, %v4676_v10  ;;  %v6430_v52 = vld [vmem:[%s12146_s4 + $0x210] sm:$0xff]  ;;  %v11229_v10 = vsel %vm226_vm0, %v4521_v58, %v4726_v62  ;;  %v11254_v58 = vsel %vm745_vm1, %v12979_v0, 0.0  ;;  %6554 = vmatpush1.bf16.msra.mxu1 %v6553_v6  ;;  %6588 = vmatprep.subr.bf16.mxu0 %v12913_v11  ;;  %v4892_v6 = vld [vmem:[%s12146_s4 + $0xb8] sm:$0xff] }
 0x5b4   : > { %12978 = vst [vmem:[#allocation125_spill] sm:$0xff] %v11229_v10  ;;  %5135 = vmatmul.mubr.f32.gmra.mrb[16].mxu0 %v11216_v61  ;;  %5260 = vmatmul.mubr.f32.gmra.mrb[18].mxu1 %v11229_v10  ;;  %12980 = vst [vmem:[#allocation100_spill] sm:$0xff] %v11254_v58  ;;  %v6589_v62 = vpack.c.bf16 %v6431_v20, %v6430_v52  ;;  %v12983_v52 = vld [vmem:[#allocation68_spill] sm:$0xff]  ;;  %v6559_v38 = vpack.c.bf16 %v4892_v6, %v4891_v14  ;;  %v12993_v6 = vld [vmem:[#allocation67_spill] sm:$0xff] }
 0x5b5   : > { %6325 = vmatprep.mubr.msk.f32.mxu0 %vm226_vm0, %v10542_v1  ;;  %6350 = vmatprep.mubr.msk.f32.mxu1 %vm226_vm0, %v10554_v22  ;;  %v4730_v4 = vpop.permute.xlu0 %4729  ;;  %v12985_v0 = vld [vmem:[#allocation52_spill] sm:$0xff] }
 0x5b6   : > { %v4678_v57 = vpop.permute.xlu1 %4677  ;;  %6555 = vmatprep.subr.bf16.mxu1 %v12913_v11  ;;  %6590 = vmatpush1.bf16.msra.mxu0 %v6589_v62  ;;  %v12989_v62 = vld [vmem:[#allocation54_spill] sm:$0xff] }
 0x5b7   : > { %v11245_v43 = vsel %vm226_vm0, %v4513_v31, %v4678_v57  ;;  %v6432_v31 = vld [vmem:[%s12146_s4 + $0x220] sm:$0xff]  ;;  %v12981_v57 = vld [vmem:[#allocation64_spill] sm:$0xff]  ;;  %6557 = vmatpush1.bf16.msra.mxu1 %v6556_v41  ;;  %6591 = vmatprep.subr.bf16.mxu0 %v12913_v11  ;;  %v12990_v41 = vrot.slane %v12989_v62, 7 }
 0x5b8   : > { %v11261_v10 = vsel %vm226_vm0, %v12981_v57, %v4728_v18  ;;  %5140 = vmatmul.mubr.f32.gmra.mrb[18].mxu0 %v11245_v43  ;;  %v12986_v57 = vrot.slane %v12985_v0, 1  ;;  %6558 = vmatprep.subr.bf16.mxu1 %v12913_v11  ;;  %v6435_v0 = vld [vmem:[%s12146_s4 + $0x238] sm:$0xff] }
 0x5b9   : > { %12982 = vst [vmem:[#allocation126_spill] sm:$0xff] %v11261_v10  ;;  %5265 = vmatmul.mubr.f32.gmra.mrb[20].mxu1 %v11261_v10  ;;  %6326 = vmatprep.mubr.msk.f32.mxu0 %vm226_vm0, %v12984_v2  ;;  %v6592_v10 = vpack.c.bf16 %v6433_v59, %v6432_v31  ;;  %v11306_v31 = vld [vmem:[#allocation2 + $0x198] sm:$0xff]  ;;  %v12992_v59 = vld [vmem:[#allocation57_spill] sm:$0xff] }
 0x5ba   : > { %v4680_v25 = vpop.permute.xlu1 %4679  ;;  %6351 = vmatprep.mubr.msk.f32.mxu1 %vm226_vm0, %v11254_v58  ;;  %v11287_v22 = vsel %vm745_vm1, %v12986_v57, 0.0  ;;  %12991 = vst [vmem:[#allocation109_spill] sm:$0xff] %v11306_v31  ;;  %v12994_v57 = vld [vmem:[#allocation56_spill] sm:$0xff]  ;;  %4755 = vrot.lane.b32.xlu1 %v11306_v31, %s6948_s21 }
 0x5bb   : > { %v11278_v20 = vsel %vm226_vm0, %v12983_v52, %v4680_v25  ;;  %v11291_v25 = vsel %vm226_vm0, %v12987_v39, %v4730_v4  ;;  %v6434_v52 = vld [vmem:[%s12146_s4 + $0x230] sm:$0xff]  ;;  %v4522_v39 = vsel %vm3260_vm3, 0.0, %v12990_v41  ;;  %v4732_v4 = vpop.permute.xlu0 %4731  ;;  %v12995_v58 = vrot.slane %v12994_v57, 7  ;;  %6593 = vmatpush1.bf16.msra.mxu0 %v6592_v10  ;;  %6560 = vmatpush1.bf16.msra.mxu1 %v6559_v38  ;;  %v13005_v57 = vld [vmem:[#allocation70_spill] sm:$0xff] }
 0x5bc   : > { %12988 = vst [vmem:[#allocation127_spill] sm:$0xff] %v11291_v25  ;;  %5145 = vmatmul.mubr.f32.gmra.mrb[20].mxu0 %v11278_v20  ;;  %v6595_v41 = vpack.c.bf16 %v6435_v0, %v6434_v52  ;;  %v11320_v35 = vsel %vm226_vm0, %v4522_v39, %v4732_v4  ;;  %6594 = vmatprep.subr.bf16.mxu0 %v12913_v11  ;;  %v12999_v38 = vld [vmem:[#allocation71_spill] sm:$0xff]  ;;  %v13001_v0 = vrot.slane %v10613_v26, 1  ;;  %v13003_v4 = vld [vmem:[#allocation58_spill] sm:$0xff] }
 0x5bd   : > { %5270 = vmatmul.mubr.f32.gmra.mrb[22].mxu1 %v11291_v25  ;;  %6327 = vmatprep.mubr.msk.f32.mxu0 %vm226_vm0, %v11287_v22  ;;  %v4514_v25 = vsel %vm3260_vm3, 0.0, %v12995_v58  ;;  %12996 = vst [vmem:[#allocation114_spill] sm:$0xff] %v11320_v35  ;;  %v13000_v58 = vld [vmem:[#allocation60_spill] sm:$0xff] }
 0x5be   : > { %v4682_v18 = vpop.permute.xlu1 %4681  ;;  %6352 = vmatprep.mubr.msk.f32.mxu1 %vm226_vm0, %v12993_v6  ;;  %v11341_v39 = vsel %vm745_vm1, %v13001_v0, 0.0  ;;  %v13007_v0 = vrot.slane %v10634_v13, 1  ;;  %v13013_v13 = vld [vmem:[#allocation83_spill] sm:$0xff] }
 0x5bf   : > { %v11310_v14 = vsel %vm226_vm0, %v12992_v59, %v4682_v18  ;;  %v11325_v18 = vld [vmem:[#allocation2 + $0x1a0] sm:$0xff]  ;;  %v11329_v59 = vld [vmem:[#allocation2 + $0x1a8] sm:$0xff]  ;;  %v4734_v11 = vpop.permute.xlu0 %4733  ;;  %13002 = vst [vmem:[#allocation115_spill] sm:$0xff] %v11341_v39  ;;  %6596 = vmatpush1.bf16.msra.mxu0 %v6595_v41 }
 0x5c0   : > { %12997 = vst [vmem:[#allocation111_spill] sm:$0xff] %v11325_v18  ;;  %5150 = vmatmul.mubr.f32.gmra.mrb[22].mxu0 %v11310_v14  ;;  %12998 = vst [vmem:[#allocation113_spill] sm:$0xff] %v11329_v59  ;;  %4757 = vrot.lane.b32.xlu0 %v11325_v18, %s6948_s21 }
 0x5c1   : > { %5275 = vmatmul.mubr.f32.gmra.mrb[24].mxu1 %v11320_v35  ;;  %6328 = vmatprep.mubr.msk.f32.mxu0 %vm226_vm0, %v12999_v38 }
 0x5c2   : > { %v4684_v62 = vpop.permute.xlu1 %4683  ;;  %6353 = vmatprep.mubr.msk.f32.mxu1 %vm226_vm0, %v13000_v58  ;;  %4759 = vrot.lane.b32.xlu1 %v11329_v59, %s6948_s21  ;;  %v13008_v59 = vld [vmem:[#allocation81_spill] sm:$0xff] }
 0x5c3   : > { %v11332_v10 = vsel %vm226_vm0, %v4514_v25, %v4684_v62  ;;  %v11347_v25 = vsel %vm226_vm0, %v13003_v4, %v4734_v11  ;;  %v13006_v62 = vld [vmem:[#allocation84_spill] sm:$0xff]  ;;  %v4736_v41 = vpop.permute.xlu0 %4735  ;;  %v11364_v4 = vsel %vm745_vm1, %v13007_v0, 0.0 }
 0x5c4   : > { %13004 = vst [vmem:[#allocation116_spill] sm:$0xff] %v11347_v25  ;;  %5155 = vmatmul.mubr.f32.gmra.mrb[24].mxu0 %v11332_v10  ;;  %v11368_v18 = vsel %vm226_vm0, %v13008_v59, %v4736_v41  ;;  %v13014_v41 = vld [vmem:[#allocation82_spill] sm:$0xff] }
 0x5c5   : > { %5280 = vmatmul.mubr.f32.gmra.mrb[26].mxu1 %v11347_v25  ;;  %6329 = vmatprep.mubr.msk.f32.mxu0 %vm226_vm0, %v13006_v62  ;;  %13009 = vst [vmem:[#allocation128_spill] sm:$0xff] %v11368_v18  ;;  %v13015_v0 = vrot.slane %v13014_v41, 7 }
 0x5c6   : > { %v4686_v52 = vpop.permute.xlu1 %4685  ;;  %6354 = vmatprep.mubr.msk.f32.mxu1 %vm226_vm0, %v11341_v39  ;;  %v13012_v39 = vld [vmem:[#allocation96_spill] sm:$0xff] }
 0x5c7   : > { %v11355_v26 = vsel %vm226_vm0, %v13005_v57, %v4686_v52  ;;  %v13010_v52 = vld [vmem:[#allocation80_spill] sm:$0xff]  ;;  %v4738_v59 = vpop.permute.xlu0 %4737  ;;  %v4515_v58 = vsel %vm3260_vm3, 0.0, %v13015_v0  ;;  %v13019_v0 = vld [vmem:[#allocation85_spill] sm:$0xff] }
 0x5c8   : > { %5160 = vmatmul.mubr.f32.gmra.mrb[26].mxu0 %v11355_v26  ;;  %v13011_v57 = vrot.slane %v13010_v52, 7  ;;  %v13020_v35 = vrot.slane %v13019_v0, 1 }
 0x5c9   : > { %5285 = vmatmul.mubr.f32.gmra.mrb[28].mxu1 %v11368_v18  ;;  %6330 = vmatprep.mubr.msk.f32.mxu0 %vm226_vm0, %v11364_v4 }
 0x5ca   : > { %v4688_v11 = vpop.permute.xlu1 %4687  ;;  %v4523_v31 = vsel %vm3260_vm3, 0.0, %v13011_v57  ;;  %6355 = vmatprep.mubr.msk.f32.mxu1 %vm226_vm0, %v13013_v13  ;;  %v13018_v57 = vld [vmem:[#allocation69_spill] sm:$0xff] }
 0x5cb   : > { %v11377_v25 = vsel %vm226_vm0, %v13012_v39, %v4688_v11  ;;  %v11387_v52 = vsel %vm226_vm0, %v4523_v31, %v4738_v59  ;;  %v13017_v11 = vld [vmem:[#allocation86_spill] sm:$0xff]  ;;  %v4740_v41 = vpop.permute.xlu0 %4739  ;;  %v11401_v31 = vsel %vm745_vm1, %v13020_v35, 0.0  ;;  %v13022_v59 = vld [vmem:[#allocation59_spill] sm:$0xff] }
 0x5cc   : > { %13016 = vst [vmem:[#allocation131_spill] sm:$0xff] %v11387_v52  ;;  %5165 = vmatmul.mubr.f32.gmra.mrb[28].mxu0 %v11377_v25  ;;  %13021 = vst [vmem:[#allocation118_spill] sm:$0xff] %v11401_v31  ;;  %v11405_v6 = vsel %vm226_vm0, %v13022_v59, %v4740_v41  ;;  %v13028_v59 = vld [vmem:[#allocation72_spill] sm:$0xff] }
 0x5cd   : > { %5290 = vmatmul.mubr.f32.gmra.mrb[30].mxu1 %v11387_v52  ;;  %6331 = vmatprep.mubr.msk.f32.mxu0 %vm226_vm0, %v13017_v11  ;;  %13023 = vst [vmem:[#allocation140_spill] sm:$0xff] %v11405_v6  ;;  %v13026_v52 = vld [vmem:[#allocation87_spill] sm:$0xff] }
 0x5ce   : > { %v4690_v18 = vpop.permute.xlu1 %4689  ;;  %6356 = vmatprep.mubr.msk.f32.mxu1 %vm226_vm0, %v13018_v57  ;;  %v13025_v57 = vld [vmem:[#allocation73_spill] sm:$0xff]  ;;  %v13027_v15 = vrot.slane %v13026_v52, 1 }
 0x5cf   : > { %v11392_v39 = vsel %vm226_vm0, %v4515_v58, %v4690_v18  ;;  %v13024_v18 = vld [vmem:[#allocation74_spill] sm:$0xff]  ;;  %v4742_v35 = vpop.permute.xlu0 %4741 }
 0x5d0   : > { %5170 = vmatmul.mubr.f32.gmra.mrb[30].mxu0 %v11392_v39  ;;  %v11420_v41 = vsel %vm745_vm1, %v13027_v15, 0.0  ;;  %v13033_v15 = vld [vmem:[#allocation88_spill] sm:$0xff] }
 0x5d1   : > { %5295 = vmatmul.mubr.f32.gmra.mrb[32].mxu1 %v11405_v6  ;;  %6332 = vmatprep.mubr.msk.f32.mxu0 %vm226_vm0, %v13025_v57  ;;  %v11424_v6 = vsel %vm226_vm0, %v13028_v59, %v4742_v35  ;;  %v13034_v35 = vld [vmem:[#allocation92_spill] sm:$0xff] }
 0x5d2   : > { %v4692_v13 = vpop.permute.xlu1 %4691  ;;  %6357 = vmatprep.mubr.msk.f32.mxu1 %vm226_vm0, %v11401_v31  ;;  %13029 = vst [vmem:[#allocation133_spill] sm:$0xff] %v11424_v6  ;;  %v13032_v31 = vld [vmem:[#allocation76_spill] sm:$0xff]  ;;  %v13035_v59 = vrot.slane %v13034_v35, 7 }
 0x5d3   : > { %v11411_v58 = vsel %vm226_vm0, %v13024_v18, %v4692_v13  ;;  %v13030_v13 = vld [vmem:[#allocation75_spill] sm:$0xff]  ;;  %v4744_v52 = vpop.permute.xlu0 %4743 }
 0x5d4   : > { %5175 = vmatmul.mubr.f32.gmra.mrb[32].mxu0 %v11411_v58  ;;  %v13031_v18 = vrot.slane %v13030_v13, 7  ;;  %v4516_v47 = vsel %vm3260_vm3, 0.0, %v13035_v59  ;;  %v13039_v59 = vrot.slane %v10780_v56, 1 }
 0x5d5   : > { %5300 = vmatmul.mubr.f32.gmra.mrb[34].mxu1 %v11424_v6  ;;  %6333 = vmatprep.mubr.msk.f32.mxu0 %vm226_vm0, %v11420_v41 }
 0x5d6   : > { %v4694_v0 = vpop.permute.xlu1 %4693  ;;  %v4524_v12 = vsel %vm3260_vm3, 0.0, %v13031_v18  ;;  %6358 = vmatprep.mubr.msk.f32.mxu1 %vm226_vm0, %v13033_v15  ;;  %v13038_v18 = vld [vmem:[#allocation91_spill] sm:$0xff] }
 0x5d7   : > { %v11433_v21 = vsel %vm226_vm0, %v13032_v31, %v4694_v0  ;;  %v11443_v13 = vsel %vm226_vm0, %v4524_v12, %v4744_v52  ;;  %v13037_v0 = vld [vmem:[#allocation101_spill] sm:$0xff]  ;;  %v4746_v35 = vpop.permute.xlu0 %4745  ;;  %v11457_v12 = vsel %vm745_vm1, %v13039_v59, 0.0  ;;  %v13041_v52 = vld [vmem:[#allocation78_spill] sm:$0xff] }
 0x5d8   : > { %13036 = vst [vmem:[#allocation139_spill] sm:$0xff] %v11443_v13  ;;  %5180 = vmatmul.mubr.f32.gmra.mrb[34].mxu0 %v11433_v21  ;;  %13040 = vst [vmem:[#allocation144_spill] sm:$0xff] %v11457_v12  ;;  %v11461_v8 = vsel %vm226_vm0, %v13041_v52, %v4746_v35  ;;  %v13046_v52 = vld [vmem:[#allocation105_spill] sm:$0xff] }
 0x5d9   : > { %5305 = vmatmul.mubr.f32.gmra.mrb[36].mxu1 %v11443_v13  ;;  %6334 = vmatprep.mubr.msk.f32.mxu0 %vm226_vm0, %v13037_v0  ;;  %13042 = vst [vmem:[#allocation141_spill] sm:$0xff] %v11461_v8  ;;  %v13045_v13 = vrot.slane %v10793_v33, 1  ;;  %v13050_v33 = vld [vmem:[#allocation103_spill] sm:$0xff] }
 0x5da   : > { %v4696_v6 = vpop.permute.xlu1 %4695  ;;  %6359 = vmatprep.mubr.msk.f32.mxu1 %vm226_vm0, %v13038_v18  ;;  %v13044_v18 = vld [vmem:[#allocation102_spill] sm:$0xff] }
 0x5db   : > { %v11448_v31 = vsel %vm226_vm0, %v4516_v47, %v4696_v6  ;;  %v13043_v47 = vld [vmem:[#allocation99_spill] sm:$0xff]  ;;  %v4748_v56 = vpop.permute.xlu0 %4747  ;;  %v11476_v35 = vsel %vm745_vm1, %v13045_v13, 0.0 }
 0x5dc   : > { %5185 = vmatmul.mubr.f32.gmra.mrb[36].mxu0 %v11448_v31 }
 0x5dd   : > { %5310 = vmatmul.mubr.f32.gmra.mrb[38].mxu1 %v11461_v8  ;;  %6335 = vmatprep.mubr.msk.f32.mxu0 %vm226_vm0, %v13044_v18  ;;  %v11480_v8 = vsel %vm226_vm0, %v13046_v52, %v4748_v56  ;;  %v13051_v56 = vrot.slane %v10834_v45, 7 }
 0x5de   : > { %v4698_v15 = vpop.permute.xlu1 %4697  ;;  %6360 = vmatprep.mubr.msk.f32.mxu1 %vm226_vm0, %v11457_v12  ;;  %13047 = vst [vmem:[#allocation158_spill] sm:$0xff] %v11480_v8  ;;  %v13049_v12 = vld [vmem:[#allocation117_spill] sm:$0xff] }
 0x5df   : > { %v11467_v6 = vsel %vm226_vm0, %v13043_v47, %v4698_v15  ;;  %v13048_v15 = vrot.slane %v10820_v40, 7  ;;  %v4750_v13 = vpop.permute.xlu0 %4749  ;;  %v4517_v52 = vsel %vm3260_vm3, 0.0, %v13051_v56  ;;  %v13054_v56 = vrot.slane %v10840_v7, 1 }
 0x5e0   : > { %5190 = vmatmul.mubr.f32.gmra.mrb[38].mxu0 %v11467_v6 }
 0x5e1   : > { %5315 = vmatmul.mubr.f32.gmra.mrb[40].mxu1 %v11480_v8  ;;  %v4525_v47 = vsel %vm3260_vm3, 0.0, %v13048_v15  ;;  %6336 = vmatprep.mubr.msk.f32.mxu0 %vm226_vm0, %v11476_v35 }
 0x5e2   : > { %v4700_v59 = vpop.permute.xlu1 %4699  ;;  %6361 = vmatprep.mubr.msk.f32.mxu1 %vm226_vm0, %v13050_v33  ;;  %v11499_v40 = vsel %vm226_vm0, %v4525_v47, %v4750_v13  ;;  %v11513_v47 = vsel %vm745_vm1, %v13054_v56, 0.0  ;;  %v13056_v13 = vld [vmem:[#allocation104_spill] sm:$0xff] }
 0x5e3   : > { %v11489_v28 = vsel %vm226_vm0, %v13049_v12, %v4700_v59  ;;  %13052 = vst [vmem:[#allocation142_spill] sm:$0xff] %v11499_v40  ;;  %v13053_v59 = vld [vmem:[#allocation79_spill] sm:$0xff]  ;;  %v4752_v45 = vpop.permute.xlu0 %4751  ;;  %13055 = vst [vmem:[#allocation145_spill] sm:$0xff] %v11513_v47 }
 0x5e4   : > { %5195 = vmatmul.mubr.f32.gmra.mrb[40].mxu0 %v11489_v28  ;;  %v11517_v33 = vsel %vm226_vm0, %v13056_v13, %v4752_v45  ;;  %v13061_v13 = vld [vmem:[#allocation89_spill] sm:$0xff] }
 0x5e5   : > { %5320 = vmatmul.mubr.f32.gmra.mrb[42].mxu1 %v11499_v40  ;;  %6337 = vmatprep.mubr.msk.f32.mxu0 %vm226_vm0, %v13053_v59  ;;  %13057 = vst [vmem:[#allocation146_spill] sm:$0xff] %v11517_v33  ;;  %v13060_v40 = vrot.slane %v10853_v36, 1  ;;  %v13065_v36 = vld [vmem:[#allocation94_spill] sm:$0xff] }
 0x5e6   : > { %v4702_v8 = vpop.permute.xlu1 %4701  ;;  %6362 = vmatprep.mubr.msk.f32.mxu1 %vm226_vm0, %v10858_v17  ;;  %v13059_v17 = vld [vmem:[#allocation93_spill] sm:$0xff] }
 0x5e7   : > { %v11504_v12 = vsel %vm226_vm0, %v4517_v52, %v4702_v8  ;;  %v13058_v8 = vld [vmem:[#allocation108_spill] sm:$0xff]  ;;  %v4754_v7 = vpop.permute.xlu0 %4753  ;;  %v11532_v45 = vsel %vm745_vm1, %v13060_v40, 0.0 }
 0x5e8   : > { %5200 = vmatmul.mubr.f32.gmra.mrb[42].mxu0 %v11504_v12 }
 0x5e9   : > { %5325 = vmatmul.mubr.f32.gmra.mrb[44].mxu1 %v11517_v33  ;;  %6338 = vmatprep.mubr.msk.f32.mxu0 %vm226_vm0, %v13059_v17  ;;  %v11536_v33 = vsel %vm226_vm0, %v13061_v13, %v4754_v7 }
 0x5ea   : > { %v4704_v15 = vpop.permute.xlu1 %4703  ;;  %6363 = vmatprep.mubr.msk.f32.mxu1 %vm226_vm0, %v11513_v47  ;;  %13062 = vst [vmem:[#allocation122_spill] sm:$0xff] %v11536_v33  ;;  %v13064_v47 = vld [vmem:[#allocation90_spill] sm:$0xff] }
 0x5eb   : > { %v11523_v52 = vsel %vm226_vm0, %v13058_v8, %v4704_v15  ;;  %v13063_v15 = vrot.slane %v10878_v60, 7  ;;  %v4654_v40 = vpop.permute.xlu0 %4653  ;;  %v13066_v60 = vld [vmem:[#allocation107_spill] sm:$0xff] }
 0x5ec   : > { %5205 = vmatmul.mubr.f32.gmra.mrb[44].mxu0 %v11523_v52 }
 0x5ed   : > { %5330 = vmatmul.mubr.f32.gmra.mrb[46].mxu1 %v11536_v33  ;;  %v4509_v8 = vsel %vm3260_vm3, 0.0, %v13063_v15  ;;  %6339 = vmatprep.mubr.msk.f32.mxu0 %vm226_vm0, %v11532_v45  ;;  %v13067_v33 = vld [vmem:[#allocation97_spill] sm:$0xff] }
 0x5ee   : > { %v4706_v56 = vpop.permute.xlu1 %4705  ;;  %6364 = vmatprep.mubr.msk.f32.mxu1 %vm226_vm0, %v13065_v36  ;;  %v4815_v13 = vsel %vm226_vm0, %v4509_v8, %v4654_v40  ;;  %v13070_v8 = vld [vmem:[#allocation110_spill] sm:$0xff] }
 0x5ef   : > { %v11545_v50 = vsel %vm226_vm0, %v13064_v47, %v4706_v56  ;;  %v4658_v47 = vpop.permute.xlu0 %4657  ;;  %v13068_v56 = vld [vmem:[#allocation95_spill] sm:$0xff] }
 0x5f0   : > { %5210 = vmatmul.mubr.f32.gmra.mrb[46].mxu0 %v11545_v50  ;;  %v13069_v23 = vrot.slane %v13068_v56, 1  ;;  %v4817_v40 = vsel %vm226_vm0, %v13070_v8, %v4658_v47  ;;  %v13097_v47 = vld [vmem:[#allocation131_spill] sm:$0xff] }
 0x5f1   : > { %5407 = vmatmul.mubr.f32.vlgmr.msra.gmra.mrb[48].mxu1 %v4815_v13  ;;  %6436 = vmatprep.mubr.msk.f32.mxu0 %vm226_vm0, %v10380_v9 }
 0x5f2   : > { %v4656_v7 = vpop.permute.xlu1 %4655  ;;  %6365 = vmatprep.mubr.msk.f32.mxu1 %vm226_vm0, %v13067_v33  ;;  %v4635_v36 = vsel %vm745_vm1, %v13069_v23, 0.0  ;;  %v13071_v33 = vld [vmem:[#allocation61_spill] sm:$0xff] }
 0x5f3   : > { %v4816_v15 = vsel %vm226_vm0, %v13066_v60, %v4656_v7  ;;  %v13074_v23 = vld [vmem:[#allocation65_spill] sm:$0xff]  ;;  %v13096_v7 = vld [vmem:[#allocation83_spill] sm:$0xff] }
 0x5f4   : > { %5744 = vmatmul.mubr.f32.vlgmr.msra.gmra.mrb[48].mxu0 %v11049_v30 }
 0x5f5   : > { %5412 = vmatmul.mubr.f32.gmra.mrb[50].mxu1 %v4816_v15  ;;  %6437 = vmatprep.mubr.msk.f32.mxu0 %vm226_vm0, %v10417_v53 }
 0x5f6   : > { %6366 = vmatprep.mubr.msk.f32.mxu1 %vm226_vm0, %v4635_v36  ;;  %v13098_v36 = vld [vmem:[#allocation69_spill] sm:$0xff] }
 0x5f8   : > { %5749 = vmatmul.mubr.f32.gmra.mrb[50].mxu0 %v11082_v44 }
 0x5f9   : > { %5417 = vmatmul.mubr.f32.gmra.mrb[52].mxu1 %v4817_v40  ;;  %6438 = vmatprep.mubr.msk.f32.mxu0 %vm226_vm0, %v11091_v49 }
 0x5fa   : > { %6367 = vmatprep.mubr.msk.f32.mxu1 %vm226_vm0, %v13071_v33 }
 0x5fc   : > { %5754 = vmatmul.mubr.f32.gmra.mrb[52].mxu0 %v11118_v34 }
 0x5fd   : > { %5422 = vmatmul.mubr.f32.gmra.mrb[54].mxu1 %v10964_v24  ;;  %6439 = vmatprep.mubr.msk.f32.mxu0 %vm226_vm0, %v10458_v32 }
 0x5fe   : > { %6368 = vmatprep.mubr.msk.f32.mxu1 %vm226_vm0, %v10347_v37  ;;  %v13072_v37 = vld [vmem:[#allocation51_spill] sm:$0xff] }
 0x600   : > { %5759 = vmatmul.mubr.f32.gmra.mrb[54].mxu0 %v11147_v48 }
 0x601   : > { %5427 = vmatmul.mubr.f32.gmra.mrb[56].mxu1 %v10984_v5  ;;  %6440 = vmatprep.mubr.msk.f32.mxu0 %vm226_vm0, %v10494_v19  ;;  %v13081_v5 = vld [vmem:[#allocation136_spill] sm:$0xff] }
 0x602   : > { %6369 = vmatprep.mubr.msk.f32.mxu1 %vm226_vm0, %v10993_v42 }
 0x604   : > { %5764 = vmatmul.mubr.f32.gmra.mrb[56].mxu0 %v11180_v54 }
 0x605   : > { %5432 = vmatmul.mubr.f32.gmra.mrb[58].mxu1 %v11020_v16  ;;  %6441 = vmatprep.mubr.msk.f32.mxu0 %vm226_vm0, %v11189_v51 }
 0x606   : > { %6370 = vmatprep.mubr.msk.f32.mxu1 %vm226_vm0, %v10380_v9  ;;  %v13073_v9 = vld [vmem:[#allocation98_spill] sm:$0xff] }
 0x608   : > { %5769 = vmatmul.mubr.f32.gmra.mrb[58].mxu0 %v11216_v61 }
 0x609   : > { %5437 = vmatmul.mubr.f32.gmra.mrb[60].mxu1 %v11049_v30  ;;  %6442 = vmatprep.mubr.msk.f32.mxu0 %vm226_vm0, %v10542_v1  ;;  %v13083_v30 = vld [vmem:[#allocation124_spill] sm:$0xff] }
 0x60a   : > { %6371 = vmatprep.mubr.msk.f32.mxu1 %vm226_vm0, %v10417_v53  ;;  %v13075_v53 = vld [vmem:[#allocation112_spill] sm:$0xff] }
 0x60c   : > { %5774 = vmatmul.mubr.f32.gmra.mrb[60].mxu0 %v11245_v43 }
 0x60d   : > { %5442 = vmatmul.mubr.f32.gmra.mrb[62].mxu1 %v11082_v44  ;;  %6443 = vmatprep.mubr.msk.f32.mxu0 %vm226_vm0, %v12984_v2 }
 0x60e   : > { %6372 = vmatprep.mubr.msk.f32.mxu1 %vm226_vm0, %v11091_v49  ;;  %v13085_v49 = vld [vmem:[#allocation125_spill] sm:$0xff] }
 0x610   : > { %5779 = vmatmul.mubr.f32.gmra.mrb[62].mxu0 %v11278_v20 }
 0x611   : > { %5447 = vmatmul.mubr.f32.gmra.mrb[64].mxu1 %v11118_v34  ;;  %6444 = vmatprep.mubr.msk.f32.mxu0 %vm226_vm0, %v11287_v22 }
 0x612   : > { %6373 = vmatprep.mubr.msk.f32.mxu1 %vm226_vm0, %v10458_v32  ;;  %v13076_v32 = vld [vmem:[#allocation119_spill] sm:$0xff] }
 0x614   : > { %5784 = vmatmul.mubr.f32.gmra.mrb[64].mxu0 %v11310_v14 }
 0x615   : > { %5452 = vmatmul.mubr.f32.gmra.mrb[66].mxu1 %v11147_v48  ;;  %6445 = vmatprep.mubr.msk.f32.mxu0 %vm226_vm0, %v12999_v38 }
 0x616   : > { %6374 = vmatprep.mubr.msk.f32.mxu1 %vm226_vm0, %v10494_v19  ;;  %v13077_v19 = vld [vmem:[#allocation120_spill] sm:$0xff] }
 0x618   : > { %5789 = vmatmul.mubr.f32.gmra.mrb[66].mxu0 %v11332_v10 }
 0x619   : > { %5457 = vmatmul.mubr.f32.gmra.mrb[68].mxu1 %v11180_v54  ;;  %6446 = vmatprep.mubr.msk.f32.mxu0 %vm226_vm0, %v13006_v62 }
 0x61a   : > { %6375 = vmatprep.mubr.msk.f32.mxu1 %vm226_vm0, %v11189_v51  ;;  %v13087_v51 = vld [vmem:[#allocation126_spill] sm:$0xff] }
 0x61c   : > { %5794 = vmatmul.mubr.f32.gmra.mrb[68].mxu0 %v11355_v26 }
 0x61d   : > { %5462 = vmatmul.mubr.f32.gmra.mrb[70].mxu1 %v11216_v61  ;;  %6447 = vmatprep.mubr.msk.f32.mxu0 %vm226_vm0, %v11364_v4 }
 0x61e   : > { %6376 = vmatprep.mubr.msk.f32.mxu1 %vm226_vm0, %v10542_v1  ;;  %v13079_v1 = vld [vmem:[#allocation123_spill] sm:$0xff] }
 0x620   : > { %5799 = vmatmul.mubr.f32.gmra.mrb[70].mxu0 %v11377_v25 }
 0x621   : > { %5467 = vmatmul.mubr.f32.gmra.mrb[72].mxu1 %v11245_v43  ;;  %6448 = vmatprep.mubr.msk.f32.mxu0 %vm226_vm0, %v13017_v11  ;;  %v13088_v43 = vld [vmem:[#allocation100_spill] sm:$0xff] }
 0x622   : > { %6377 = vmatprep.mubr.msk.f32.mxu1 %vm226_vm0, %v12984_v2 }
 0x624   : > { %5804 = vmatmul.mubr.f32.gmra.mrb[72].mxu0 %v11392_v39 }
 0x625   : > { %5472 = vmatmul.mubr.f32.gmra.mrb[74].mxu1 %v11278_v20  ;;  %6449 = vmatprep.mubr.msk.f32.mxu0 %vm226_vm0, %v13025_v57 }
 0x626   : > { %6378 = vmatprep.mubr.msk.f32.mxu1 %vm226_vm0, %v11287_v22  ;;  %v13078_v22 = vld [vmem:[#allocation62_spill] sm:$0xff] }
 0x628   : > { %5809 = vmatmul.mubr.f32.gmra.mrb[74].mxu0 %v11411_v58 }
 0x629   : > { %5477 = vmatmul.mubr.f32.gmra.mrb[76].mxu1 %v11310_v14  ;;  %6450 = vmatprep.mubr.msk.f32.mxu0 %vm226_vm0, %v11420_v41 }
 0x62a   : > { %6379 = vmatprep.mubr.msk.f32.mxu1 %vm226_vm0, %v12999_v38 }
 0x62c   : > { %5814 = vmatmul.mubr.f32.gmra.mrb[76].mxu0 %v11433_v21 }
 0x62d   : > { %5482 = vmatmul.mubr.f32.gmra.mrb[78].mxu1 %v11332_v10  ;;  %6451 = vmatprep.mubr.msk.f32.mxu0 %vm226_vm0, %v13037_v0  ;;  %v13089_v10 = vld [vmem:[#allocation127_spill] sm:$0xff] }
 0x62e   : > { %6380 = vmatprep.mubr.msk.f32.mxu1 %vm226_vm0, %v13006_v62 }
 0x630   : > { %5819 = vmatmul.mubr.f32.gmra.mrb[78].mxu0 %v11448_v31 }
 0x631   : > { %5487 = vmatmul.mubr.f32.gmra.mrb[80].mxu1 %v11355_v26  ;;  %6452 = vmatprep.mubr.msk.f32.mxu0 %vm226_vm0, %v13044_v18 }
 0x632   : > { %6381 = vmatprep.mubr.msk.f32.mxu1 %vm226_vm0, %v11364_v4 }
 0x634   : > { %5824 = vmatmul.mubr.f32.gmra.mrb[80].mxu0 %v11467_v6 }
 0x635   : > { %5492 = vmatmul.mubr.f32.gmra.mrb[82].mxu1 %v11377_v25  ;;  %6453 = vmatprep.mubr.msk.f32.mxu0 %vm226_vm0, %v11476_v35  ;;  %v13090_v25 = vld [vmem:[#allocation67_spill] sm:$0xff] }
 0x636   : > { %6382 = vmatprep.mubr.msk.f32.mxu1 %vm226_vm0, %v13017_v11 }
 0x638   : > { %5829 = vmatmul.mubr.f32.gmra.mrb[82].mxu0 %v11489_v28 }
 0x639   : > { %5497 = vmatmul.mubr.f32.gmra.mrb[84].mxu1 %v11392_v39  ;;  %6454 = vmatprep.mubr.msk.f32.mxu0 %vm226_vm0, %v13053_v59  ;;  %v13091_v39 = vld [vmem:[#allocation114_spill] sm:$0xff] }
 0x63a   : > { %6383 = vmatprep.mubr.msk.f32.mxu1 %vm226_vm0, %v13025_v57  ;;  %v13092_v57 = vld [vmem:[#allocation60_spill] sm:$0xff] }
 0x63c   : > { %5834 = vmatmul.mubr.f32.gmra.mrb[84].mxu0 %v11504_v12 }
 0x63d   : > { %5502 = vmatmul.mubr.f32.gmra.mrb[86].mxu1 %v11411_v58  ;;  %6455 = vmatprep.mubr.msk.f32.mxu0 %vm226_vm0, %v13059_v17 }
 0x63e   : > { %6384 = vmatprep.mubr.msk.f32.mxu1 %vm226_vm0, %v11420_v41 }
 0x640   : > { %5839 = vmatmul.mubr.f32.gmra.mrb[86].mxu0 %v11523_v52 }
 0x641   : > { %5507 = vmatmul.mubr.f32.gmra.mrb[88].mxu1 %v11433_v21  ;;  %6456 = vmatprep.mubr.msk.f32.mxu0 %vm226_vm0, %v11532_v45 }
 0x642   : > { %6385 = vmatprep.mubr.msk.f32.mxu1 %vm226_vm0, %v13037_v0  ;;  %v13093_v0 = vld [vmem:[#allocation116_spill] sm:$0xff] }
 0x644   : > { %5844 = vmatmul.mubr.f32.gmra.mrb[88].mxu0 %v11545_v50 }
 0x645   : > { %5512 = vmatmul.mubr.f32.gmra.mrb[90].mxu1 %v11448_v31  ;;  %6457 = vmatprep.mubr.msk.f32.mxu0 %vm226_vm0, %v13072_v37 }
 0x646   : > { %6386 = vmatprep.mubr.msk.f32.mxu1 %vm226_vm0, %v13044_v18 }
 0x648   : > { %5849 = vmatmul.mubr.f32.gmra.mrb[90].mxu0 %v10941_v27 }
 0x649   : > { %5517 = vmatmul.mubr.f32.gmra.mrb[92].mxu1 %v11467_v6  ;;  %6458 = vmatprep.mubr.msk.f32.mxu0 %vm226_vm0, %v10328_v63  ;;  %v13094_v6 = vld [vmem:[#allocation115_spill] sm:$0xff] }
 0x64a   : > { %6387 = vmatprep.mubr.msk.f32.mxu1 %vm226_vm0, %v11476_v35 }
 0x64c   : > { %5854 = vmatmul.mubr.f32.gmra.mrb[92].mxu0 %v10955_v29 }
 0x64d   : > { %5522 = vmatmul.mubr.f32.gmra.mrb[94].mxu1 %v11489_v28  ;;  %6459 = vmatprep.mubr.msk.f32.mxu0 %vm226_vm0, %v10969_v46  ;;  %v13084_v28 = vld [vmem:[#allocation63_spill] sm:$0xff] }
 0x64e   : > { %6388 = vmatprep.mubr.msk.f32.mxu1 %vm226_vm0, %v13053_v59 }
 0x64f   : > { %v11729_v24 = vpop.f32.mrb[0].mxu1 }
 0x650   : > { %5859 = vmatmul.mubr.f32.gmra.mrb[94].mxu0 %v13073_v9 }
 0x651   : > { %5527 = vmatmul.mubr.f32.gmra.mrb[96].mxu1 %v11504_v12  ;;  %6460 = vmatprep.mubr.msk.f32.mxu0 %vm226_vm0, %v10363_v55 }
 0x652   : > { %6389 = vmatprep.mubr.msk.f32.mxu1 %vm226_vm0, %v13059_v17  ;;  %v13080_v17 = vld [vmem:[#allocation77_spill] sm:$0xff] }
 0x654   : > { %5864 = vmatmul.mubr.f32.gmra.mrb[96].mxu0 %v11033_v3 }
 0x655   : > { %5532 = vmatmul.mubr.f32.gmra.mrb[98].mxu1 %v11523_v52  ;;  %6461 = vmatprep.mubr.msk.f32.mxu0 %vm226_vm0, %v13074_v23  ;;  %v13095_v52 = vld [vmem:[#allocation128_spill] sm:$0xff] }
 0x656   : > { %6390 = vmatprep.mubr.msk.f32.mxu1 %vm226_vm0, %v11532_v45 }
 0x658   : > { %5869 = vmatmul.mubr.f32.gmra.mrb[98].mxu0 %v13075_v53 }
 0x659   : > { %5537 = vmatmul.mubr.f32.gmra.mrb[100].mxu1 %v11545_v50  ;;  %6462 = vmatprep.mubr.msk.f32.mxu0 %vm226_vm0, %v13076_v32 }
 0x65a   : > { %6391 = vmatprep.mubr.msk.f32.mxu1 %vm226_vm0, %v13072_v37  ;;  %v13099_v37 = vld [vmem:[#allocation140_spill] sm:$0xff] }
 0x65c   : > { %5874 = vmatmul.mubr.f32.gmra.mrb[100].mxu0 %v13077_v19 }
 0x65d   : > { %5542 = vmatmul.mubr.f32.gmra.mrb[102].mxu1 %v10941_v27  ;;  %6463 = vmatprep.mubr.msk.f32.mxu0 %vm226_vm0, %v13078_v22  ;;  %v5218_v27 = vpop.f32.mrb[1].mxu1 }
 0x65e   : > { %6392 = vmatprep.mubr.msk.f32.mxu1 %vm226_vm0, %v10328_v63  ;;  %v13082_v63 = vld [vmem:[#allocation121_spill] sm:$0xff]  ;;  %v11739_v42 = vpop.f32.mrb[2].mxu1 }
 0x65f   : > { %v5223_v16 = vpop.f32.mrb[3].mxu1 }
 0x660   : > { %5879 = vmatmul.mubr.f32.gmra.mrb[102].mxu0 %v13079_v1  ;;  %v11749_v50 = vpop.f32.mrb[4].mxu1 }
 0x661   : > { %5547 = vmatmul.mubr.f32.gmra.mrb[104].mxu1 %v10955_v29  ;;  %6464 = vmatprep.mubr.msk.f32.mxu0 %vm226_vm0, %v13080_v17  ;;  %v11737_v29 = vpop.f32.mrb[0].mxu0  ;;  %v5228_v34 = vpop.f32.mrb[5].mxu1 }
 0x662   : > { %6393 = vmatprep.mubr.msk.f32.mxu1 %vm226_vm0, %v10969_v46  ;;  %v5098_v46 = vpop.f32.mrb[1].mxu0  ;;  %v11759_v48 = vpop.f32.mrb[6].mxu1  ;;  %v13105_v34 = vld [vmem:[#allocation141_spill] sm:$0xff] }
 0x663   : > { %v5233_v61 = vpop.f32.mrb[7].mxu1  ;;  %v13103_v46 = vld [vmem:[#allocation139_spill] sm:$0xff] }
 0x664   : > { %5884 = vmatmul.mubr.f32.gmra.mrb[104].mxu0 %v13081_v5  ;;  %v11769_v2 = vpop.f32.mrb[8].mxu1 }
 0x665   : > { %5552 = vmatmul.mubr.f32.gmra.mrb[106].mxu1 %v13073_v9  ;;  %6465 = vmatprep.mubr.msk.f32.mxu0 %vm226_vm0, %v13082_v63  ;;  %v5238_v38 = vpop.f32.mrb[9].mxu1 }
 0x666   : > { %6394 = vmatprep.mubr.msk.f32.mxu1 %vm226_vm0, %v10363_v55  ;;  %v11747_v55 = vpop.f32.mrb[2].mxu0  ;;  %v11779_v62 = vpop.f32.mrb[10].mxu1  ;;  %v13108_v38 = vld [vmem:[#allocation103_spill] sm:$0xff] }
 0x667   : > { %v5103_v44 = vpop.f32.mrb[3].mxu0  ;;  %v5243_v11 = vpop.f32.mrb[11].mxu1 }
 0x668   : > { %5889 = vmatmul.mubr.f32.gmra.mrb[106].mxu0 %v13083_v30  ;;  %v11757_v21 = vpop.f32.mrb[4].mxu0  ;;  %v13109_v11 = vld [vmem:[#allocation142_spill] sm:$0xff] }
 0x669   : > { %5557 = vmatmul.mubr.f32.gmra.mrb[108].mxu1 %v11033_v3  ;;  %6466 = vmatprep.mubr.msk.f32.mxu0 %vm226_vm0, %v13084_v28  ;;  %v13086_v3 = vld [vmem:[#allocation66_spill] sm:$0xff]  ;;  %v5108_v54 = vpop.f32.mrb[5].mxu0 }
 0x66a   : > { %6395 = vmatprep.mubr.msk.f32.mxu1 %vm226_vm0, %v13074_v23  ;;  %v11767_v20 = vpop.f32.mrb[6].mxu0  ;;  %v13100_v23 = vld [vmem:[#allocation118_spill] sm:$0xff]  ;;  %v13106_v54 = vld [vmem:[#allocation144_spill] sm:$0xff] }
 0x66b   : > { %v5113_v14 = vpop.f32.mrb[7].mxu0 }
 0x66c   : > { %5894 = vmatmul.mubr.f32.gmra.mrb[108].mxu0 %v13085_v49  ;;  %v11777_v26 = vpop.f32.mrb[8].mxu0  ;;  %v13107_v14 = vld [vmem:[#allocation158_spill] sm:$0xff] }
 0x66d   : > { %5562 = vmatmul.mubr.f32.gmra.mrb[110].mxu1 %v13075_v53  ;;  %6467 = vmatprep.mubr.msk.f32.mxu0 %vm226_vm0, %v13086_v3  ;;  %v5118_v4 = vpop.f32.mrb[9].mxu0 }
 0x66e   : > { %6396 = vmatprep.mubr.msk.f32.mxu1 %vm226_vm0, %v13076_v32  ;;  %v11787_v58 = vpop.f32.mrb[10].mxu0  ;;  %v11789_v41 = vpop.f32.mrb[12].mxu1 }
 0x66f   : > { %v5123_v31 = vpop.f32.mrb[11].mxu0  ;;  %v5248_v18 = vpop.f32.mrb[13].mxu1 }
 0x670   : > { %5899 = vmatmul.mubr.f32.gmra.mrb[110].mxu0 %v13087_v51  ;;  %v13110_v31 = vld [vmem:[#allocation106_spill] sm:$0xff] }
 0x671   : > { %5567 = vmatmul.mubr.f32.gmra.mrb[112].mxu1 %v13077_v19  ;;  %6468 = vmatprep.mubr.msk.f32.mxu0 %vm226_vm0, %v13088_v43 }
 0x672   : > { %6397 = vmatprep.mubr.msk.f32.mxu1 %vm226_vm0, %v13078_v22  ;;  %v13101_v22 = vld [vmem:[#allocation133_spill] sm:$0xff] }
 0x674   : > { %5904 = vmatmul.mubr.f32.gmra.mrb[112].mxu0 %v13089_v10 }
 0x675   : > { %5572 = vmatmul.mubr.f32.gmra.mrb[114].mxu1 %v13079_v1  ;;  %6469 = vmatprep.mubr.msk.f32.mxu0 %vm226_vm0, %v13090_v25 }
 0x676   : > { %6398 = vmatprep.mubr.msk.f32.mxu1 %vm226_vm0, %v13080_v17  ;;  %v13102_v17 = vld [vmem:[#allocation88_spill] sm:$0xff] }
 0x678   : > { %5909 = vmatmul.mubr.f32.gmra.mrb[114].mxu0 %v13091_v39 }
 0x679   : > { %5577 = vmatmul.mubr.f32.gmra.mrb[116].mxu1 %v13081_v5  ;;  %6470 = vmatprep.mubr.msk.f32.mxu0 %vm226_vm0, %v13092_v57 }
 0x67a   : > { %6399 = vmatprep.mubr.msk.f32.mxu1 %vm226_vm0, %v13082_v63 }
 0x67c   : > { %5914 = vmatmul.mubr.f32.gmra.mrb[116].mxu0 %v13093_v0 }
 0x67d   : > { %5582 = vmatmul.mubr.f32.gmra.mrb[118].mxu1 %v13083_v30  ;;  %6471 = vmatprep.mubr.msk.f32.mxu0 %vm226_vm0, %v13094_v6  ;;  %v11797_v35 = vpop.f32.mrb[12].mxu0  ;;  %v11799_v12 = vpop.f32.mrb[14].mxu1  ;;  %v13104_v30 = vld [vmem:[#allocation91_spill] sm:$0xff] }
 0x67e   : > { %6400 = vmatprep.mubr.msk.f32.mxu1 %vm226_vm0, %v13084_v28  ;;  %v5128_v59 = vpop.f32.mrb[13].mxu0  ;;  %v5253_v45 = vpop.f32.mrb[15].mxu1 }
 0x67f   : > { %v13112_v59 = vld [vmem:[#allocation111_spill] sm:$0xff] }
 0x680   : > { %5919 = vmatmul.mubr.f32.gmra.mrb[118].mxu0 %v13095_v52 }
 0x681   : > { %5587 = vmatmul.mubr.f32.gmra.mrb[120].mxu1 %v13085_v49  ;;  %6472 = vmatprep.mubr.msk.f32.mxu0 %vm226_vm0, %v13096_v7 }
 0x682   : > { %6401 = vmatprep.mubr.msk.f32.mxu1 %vm226_vm0, %v13086_v3 }
 0x683   : > { %v11807_v13 = vpop.f32.mrb[14].mxu0  ;;  %v11809_v60 = vpop.f32.mrb[16].mxu1 }
 0x684   : > { %v5133_v15 = vpop.f32.mrb[15].mxu0  ;;  %5924 = vmatmul.mubr.f32.gmra.mrb[120].mxu0 %v13097_v47  ;;  %v5258_v56 = vpop.f32.mrb[17].mxu1 }
 0x685   : > { %5592 = vmatmul.mubr.f32.gmra.mrb[122].mxu1 %v13087_v51  ;;  %6473 = vmatprep.mubr.msk.f32.mxu0 %vm226_vm0, %v13098_v36 }
 0x686   : > { %6402 = vmatprep.mubr.msk.f32.mxu1 %vm226_vm0, %v13088_v43 }
 0x687   : > { %v11817_v8 = vpop.f32.mrb[16].mxu0  ;;  %v11819_v40 = vpop.f32.mrb[18].mxu1 }
 0x688   : > { %v5138_v33 = vpop.f32.mrb[17].mxu0  ;;  %5929 = vmatmul.mubr.f32.gmra.mrb[122].mxu0 %v13099_v37  ;;  %v5263_v9 = vpop.f32.mrb[19].mxu1 }
 0x689   : > { %5597 = vmatmul.mubr.f32.gmra.mrb[124].mxu1 %v13089_v10  ;;  %6474 = vmatprep.mubr.msk.f32.mxu0 %vm226_vm0, %v13100_v23 }
 0x68a   : > { %6403 = vmatprep.mubr.msk.f32.mxu1 %vm226_vm0, %v13090_v25 }
 0x68b   : > { %v11827_v53 = vpop.f32.mrb[18].mxu0 }
 0x68c   : > { %v11829_v32 = vpop.f32.mrb[20].mxu1  ;;  %v5143_v19 = vpop.f32.mrb[19].mxu0  ;;  %5934 = vmatmul.mubr.f32.gmra.mrb[124].mxu0 %v13101_v22 }
 0x68d   : > { %5602 = vmatmul.mubr.f32.gmra.mrb[126].mxu1 %v13091_v39  ;;  %v5268_v1 = vpop.f32.mrb[21].mxu1  ;;  %6475 = vmatprep.mubr.msk.f32.mxu0 %vm226_vm0, %v13102_v17  ;;  %v13115_v19 = vld [vmem:[#allocation113_spill] sm:$0xff] }
 0x68e   : > { %6404 = vmatprep.mubr.msk.f32.mxu1 %vm226_vm0, %v13092_v57  ;;  %v4615_v1 = vrot.slane %v13115_v19, 1 }
 0x68f   : > { %v11837_v27 = vpop.f32.mrb[20].mxu0 }
 0x690   : > { %v11839_v5 = vpop.f32.mrb[22].mxu1  ;;  %v5148_v63 = vpop.f32.mrb[21].mxu0  ;;  %5939 = vmatmul.mubr.f32.gmra.mrb[126].mxu0 %v13103_v46 }
 0x691   : > { %5607 = vmatmul.mubr.f32.gmra.mrb[128].mxu1 %v13093_v0  ;;  %v5273_v16 = vpop.f32.mrb[23].mxu1  ;;  %6476 = vmatprep.mubr.msk.f32.mxu0 %vm226_vm0, %v13104_v30  ;;  %v13111_v0 = vld [vmem:[#allocation109_spill] sm:$0xff] }
 0x692   : > { %6405 = vmatprep.mubr.msk.f32.mxu1 %vm226_vm0, %v13094_v6  ;;  %v4450_v18 = vrot.slane %v13111_v0, 7  ;;  %v4612_v6 = vrot.slane %v13111_v0, 1 }
 0x693   : > { %v11847_v28 = vpop.f32.mrb[22].mxu0 }
 0x694   : > { %v11849_v44 = vpop.f32.mrb[24].mxu1  ;;  %v5153_v49 = vpop.f32.mrb[23].mxu0  ;;  %5944 = vmatmul.mubr.f32.gmra.mrb[128].mxu0 %v13105_v34  ;;  %v4526_v33 = vsel %vm3260_vm3, 0.0, %v4450_v18 }
 0x695   : > { %5612 = vmatmul.mubr.f32.gmra.mrb[130].mxu1 %v13095_v52  ;;  %v5278_v3 = vpop.f32.mrb[25].mxu1  ;;  %6477 = vmatprep.mubr.msk.f32.mxu0 %vm226_vm0, %v13106_v54  ;;  %v4613_v52 = vrot.slane %v13112_v59, 1 }
 0x696   : > { %6406 = vmatprep.mubr.msk.f32.mxu1 %vm226_vm0, %v13096_v7 }
 0x697   : > { %v11857_v51 = vpop.f32.mrb[24].mxu0  ;;  %v4614_v9 = vsel %vm745_vm1, %v4612_v6, %v4613_v52  ;;  %v4652_v6 = vsel %vm745_vm1, %v4615_v1, 0.0 }
 0x698   : > { %v11859_v61 = vpop.f32.mrb[26].mxu1  ;;  %v5158_v43 = vpop.f32.mrb[25].mxu0  ;;  %5949 = vmatmul.mubr.f32.gmra.mrb[130].mxu0 %v13107_v14 }
 0x699   : > { %5617 = vmatmul.mubr.f32.gmra.mrb[132].mxu1 %v13097_v47  ;;  %v5283_v10 = vpop.f32.mrb[27].mxu1  ;;  %6478 = vmatprep.mubr.msk.f32.mxu0 %vm226_vm0, %v13108_v38  ;;  %v13113_v47 = vld [vmem:[#allocation146_spill] sm:$0xff]  ;;  %v4616_v38 = vsel %vm745_vm1, %v4613_v52, %v4615_v1 }
 0x69a   : > { %6407 = vmatprep.mubr.msk.f32.mxu1 %vm226_vm0, %v13098_v36  ;;  %v13114_v36 = vld [vmem:[#allocation145_spill] sm:$0xff]  ;;  %v4758_v10 = vpop.permute.xlu0 %4757 }
 0x69b   : > { %v11867_v25 = vpop.f32.mrb[26].mxu0 }
 0x69c   : > { %v11869_v4 = vpop.f32.mrb[28].mxu1  ;;  %v5163_v39 = vpop.f32.mrb[27].mxu0  ;;  %5954 = vmatmul.mubr.f32.gmra.mrb[132].mxu0 %v13109_v11 }
 0x69d   : > { %5622 = vmatmul.mubr.f32.gmra.mrb[134].mxu1 %v13099_v37  ;;  %v5288_v57 = vpop.f32.mrb[29].mxu1  ;;  %6479 = vmatprep.mubr.msk.f32.mxu0 %vm226_vm0, %v13110_v31  ;;  %v4756_v37 = vpop.permute.xlu1 %4755  ;;  %v4453_v39 = vrot.slane %v13115_v19, 7 }
 0x69e   : > { %6408 = vmatprep.mubr.msk.f32.mxu1 %vm226_vm0, %v13100_v23  ;;  %v4451_v23 = vrot.slane %v13112_v59, 7  ;;  %v4866_v3 = vsel %vm226_vm0, %v4526_v33, %v4756_v37 }
 0x69f   : > { %v11880_v45 = vpop.f32.mrb[28].mxu0 }
 0x6a0   : > { %v11882_v7 = vpop.f32.mrb[30].mxu1  ;;  %v5168_v15 = vpop.f32.mrb[29].mxu0  ;;  %5959 = vmatmul.mubr.f32.gmra.mrb[134].mxu0 %v13113_v47  ;;  %v4452_v43 = vsel %vm3260_vm3, %v4450_v18, %v4451_v23  ;;  %v4454_v0 = vsel %vm3260_vm3, %v4451_v23, %v4453_v39 }
 0x6a1   : > { %5627 = vmatmul.mubr.f32.gmra.mrb[136].mxu1 %v13101_v22  ;;  %v5293_v56 = vpop.f32.mrb[31].mxu1  ;;  %6480 = vmatprep.mubr.msk.f32.mxu0 %vm226_vm0, %v13114_v36  ;;  %v4760_v18 = vpop.permute.xlu1 %4759 }
 0x6a2   : > { %6409 = vmatprep.mubr.msk.f32.mxu1 %vm226_vm0, %v13102_v17  ;;  %v13116_v17 = vld [vmem:[#allocation122_spill] sm:$0xff]  ;;  %v4868_v47 = vsel %vm226_vm0, %v4454_v0, %v4760_v18 }
 0x6a3   : > { %v11894_v63 = vpop.f32.mrb[30].mxu0 }
 0x6a4   : > { %v11896_v22 = vpop.f32.mrb[32].mxu1  ;;  %v5173_v16 = vpop.f32.mrb[31].mxu0  ;;  %5964 = vmatmul.mubr.f32.gmra.mrb[136].mxu0 %v13116_v17 }
 0x6a5   : > { %5632 = vmatmul.mubr.f32.gmra.mrb[138].mxu1 %v13103_v46  ;;  %v5298_v49 = vpop.f32.mrb[33].mxu1  ;;  %6481 = vmatprep.mubr.msk.f32.mxu0 %vm226_vm0, %v4614_v9 }
 0x6a6   : > { %6410 = vmatprep.mubr.msk.f32.mxu1 %vm226_vm0, %v13104_v30  ;;  %v4867_v30 = vsel %vm226_vm0, %v4452_v43, %v4758_v10 }
 0x6a7   : > { %v11907_v11 = vpop.f32.mrb[32].mxu0 }
 0x6a8   : > { %v11909_v46 = vpop.f32.mrb[34].mxu1  ;;  %v5178_v57 = vpop.f32.mrb[33].mxu0  ;;  %5969 = vmatmul.mubr.f32.gmra.mrb[138].mxu0 %v4866_v3 }
 0x6a9   : > { %5637 = vmatmul.mubr.f32.gmra.mrb[140].mxu1 %v13105_v34  ;;  %v5303_v31 = vpop.f32.mrb[35].mxu1  ;;  %6482 = vmatprep.mubr.msk.f32.mxu0 %vm226_vm0, %v4616_v38 }
 0x6aa   : > { %6411 = vmatprep.mubr.msk.f32.mxu1 %vm226_vm0, %v13106_v54 }
 0x6ab   : > { %v11918_v59 = vpop.f32.mrb[34].mxu0 }
 0x6ac   : > { %v11920_v52 = vpop.f32.mrb[36].mxu1  ;;  %v5183_v15 = vpop.f32.mrb[35].mxu0  ;;  %5974 = vmatmul.mubr.f32.gmra.mrb[140].mxu0 %v4867_v30 }
 0x6ad   : > { %5642 = vmatmul.mubr.f32.gmra.mrb[142].mxu1 %v13107_v14  ;;  %v5308_v34 = vpop.f32.mrb[37].mxu1  ;;  %6483 = vmatprep.mubr.msk.f32.mxu0 %vm226_vm0, %v4652_v6 }
 0x6af   : > { %v11925_v54 = vpop.f32.mrb[36].mxu0 }
 0x6b0   : > { %v11927_v56 = vpop.f32.mrb[38].mxu1  ;;  %v5188_v36 = vpop.f32.mrb[37].mxu0  ;;  %5979 = vmatmul.mubr.f32.gmra.mrb[142].mxu0 %v4868_v47 }
 0x6b1   : > { %v5313_v33 = vpop.f32.mrb[39].mxu1 }
 0x6b3   : > { %v11929_v37 = vpop.f32.mrb[38].mxu0 }
 0x6b4   : > { %v11931_v9 = vpop.f32.mrb[40].mxu1  ;;  %v5193_v23 = vpop.f32.mrb[39].mxu0 }
 0x6b5   : > { %v5318_v19 = vpop.f32.mrb[41].mxu1 }
 0x6b7   : > { %v11933_v14 = vpop.f32.mrb[40].mxu0 }
 0x6b8   : > { %v11935_v1 = vpop.f32.mrb[42].mxu1  ;;  %v5198_v16 = vpop.f32.mrb[41].mxu0 }
 0x6b9   : > { %v5323_v17 = vpop.f32.mrb[43].mxu1  ;;  %v13117_v16 = vld [vmem:[#allocation3_spill] sm:$0xff] }
 0x6bb   : > { %v11937_v49 = vpop.f32.mrb[42].mxu0 }
 0x6bc   : > { %v11939_v3 = vpop.f32.mrb[44].mxu1  ;;  %v5203_v43 = vpop.f32.mrb[43].mxu0 }
 0x6bd   : > { %v5328_v10 = vpop.f32.mrb[45].mxu1 }
 0x6bf   : > { %v11941_v38 = vpop.f32.mrb[44].mxu0 }
 0x6c0   : > { %v11943_v39 = vpop.f32.mrb[46].mxu1  ;;  %v5208_v57 = vpop.f32.mrb[45].mxu0 }
 0x6c1   : > { %v5333_v31 = vpop.f32.mrb[47].mxu1 }
 0x6c3   : > { %v11945_v30 = vpop.f32.mrb[46].mxu0 }
 0x6c4   : > { %v5408_v0 = vpop.f32.mrb[48].mxu1  ;;  %v5213_v6 = vpop.f32.mrb[47].mxu0 }
 0x6c5   : > { %v5409_v18 = vadd.f32 %v5408_v0, %v11737_v29  ;;  %v5410_v15 = vpop.f32.mrb[49].mxu1  ;;  %v13118_v6 = vld [vmem:[#allocation4_spill] sm:$0xff] }
 0x6c7   : > { %v5745_v47 = vpop.f32.mrb[48].mxu0 }
 0x6c8   : > { %v5413_v34 = vpop.f32.mrb[50].mxu1  ;;  %v5984_v33 = vadd.f32 %v5745_v47, %v5409_v18  ;;  %v5747_v23 = vpop.f32.mrb[49].mxu0 }
 0x6c9   : > { %v5414_v36 = vadd.f32 %v5413_v34, %v11747_v55  ;;  %v5415_v19 = vpop.f32.mrb[51].mxu1 }
 0x6ca   : > { %v6032_v17 = vadd.f32 %v5984_v33, %v13117_v16  ;;  %v13119_v19 = vld [vmem:[#allocation33_spill] sm:$0xff] }
 0x6cb   : > { %v5750_v10 = vpop.f32.mrb[50].mxu0 }
 0x6cc   : > { %v5418_v43 = vpop.f32.mrb[52].mxu1  ;;  %6081 = vst.msk [vmem:[%s6991_s24 - $0x1] sm:$0xfe] %vm6080_vm6, %v6032_v17  ;;  %v5985_v29 = vadd.f32 %v5750_v10, %v5414_v36  ;;  %v5752_v31 = vpop.f32.mrb[51].mxu0 }
 0x6cd   : > { %v5419_v57 = vadd.f32 %v5418_v43, %v11757_v21  ;;  %v5420_v0 = vpop.f32.mrb[53].mxu1  ;;  %v13120_v31 = vld [vmem:[#allocation6_spill] sm:$0xff] }
 0x6ce   : > { %v6033_v55 = vadd.f32 %v5985_v29, %v13118_v6 }
 0x6cf   : > { %v5755_v15 = vpop.f32.mrb[52].mxu0 }
 0x6d0   : > { %v5423_v18 = vpop.f32.mrb[54].mxu1  ;;  %6083 = vst.msk [vmem:[%s6991_s24 + $0x7] sm:$0xff] %vm6082_vm7, %v6033_v55  ;;  %v5986_v47 = vadd.f32 %v5755_v15, %v5419_v57  ;;  %v5757_v23 = vpop.f32.mrb[53].mxu0 }
 0x6d1   : > { %v5424_v34 = vadd.f32 %v5423_v18, %v11767_v20  ;;  %v5425_v33 = vpop.f32.mrb[55].mxu1 }
 0x6d2   : > { %v6034_v21 = vadd.f32 %v5986_v47, %v13119_v19  ;;  %v13121_v47 = vld [vmem:[#allocation5_spill] sm:$0xff] }
 0x6d3   : > { %v5760_v16 = vpop.f32.mrb[54].mxu0 }
 0x6d4   : > { %v5428_v36 = vpop.f32.mrb[56].mxu1  ;;  %6085 = vst.msk [vmem:[%s6991_s24 + $0xf] sm:$0x1] %vm6084_vm8, %v6034_v21  ;;  %v5987_v43 = vadd.f32 %v5760_v16, %v5424_v34  ;;  %v5762_v29 = vpop.f32.mrb[55].mxu0  ;;  %v13122_v16 = vld [vmem:[#allocation35_spill] sm:$0xff] }
 0x6d5   : > { %v5429_v17 = vadd.f32 %v5428_v36, %v11777_v26  ;;  %v5430_v10 = vpop.f32.mrb[57].mxu1 }
 0x6d6   : > { %v6035_v0 = vadd.f32 %v5987_v43, %v13120_v31 }
 0x6d7   : > { %v5765_v6 = vpop.f32.mrb[56].mxu0 }
 0x6d8   : > { %v5433_v20 = vpop.f32.mrb[58].mxu1  ;;  %6086 = vst.msk [vmem:[%s6991_s24 + $0xf] sm:$0xfe] %vm6080_vm6, %v6035_v0  ;;  %v5988_v55 = vadd.f32 %v5765_v6, %v5429_v17  ;;  %v5767_v15 = vpop.f32.mrb[57].mxu0 }
 0x6d9   : > { %v5434_v57 = vadd.f32 %v5433_v20, %v11787_v58  ;;  %v5435_v18 = vpop.f32.mrb[59].mxu1  ;;  %v13123_v20 = vld [vmem:[#allocation8_spill] sm:$0xff] }
 0x6da   : > { %v6036_v33 = vadd.f32 %v5988_v55, %v13121_v47 }
 0x6db   : > { %v5770_v19 = vpop.f32.mrb[58].mxu0 }
 0x6dc   : > { %v5438_v23 = vpop.f32.mrb[60].mxu1  ;;  %6087 = vst.msk [vmem:[%s6991_s24 + $0x17] sm:$0xff] %vm6082_vm7, %v6036_v33  ;;  %v5989_v34 = vadd.f32 %v5770_v19, %v5434_v57  ;;  %v5772_v36 = vpop.f32.mrb[59].mxu0  ;;  %v13124_v33 = vld [vmem:[#allocation7_spill] sm:$0xff] }
 0x6dd   : > { %v5439_v26 = vadd.f32 %v5438_v23, %v11797_v35  ;;  %v5440_v21 = vpop.f32.mrb[61].mxu1 }
 0x6de   : > { %v6037_v43 = vadd.f32 %v5989_v34, %v13122_v16  ;;  %v13125_v16 = vld [vmem:[#allocation34_spill] sm:$0xff] }
 0x6df   : > { %v5775_v29 = vpop.f32.mrb[60].mxu0 }
 0x6e0   : > { %v5443_v10 = vpop.f32.mrb[62].mxu1  ;;  %6088 = vst.msk [vmem:[%s6991_s24 + $0x1f] sm:$0x1] %vm6084_vm8, %v6037_v43  ;;  %v5990_v17 = vadd.f32 %v5775_v29, %v5439_v26  ;;  %v5777_v0 = vpop.f32.mrb[61].mxu0 }
 0x6e1   : > { %v5444_v58 = vadd.f32 %v5443_v10, %v11807_v13  ;;  %v5445_v31 = vpop.f32.mrb[63].mxu1  ;;  %v13126_v0 = vld [vmem:[#allocation10_spill] sm:$0xff] }
 0x6e2   : > { %v6038_v6 = vadd.f32 %v5990_v17, %v13123_v20 }
 0x6e3   : > { %v5780_v18 = vpop.f32.mrb[62].mxu0 }
 0x6e4   : > { %v5448_v55 = vpop.f32.mrb[64].mxu1  ;;  %6089 = vst.msk [vmem:[%s6991_s24 + $0x1f] sm:$0xfe] %vm6080_vm6, %v6038_v6  ;;  %v5991_v57 = vadd.f32 %v5780_v18, %v5444_v58  ;;  %v5782_v47 = vpop.f32.mrb[63].mxu0 }
 0x6e5   : > { %v5449_v35 = vadd.f32 %v5448_v55, %v11817_v8  ;;  %v5450_v15 = vpop.f32.mrb[65].mxu1 }
 0x6e6   : > { %v6039_v23 = vadd.f32 %v5991_v57, %v13124_v33  ;;  %v13127_v15 = vld [vmem:[#allocation9_spill] sm:$0xff] }
 0x6e7   : > { %v5785_v34 = vpop.f32.mrb[64].mxu0 }
 0x6e8   : > { %v5453_v19 = vpop.f32.mrb[66].mxu1  ;;  %6090 = vst.msk [vmem:[%s6991_s24 + $0x27] sm:$0xff] %vm6082_vm7, %v6039_v23  ;;  %v5992_v26 = vadd.f32 %v5785_v34, %v5449_v35  ;;  %v5787_v36 = vpop.f32.mrb[65].mxu0 }
 0x6e9   : > { %v5454_v13 = vadd.f32 %v5453_v19, %v11827_v53  ;;  %v5455_v21 = vpop.f32.mrb[67].mxu1 }
 0x6ea   : > { %v6040_v43 = vadd.f32 %v5992_v26, %v13125_v16  ;;  %v13128_v26 = vld [vmem:[#allocation37_spill] sm:$0xff] }
 0x6eb   : > { %v5790_v29 = vpop.f32.mrb[66].mxu0 }
 0x6ec   : > { %v5458_v10 = vpop.f32.mrb[68].mxu1  ;;  %6091 = vst.msk [vmem:[%s6991_s24 + $0x2f] sm:$0x1] %vm6084_vm8, %v6040_v43  ;;  %v5993_v58 = vadd.f32 %v5790_v29, %v5454_v13  ;;  %v5792_v31 = vpop.f32.mrb[67].mxu0 }
 0x6ed   : > { %v5459_v8 = vadd.f32 %v5458_v10, %v11837_v27  ;;  %v5460_v17 = vpop.f32.mrb[69].mxu1 }
 0x6ee   : > { %v6041_v20 = vadd.f32 %v5993_v58, %v13126_v0 }
 0x6ef   : > { %v5795_v55 = vpop.f32.mrb[68].mxu0 }
 0x6f0   : > { %v5463_v6 = vpop.f32.mrb[70].mxu1  ;;  %6092 = vst.msk [vmem:[%s6991_s24 + $0x2f] sm:$0xfe] %vm6080_vm6, %v6041_v20  ;;  %v5994_v18 = vadd.f32 %v5795_v55, %v5459_v8  ;;  %v5797_v57 = vpop.f32.mrb[69].mxu0  ;;  %v13129_v8 = vld [vmem:[#allocation12_spill] sm:$0xff]  ;;  %v13130_v55 = vld [vmem:[#allocation11_spill] sm:$0xff] }
 0x6f1   : > { %v5464_v53 = vadd.f32 %v5463_v6, %v11847_v28  ;;  %v5465_v35 = vpop.f32.mrb[71].mxu1 }
 0x6f2   : > { %v6042_v47 = vadd.f32 %v5994_v18, %v13127_v15 }
 0x6f3   : > { %v5800_v23 = vpop.f32.mrb[70].mxu0 }
 0x6f4   : > { %v5468_v33 = vpop.f32.mrb[72].mxu1  ;;  %6093 = vst.msk [vmem:[%s6991_s24 + $0x37] sm:$0xff] %vm6082_vm7, %v6042_v47  ;;  %v5995_v19 = vadd.f32 %v5800_v23, %v5464_v53  ;;  %v5802_v13 = vpop.f32.mrb[71].mxu0 }
 0x6f5   : > { %v5469_v27 = vadd.f32 %v5468_v33, %v11857_v51  ;;  %v5470_v34 = vpop.f32.mrb[73].mxu1  ;;  %v13131_v33 = vld [vmem:[#allocation36_spill] sm:$0xff] }
 0x6f6   : > { %v6043_v21 = vadd.f32 %v5995_v19, %v13128_v26 }
 0x6f7   : > { %v5805_v16 = vpop.f32.mrb[72].mxu0 }
 0x6f8   : > { %v5473_v36 = vpop.f32.mrb[74].mxu1  ;;  %6094 = vst.msk [vmem:[%s6991_s24 + $0x3f] sm:$0x1] %vm6084_vm8, %v6043_v21  ;;  %v5996_v43 = vadd.f32 %v5805_v16, %v5469_v27  ;;  %v5807_v29 = vpop.f32.mrb[73].mxu0  ;;  %v13132_v21 = vld [vmem:[#allocation14_spill] sm:$0xff] }
 0x6f9   : > { %v5474_v28 = vadd.f32 %v5473_v36, %v11867_v25  ;;  %v5475_v10 = vpop.f32.mrb[75].mxu1 }
 0x6fa   : > { %v6044_v58 = vadd.f32 %v5996_v43, %v13129_v8  ;;  %v13133_v8 = vld [vmem:[#allocation13_spill] sm:$0xff] }
 0x6fb   : > { %v5810_v31 = vpop.f32.mrb[74].mxu0 }
 0x6fc   : > { %v5478_v17 = vpop.f32.mrb[76].mxu1  ;;  %6095 = vst.msk [vmem:[%s6991_s24 + $0x3f] sm:$0xfe] %vm6080_vm6, %v6044_v58  ;;  %v5997_v0 = vadd.f32 %v5810_v31, %v5474_v28  ;;  %v5812_v6 = vpop.f32.mrb[75].mxu0 }
 0x6fd   : > { %v5479_v51 = vadd.f32 %v5478_v17, %v11880_v45  ;;  %v5480_v20 = vpop.f32.mrb[77].mxu1  ;;  %v13134_v6 = vld [vmem:[#allocation39_spill] sm:$0xff] }
 0x6fe   : > { %v6045_v53 = vadd.f32 %v5997_v0, %v13130_v55 }
 0x6ff   : > { %v5815_v35 = vpop.f32.mrb[76].mxu0 }
 0x700   : > { %v5483_v18 = vpop.f32.mrb[78].mxu1  ;;  %6096 = vst.msk [vmem:[%s6991_s24 + $0x47] sm:$0xff] %vm6082_vm7, %v6045_v53  ;;  %v5998_v57 = vadd.f32 %v5815_v35, %v5479_v51  ;;  %v5817_v47 = vpop.f32.mrb[77].mxu0 }
 0x701   : > { %v5484_v25 = vadd.f32 %v5483_v18, %v11894_v63  ;;  %v5485_v15 = vpop.f32.mrb[79].mxu1 }
 0x702   : > { %v6046_v23 = vadd.f32 %v5998_v57, %v13131_v33  ;;  %v13135_v15 = vld [vmem:[#allocation16_spill] sm:$0xff] }
 0x703   : > { %v5820_v19 = vpop.f32.mrb[78].mxu0 }
 0x704   : > { %v5488_v27 = vpop.f32.mrb[80].mxu1  ;;  %6097 = vst.msk [vmem:[%s6991_s24 + $0x4f] sm:$0x1] %vm6084_vm8, %v6046_v23  ;;  %v5999_v34 = vadd.f32 %v5820_v19, %v5484_v25  ;;  %v5822_v26 = vpop.f32.mrb[79].mxu0 }
 0x705   : > { %v5489_v45 = vadd.f32 %v5488_v27, %v11907_v11  ;;  %v5490_v13 = vpop.f32.mrb[81].mxu1 }
 0x706   : > { %v6047_v36 = vadd.f32 %v5999_v34, %v13132_v21  ;;  %v13136_v34 = vld [vmem:[#allocation15_spill] sm:$0xff] }
 0x707   : > { %v5825_v28 = vpop.f32.mrb[80].mxu0 }
 0x708   : > { %v5493_v16 = vpop.f32.mrb[82].mxu1  ;;  %6098 = vst.msk [vmem:[%s6991_s24 + $0x4f] sm:$0xfe] %vm6080_vm6, %v6047_v36  ;;  %v6000_v43 = vadd.f32 %v5825_v28, %v5489_v45  ;;  %v5827_v29 = vpop.f32.mrb[81].mxu0 }
 0x709   : > { %v5494_v63 = vadd.f32 %v5493_v16, %v11918_v59  ;;  %v5495_v10 = vpop.f32.mrb[83].mxu1 }
 0x70a   : > { %v6048_v58 = vadd.f32 %v6000_v43, %v13133_v8 }
 0x70b   : > { %v5830_v31 = vpop.f32.mrb[82].mxu0 }
 0x70c   : > { %v5498_v17 = vpop.f32.mrb[84].mxu1  ;;  %6099 = vst.msk [vmem:[%s6991_s24 + $0x57] sm:$0xff] %vm6082_vm7, %v6048_v58  ;;  %v6001_v51 = vadd.f32 %v5830_v31, %v5494_v63  ;;  %v5832_v20 = vpop.f32.mrb[83].mxu0  ;;  %v13137_v63 = vld [vmem:[#allocation38_spill] sm:$0xff] }
 0x70d   : > { %v5499_v11 = vadd.f32 %v5498_v17, %v11925_v54  ;;  %v5500_v0 = vpop.f32.mrb[85].mxu1  ;;  %v13138_v31 = vld [vmem:[#allocation18_spill] sm:$0xff] }
 0x70e   : > { %v6049_v55 = vadd.f32 %v6001_v51, %v13134_v6 }
 0x70f   : > { %v5835_v18 = vpop.f32.mrb[84].mxu0 }
 0x710   : > { %v5503_v53 = vpop.f32.mrb[86].mxu1  ;;  %6100 = vst.msk [vmem:[%s6991_s24 + $0x5f] sm:$0x1] %vm6084_vm8, %v6049_v55  ;;  %v6002_v35 = vadd.f32 %v5835_v18, %v5499_v11  ;;  %v5837_v57 = vpop.f32.mrb[85].mxu0 }
 0x711   : > { %v5504_v59 = vadd.f32 %v5503_v53, %v11929_v37  ;;  %v5505_v25 = vpop.f32.mrb[87].mxu1  ;;  %v13139_v53 = vld [vmem:[#allocation17_spill] sm:$0xff] }
 0x712   : > { %v6050_v47 = vadd.f32 %v6002_v35, %v13135_v15 }
 0x713   : > { %v5840_v23 = vpop.f32.mrb[86].mxu0 }
 0x714   : > { %v5508_v33 = vpop.f32.mrb[88].mxu1  ;;  %6101 = vst.msk [vmem:[%s6991_s24 + $0x5f] sm:$0xfe] %vm6080_vm6, %v6050_v47  ;;  %v6003_v27 = vadd.f32 %v5840_v23, %v5504_v59  ;;  %v5842_v45 = vpop.f32.mrb[87].mxu0  ;;  %v13140_v47 = vld [vmem:[#allocation41_spill] sm:$0xff] }
 0x715   : > { %v5509_v54 = vadd.f32 %v5508_v33, %v11933_v14  ;;  %v5510_v19 = vpop.f32.mrb[89].mxu1 }
 0x716   : > { %v6051_v13 = vadd.f32 %v6003_v27, %v13136_v34  ;;  %v13141_v34 = vld [vmem:[#allocation20_spill] sm:$0xff] }
 0x717   : > { %v5845_v21 = vpop.f32.mrb[88].mxu0 }
 0x718   : > { %v5513_v26 = vpop.f32.mrb[90].mxu1  ;;  %6102 = vst.msk [vmem:[%s6991_s24 + $0x67] sm:$0xff] %vm6082_vm7, %v6051_v13  ;;  %v6004_v36 = vadd.f32 %v5845_v21, %v5509_v54  ;;  %v5847_v28 = vpop.f32.mrb[89].mxu0 }
 0x719   : > { %v5514_v37 = vadd.f32 %v5513_v26, %v11937_v49  ;;  %v5515_v16 = vpop.f32.mrb[91].mxu1  ;;  %v13142_v28 = vld [vmem:[#allocation19_spill] sm:$0xff] }
 0x71a   : > { %v6052_v43 = vadd.f32 %v6004_v36, %v13137_v63 }
 0x71b   : > { %v5850_v29 = vpop.f32.mrb[90].mxu0 }
 0x71c   : > { %v5518_v10 = vpop.f32.mrb[92].mxu1  ;;  %6103 = vst.msk [vmem:[%s6991_s24 + $0x6f] sm:$0x1] %vm6084_vm8, %v6052_v43  ;;  %v6005_v8 = vadd.f32 %v5850_v29, %v5514_v37  ;;  %v5852_v17 = vpop.f32.mrb[91].mxu0 }
 0x71d   : > { %v5519_v14 = vadd.f32 %v5518_v10, %v11941_v38  ;;  %v5520_v58 = vpop.f32.mrb[93].mxu1 }
 0x71e   : > { %v6053_v11 = vadd.f32 %v6005_v8, %v13138_v31  ;;  %v13143_v58 = vld [vmem:[#allocation40_spill] sm:$0xff] }
 0x71f   : > { %v5855_v0 = vpop.f32.mrb[92].mxu0 }
 0x720   : > { %v5523_v51 = vpop.f32.mrb[94].mxu1  ;;  %6104 = vst.msk [vmem:[%s6991_s24 + $0x6f] sm:$0xfe] %vm6080_vm6, %v6053_v11  ;;  %v6006_v20 = vadd.f32 %v5855_v0, %v5519_v14  ;;  %v5857_v55 = vpop.f32.mrb[93].mxu0 }
 0x721   : > { %v5524_v49 = vadd.f32 %v5523_v51, %v11945_v30  ;;  %v5525_v6 = vpop.f32.mrb[95].mxu1 }
 0x722   : > { %v6054_v18 = vadd.f32 %v6006_v20, %v13139_v53  ;;  %v13144_v20 = vld [vmem:[#allocation22_spill] sm:$0xff] }
 0x723   : > { %v5860_v35 = vpop.f32.mrb[94].mxu0 }
 0x724   : > { %v5528_v59 = vpop.f32.mrb[96].mxu1  ;;  %6105 = vst.msk [vmem:[%s6991_s24 + $0x77] sm:$0xff] %vm6082_vm7, %v6054_v18  ;;  %v6007_v25 = vadd.f32 %v5860_v35, %v5524_v49  ;;  %v5862_v15 = vpop.f32.mrb[95].mxu0 }
 0x725   : > { %v5529_v38 = vadd.f32 %v5528_v59, %v11729_v24  ;;  %v5530_v57 = vpop.f32.mrb[97].mxu1 }
 0x726   : > { %v6055_v33 = vadd.f32 %v6007_v25, %v13140_v47 }
 0x727   : > { %v5865_v54 = vpop.f32.mrb[96].mxu0 }
 0x728   : > { %v5533_v23 = vpop.f32.mrb[98].mxu1  ;;  %6106 = vst.msk [vmem:[%s6991_s24 + $0x7f] sm:$0x1] %vm6084_vm8, %v6055_v33  ;;  %v6008_v27 = vadd.f32 %v5865_v54, %v5529_v38  ;;  %v5867_v45 = vpop.f32.mrb[97].mxu0  ;;  %v13145_v38 = vld [vmem:[#allocation21_spill] sm:$0xff]  ;;  %v13146_v54 = vld [vmem:[#allocation43_spill] sm:$0xff] }
 0x729   : > { %v5534_v30 = vadd.f32 %v5533_v23, %v11739_v42  ;;  %v5535_v19 = vpop.f32.mrb[99].mxu1 }
 0x72a   : > { %v6056_v13 = vadd.f32 %v6008_v27, %v13141_v34 }
 0x72b   : > { %v5870_v21 = vpop.f32.mrb[98].mxu0 }
 0x72c   : > { %v5538_v26 = vpop.f32.mrb[100].mxu1  ;;  %6107 = vst.msk [vmem:[%s6991_s24 + $0x7f] sm:$0xfe] %vm6080_vm6, %v6056_v13  ;;  %v6009_v37 = vadd.f32 %v5870_v21, %v5534_v30  ;;  %v5872_v16 = vpop.f32.mrb[99].mxu0 }
 0x72d   : > { %v5539_v24 = vadd.f32 %v5538_v26, %v11749_v50  ;;  %v5540_v36 = vpop.f32.mrb[101].mxu1  ;;  %v13147_v26 = vld [vmem:[#allocation24_spill] sm:$0xff] }
 0x72e   : > { %v6057_v63 = vadd.f32 %v6009_v37, %v13142_v28 }
 0x72f   : > { %v5875_v10 = vpop.f32.mrb[100].mxu0 }
 0x730   : > { %v5543_v43 = vpop.f32.mrb[102].mxu1  ;;  %6108 = vst.msk [vmem:[%s6991_s24 + $0x87] sm:$0xff] %vm6082_vm7, %v6057_v63  ;;  %v6010_v29 = vadd.f32 %v5875_v10, %v5539_v24  ;;  %v5877_v8 = vpop.f32.mrb[101].mxu0  ;;  %v13148_v63 = vld [vmem:[#allocation23_spill] sm:$0xff] }
 0x731   : > { %v5544_v42 = vadd.f32 %v5543_v43, %v11759_v48  ;;  %v5545_v14 = vpop.f32.mrb[103].mxu1 }
 0x732   : > { %v6058_v17 = vadd.f32 %v6010_v29, %v13143_v58  ;;  %v13149_v58 = vld [vmem:[#allocation42_spill] sm:$0xff] }
 0x733   : > { %v5880_v11 = vpop.f32.mrb[102].mxu0 }
 0x734   : > { %v5548_v31 = vpop.f32.mrb[104].mxu1  ;;  %6109 = vst.msk [vmem:[%s6991_s24 + $0x8f] sm:$0x1] %vm6084_vm8, %v6058_v17  ;;  %v6011_v51 = vadd.f32 %v5880_v11, %v5544_v42  ;;  %v5882_v49 = vpop.f32.mrb[103].mxu0 }
 0x735   : > { %v5549_v50 = vadd.f32 %v5548_v31, %v11769_v2  ;;  %v5550_v0 = vpop.f32.mrb[105].mxu1  ;;  %v13150_v49 = vld [vmem:[#allocation26_spill] sm:$0xff] }
 0x736   : > { %v6059_v6 = vadd.f32 %v6011_v51, %v13144_v20 }
 0x737   : > { %v5885_v53 = vpop.f32.mrb[104].mxu0 }
 0x738   : > { %v5553_v55 = vpop.f32.mrb[106].mxu1  ;;  %6110 = vst.msk [vmem:[%s6991_s24 + $0x8f] sm:$0xfe] %vm6080_vm6, %v6059_v6  ;;  %v6012_v18 = vadd.f32 %v5885_v53, %v5549_v50  ;;  %v5887_v35 = vpop.f32.mrb[105].mxu0 }
 0x739   : > { %v5554_v48 = vadd.f32 %v5553_v55, %v11779_v62  ;;  %v5555_v59 = vpop.f32.mrb[107].mxu1 }
 0x73a   : > { %v6060_v25 = vadd.f32 %v6012_v18, %v13145_v38  ;;  %v13151_v59 = vld [vmem:[#allocation25_spill] sm:$0xff] }
 0x73b   : > { %v5890_v15 = vpop.f32.mrb[106].mxu0 }
 0x73c   : > { %v5558_v57 = vpop.f32.mrb[108].mxu1  ;;  %6111 = vst.msk [vmem:[%s6991_s24 + $0x97] sm:$0xff] %vm6082_vm7, %v6060_v25  ;;  %v6013_v47 = vadd.f32 %v5890_v15, %v5554_v48  ;;  %v5892_v23 = vpop.f32.mrb[107].mxu0 }
 0x73d   : > { %v5559_v2 = vadd.f32 %v5558_v57, %v11789_v41  ;;  %v5560_v33 = vpop.f32.mrb[109].mxu1 }
 0x73e   : > { %v6061_v30 = vadd.f32 %v6013_v47, %v13146_v54  ;;  %v13152_v47 = vld [vmem:[#allocation45_spill] sm:$0xff] }
 0x73f   : > { %v5895_v19 = vpop.f32.mrb[108].mxu0 }
 0x740   : > { %v5563_v27 = vpop.f32.mrb[110].mxu1  ;;  %6112 = vst.msk [vmem:[%s6991_s24 + $0x9f] sm:$0x1] %vm6084_vm8, %v6061_v30  ;;  %v6014_v45 = vadd.f32 %v5895_v19, %v5559_v2  ;;  %v5897_v13 = vpop.f32.mrb[109].mxu0 }
 0x741   : > { %v5564_v62 = vadd.f32 %v5563_v27, %v11799_v12  ;;  %v5565_v34 = vpop.f32.mrb[111].mxu1 }
 0x742   : > { %v6062_v21 = vadd.f32 %v6014_v45, %v13147_v26 }
 0x743   : > { %v5900_v37 = vpop.f32.mrb[110].mxu0 }
 0x744   : > { %v5568_v24 = vpop.f32.mrb[112].mxu1  ;;  %6113 = vst.msk [vmem:[%s6991_s24 + $0x9f] sm:$0xfe] %vm6080_vm6, %v6062_v21  ;;  %v6015_v36 = vadd.f32 %v5900_v37, %v5564_v62  ;;  %v5902_v28 = vpop.f32.mrb[111].mxu0  ;;  %v13153_v62 = vld [vmem:[#allocation28_spill] sm:$0xff]  ;;  %v13154_v37 = vld [vmem:[#allocation27_spill] sm:$0xff] }
 0x745   : > { %v5569_v41 = vadd.f32 %v5568_v24, %v11809_v60  ;;  %v5570_v16 = vpop.f32.mrb[113].mxu1 }
 0x746   : > { %v6063_v43 = vadd.f32 %v6015_v36, %v13148_v63 }
 0x747   : > { %v5905_v42 = vpop.f32.mrb[112].mxu0 }
 0x748   : > { %v5573_v10 = vpop.f32.mrb[114].mxu1  ;;  %6114 = vst.msk [vmem:[%s6991_s24 + $0xa7] sm:$0xff] %vm6082_vm7, %v6063_v43  ;;  %v6016_v29 = vadd.f32 %v5905_v42, %v5569_v41  ;;  %v5907_v8 = vpop.f32.mrb[113].mxu0 }
 0x749   : > { %v5574_v12 = vadd.f32 %v5573_v10, %v11819_v40  ;;  %v5575_v14 = vpop.f32.mrb[115].mxu1  ;;  %v13155_v10 = vld [vmem:[#allocation44_spill] sm:$0xff] }
 0x74a   : > { %v6064_v17 = vadd.f32 %v6016_v29, %v13149_v58 }
 0x74b   : > { %v5910_v11 = vpop.f32.mrb[114].mxu0 }
 0x74c   : > { %v5578_v31 = vpop.f32.mrb[116].mxu1  ;;  %6115 = vst.msk [vmem:[%s6991_s24 + $0xaf] sm:$0x1] %vm6084_vm8, %v6064_v17  ;;  %v6017_v50 = vadd.f32 %v5910_v11, %v5574_v12  ;;  %v5912_v0 = vpop.f32.mrb[115].mxu0  ;;  %v13156_v17 = vld [vmem:[#allocation30_spill] sm:$0xff] }
 0x74d   : > { %v5579_v60 = vadd.f32 %v5578_v31, %v11829_v32  ;;  %v5580_v51 = vpop.f32.mrb[117].mxu1 }
 0x74e   : > { %v6065_v20 = vadd.f32 %v6017_v50, %v13150_v49  ;;  %v13157_v49 = vld [vmem:[#allocation29_spill] sm:$0xff] }
 0x74f   : > { %v5915_v55 = vpop.f32.mrb[116].mxu0 }
 0x750   : > { %v5583_v6 = vpop.f32.mrb[118].mxu1  ;;  %6116 = vst.msk [vmem:[%s6991_s24 + $0xaf] sm:$0xfe] %vm6080_vm6, %v6065_v20  ;;  %v6018_v53 = vadd.f32 %v5915_v55, %v5579_v60  ;;  %v5917_v18 = vpop.f32.mrb[117].mxu0 }
 0x751   : > { %v5584_v40 = vadd.f32 %v5583_v6, %v11839_v5  ;;  %v5585_v48 = vpop.f32.mrb[119].mxu1  ;;  %v13158_v18 = vld [vmem:[#allocation47_spill] sm:$0xff] }
 0x752   : > { %v6066_v35 = vadd.f32 %v6018_v53, %v13151_v59 }
 0x753   : > { %v5920_v25 = vpop.f32.mrb[118].mxu0 }
 0x754   : > { %v5588_v38 = vpop.f32.mrb[120].mxu1  ;;  %6117 = vst.msk [vmem:[%s6991_s24 + $0xb7] sm:$0xff] %vm6082_vm7, %v6066_v35  ;;  %v6019_v57 = vadd.f32 %v5920_v25, %v5584_v40  ;;  %v5922_v2 = vpop.f32.mrb[119].mxu0 }
 0x755   : > { %v5589_v32 = vadd.f32 %v5588_v38, %v11849_v44  ;;  %v5590_v15 = vpop.f32.mrb[121].mxu1 }
 0x756   : > { %v6067_v33 = vadd.f32 %v6019_v57, %v13152_v47  ;;  %v13159_v15 = vld [vmem:[#allocation32_spill] sm:$0xff] }
 0x757   : > { %v5925_v54 = vpop.f32.mrb[120].mxu0 }
 0x758   : > { %v5593_v23 = vpop.f32.mrb[122].mxu1  ;;  %6118 = vst.msk [vmem:[%s6991_s24 + $0xbf] sm:$0x1] %vm6084_vm8, %v6067_v33  ;;  %v6020_v30 = vadd.f32 %v5925_v54, %v5589_v32  ;;  %v5927_v19 = vpop.f32.mrb[121].mxu0 }
 0x759   : > { %v5594_v5 = vadd.f32 %v5593_v23, %v11859_v61  ;;  %v5595_v27 = vpop.f32.mrb[123].mxu1 }
 0x75a   : > { %v6068_v45 = vadd.f32 %v6020_v30, %v13153_v62  ;;  %v13160_v30 = vld [vmem:[#allocation31_spill] sm:$0xff] }
 0x75b   : > { %v5930_v13 = vpop.f32.mrb[122].mxu0 }
 0x75c   : > { %v5598_v34 = vpop.f32.mrb[124].mxu1  ;;  %6119 = vst.msk [vmem:[%s6991_s24 + $0xbf] sm:$0xfe] %vm6080_vm6, %v6068_v45  ;;  %v6021_v26 = vadd.f32 %v5930_v13, %v5594_v5  ;;  %v5932_v24 = vpop.f32.mrb[123].mxu0 }
 0x75d   : > { %v5599_v44 = vadd.f32 %v5598_v34, %v11869_v4  ;;  %v5600_v21 = vpop.f32.mrb[125].mxu1 }
 0x75e   : > { %v6069_v41 = vadd.f32 %v6021_v26, %v13154_v37 }
 0x75f   : > { %v5935_v16 = vpop.f32.mrb[124].mxu0 }
 0x760   : > { %v5603_v36 = vpop.f32.mrb[126].mxu1  ;;  %6120 = vst.msk [vmem:[%s6991_s24 + $0xc7] sm:$0xff] %vm6082_vm7, %v6069_v41  ;;  %v6022_v28 = vadd.f32 %v5935_v16, %v5599_v44  ;;  %v5937_v43 = vpop.f32.mrb[125].mxu0  ;;  %v13161_v44 = vld [vmem:[#allocation46_spill] sm:$0xff]  ;;  %v13162_v16 = vld [vmem:[#allocation49_spill] sm:$0xff] }
 0x761   : > { %v5604_v61 = vadd.f32 %v5603_v36, %v11882_v7  ;;  %v5605_v63 = vpop.f32.mrb[127].mxu1 }
 0x762   : > { %v6070_v42 = vadd.f32 %v6022_v28, %v13155_v10 }
 0x763   : > { %v5940_v29 = vpop.f32.mrb[126].mxu0 }
 0x764   : > { %v5608_v12 = vpop.f32.mrb[128].mxu1  ;;  %6121 = vst.msk [vmem:[%s6991_s24 + $0xcf] sm:$0x1] %vm6084_vm8, %v6070_v42  ;;  %v6023_v14 = vadd.f32 %v5940_v29, %v5604_v61  ;;  %v5942_v58 = vpop.f32.mrb[127].mxu0 }
 0x765   : > { %v5609_v4 = vadd.f32 %v5608_v12, %v11896_v22  ;;  %v5610_v8 = vpop.f32.mrb[129].mxu1  ;;  %v13163_v12 = vld [vmem:[#allocation48_spill] sm:$0xff] }
 0x766   : > { %v6071_v31 = vadd.f32 %v6023_v14, %v13156_v17  ;;  %v13164_v8 = vld [vmem:[#allocation50_spill] sm:$0xff] }
 0x767   : > { %v5945_v60 = vpop.f32.mrb[128].mxu0 }
 0x768   : > { %v5613_v11 = vpop.f32.mrb[130].mxu1  ;;  %6122 = vst.msk [vmem:[%s6991_s24 + $0xcf] sm:$0xfe] %vm6080_vm6, %v6071_v31  ;;  %v6024_v50 = vadd.f32 %v5945_v60, %v5609_v4  ;;  %v5947_v0 = vpop.f32.mrb[129].mxu0 }
 0x769   : > { %v5614_v7 = vadd.f32 %v5613_v11, %v11909_v46  ;;  %v5615_v51 = vpop.f32.mrb[131].mxu1 }
 0x76a   : > { %v6072_v20 = vadd.f32 %v6024_v50, %v13157_v49 }
 0x76b   : > { %v5950_v55 = vpop.f32.mrb[130].mxu0 }
 0x76c   : > { %v5618_v6 = vpop.f32.mrb[132].mxu1  ;;  %6123 = vst.msk [vmem:[%s6991_s24 + $0xd7] sm:$0xff] %vm6082_vm7, %v6072_v20  ;;  %v6025_v40 = vadd.f32 %v5950_v55, %v5614_v7  ;;  %v5952_v48 = vpop.f32.mrb[131].mxu0 }
 0x76d   : > { %v5619_v22 = vadd.f32 %v5618_v6, %v11920_v52  ;;  %v5620_v53 = vpop.f32.mrb[133].mxu1 }
 0x76e   : > { %v6073_v59 = vadd.f32 %v6025_v40, %v13158_v18 }
 0x76f   : > { %v5955_v38 = vpop.f32.mrb[132].mxu0 }
 0x770   : > { %v5623_v35 = vpop.f32.mrb[134].mxu1  ;;  %6124 = vst.msk [vmem:[%s6991_s24 + $0xdf] sm:$0x1] %vm6084_vm8, %v6073_v59  ;;  %v6026_v25 = vadd.f32 %v5955_v38, %v5619_v22  ;;  %v5957_v57 = vpop.f32.mrb[133].mxu0 }
 0x771   : > { %v5624_v46 = vadd.f32 %v5623_v35, %v11927_v56  ;;  %v5625_v32 = vpop.f32.mrb[135].mxu1 }
 0x772   : > { %v6074_v2 = vadd.f32 %v6026_v25, %v13159_v15 }
 0x773   : > { %v5960_v33 = vpop.f32.mrb[134].mxu0 }
 0x774   : > { %v5628_v47 = vpop.f32.mrb[136].mxu1  ;;  %6125 = vst.msk [vmem:[%s6991_s24 + $0xdf] sm:$0xfe] %vm6080_vm6, %v6074_v2  ;;  %v6027_v23 = vadd.f32 %v5960_v33, %v5624_v46  ;;  %v5962_v5 = vpop.f32.mrb[135].mxu0 }
 0x775   : > { %v5629_v52 = vadd.f32 %v5628_v47, %v11931_v9  ;;  %v5630_v54 = vpop.f32.mrb[137].mxu1 }
 0x776   : > { %v6075_v27 = vadd.f32 %v6027_v23, %v13160_v30 }
 0x777   : > { %v5965_v62 = vpop.f32.mrb[136].mxu0 }
 0x778   : > { %v5633_v19 = vpop.f32.mrb[138].mxu1  ;;  %6126 = vst.msk [vmem:[%s6991_s24 + $0xe7] sm:$0xff] %vm6082_vm7, %v6075_v27  ;;  %v6028_v45 = vadd.f32 %v5965_v62, %v5629_v52  ;;  %v5967_v13 = vpop.f32.mrb[137].mxu0 }
 0x779   : > { %v5634_v56 = vadd.f32 %v5633_v19, %v11935_v1  ;;  %v5635_v34 = vpop.f32.mrb[139].mxu1 }
 0x77a   : > { %v6076_v26 = vadd.f32 %v6028_v45, %v13161_v44 }
 0x77b   : > { %v5970_v24 = vpop.f32.mrb[138].mxu0 }
 0x77c   : > { %v5638_v21 = vpop.f32.mrb[140].mxu1  ;;  %6127 = vst.msk [vmem:[%s6991_s24 + $0xef] sm:$0x1] %vm6084_vm8, %v6076_v26  ;;  %v6029_v37 = vadd.f32 %v5970_v24, %v5634_v56  ;;  %v5972_v36 = vpop.f32.mrb[139].mxu0 }
 0x77d   : > { %v5639_v9 = vadd.f32 %v5638_v21, %v11939_v3  ;;  %v5640_v41 = vpop.f32.mrb[141].mxu1 }
 0x77e   : > { %v6077_v61 = vadd.f32 %v6029_v37, %v13162_v16 }
 0x77f   : > { %v5975_v1 = vpop.f32.mrb[140].mxu0 }
 0x780   : > { %v5643_v28 = vpop.f32.mrb[142].mxu1  ;;  %6128 = vst.msk [vmem:[%s6991_s24 + $0xef] sm:$0xfe] %vm6080_vm6, %v6077_v61  ;;  %v6030_v43 = vadd.f32 %v5975_v1, %v5639_v9  ;;  %v5977_v42 = vpop.f32.mrb[141].mxu0 }
 0x781   : > { %v5644_v63 = vadd.f32 %v5643_v28, %v11943_v39  ;;  %v5645_v10 = vpop.f32.mrb[143].mxu1 }
 0x782   : > { %v6078_v29 = vadd.f32 %v6030_v43, %v13163_v12 }
 0x783   : > { %v5980_v4 = vpop.f32.mrb[142].mxu0 }
 0x784   : > { %6129 = vst.msk [vmem:[%s6991_s24 + $0xf7] sm:$0xff] %vm6082_vm7, %v6078_v29  ;;  %v6031_v3 = vadd.f32 %v5980_v4, %v5644_v63  ;;  %v5982_v14 = vpop.f32.mrb[143].mxu0 }
 0x786   : > { %v6079_v58 = vadd.f32 %v6031_v3, %v13164_v8 }
 0x788   : > { %6130 = vst.msk [vmem:[%s6991_s24 + $0xff] sm:$0x1] %vm6084_vm8, %v6079_v58 }
 0x789 PF: > { %s15_s18 = sadd.s32 1, %s6938_s18  }
 0x78a   : > { %p12_p5 = scmp.ge.s32.totalorder %s15_s18, 4  }
 0x78c   :  { %14 = sbr.rel (!%p12_p5) target bundleno = 1 (0x1), region = 96 }

</bundles_post_ra>
